<compile_context>
chip_gen: v5e
topology: v5e:2x2
jax: 0.10.0
libtpu: 0.0.40
codegen_flags: <defaults>
</compile_context>

<pallas_src>
import functools

import numpy as np
import jax
import jax.numpy as jnp
from jax.experimental import pallas as pl
from jax.experimental.pallas import tpu as pltpu

IMG = 120
K_RAW = IMG * IMG * 3          # 43200
K_PAD = 43264                  # 338 * 128  (next multiple of 128)
TK = 21632                     # 169 * 128 -> 2 grid steps
NPARAM = 62                    # TDDFA params
NPARAM_PAD = 64                # padded to 64 lanes
N_LMK = 68
P_BASE = 3 * N_LMK             # 204
D_COMB = 64                    # packed node width: S(40) | E(10) | R(12) | pad(2)


# --------------------------- fused Pallas kernel ----------------------------

def _fused_forward_kernel(num_steps, x_ref, w_ref, b_ref, wl_ref, wr_ref,
                          bg_ref, u_ref, wb_ref, base_ref, vecr_ref, acc_ref):
    """K-split head matmul with resident f32 accumulator + fused epilogue.

    Epilogue (last K step only):
      params  = acc + bias                      (already in packed [S|E|R|0] order)
      x       = [zeros(1,64); params]           hetero node features (anchor + per-image)
      for each graph step: x = mean_nodes(x) @ Wl + x @ Wr + b   (block-diag S/E)
      base_vec = u_base + x[0] @ [w_shp_base^T; w_exp_base^T; 0]
      vec_R    = [zeros(1,12); params[:, 50:62]]
    R lanes (50:62) riding along in x are harmless: Wl/Wr/bias/wbase rows 50:64
    are zero, so they never influence the S/E blocks or the reconstruction.
    """
    k = pl.program_id(0)

    @pl.when(k == 0)
    def _init():
        acc_ref[...] = jnp.zeros_like(acc_ref)

    acc_ref[...] += jnp.dot(x_ref[...], w_ref[...],
                            preferred_element_type=jnp.float32)

    @pl.when(k == pl.num_programs(0) - 1)
    def _epilogue():
        params = acc_ref[...] + b_ref[...]                       # (n, 64) f32
        anchor = jnp.zeros((1, D_COMB), jnp.float32)
        x = jnp.concatenate([anchor, params], axis=0)            # (n+1, 64)

        for s in range(num_steps):                               # static unroll
            nb_mean = jnp.mean(x, axis=0, keepdims=True)         # (1, 64)
            x = (jnp.dot(nb_mean, wl_ref[s], preferred_element_type=jnp.float32)
                 + jnp.dot(x, wr_ref[s], preferred_element_type=jnp.float32)
                 + bg_ref[s])

        base_ref[...] = u_ref[...] + jnp.dot(
            x[0:1, :], wb_ref[...], preferred_element_type=jnp.float32)

        vecr_ref[...] = jnp.concatenate(
            [jnp.zeros((1, 12), jnp.float32), params[:, 50:62]], axis=0)


def fused_forward(x_flat_bf16, w_bf16, bias, wl_all, wr_all, bg_all,
                  u_base, w_base_t, num_steps):
    n = x_flat_bf16.shape[0]
    nk = K_PAD // TK
    s_alloc = wl_all.shape[0]
    p = u_base.shape[1]
    kernel = functools.partial(_fused_forward_kernel, num_steps)

    cost = pl.CostEstimate(
        flops=2 * n * K_PAD * NPARAM_PAD + 6 * s_alloc * (n + 1) * D_COMB * D_COMB,
        transcendentals=0,
        bytes_accessed=(K_PAD * NPARAM_PAD * 2           # bf16 weights
                        + n * K_PAD * 2                  # bf16 activations
                        + 4 * (NPARAM_PAD
                               + 2 * s_alloc * D_COMB * D_COMB
                               + s_alloc * D_COMB
                               + p + D_COMB * p
                               + p + (n + 1) * 12)))

    return pl.pallas_call(
        kernel,
        out_shape=(
            jax.ShapeDtypeStruct((1, p), jnp.float32),          # base_vec
            jax.ShapeDtypeStruct((n + 1, 12), jnp.float32),     # vec_R
        ),
        grid_spec=pltpu.PrefetchScalarGridSpec(
            num_scalar_prefetch=0,
            grid=(nk,),
            in_specs=[
                pl.BlockSpec((n, TK), lambda k: (0, k)),               # x
                pl.BlockSpec((TK, NPARAM_PAD), lambda k: (k, 0)),      # W
                pl.BlockSpec((1, NPARAM_PAD), lambda k: (0, 0)),       # bias
                pl.BlockSpec((s_alloc, D_COMB, D_COMB), lambda k: (0, 0, 0)),  # Wl
                pl.BlockSpec((s_alloc, D_COMB, D_COMB), lambda k: (0, 0, 0)),  # Wr
                pl.BlockSpec((s_alloc, 1, D_COMB), lambda k: (0, 0, 0)),       # graph bias
                pl.BlockSpec((1, p), lambda k: (0, 0)),                # u_base
                pl.BlockSpec((D_COMB, p), lambda k: (0, 0)),           # packed bases^T
            ],
            out_specs=(
                pl.BlockSpec((1, p), lambda k: (0, 0)),
                pl.BlockSpec((n + 1, 12), lambda k: (0, 0)),
            ),
            scratch_shapes=[pltpu.VMEM((n, NPARAM_PAD), jnp.float32)],
        ),
        compiler_params=pltpu.CompilerParams(
            dimension_semantics=("arbitrary",),          # resident accumulator over K
            vmem_limit_bytes=32 * 1024 * 1024),          # headroom on v5e (16 MiB default)
        cost_estimate=cost,
    )(x_flat_bf16, w_bf16, bias, wl_all, wr_all, bg_all, u_base, w_base_t)


# --------------------------- host-side glue ---------------------------------

def parse_roi_box_from_bbox(bbox):
    left, top, right, bottom = [float(v) for v in bbox[:4]]
    old_size = (right - left + bottom - top) / 2
    center_x = right - (right - left) / 2.0
    center_y = bottom - (bottom - top) / 2.0 + old_size * 0.14
    size = int(old_size * 1.58)
    roi_box = [0.0] * 4
    roi_box[0] = center_x - size / 2
    roi_box[1] = center_y - size / 2
    roi_box[2] = roi_box[0] + size
    roi_box[3] = roi_box[1] + size
    return roi_box


class HeteroFrameworkPallas:
    """JAX/Pallas re-implementation of HeteroFramework.forward.

    Only the ('S','Ss','S') and ('E','Ee','E') relations exist both in the
    HeteroConv dict and in edges_for_n_images() (all other keys mismatch on
    src/dst), so each graph step reduces to one SAGEConv on S (40->40) and one
    on E (10->10) over a fully-connected graph with self loops, with 'R'
    restored from its pre-graph value every step -- exactly as in the
    reference forward.  The two SAGEConvs are packed block-diagonally so both
    are handled by a single matmul per step, and the whole post-head graph +
    BFM reconstruction runs as the epilogue of the head kernel.
    """
    N_LMK = N_LMK

    def __init__(self, num_graph_steps=2, seed=0):
        self.num_graph_steps = int(num_graph_steps)
        keys = iter(jax.random.split(jax.random.PRNGKey(seed),
                                     8 + 6 * max(1, self.num_graph_steps)))

        # TODO(synk): mobilenet TDDFA backbone + weights/mb1_120x120.pth are not
        # available; replaced by a deterministic linear head (flatten -> 62).
        w = jax.random.normal(next(keys), (K_RAW, NPARAM_PAD), jnp.float32) * 0.01
        w = w.at[:, NPARAM:].set(0.0)
        b = jax.random.normal(next(keys), (1, NPARAM_PAD), jnp.float32) * 0.01
        # TODO(synk): param_mean/param_std come from a pickle; deterministic
        # synthetic stand-ins with the same shapes (62-d, padded to 64).
        param_std = (0.5 + 0.1 * jnp.abs(
            jax.random.normal(next(keys), (1, NPARAM_PAD), jnp.float32)))
        param_mean = jax.random.normal(next(keys), (1, NPARAM_PAD), jnp.float32) * 0.05

        # Fold NormalizeGjz ((x-127.5)/128) and param*std+mean into W/b:
        #   param = x @ (W*std/128) + (b - (127.5/128)*sum_k W[k,:])*std + mean
        colsum = jnp.sum(w, axis=0, keepdims=True)                 # (1, 64)
        w_fused = w * (param_std / 128.0)
        b_fused = (b - (127.5 / 128.0) * colsum) * param_std + param_mean
        b_fused = b_fused.at[:, NPARAM:].set(0.0)                  # keep pad lanes zero

        # Permute output columns at init so the head directly emits the packed
        # node layout [S(0:40) | E(40:50) | R(50:62) | pad(62:64)] -- removes
        # all per-call lane repacking from the kernel epilogue.
        perm = np.concatenate([np.arange(12, 62), np.arange(0, 12),
                               np.arange(62, 64)])
        w_fused = w_fused[:, perm]
        b_fused = b_fused[:, perm]

        w_pad = jnp.zeros((K_PAD, NPARAM_PAD), jnp.float32).at[:K_RAW].set(w_fused)
        # TODO(synk): int8/fp8 weight compression (per-chip dtype split) left out
        # to keep a single portable bf16 MXU path on v5e/v6e/v7x.
        self.tddfa_w = w_pad.astype(jnp.bfloat16)     # bf16 weights, f32 accum
        self.tddfa_b = b_fused.astype(jnp.float32)    # f32 bias, added in-kernel

        # Graph weights, packed block-diagonally: lanes 0:40 = S, 40:50 = E,
        # lanes 50:64 (where R rides along) map to all-zero rows/cols.
        n_steps_alloc = max(1, self.num_graph_steps)
        wl_all = np.zeros((n_steps_alloc, D_COMB, D_COMB), np.float32)
        wr_all = np.zeros((n_steps_alloc, D_COMB, D_COMB), np.float32)
        b_all = np.zeros((n_steps_alloc, 1, D_COMB), np.float32)
        for t in range(self.num_graph_steps):
            wl_s = np.asarray(jax.random.normal(next(keys), (40, 40), jnp.float32)) * 0.1
            wr_s = np.asarray(jax.random.normal(next(keys), (40, 40), jnp.float32)) * 0.1
            b_s = np.asarray(jax.random.normal(next(keys), (1, 40), jnp.float32)) * 0.01
            wl_e = np.asarray(jax.random.normal(next(keys), (10, 10), jnp.float32)) * 0.1
            wr_e = np.asarray(jax.random.normal(next(keys), (10, 10), jnp.float32)) * 0.1
            b_e = np.asarray(jax.random.normal(next(keys), (1, 10), jnp.float32)) * 0.01
            wl_all[t, 0:40, 0:40] = wl_s
            wl_all[t, 40:50, 40:50] = wl_e
            wr_all[t, 0:40, 0:40] = wr_s
            wr_all[t, 40:50, 40:50] = wr_e
            b_all[t, 0, 0:40] = b_s[0]
            b_all[t, 0, 40:50] = b_e[0]
        self.wl_all = jnp.asarray(wl_all)
        self.wr_all = jnp.asarray(wr_all)
        self.b_all = jnp.asarray(b_all)

        # TODO(synk): BFM bases come from configs/bfm_noneck_v3.pkl; synthetic
        # deterministic tensors of the same shapes (68 landmarks * 3 = 204 rows).
        self.u_base = jax.random.normal(next(keys), (1, P_BASE), jnp.float32) * 10.0
        w_shp_t = np.asarray(jax.random.normal(next(keys), (40, P_BASE), jnp.float32)) * 0.1
        w_exp_t = np.asarray(jax.random.normal(next(keys), (10, P_BASE), jnp.float32)) * 0.1
        wbase = np.zeros((D_COMB, P_BASE), np.float32)
        wbase[0:40] = w_shp_t
        wbase[40:50] = w_exp_t
        self.w_base_t = jnp.asarray(wbase)

        # Single jit over the whole device portion (flatten/pad/cast + 1 kernel).
        self._forward_jit = jax.jit(self._device_forward)

    # --- device portion (one jit, one pallas_call) ---------------------------
    def _device_forward(self, images):
        n = images.shape[0]
        # Cast to bf16 BEFORE the pad: no f32 (n, 43264) intermediate.
        x = images.reshape(n, K_RAW).astype(jnp.bfloat16)
        x = jnp.pad(x, ((0, 0), (0, K_PAD - K_RAW)))

        base_vec, vec_r = fused_forward(
            x, self.tddfa_w, self.tddfa_b, self.wl_all, self.wr_all,
            self.b_all, self.u_base, self.w_base_t, self.num_graph_steps)

        # reshape_fortran((204,1), (3,-1))  ==  column-major -> (3, 68)
        base = base_vec.reshape(self.N_LMK, 3).T
        return base, vec_r

    # --- public forward ------------------------------------------------------
    def forward(self, images, bboxes):
        # TODO(synk): cv2-based crop_img/resize is host preprocessing; images are
        # assumed already cropped & resized to 120x120x3.
        list_bbox = [parse_roi_box_from_bbox(b) for b in bboxes]
        base, vec_r = self._forward_jit(jnp.asarray(images, jnp.float32))
        return base, vec_r, list_bbox


if __name__ == "__main__":
    key = jax.random.PRNGKey(0)
    n_images = 2
    images = jax.random.uniform(key, (n_images, IMG, IMG, 3), jnp.float32,
                                minval=0.0, maxval=255.0)
    bboxes = [(10.0, 20.0, 90.0, 100.0), (15.0, 25.0, 95.0, 105.0)]

    model = HeteroFrameworkPallas(num_graph_steps=2, seed=0)
    base, vec_r, roi_boxes = model.forward(images, bboxes)
    jax.block_until_ready((base, vec_r))

    assert base.shape == (3, N_LMK), base.shape
    assert vec_r.shape == (n_images + 1, 12), vec_r.shape
    assert len(roi_boxes) == n_images and len(roi_boxes[0]) == 4
    assert bool(jnp.all(jnp.isfinite(base))) and bool(jnp.all(jnp.isfinite(vec_r)))
    print("KERNEL_OK")
</pallas_src>

<mosaic_0001>
module attributes {stable_mosaic.version = 11 : i64} {
  func.func @_fused_forward_kernel(%arg0: i32, %arg1: memref<2x21632xbf16, #tpu.memory_space<vmem>>, %arg2: memref<21632x64xbf16, #tpu.memory_space<vmem>>, %arg3: memref<1x64xf32, #tpu.memory_space<vmem>>, %arg4: memref<2x64x64xf32, #tpu.memory_space<vmem>>, %arg5: memref<2x64x64xf32, #tpu.memory_space<vmem>>, %arg6: memref<2x1x64xf32, #tpu.memory_space<vmem>>, %arg7: memref<1x204xf32, #tpu.memory_space<vmem>>, %arg8: memref<64x204xf32, #tpu.memory_space<vmem>>, %arg9: memref<1x204xf32, #tpu.memory_space<vmem>>, %arg10: memref<3x12xf32, #tpu.memory_space<vmem>>, %arg11: memref<2x64xf32, #tpu.memory_space<vmem>>) attributes {dimension_semantics = [#tpu.dimension_semantics<arbitrary>], iteration_bounds = array<i64: 2>, scalar_prefetch = 0 : i64, scratch_operands = 1 : i64, tpu.core_type = #tpu.core_type<tc>, window_params = [{transform_indices = @transform_0, window_bounds = array<i64: 2, 21632>}, {transform_indices = @transform_1, window_bounds = array<i64: 21632, 64>}, {pipeline_mode = #tpu.pipeline_mode<synchronous>, transform_indices = @transform_2, window_bounds = array<i64: 1, 64>}, {pipeline_mode = #tpu.pipeline_mode<synchronous>, transform_indices = @transform_3, window_bounds = array<i64: 2, 64, 64>}, {pipeline_mode = #tpu.pipeline_mode<synchronous>, transform_indices = @transform_4, window_bounds = array<i64: 2, 64, 64>}, {pipeline_mode = #tpu.pipeline_mode<synchronous>, transform_indices = @transform_5, window_bounds = array<i64: 2, 1, 64>}, {pipeline_mode = #tpu.pipeline_mode<synchronous>, transform_indices = @transform_6, window_bounds = array<i64: 1, 204>}, {pipeline_mode = #tpu.pipeline_mode<synchronous>, transform_indices = @transform_7, window_bounds = array<i64: 64, 204>}, {pipeline_mode = #tpu.pipeline_mode<synchronous>, transform_indices = @transform_8, window_bounds = array<i64: 1, 204>}, {pipeline_mode = #tpu.pipeline_mode<synchronous>, transform_indices = @transform_9, window_bounds = array<i64: 3, 12>}]} {
    %c0_i32 = arith.constant 0 : i32
    %0 = arith.cmpi eq, %arg0, %c0_i32 : i32
    %1 = arith.extui %0 : i1 to i32
    %c0_i32_0 = arith.constant 0 : i32
    %2 = arith.cmpi ne, %1, %c0_i32_0 : i32
    scf.if %2 {
      %cst_9 = arith.constant 0.000000e+00 : f32
      %12 = vector.broadcast %cst_9 : f32 to vector<2x64xf32>
      %c0_10 = arith.constant 0 : index
      %c0_11 = arith.constant 0 : index
      %13 = vector.load %arg11[%c0_10, %c0_11] : memref<2x64xf32, #tpu.memory_space<vmem>>, vector<2x64xf32>
      tpu.vector_store %arg11[%c0_10, %c0_11], %12 {strides = array<i32>} : memref<2x64xf32, #tpu.memory_space<vmem>>, vector<2x64xf32>,
    } else {
    }
    %c0 = arith.constant 0 : index
    %c0_1 = arith.constant 0 : index
    %3 = vector.load %arg11[%c0, %c0_1] : memref<2x64xf32, #tpu.memory_space<vmem>>, vector<2x64xf32>
    %c0_2 = arith.constant 0 : index
    %c0_3 = arith.constant 0 : index
    %4 = vector.load %arg1[%c0_2, %c0_3] : memref<2x21632xbf16, #tpu.memory_space<vmem>>, vector<2x21632xbf16>
    %c0_4 = arith.constant 0 : index
    %c0_5 = arith.constant 0 : index
    %5 = vector.load %arg2[%c0_4, %c0_5] : memref<21632x64xbf16, #tpu.memory_space<vmem>>, vector<21632x64xbf16>
    %cst = arith.constant dense<0.000000e+00> : vector<2x64xf32>
    %6 = tpu.matmul %4, %5, %cst {dimension_numbers = #tpu.dot_dimension_numbers<[1], [0], [0], [1], [0, 0, 1, 1], [], []>} : vector<2x21632xbf16>, vector<21632x64xbf16>, vector<2x64xf32> -> vector<2x64xf32>
    %7 = arith.addf %3, %6 : vector<2x64xf32>
    %c0_6 = arith.constant 0 : index
    %c0_7 = arith.constant 0 : index
    %8 = vector.load %arg11[%c0_6, %c0_7] : memref<2x64xf32, #tpu.memory_space<vmem>>, vector<2x64xf32>
    tpu.vector_store %arg11[%c0_6, %c0_7], %7 {strides = array<i32>} : memref<2x64xf32, #tpu.memory_space<vmem>>, vector<2x64xf32>,
    %c1_i32 = arith.constant 1 : i32
    %9 = arith.cmpi eq, %arg0, %c1_i32 : i32
    %10 = arith.extui %9 : i1 to i32
    %c0_i32_8 = arith.constant 0 : i32
    %11 = arith.cmpi ne, %10, %c0_i32_8 : i32
    scf.if %11 {
      %c0_9 = arith.constant 0 : index
      %c0_10 = arith.constant 0 : index
      %12 = vector.load %arg11[%c0_9, %c0_10] : memref<2x64xf32, #tpu.memory_space<vmem>>, vector<2x64xf32>
      %c0_11 = arith.constant 0 : index
      %c0_12 = arith.constant 0 : index
      %13 = vector.load %arg3[%c0_11, %c0_12] : memref<1x64xf32, #tpu.memory_space<vmem>>, vector<1x64xf32>
      %14 = vector.broadcast %13 : vector<1x64xf32> to vector<2x64xf32>
      %15 = arith.addf %12, %14 : vector<2x64xf32>
      %cst_13 = arith.constant 0.000000e+00 : f32
      %16 = vector.broadcast %cst_13 : f32 to vector<1x64xf32>
      %17 = tpu.concatenate %16, %15 in 0 : vector<1x64xf32>, vector<2x64xf32> -> vector<3x64xf32>
      %cst_14 = arith.constant dense<0.000000e+00> : vector<64xf32>
      %18 = vector.multi_reduction <add>, %17, %cst_14 [0] : vector<3x64xf32> to vector<64xf32>
      %19 = vector.shape_cast %18 : vector<64xf32> to vector<1x64xf32>
      %cst_15 = arith.constant 3.000000e+00 : f32
      %20 = vector.broadcast %cst_15 : f32 to vector<1x64xf32>
      %21 = arith.divf %19, %20 : vector<1x64xf32>
      %c0_16 = arith.constant 0 : index
      %c0_17 = arith.constant 0 : index
      %c0_18 = arith.constant 0 : index
      %22 = vector.load %arg4[%c0_16, %c0_17, %c0_18] : memref<2x64x64xf32, #tpu.memory_space<vmem>>, vector<1x64x64xf32>
      %23 = vector.shape_cast %22 : vector<1x64x64xf32> to vector<64x64xf32>
      %cst_19 = arith.constant dense<0.000000e+00> : vector<1x64xf32>
      %24 = tpu.matmul %21, %23, %cst_19 {dimension_numbers = #tpu.dot_dimension_numbers<[1], [0], [0], [1], [0, 0, 1, 1], [], []>} : vector<1x64xf32>, vector<64x64xf32>, vector<1x64xf32> -> vector<1x64xf32>
      %c0_20 = arith.constant 0 : index
      %c0_21 = arith.constant 0 : index
      %c0_22 = arith.constant 0 : index
      %25 = vector.load %arg5[%c0_20, %c0_21, %c0_22] : memref<2x64x64xf32, #tpu.memory_space<vmem>>, vector<1x64x64xf32>
      %26 = vector.shape_cast %25 : vector<1x64x64xf32> to vector<64x64xf32>
      %cst_23 = arith.constant dense<0.000000e+00> : vector<3x64xf32>
      %27 = tpu.matmul %17, %26, %cst_23 {dimension_numbers = #tpu.dot_dimension_numbers<[1], [0], [0], [1], [0, 0, 1, 1], [], []>} : vector<3x64xf32>, vector<64x64xf32>, vector<3x64xf32> -> vector<3x64xf32>
      %28 = vector.broadcast %24 : vector<1x64xf32> to vector<3x64xf32>
      %29 = arith.addf %28, %27 : vector<3x64xf32>
      %c0_24 = arith.constant 0 : index
      %c0_25 = arith.constant 0 : index
      %c0_26 = arith.constant 0 : index
      %30 = vector.load %arg6[%c0_24, %c0_25, %c0_26] : memref<2x1x64xf32, #tpu.memory_space<vmem>>, vector<1x1x64xf32>
      %31 = vector.shape_cast %30 : vector<1x1x64xf32> to vector<1x64xf32>
      %32 = vector.broadcast %31 : vector<1x64xf32> to vector<3x64xf32>
      %33 = arith.addf %29, %32 : vector<3x64xf32>
      %cst_27 = arith.constant dense<0.000000e+00> : vector<64xf32>
      %34 = vector.multi_reduction <add>, %33, %cst_27 [0] : vector<3x64xf32> to vector<64xf32>
      %35 = vector.shape_cast %34 : vector<64xf32> to vector<1x64xf32>
      %cst_28 = arith.constant 3.000000e+00 : f32
      %36 = vector.broadcast %cst_28 : f32 to vector<1x64xf32>
      %37 = arith.divf %35, %36 : vector<1x64xf32>
      %c1 = arith.constant 1 : index
      %c0_29 = arith.constant 0 : index
      %c0_30 = arith.constant 0 : index
      %38 = vector.load %arg4[%c1, %c0_29, %c0_30] : memref<2x64x64xf32, #tpu.memory_space<vmem>>, vector<1x64x64xf32>
      %39 = vector.shape_cast %38 : vector<1x64x64xf32> to vector<64x64xf32>
      %cst_31 = arith.constant dense<0.000000e+00> : vector<1x64xf32>
      %40 = tpu.matmul %37, %39, %cst_31 {dimension_numbers = #tpu.dot_dimension_numbers<[1], [0], [0], [1], [0, 0, 1, 1], [], []>} : vector<1x64xf32>, vector<64x64xf32>, vector<1x64xf32> -> vector<1x64xf32>
      %c1_32 = arith.constant 1 : index
      %c0_33 = arith.constant 0 : index
      %c0_34 = arith.constant 0 : index
      %41 = vector.load %arg5[%c1_32, %c0_33, %c0_34] : memref<2x64x64xf32, #tpu.memory_space<vmem>>, vector<1x64x64xf32>
      %42 = vector.shape_cast %41 : vector<1x64x64xf32> to vector<64x64xf32>
      %cst_35 = arith.constant dense<0.000000e+00> : vector<3x64xf32>
      %43 = tpu.matmul %33, %42, %cst_35 {dimension_numbers = #tpu.dot_dimension_numbers<[1], [0], [0], [1], [0, 0, 1, 1], [], []>} : vector<3x64xf32>, vector<64x64xf32>, vector<3x64xf32> -> vector<3x64xf32>
      %44 = vector.broadcast %40 : vector<1x64xf32> to vector<3x64xf32>
      %45 = arith.addf %44, %43 : vector<3x64xf32>
      %c1_36 = arith.constant 1 : index
      %c0_37 = arith.constant 0 : index
      %c0_38 = arith.constant 0 : index
      %46 = vector.load %arg6[%c1_36, %c0_37, %c0_38] : memref<2x1x64xf32, #tpu.memory_space<vmem>>, vector<1x1x64xf32>
      %47 = vector.shape_cast %46 : vector<1x1x64xf32> to vector<1x64xf32>
      %48 = vector.broadcast %47 : vector<1x64xf32> to vector<3x64xf32>
      %49 = arith.addf %45, %48 : vector<3x64xf32>
      %c0_39 = arith.constant 0 : index
      %c0_40 = arith.constant 0 : index
      %50 = vector.load %arg7[%c0_39, %c0_40] : memref<1x204xf32, #tpu.memory_space<vmem>>, vector<1x204xf32>
      %51 = vector.extract_strided_slice %49 {offsets = [0, 0], sizes = [1, 64], strides = [1, 1]} : vector<3x64xf32> to vector<1x64xf32>
      %c0_41 = arith.constant 0 : index
      %c0_42 = arith.constant 0 : index
      %52 = vector.load %arg8[%c0_41, %c0_42] : memref<64x204xf32, #tpu.memory_space<vmem>>, vector<64x204xf32>
      %cst_43 = arith.constant dense<0.000000e+00> : vector<1x204xf32>
      %53 = tpu.matmul %51, %52, %cst_43 {dimension_numbers = #tpu.dot_dimension_numbers<[1], [0], [0], [1], [0, 0, 1, 1], [], []>} : vector<1x64xf32>, vector<64x204xf32>, vector<1x204xf32> -> vector<1x204xf32>
      %54 = arith.addf %50, %53 : vector<1x204xf32>
      %c0_44 = arith.constant 0 : index
      %c0_45 = arith.constant 0 : index
      %55 = vector.load %arg9[%c0_44, %c0_45] : memref<1x204xf32, #tpu.memory_space<vmem>>, vector<1x204xf32>
      tpu.vector_store %arg9[%c0_44, %c0_45], %54 {strides = array<i32>} : memref<1x204xf32, #tpu.memory_space<vmem>>, vector<1x204xf32>,
      %cst_46 = arith.constant 0.000000e+00 : f32
      %56 = vector.broadcast %cst_46 : f32 to vector<1x12xf32>
      %57 = vector.extract_strided_slice %15 {offsets = [0, 50], sizes = [2, 12], strides = [1, 1]} : vector<2x64xf32> to vector<2x12xf32>
      %58 = tpu.concatenate %56, %57 in 0 : vector<1x12xf32>, vector<2x12xf32> -> vector<3x12xf32>
      %c0_47 = arith.constant 0 : index
      %c0_48 = arith.constant 0 : index
      %59 = vector.load %arg10[%c0_47, %c0_48] : memref<3x12xf32, #tpu.memory_space<vmem>>, vector<3x12xf32>
      tpu.vector_store %arg10[%c0_47, %c0_48], %58 {strides = array<i32>} : memref<3x12xf32, #tpu.memory_space<vmem>>, vector<3x12xf32>,
    } else {
    }
    return
  }
  func.func @transform_0(%arg0: i32) -> (i32, i32) {
    %c0_i32 = arith.constant 0 : i32
    %c0_i32_0 = arith.constant 0 : i32
    return %c0_i32, %arg0 : i32, i32
  }
  func.func @transform_1(%arg0: i32) -> (i32, i32) {
    %c0_i32 = arith.constant 0 : i32
    %c0_i32_0 = arith.constant 0 : i32
    return %arg0, %c0_i32 : i32, i32
  }
  func.func @transform_2(%arg0: i32) -> (i32, i32) {
    %c0_i32 = arith.constant 0 : i32
    %c0_i32_0 = arith.constant 0 : i32
    %c0_i32_1 = arith.constant 0 : i32
    return %c0_i32, %c0_i32_0 : i32, i32
  }
  func.func @transform_3(%arg0: i32) -> (i32, i32, i32) {
    %c0_i32 = arith.constant 0 : i32
    %c0_i32_0 = arith.constant 0 : i32
    %c0_i32_1 = arith.constant 0 : i32
    %c0_i32_2 = arith.constant 0 : i32
    return %c0_i32, %c0_i32_0, %c0_i32_1 : i32, i32, i32
  }
  func.func @transform_4(%arg0: i32) -> (i32, i32, i32) {
    %c0_i32 = arith.constant 0 : i32
    %c0_i32_0 = arith.constant 0 : i32
    %c0_i32_1 = arith.constant 0 : i32
    %c0_i32_2 = arith.constant 0 : i32
    return %c0_i32, %c0_i32_0, %c0_i32_1 : i32, i32, i32
  }
  func.func @transform_5(%arg0: i32) -> (i32, i32, i32) {
    %c0_i32 = arith.constant 0 : i32
    %c0_i32_0 = arith.constant 0 : i32
    %c0_i32_1 = arith.constant 0 : i32
    %c0_i32_2 = arith.constant 0 : i32
    return %c0_i32, %c0_i32_0, %c0_i32_1 : i32, i32, i32
  }
  func.func @transform_6(%arg0: i32) -> (i32, i32) {
    %c0_i32 = arith.constant 0 : i32
    %c0_i32_0 = arith.constant 0 : i32
    %c0_i32_1 = arith.constant 0 : i32
    return %c0_i32, %c0_i32_0 : i32, i32
  }
  func.func @transform_7(%arg0: i32) -> (i32, i32) {
    %c0_i32 = arith.constant 0 : i32
    %c0_i32_0 = arith.constant 0 : i32
    %c0_i32_1 = arith.constant 0 : i32
    return %c0_i32, %c0_i32_0 : i32, i32
  }
  func.func @transform_8(%arg0: i32) -> (i32, i32) {
    %c0_i32 = arith.constant 0 : i32
    %c0_i32_0 = arith.constant 0 : i32
    %c0_i32_1 = arith.constant 0 : i32
    return %c0_i32, %c0_i32_0 : i32, i32
  }
  func.func @transform_9(%arg0: i32) -> (i32, i32) {
    %c0_i32 = arith.constant 0 : i32
    %c0_i32_0 = arith.constant 0 : i32
    %c0_i32_1 = arith.constant 0 : i32
    return %c0_i32, %c0_i32_0 : i32, i32
  }
}

</mosaic_0001>

<bundles_post_ra>
// kernel: _device_forward.1
= control target key start
LH: loop header
LB: loop body
LE: loop exit
PB: predicated region body
PF: predicated region fallthrough
CT: control target
= control target key end

     0   :  { %15 = vsyncpa [#allocation4], 0  ;;  %s20997_s30 = smov 0   ;;  %s22630_s0 = inlined_call_operand.vmem [shape: bf16[2,43264], index: 0, kind: input, shape index: {}]   ;;  %s22631_s1 = inlined_call_operand.vmem [shape: bf16[43264,64], index: 1, kind: input, shape index: {}]   ;;  %s22632_s2 = inlined_call_operand.vmem [shape: f32[1,64], index: 2, kind: input, shape index: {}]   ;;  %s22633_s3 = inlined_call_operand.vmem [shape: f32[2,64,64], index: 3, kind: input, shape index: {}]   ;;  %s22634_s4 = inlined_call_operand.vmem [shape: f32[2,64,64], index: 4, kind: input, shape index: {}]   ;;  %s22635_s5 = inlined_call_operand.vmem [shape: f32[2,1,64], index: 5, kind: input, shape index: {}]   ;;  %s22636_s6 = inlined_call_operand.vmem [shape: f32[1,204], index: 6, kind: input, shape index: {}]   ;;  %s22637_s7 = inlined_call_operand.vmem [shape: f32[64,204], index: 7, kind: input, shape index: {}]   ;;  %s22638_s8 = inlined_call_operand.vmem [shape: f32[1,204], index: 8, kind: output, shape index: {0}]   ;;  %s22639_s9 = inlined_call_operand.hbm [shape: f32[3,12], index: 9, kind: output, shape index: {1}]  }
   0x1 LB: > { %s21003_s10 = sadd.s32 4294967295, %s20941_s30   ;;  %p14089_p0 = scmp.ge.s32.totalorder %s20941_s30, 1  ;;  %s20941_s30 = sphi %s20997_s30, %s21_s30  }
   0x2   : > { %p292_p1 = scmp.lt.s32.totalorder %s20941_s30, 3 }
   0x4   : > { %p293_p2 = pnand %p14089_p0, %p292_p1 }
   0x5   : > { %s327_s11 = smul.u32 (!%p293_p2), 169, %s21003_s10  ;;  %p14091_p5 = scmp.ne.s32.totalorder (!%p293_p2), %s21003_s10, 0 }
   0x6   : > { %296 = sbr.rel (%p293_p2) target bundleno = 1977 (0x7b9), region = 52 }
   0x7   : > { %s332_s12 = smul.u32 (!%p293_p2), 2704, %s21003_s10  ;;  %p328_p3 = scmp.lt.s32.totalorder (!%p293_p2), %s327_s11, 337 }
   0x9   : > { %p333_p4 = scmp.lt.s32.totalorder (!%p293_p2), %s332_s12, 5407 }
   0xb   : > { %s22641_s11 = smov (!%p328_p3, %s327_s11), 337  ;;  %s22643_s12 = smov (!%p333_p4, %s332_s12), 5407 }
   0xc   : > { %s21012_s15 = scalar_lea.vmem %s22630_s0, %s22641_s11  ;;  %s14090_s16 = sshll.u32 %s22643_s12, 2 }
   0xd   : > { %s21017_s19 = scalar_lea.vmem %s22631_s1, %s14090_s16  ;;  %341 = sbr.rel (%p14091_p5) target bundleno = 20 (0x14), region = 56 }
  0x12   : > { %vm342_vm0 = vcmask 517120   ;;  %v20943_v0 = vmov 0.0  }
  0x13   : > { %343 = vst.msk [vmem:[#allocation2] sm:$0x3] %vm342_vm0, %v20943_v0 }
  0x14 PF: > { %v19535_v1 = vld [vmem:[%s21017_s19 + $0x38] sm:$0xff]  ;;  %v19534_v5 = vld [vmem:[%s21017_s19 + $0x30] sm:$0xff]  ;;  %v19533_v9 = vld [vmem:[%s21017_s19 + $0x28] sm:$0xff]  ;;  %vm13763_vm1 = vcmask 517120   ;;  %p19500_p6 = scmp.ne.s32.totalorder %s21003_s10, 1 }
  0x15   : > { %v19551_v2 = vld [vmem:[%s21017_s19 + $0xb8] sm:$0xff]  ;;  %11565 = vmatpush.bf16.msra.mxu0 %v19535_v1  ;;  %v19550_v6 = vld [vmem:[%s21017_s19 + $0xb0] sm:$0xff]  ;;  %v19549_v10 = vld [vmem:[%s21017_s19 + $0xa8] sm:$0xff]  ;;  %s20945_s12 = smov (!%p19500_p6), 78  }
  0x16   : > { %v19543_v3 = vld [vmem:[%s21017_s19 + $0x78] sm:$0xff]  ;;  %11591 = vmatpush.bf16.msra.mxu2 %v19551_v2  ;;  %v19542_v7 = vld [vmem:[%s21017_s19 + $0x70] sm:$0xff]  ;;  %v19541_v11 = vld [vmem:[%s21017_s19 + $0x68] sm:$0xff] }
  0x17   : > { %v19559_v4 = vld [vmem:[%s21017_s19 + $0xf8] sm:$0xff]  ;;  %11578 = vmatpush.bf16.msra.mxu1 %v19543_v3  ;;  %v19558_v8 = vld [vmem:[%s21017_s19 + $0xf0] sm:$0xff]  ;;  %v19557_v12 = vld [vmem:[%s21017_s19 + $0xe8] sm:$0xff] }
  0x18   : > { %11604 = vmatpush.bf16.msra.mxu3 %v19559_v4  ;;  %v19532_v13 = vld [vmem:[%s21017_s19 + $0x20] sm:$0xff]  ;;  %v19531_v17 = vld [vmem:[%s21017_s19 + $0x18] sm:$0xff]  ;;  %v19530_v22 = vld [vmem:[%s21017_s19 + $0x10] sm:$0xff] }
  0x19   : > { %11566 = vmatpush.bf16.msra.mxu0 %v19534_v5  ;;  %v19548_v14 = vld [vmem:[%s21017_s19 + $0xa0] sm:$0xff]  ;;  %v19547_v18 = vld [vmem:[%s21017_s19 + $0x98] sm:$0xff]  ;;  %v19546_v23 = vld [vmem:[%s21017_s19 + $0x90] sm:$0xff] }
  0x1a   : > { %11592 = vmatpush.bf16.msra.mxu2 %v19550_v6  ;;  %v19540_v15 = vld [vmem:[%s21017_s19 + $0x60] sm:$0xff]  ;;  %v19539_v19 = vld [vmem:[%s21017_s19 + $0x58] sm:$0xff]  ;;  %v19538_v24 = vld [vmem:[%s21017_s19 + $0x50] sm:$0xff] }
  0x1b   : > { %11579 = vmatpush.bf16.msra.mxu1 %v19542_v7  ;;  %v19556_v16 = vld [vmem:[%s21017_s19 + $0xe0] sm:$0xff]  ;;  %v19555_v20 = vld [vmem:[%s21017_s19 + $0xd8] sm:$0xff]  ;;  %v19554_v25 = vld [vmem:[%s21017_s19 + $0xd0] sm:$0xff] }
  0x1c   : > { %11605 = vmatpush.bf16.msra.mxu3 %v19558_v8  ;;  %v345_v21 = vld [vmem:[%s21012_s15] sm:$0xff]  ;;  %v19529_v26 = vld [vmem:[%s21017_s19 + $0x8] sm:$0xff]  ;;  %v19567_v32 = vld [vmem:[%s21017_s19 + $0x138] sm:$0xff] }
  0x1d   : > { %11567 = vmatpush.bf16.msra.mxu0 %v19533_v9  ;;  %3072 = vst [vmem:[#allocation1] ss:$9 sm:$0xff] %v345_v21  ;;  %v19545_v27 = vld [vmem:[%s21017_s19 + $0x88] sm:$0xff]  ;;  %v19528_v30 = vld [vmem:[%s21017_s19] sm:$0xff]  ;;  %v19583_v33 = vld [vmem:[%s21017_s19 + $0x1b8] sm:$0xff] }
  0x1e   : > { %11593 = vmatpush.bf16.msra.mxu2 %v19549_v10  ;;  %v19537_v28 = vld [vmem:[%s21017_s19 + $0x48] sm:$0xff]  ;;  %v19544_v31 = vld [vmem:[%s21017_s19 + $0x80] sm:$0xff]  ;;  %v19575_v36 = vld [vmem:[%s21017_s19 + $0x178] sm:$0xff] }
  0x1f   : > { %11580 = vmatpush.bf16.msra.mxu1 %v19541_v11  ;;  %v19553_v29 = vld [vmem:[%s21017_s19 + $0xc8] sm:$0xff]  ;;  %v19536_v34 = vld [vmem:[%s21017_s19 + $0x40] sm:$0xff]  ;;  %v19591_v37 = vld [vmem:[%s21017_s19 + $0x1f8] sm:$0xff] }
  0x20   : > { %11606 = vmatpush.bf16.msra.mxu3 %v19557_v12  ;;  %v19552_v35 = vld [vmem:[%s21017_s19 + $0xc0] sm:$0xff]  ;;  %v19566_v38 = vld [vmem:[%s21017_s19 + $0x130] sm:$0xff]  ;;  %v19565_v46 = vld [vmem:[%s21017_s19 + $0x128] sm:$0xff] }
  0x21   : > { %11568 = vmatpush.bf16.msra.mxu0 %v19532_v13  ;;  %v19582_v39 = vld [vmem:[%s21017_s19 + $0x1b0] sm:$0xff]  ;;  %v19581_v47 = vld [vmem:[%s21017_s19 + $0x1a8] sm:$0xff]  ;;  %v19564_v50 = vld [vmem:[%s21017_s19 + $0x120] sm:$0xff] }
  0x22   : > { %11594 = vmatpush.bf16.msra.mxu2 %v19548_v14  ;;  %v19574_v42 = vld [vmem:[%s21017_s19 + $0x170] sm:$0xff]  ;;  %v19573_v48 = vld [vmem:[%s21017_s19 + $0x168] sm:$0xff]  ;;  %v19580_v51 = vld [vmem:[%s21017_s19 + $0x1a0] sm:$0xff] }
  0x23   : > { %11581 = vmatpush.bf16.msra.mxu1 %v19540_v15  ;;  %v19590_v43 = vld [vmem:[%s21017_s19 + $0x1f0] sm:$0xff]  ;;  %v19589_v49 = vld [vmem:[%s21017_s19 + $0x1e8] sm:$0xff]  ;;  %v19572_v52 = vld [vmem:[%s21017_s19 + $0x160] sm:$0xff] }
  0x24   : > { %11607 = vmatpush.bf16.msra.mxu3 %v19556_v16  ;;  %v3075_v40 = vld [vmem:[#allocation1 + $0x12] sm:$0xff]  ;;  %v3073_v41 = vld [vmem:[#allocation1] sm:$0xff]  ;;  %v3074_v45 = vld [vmem:[#allocation1 + $0x9] sm:$0xff] }
  0x25   : > { %11569 = vmatpush.bf16.msra.mxu0 %v19531_v17  ;;  %v3076_v44 = vld [vmem:[#allocation1 + $0x1b] sm:$0xff]  ;;  %v19562_v58 = vld [vmem:[%s21017_s19 + $0x110] sm:$0xff]  ;;  %v3077_v63 = vld [vmem:[#allocation1 + $0x24] sm:$0xff] }
  0x26   : > { %11595 = vmatpush.bf16.msra.mxu2 %v19547_v18  ;;  %v19588_v53 = vld [vmem:[%s21017_s19 + $0x1e0] sm:$0xff]  ;;  %v19563_v54 = vld [vmem:[%s21017_s19 + $0x118] sm:$0xff]  ;;  %v19578_v59 = vld [vmem:[%s21017_s19 + $0x190] sm:$0xff] }
  0x27   : > { %11582 = vmatpush.bf16.msra.mxu1 %v19539_v19  ;;  %v19579_v55 = vld [vmem:[%s21017_s19 + $0x198] sm:$0xff]  ;;  %v19570_v60 = vld [vmem:[%s21017_s19 + $0x150] sm:$0xff]  ;;  %v346_v2 = vld [vmem:[%s21012_s15 + $0x8] sm:$0xff] }
  0x28   : > { %11608 = vmatpush.bf16.msra.mxu3 %v19555_v20  ;;  %v19571_v56 = vld [vmem:[%s21017_s19 + $0x158] sm:$0xff]  ;;  %v19586_v61 = vld [vmem:[%s21017_s19 + $0x1d0] sm:$0xff]  ;;  %v19561_v3 = vld [vmem:[%s21017_s19 + $0x108] sm:$0xff] }
  0x29   : > { %11570 = vmatpush.bf16.msra.mxu0 %v19530_v22  ;;  %v19587_v57 = vld [vmem:[%s21017_s19 + $0x1d8] sm:$0xff]  ;;  %v3078_v1 = vld [vmem:[#allocation1 + $0x2d] sm:$0xff]  ;;  %v19560_v7 = vld [vmem:[%s21017_s19 + $0x100] sm:$0xff] }
  0x2a   : > { %11596 = vmatpush.bf16.msra.mxu2 %v19546_v23  ;;  %v3079_v62 = vld [vmem:[#allocation1 + $0x36] sm:$0xff]  ;;  %v3080_v0 = vld [vmem:[#allocation1 + $0x3f] sm:$0xff]  ;;  %v19577_v4 = vld [vmem:[%s21017_s19 + $0x188] sm:$0xff] }
  0x2b   : > { %11583 = vmatpush.bf16.msra.mxu1 %v19538_v24  ;;  %3082 = vst [vmem:[#allocation1] ss:$9 sm:$0xff] %v346_v2  ;;  %v19569_v5 = vld [vmem:[%s21017_s19 + $0x148] sm:$0xff]  ;;  %v19576_v8 = vld [vmem:[%s21017_s19 + $0x180] sm:$0xff]  ;;  %v19599_v9 = vld [vmem:[%s21017_s19 + $0x238] sm:$0xff] }
  0x2c   : > { %11609 = vmatpush.bf16.msra.mxu3 %v19554_v25  ;;  %v19585_v6 = vld [vmem:[%s21017_s19 + $0x1c8] sm:$0xff]  ;;  %v19615_v10 = vld [vmem:[%s21017_s19 + $0x2b8] sm:$0xff]  ;;  %v19568_v11 = vld [vmem:[%s21017_s19 + $0x140] sm:$0xff] }
  0x2d   : > { %11571 = vmatpush.bf16.msra.mxu0 %v19529_v26  ;;  %v19584_v12 = vld [vmem:[%s21017_s19 + $0x1c0] sm:$0xff]  ;;  %v19607_v13 = vld [vmem:[%s21017_s19 + $0x278] sm:$0xff]  ;;  %v19598_v15 = vld [vmem:[%s21017_s19 + $0x230] sm:$0xff] }
  0x2e   : > { %11597 = vmatpush.bf16.msra.mxu2 %v19545_v27  ;;  %v19623_v14 = vld [vmem:[%s21017_s19 + $0x2f8] sm:$0xff]  ;;  %v19614_v16 = vld [vmem:[%s21017_s19 + $0x2b0] sm:$0xff]  ;;  %v19597_v19 = vld [vmem:[%s21017_s19 + $0x228] sm:$0xff] }
  0x2f   : > { %11584 = vmatpush.bf16.msra.mxu1 %v19537_v28  ;;  %v19606_v17 = vld [vmem:[%s21017_s19 + $0x270] sm:$0xff]  ;;  %v19613_v20 = vld [vmem:[%s21017_s19 + $0x2a8] sm:$0xff]  ;;  %v19596_v23 = vld [vmem:[%s21017_s19 + $0x220] sm:$0xff] }
  0x30   : > { %11610 = vmatpush.bf16.msra.mxu3 %v19553_v29  ;;  %v19622_v18 = vld [vmem:[%s21017_s19 + $0x2f0] sm:$0xff]  ;;  %v19605_v21 = vld [vmem:[%s21017_s19 + $0x268] sm:$0xff]  ;;  %v19612_v24 = vld [vmem:[%s21017_s19 + $0x2a0] sm:$0xff] }
  0x31   : > { %11572 = vmatpush.bf16.msra.mxu0 %v19528_v30  ;;  %v19621_v22 = vld [vmem:[%s21017_s19 + $0x2e8] sm:$0xff]  ;;  %v19604_v25 = vld [vmem:[%s21017_s19 + $0x260] sm:$0xff]  ;;  %v19595_v27 = vld [vmem:[%s21017_s19 + $0x218] sm:$0xff] }
  0x32   : > { %11598 = vmatpush.bf16.msra.mxu2 %v19544_v31  ;;  %v19620_v26 = vld [vmem:[%s21017_s19 + $0x2e0] sm:$0xff]  ;;  %v19611_v28 = vld [vmem:[%s21017_s19 + $0x298] sm:$0xff]  ;;  %v19594_v31 = vld [vmem:[%s21017_s19 + $0x210] sm:$0xff] }
  0x33   : > { %11585 = vmatpush.bf16.msra.mxu1 %v19536_v34  ;;  %v19603_v29 = vld [vmem:[%s21017_s19 + $0x258] sm:$0xff]  ;;  %v19618_v34 = vld [vmem:[%s21017_s19 + $0x2d0] sm:$0xff] }
  0x34   : > { %11611 = vmatpush.bf16.msra.mxu3 %v19552_v35  ;;  %11573 = vmatmul.bf16.vlgmr.msra.gmra.mxu0 %v3073_v41  ;;  %v19619_v30 = vld [vmem:[%s21017_s19 + $0x2d8] sm:$0xff]  ;;  %v19593_v35 = vld [vmem:[%s21017_s19 + $0x208] sm:$0xff] }
  0x35   : > { %11617 = vmatpush.bf16.msrb.mxu0 %v19567_v32  ;;  %11599 = vmatmul.bf16.vlgmr.msra.gmra.mxu2 %v3075_v40  ;;  %v19610_v32 = vld [vmem:[%s21017_s19 + $0x290] sm:$0xff]  ;;  %v19608_v40 = vld [vmem:[%s21017_s19 + $0x280] sm:$0xff]  ;;  %v19631_v41 = vld [vmem:[%s21017_s19 + $0x338] sm:$0xff] }
  0x36   : > { %11643 = vmatpush.bf16.msrb.mxu2 %v19583_v33  ;;  %11586 = vmatmul.bf16.vlgmr.msra.gmra.mxu1 %v3074_v45  ;;  %v19602_v33 = vld [vmem:[%s21017_s19 + $0x250] sm:$0xff]  ;;  %v19639_v45 = vld [vmem:[%s21017_s19 + $0x378] sm:$0xff] }
  0x37   : > { %11630 = vmatpush.bf16.msrb.mxu1 %v19575_v36  ;;  %11612 = vmatmul.bf16.vlgmr.msra.gmra.mxu3 %v3076_v44  ;;  %v19609_v36 = vld [vmem:[%s21017_s19 + $0x288] sm:$0xff]  ;;  %v19616_v44 = vld [vmem:[%s21017_s19 + $0x2c0] sm:$0xff]  ;;  %v19651_v2 = vld [vmem:[%s21017_s19 + $0x3d8] sm:$0xff] }
  0x38   : > { %11656 = vmatpush.bf16.msrb.mxu3 %v19591_v37  ;;  %v19601_v37 = vld [vmem:[%s21017_s19 + $0x248] sm:$0xff] }
  0x39   : > { %11618 = vmatpush.bf16.msrb.mxu0 %v19566_v38  ;;  %v19617_v38 = vld [vmem:[%s21017_s19 + $0x2c8] sm:$0xff] }
  0x3a   : > { %11644 = vmatpush.bf16.msrb.mxu2 %v19582_v39  ;;  %v19592_v39 = vld [vmem:[%s21017_s19 + $0x200] sm:$0xff] }
  0x3b   : > { %11631 = vmatpush.bf16.msrb.mxu1 %v19574_v42  ;;  %v19647_v42 = vld [vmem:[%s21017_s19 + $0x3b8] sm:$0xff] }
  0x3c   : > { %11657 = vmatpush.bf16.msrb.mxu3 %v19590_v43  ;;  %v19600_v43 = vld [vmem:[%s21017_s19 + $0x240] sm:$0xff] }
  0x3d   : > { %11619 = vmatpush.bf16.msrb.mxu0 %v19565_v46  ;;  %v3083_v46 = vld [vmem:[#allocation1] sm:$0xff] }
  0x3e   : > { %11645 = vmatpush.bf16.msrb.mxu2 %v19581_v47  ;;  %v3085_v47 = vld [vmem:[#allocation1 + $0x12] sm:$0xff] }
  0x3f   : > { %11632 = vmatpush.bf16.msrb.mxu1 %v19573_v48  ;;  %v19655_v48 = vld [vmem:[%s21017_s19 + $0x3f8] sm:$0xff] }
  0x40   : > { %11658 = vmatpush.bf16.msrb.mxu3 %v19589_v49  ;;  %v3084_v49 = vld [vmem:[#allocation1 + $0x9] sm:$0xff] }
  0x41   : > { %11620 = vmatpush.bf16.msrb.mxu0 %v19564_v50  ;;  %v3086_v50 = vld [vmem:[#allocation1 + $0x1b] sm:$0xff] }
  0x42   : > { %11646 = vmatpush.bf16.msrb.mxu2 %v19580_v51  ;;  %v19630_v51 = vld [vmem:[%s21017_s19 + $0x330] sm:$0xff] }
  0x43   : > { %11633 = vmatpush.bf16.msrb.mxu1 %v19572_v52  ;;  %v19646_v52 = vld [vmem:[%s21017_s19 + $0x3b0] sm:$0xff] }
  0x44   : > { %11659 = vmatpush.bf16.msrb.mxu3 %v19588_v53  ;;  %v19638_v53 = vld [vmem:[%s21017_s19 + $0x370] sm:$0xff] }
  0x45   : > { %11621 = vmatpush.bf16.msrb.mxu0 %v19563_v54  ;;  %v19654_v54 = vld [vmem:[%s21017_s19 + $0x3f0] sm:$0xff] }
  0x46   : > { %11647 = vmatpush.bf16.msrb.mxu2 %v19579_v55  ;;  %v19629_v55 = vld [vmem:[%s21017_s19 + $0x328] sm:$0xff] }
  0x47   : > { %11634 = vmatpush.bf16.msrb.mxu1 %v19571_v56  ;;  %v19645_v56 = vld [vmem:[%s21017_s19 + $0x3a8] sm:$0xff] }
  0x48   : > { %11660 = vmatpush.bf16.msrb.mxu3 %v19587_v57  ;;  %v19637_v57 = vld [vmem:[%s21017_s19 + $0x368] sm:$0xff] }
  0x49   : > { %11622 = vmatpush.bf16.msrb.mxu0 %v19562_v58  ;;  %v19653_v58 = vld [vmem:[%s21017_s19 + $0x3e8] sm:$0xff] }
  0x4a   : > { %11648 = vmatpush.bf16.msrb.mxu2 %v19578_v59  ;;  %v19628_v59 = vld [vmem:[%s21017_s19 + $0x320] sm:$0xff] }
  0x4b   : > { %11635 = vmatpush.bf16.msrb.mxu1 %v19570_v60  ;;  %v19644_v60 = vld [vmem:[%s21017_s19 + $0x3a0] sm:$0xff] }
  0x4c   : > { %11661 = vmatpush.bf16.msrb.mxu3 %v19586_v61  ;;  %v19636_v61 = vld [vmem:[%s21017_s19 + $0x360] sm:$0xff] }
  0x4d   : > { %11623 = vmatpush.bf16.msrb.mxu0 %v19561_v3  ;;  %v19626_v3 = vld [vmem:[%s21017_s19 + $0x310] sm:$0xff] }
  0x4e   : > { %11649 = vmatpush.bf16.msrb.mxu2 %v19577_v4  ;;  %v19642_v4 = vld [vmem:[%s21017_s19 + $0x390] sm:$0xff] }
  0x4f   : > { %11636 = vmatpush.bf16.msrb.mxu1 %v19569_v5  ;;  %v19634_v5 = vld [vmem:[%s21017_s19 + $0x350] sm:$0xff] }
  0x50   : > { %11662 = vmatpush.bf16.msrb.mxu3 %v19585_v6  ;;  %v19650_v6 = vld [vmem:[%s21017_s19 + $0x3d0] sm:$0xff] }
  0x51   : > { %11624 = vmatpush.bf16.msrb.mxu0 %v19560_v7  ;;  %v19625_v7 = vld [vmem:[%s21017_s19 + $0x308] sm:$0xff] }
  0x52   : > { %11650 = vmatpush.bf16.msrb.mxu2 %v19576_v8  ;;  %v19641_v8 = vld [vmem:[%s21017_s19 + $0x388] sm:$0xff] }
  0x53   : > { %11637 = vmatpush.bf16.msrb.mxu1 %v19568_v11  ;;  %v3088_v11 = vld [vmem:[#allocation1 + $0x2d] sm:$0xff] }
  0x54   : > { %11663 = vmatpush.bf16.msrb.mxu3 %v19584_v12  ;;  %11625 = vmatmul.bf16.vlgmr.msrb.gmra.mxu0 %v3077_v63  ;;  %v19627_v63 = vld [vmem:[%s21017_s19 + $0x318] sm:$0xff] }
  0x55   : > { %11669 = vmatpush.bf16.msra.mxu0 %v19599_v9  ;;  %11651 = vmatmul.bf16.vlgmr.msrb.gmra.mxu2 %v3079_v62  ;;  %v19652_v62 = vld [vmem:[%s21017_s19 + $0x3e0] sm:$0xff] }
  0x56   : > { %11695 = vmatpush.bf16.msra.mxu2 %v19615_v10  ;;  %11638 = vmatmul.bf16.vlgmr.msrb.gmra.mxu1 %v3078_v1  ;;  %v19635_v1 = vld [vmem:[%s21017_s19 + $0x358] sm:$0xff]  ;;  %v3087_v9 = vld [vmem:[#allocation1 + $0x24] sm:$0xff] }
  0x57   : > { %11682 = vmatpush.bf16.msra.mxu1 %v19607_v13  ;;  %11664 = vmatmul.bf16.vlgmr.msrb.gmra.mxu3 %v3080_v0  ;;  %v19643_v0 = vld [vmem:[%s21017_s19 + $0x398] sm:$0xff]  ;;  %v347_v13 = vld [vmem:[%s21012_s15 + $0x10] sm:$0xff] }
  0x58   : > { %11708 = vmatpush.bf16.msra.mxu3 %v19623_v14  ;;  %v3089_v10 = vld [vmem:[#allocation1 + $0x36] sm:$0xff]  ;;  %v3090_v12 = vld [vmem:[#allocation1 + $0x3f] sm:$0xff]  ;;  %v19633_v14 = vld [vmem:[%s21017_s19 + $0x348] sm:$0xff] }
  0x59   : > { %11670 = vmatpush.bf16.msra.mxu0 %v19598_v15  ;;  %3092 = vst [vmem:[#allocation1] ss:$9 sm:$0xff] %v347_v13  ;;  %v19649_v15 = vld [vmem:[%s21017_s19 + $0x3c8] sm:$0xff]  ;;  %v19699_v13 = vld [vmem:[%s21017_s19 + $0x558] sm:$0xff] }
  0x5a   : > { %11696 = vmatpush.bf16.msra.mxu2 %v19614_v16  ;;  %v19624_v16 = vld [vmem:[%s21017_s19 + $0x300] sm:$0xff] }
  0x5b   : > { %11683 = vmatpush.bf16.msra.mxu1 %v19606_v17  ;;  %v19640_v17 = vld [vmem:[%s21017_s19 + $0x380] sm:$0xff] }
  0x5c   : > { %11709 = vmatpush.bf16.msra.mxu3 %v19622_v18  ;;  %v19663_v18 = vld [vmem:[%s21017_s19 + $0x438] sm:$0xff] }
  0x5d   : > { %11671 = vmatpush.bf16.msra.mxu0 %v19597_v19  ;;  %v19679_v19 = vld [vmem:[%s21017_s19 + $0x4b8] sm:$0xff] }
  0x5e   : > { %11697 = vmatpush.bf16.msra.mxu2 %v19613_v20  ;;  %v19632_v20 = vld [vmem:[%s21017_s19 + $0x340] sm:$0xff] }
  0x5f   : > { %11684 = vmatpush.bf16.msra.mxu1 %v19605_v21  ;;  %v19648_v21 = vld [vmem:[%s21017_s19 + $0x3c0] sm:$0xff] }
  0x60   : > { %11710 = vmatpush.bf16.msra.mxu3 %v19621_v22  ;;  %v19671_v22 = vld [vmem:[%s21017_s19 + $0x478] sm:$0xff] }
  0x61   : > { %11672 = vmatpush.bf16.msra.mxu0 %v19596_v23  ;;  %v19687_v23 = vld [vmem:[%s21017_s19 + $0x4f8] sm:$0xff] }
  0x62   : > { %11698 = vmatpush.bf16.msra.mxu2 %v19612_v24  ;;  %v19662_v24 = vld [vmem:[%s21017_s19 + $0x430] sm:$0xff] }
  0x63   : > { %11685 = vmatpush.bf16.msra.mxu1 %v19604_v25  ;;  %v19678_v25 = vld [vmem:[%s21017_s19 + $0x4b0] sm:$0xff] }
  0x64   : > { %11711 = vmatpush.bf16.msra.mxu3 %v19620_v26  ;;  %v19670_v26 = vld [vmem:[%s21017_s19 + $0x470] sm:$0xff] }
  0x65   : > { %11673 = vmatpush.bf16.msra.mxu0 %v19595_v27  ;;  %v19686_v27 = vld [vmem:[%s21017_s19 + $0x4f0] sm:$0xff] }
  0x66   : > { %11699 = vmatpush.bf16.msra.mxu2 %v19611_v28  ;;  %v19661_v28 = vld [vmem:[%s21017_s19 + $0x428] sm:$0xff] }
  0x67   : > { %11686 = vmatpush.bf16.msra.mxu1 %v19603_v29  ;;  %v19677_v29 = vld [vmem:[%s21017_s19 + $0x4a8] sm:$0xff] }
  0x68   : > { %11712 = vmatpush.bf16.msra.mxu3 %v19619_v30  ;;  %v19669_v30 = vld [vmem:[%s21017_s19 + $0x468] sm:$0xff] }
  0x69   : > { %11674 = vmatpush.bf16.msra.mxu0 %v19594_v31  ;;  %v19685_v31 = vld [vmem:[%s21017_s19 + $0x4e8] sm:$0xff] }
  0x6a   : > { %11700 = vmatpush.bf16.msra.mxu2 %v19610_v32  ;;  %v19660_v32 = vld [vmem:[%s21017_s19 + $0x420] sm:$0xff] }
  0x6b   : > { %11687 = vmatpush.bf16.msra.mxu1 %v19602_v33  ;;  %v19676_v33 = vld [vmem:[%s21017_s19 + $0x4a0] sm:$0xff] }
  0x6c   : > { %11713 = vmatpush.bf16.msra.mxu3 %v19618_v34  ;;  %v19668_v34 = vld [vmem:[%s21017_s19 + $0x460] sm:$0xff] }
  0x6d   : > { %11675 = vmatpush.bf16.msra.mxu0 %v19593_v35  ;;  %v19684_v35 = vld [vmem:[%s21017_s19 + $0x4e0] sm:$0xff] }
  0x6e   : > { %11701 = vmatpush.bf16.msra.mxu2 %v19609_v36  ;;  %v19659_v36 = vld [vmem:[%s21017_s19 + $0x418] sm:$0xff] }
  0x6f   : > { %11688 = vmatpush.bf16.msra.mxu1 %v19601_v37  ;;  %v19675_v37 = vld [vmem:[%s21017_s19 + $0x498] sm:$0xff] }
  0x70   : > { %11714 = vmatpush.bf16.msra.mxu3 %v19617_v38  ;;  %v19667_v38 = vld [vmem:[%s21017_s19 + $0x458] sm:$0xff] }
  0x71   : > { %11676 = vmatpush.bf16.msra.mxu0 %v19592_v39  ;;  %v19683_v39 = vld [vmem:[%s21017_s19 + $0x4d8] sm:$0xff] }
  0x72   : > { %11702 = vmatpush.bf16.msra.mxu2 %v19608_v40  ;;  %v19658_v40 = vld [vmem:[%s21017_s19 + $0x410] sm:$0xff] }
  0x73   : > { %11689 = vmatpush.bf16.msra.mxu1 %v19600_v43  ;;  %v19682_v43 = vld [vmem:[%s21017_s19 + $0x4d0] sm:$0xff] }
  0x74   : > { %11715 = vmatpush.bf16.msra.mxu3 %v19616_v44  ;;  %11677 = vmatmul.bf16.vlgmr.msra.gmra.mxu0 %v3083_v46  ;;  %v19657_v44 = vld [vmem:[%s21017_s19 + $0x408] sm:$0xff] }
  0x75   : > { %11721 = vmatpush.bf16.msrb.mxu0 %v19631_v41  ;;  %11703 = vmatmul.bf16.vlgmr.msra.gmra.mxu2 %v3085_v47  ;;  %v19674_v41 = vld [vmem:[%s21017_s19 + $0x490] sm:$0xff]  ;;  %v19665_v46 = vld [vmem:[%s21017_s19 + $0x448] sm:$0xff] }
  0x76   : > { %11747 = vmatpush.bf16.msrb.mxu2 %v19647_v42  ;;  %11690 = vmatmul.bf16.vlgmr.msra.gmra.mxu1 %v3084_v49  ;;  %v19666_v42 = vld [vmem:[%s21017_s19 + $0x450] sm:$0xff]  ;;  %v19681_v47 = vld [vmem:[%s21017_s19 + $0x4c8] sm:$0xff]  ;;  %v19672_v49 = vld [vmem:[%s21017_s19 + $0x480] sm:$0xff] }
  0x77   : > { %11734 = vmatpush.bf16.msrb.mxu1 %v19639_v45  ;;  %11716 = vmatmul.bf16.vlgmr.msra.gmra.mxu3 %v3086_v50  ;;  %v19673_v45 = vld [vmem:[%s21017_s19 + $0x488] sm:$0xff]  ;;  %v19695_v50 = vld [vmem:[%s21017_s19 + $0x538] sm:$0xff] }
  0x78   : > { %11760 = vmatpush.bf16.msrb.mxu3 %v19655_v48  ;;  %v19656_v48 = vld [vmem:[%s21017_s19 + $0x400] sm:$0xff] }
  0x79   : > { %11722 = vmatpush.bf16.msrb.mxu0 %v19630_v51  ;;  %v19711_v51 = vld [vmem:[%s21017_s19 + $0x5b8] sm:$0xff] }
  0x7a   : > { %11748 = vmatpush.bf16.msrb.mxu2 %v19646_v52  ;;  %v19664_v52 = vld [vmem:[%s21017_s19 + $0x440] sm:$0xff] }
  0x7b   : > { %11735 = vmatpush.bf16.msrb.mxu1 %v19638_v53  ;;  %v19680_v53 = vld [vmem:[%s21017_s19 + $0x4c0] sm:$0xff] }
  0x7c   : > { %11761 = vmatpush.bf16.msrb.mxu3 %v19654_v54  ;;  %v19703_v54 = vld [vmem:[%s21017_s19 + $0x578] sm:$0xff] }
  0x7d   : > { %11723 = vmatpush.bf16.msrb.mxu0 %v19629_v55  ;;  %v3093_v55 = vld [vmem:[#allocation1] sm:$0xff] }
  0x7e   : > { %11749 = vmatpush.bf16.msrb.mxu2 %v19645_v56  ;;  %v3095_v56 = vld [vmem:[#allocation1 + $0x12] sm:$0xff] }
  0x7f   : > { %11736 = vmatpush.bf16.msrb.mxu1 %v19637_v57  ;;  %v19719_v57 = vld [vmem:[%s21017_s19 + $0x5f8] sm:$0xff] }
  0x80   : > { %11762 = vmatpush.bf16.msrb.mxu3 %v19653_v58  ;;  %v3094_v58 = vld [vmem:[#allocation1 + $0x9] sm:$0xff] }
  0x81   : > { %11724 = vmatpush.bf16.msrb.mxu0 %v19628_v59  ;;  %v3096_v59 = vld [vmem:[#allocation1 + $0x1b] sm:$0xff] }
  0x82   : > { %11750 = vmatpush.bf16.msrb.mxu2 %v19644_v60  ;;  %v19694_v60 = vld [vmem:[%s21017_s19 + $0x530] sm:$0xff] }
  0x83   : > { %11737 = vmatpush.bf16.msrb.mxu1 %v19636_v61  ;;  %v19710_v61 = vld [vmem:[%s21017_s19 + $0x5b0] sm:$0xff] }
  0x84   : > { %11763 = vmatpush.bf16.msrb.mxu3 %v19652_v62  ;;  %v19702_v62 = vld [vmem:[%s21017_s19 + $0x570] sm:$0xff] }
  0x85   : > { %11725 = vmatpush.bf16.msrb.mxu0 %v19627_v63  ;;  %v19718_v63 = vld [vmem:[%s21017_s19 + $0x5f0] sm:$0xff] }
  0x86   : > { %11751 = vmatpush.bf16.msrb.mxu2 %v19643_v0  ;;  %v19693_v0 = vld [vmem:[%s21017_s19 + $0x528] sm:$0xff] }
  0x87   : > { %11738 = vmatpush.bf16.msrb.mxu1 %v19635_v1  ;;  %v19709_v1 = vld [vmem:[%s21017_s19 + $0x5a8] sm:$0xff] }
  0x88   : > { %11764 = vmatpush.bf16.msrb.mxu3 %v19651_v2  ;;  %v19701_v2 = vld [vmem:[%s21017_s19 + $0x568] sm:$0xff] }
  0x89   : > { %11726 = vmatpush.bf16.msrb.mxu0 %v19626_v3  ;;  %v19717_v3 = vld [vmem:[%s21017_s19 + $0x5e8] sm:$0xff] }
  0x8a   : > { %11752 = vmatpush.bf16.msrb.mxu2 %v19642_v4  ;;  %v19692_v4 = vld [vmem:[%s21017_s19 + $0x520] sm:$0xff] }
  0x8b   : > { %11739 = vmatpush.bf16.msrb.mxu1 %v19634_v5  ;;  %v19708_v5 = vld [vmem:[%s21017_s19 + $0x5a0] sm:$0xff] }
  0x8c   : > { %11765 = vmatpush.bf16.msrb.mxu3 %v19650_v6 }
  0x8d   : > { %11727 = vmatpush.bf16.msrb.mxu0 %v19625_v7  ;;  %v19700_v7 = vld [vmem:[%s21017_s19 + $0x560] sm:$0xff] }
  0x8e   : > { %11753 = vmatpush.bf16.msrb.mxu2 %v19641_v8  ;;  %v19716_v8 = vld [vmem:[%s21017_s19 + $0x5e0] sm:$0xff] }
  0x8f   : > { %11740 = vmatpush.bf16.msrb.mxu1 %v19633_v14  ;;  %v19715_v14 = vld [vmem:[%s21017_s19 + $0x5d8] sm:$0xff] }
  0x90   : > { %11766 = vmatpush.bf16.msrb.mxu3 %v19649_v15 }
  0x91   : > { %11728 = vmatpush.bf16.msrb.mxu0 %v19624_v16  ;;  %v19690_v16 = vld [vmem:[%s21017_s19 + $0x510] sm:$0xff] }
  0x92   : > { %11754 = vmatpush.bf16.msrb.mxu2 %v19640_v17  ;;  %v19706_v17 = vld [vmem:[%s21017_s19 + $0x590] sm:$0xff] }
  0x93   : > { %11741 = vmatpush.bf16.msrb.mxu1 %v19632_v20 }
  0x94   : > { %11767 = vmatpush.bf16.msrb.mxu3 %v19648_v21  ;;  %11729 = vmatmul.bf16.vlgmr.msrb.gmra.mxu0 %v3087_v9  ;;  %v19698_v21 = vld [vmem:[%s21017_s19 + $0x550] sm:$0xff] }
  0x95   : > { %11773 = vmatpush.bf16.msra.mxu0 %v19663_v18  ;;  %11755 = vmatmul.bf16.vlgmr.msrb.gmra.mxu2 %v3089_v10  ;;  %v19691_v10 = vld [vmem:[%s21017_s19 + $0x518] sm:$0xff] }
  0x96   : > { %11799 = vmatpush.bf16.msra.mxu2 %v19679_v19  ;;  %11742 = vmatmul.bf16.vlgmr.msrb.gmra.mxu1 %v3088_v11  ;;  %v19707_v11 = vld [vmem:[%s21017_s19 + $0x598] sm:$0xff] }
  0x97   : > { %11786 = vmatpush.bf16.msra.mxu1 %v19671_v22  ;;  %11768 = vmatmul.bf16.vlgmr.msrb.gmra.mxu3 %v3090_v12  ;;  %v19714_v22 = vld [vmem:[%s21017_s19 + $0x5d0] sm:$0xff] }
  0x98   : > { %11812 = vmatpush.bf16.msra.mxu3 %v19687_v23  ;;  %v19689_v23 = vld [vmem:[%s21017_s19 + $0x508] sm:$0xff] }
  0x99   : > { %11774 = vmatpush.bf16.msra.mxu0 %v19662_v24 }
  0x9a   : > { %11800 = vmatpush.bf16.msra.mxu2 %v19678_v25  ;;  %v19705_v25 = vld [vmem:[%s21017_s19 + $0x588] sm:$0xff] }
  0x9b   : > { %11787 = vmatpush.bf16.msra.mxu1 %v19670_v26  ;;  %v3097_v26 = vld [vmem:[#allocation1 + $0x24] sm:$0xff] }
  0x9c   : > { %11813 = vmatpush.bf16.msra.mxu3 %v19686_v27  ;;  %v3099_v27 = vld [vmem:[#allocation1 + $0x36] sm:$0xff] }
  0x9d   : > { %11775 = vmatpush.bf16.msra.mxu0 %v19661_v28 }
  0x9e   : > { %11801 = vmatpush.bf16.msra.mxu2 %v19677_v29  ;;  %v3098_v29 = vld [vmem:[#allocation1 + $0x2d] sm:$0xff] }
  0x9f   : > { %11788 = vmatpush.bf16.msra.mxu1 %v19669_v30  ;;  %v3100_v30 = vld [vmem:[#allocation1 + $0x3f] sm:$0xff] }
  0xa0   : > { %11814 = vmatpush.bf16.msra.mxu3 %v19685_v31  ;;  %v348_v31 = vld [vmem:[%s21012_s15 + $0x18] sm:$0xff] }
  0xa1   : > { %11776 = vmatpush.bf16.msra.mxu0 %v19660_v32  ;;  %3102 = vst [vmem:[#allocation1] ss:$9 sm:$0xff] %v348_v31  ;;  %v19697_v32 = vld [vmem:[%s21017_s19 + $0x548] sm:$0xff]  ;;  %v19782_v31 = vld [vmem:[%s21017_s19 + $0x7f0] sm:$0xff] }
  0xa2   : > { %11802 = vmatpush.bf16.msra.mxu2 %v19676_v33  ;;  %v19713_v33 = vld [vmem:[%s21017_s19 + $0x5c8] sm:$0xff] }
  0xa3   : > { %11789 = vmatpush.bf16.msra.mxu1 %v19668_v34 }
  0xa4   : > { %11815 = vmatpush.bf16.msra.mxu3 %v19684_v35  ;;  %v19688_v35 = vld [vmem:[%s21017_s19 + $0x500] sm:$0xff] }
  0xa5   : > { %11777 = vmatpush.bf16.msra.mxu0 %v19659_v36  ;;  %v19704_v36 = vld [vmem:[%s21017_s19 + $0x580] sm:$0xff] }
  0xa6   : > { %11803 = vmatpush.bf16.msra.mxu2 %v19675_v37  ;;  %v19727_v37 = vld [vmem:[%s21017_s19 + $0x638] sm:$0xff] }
  0xa7   : > { %11790 = vmatpush.bf16.msra.mxu1 %v19667_v38  ;;  %v19743_v38 = vld [vmem:[%s21017_s19 + $0x6b8] sm:$0xff] }
  0xa8   : > { %11816 = vmatpush.bf16.msra.mxu3 %v19683_v39 }
  0xa9   : > { %11778 = vmatpush.bf16.msra.mxu0 %v19658_v40  ;;  %v19696_v40 = vld [vmem:[%s21017_s19 + $0x540] sm:$0xff] }
  0xaa   : > { %11804 = vmatpush.bf16.msra.mxu2 %v19674_v41  ;;  %v19712_v41 = vld [vmem:[%s21017_s19 + $0x5c0] sm:$0xff] }
  0xab   : > { %11791 = vmatpush.bf16.msra.mxu1 %v19666_v42  ;;  %v19735_v42 = vld [vmem:[%s21017_s19 + $0x678] sm:$0xff] }
  0xac   : > { %11817 = vmatpush.bf16.msra.mxu3 %v19682_v43  ;;  %v19751_v43 = vld [vmem:[%s21017_s19 + $0x6f8] sm:$0xff] }
  0xad   : > { %11779 = vmatpush.bf16.msra.mxu0 %v19657_v44  ;;  %v19726_v44 = vld [vmem:[%s21017_s19 + $0x630] sm:$0xff] }
  0xae   : > { %11805 = vmatpush.bf16.msra.mxu2 %v19673_v45  ;;  %v19742_v45 = vld [vmem:[%s21017_s19 + $0x6b0] sm:$0xff] }
  0xaf   : > { %11792 = vmatpush.bf16.msra.mxu1 %v19665_v46  ;;  %v19734_v46 = vld [vmem:[%s21017_s19 + $0x670] sm:$0xff] }
  0xb0   : > { %11818 = vmatpush.bf16.msra.mxu3 %v19681_v47  ;;  %v19750_v47 = vld [vmem:[%s21017_s19 + $0x6f0] sm:$0xff] }
  0xb1   : > { %11780 = vmatpush.bf16.msra.mxu0 %v19656_v48  ;;  %v11574_v6 = vpop.f32.mrf.mxu0  ;;  %v19725_v48 = vld [vmem:[%s21017_s19 + $0x628] sm:$0xff] }
  0xb2   : > { %11806 = vmatpush.bf16.msra.mxu2 %v19672_v49  ;;  %v19741_v49 = vld [vmem:[%s21017_s19 + $0x6a8] sm:$0xff] }
  0xb3   : > { %11793 = vmatpush.bf16.msra.mxu1 %v19664_v52  ;;  %v11587_v9 = vpop.f32.mrf.mxu1  ;;  %v19724_v52 = vld [vmem:[%s21017_s19 + $0x620] sm:$0xff] }
  0xb4   : > { %11819 = vmatpush.bf16.msra.mxu3 %v19680_v53  ;;  %11781 = vmatmul.bf16.vlgmr.msra.gmra.mxu0 %v3093_v55  ;;  %v11588_v12 = vadd.f32 %v11587_v9, %v11574_v6  ;;  %v19740_v53 = vld [vmem:[%s21017_s19 + $0x6a0] sm:$0xff] }
  0xb5   : > { %11825 = vmatpush.bf16.msrb.mxu0 %v19695_v50  ;;  %11807 = vmatmul.bf16.vlgmr.msra.gmra.mxu2 %v3095_v56  ;;  %v19733_v50 = vld [vmem:[%s21017_s19 + $0x668] sm:$0xff]  ;;  %v19732_v56 = vld [vmem:[%s21017_s19 + $0x660] sm:$0xff] }
  0xb6   : > { %11851 = vmatpush.bf16.msrb.mxu2 %v19711_v51  ;;  %11794 = vmatmul.bf16.vlgmr.msra.gmra.mxu1 %v3094_v58  ;;  %v19749_v51 = vld [vmem:[%s21017_s19 + $0x6e8] sm:$0xff] }
  0xb7   : > { %11838 = vmatpush.bf16.msrb.mxu1 %v19703_v54  ;;  %11820 = vmatmul.bf16.vlgmr.msra.gmra.mxu3 %v3096_v59 }
  0xb8   : > { %11864 = vmatpush.bf16.msrb.mxu3 %v19719_v57  ;;  %v11600_v15 = vpop.f32.mrf.mxu2  ;;  %v19748_v57 = vld [vmem:[%s21017_s19 + $0x6e0] sm:$0xff] }
  0xb9   : > { %11826 = vmatpush.bf16.msrb.mxu0 %v19694_v60  ;;  %v11601_v18 = vadd.f32 %v11600_v15, %v11588_v12  ;;  %v11576_v20 = vpop.f32.mrf.mxu0  ;;  %v19723_v60 = vld [vmem:[%s21017_s19 + $0x618] sm:$0xff]  ;;  %v19729_v12 = vld [vmem:[%s21017_s19 + $0x648] sm:$0xff]  ;;  %v19720_v15 = vld [vmem:[%s21017_s19 + $0x600] sm:$0xff] }
  0xba   : > { %11852 = vmatpush.bf16.msrb.mxu2 %v19710_v61  ;;  %v11613_v19 = vpop.f32.mrf.mxu3  ;;  %v19739_v61 = vld [vmem:[%s21017_s19 + $0x698] sm:$0xff]  ;;  %v19728_v20 = vld [vmem:[%s21017_s19 + $0x640] sm:$0xff] }
  0xbb   : > { %11839 = vmatpush.bf16.msrb.mxu1 %v19702_v62  ;;  %v11614_v24 = vadd.f32 %v11613_v19, %v11601_v18  ;;  %v11589_v28 = vpop.f32.mrf.mxu1  ;;  %v19731_v62 = vld [vmem:[%s21017_s19 + $0x658] sm:$0xff] }
  0xbc   : > { %11865 = vmatpush.bf16.msrb.mxu3 %v19718_v63  ;;  %v19747_v63 = vld [vmem:[%s21017_s19 + $0x6d8] sm:$0xff]  ;;  %v19758_v28 = vld [vmem:[%s21017_s19 + $0x730] sm:$0xff] }
  0xbd   : > { %11827 = vmatpush.bf16.msrb.mxu0 %v19693_v0  ;;  %v19759_v18 = vld [vmem:[%s21017_s19 + $0x738] sm:$0xff] }
  0xbe   : > { %11853 = vmatpush.bf16.msrb.mxu2 %v19709_v1  ;;  %v19775_v19 = vld [vmem:[%s21017_s19 + $0x7b8] sm:$0xff] }
  0xbf   : > { %11840 = vmatpush.bf16.msrb.mxu1 %v19701_v2  ;;  %v19722_v2 = vld [vmem:[%s21017_s19 + $0x610] sm:$0xff] }
  0xc0   : > { %11866 = vmatpush.bf16.msrb.mxu3 %v19717_v3  ;;  %v11602_v34 = vpop.f32.mrf.mxu2  ;;  %v19738_v3 = vld [vmem:[%s21017_s19 + $0x690] sm:$0xff] }
  0xc1   : > { %11828 = vmatpush.bf16.msrb.mxu0 %v19692_v4  ;;  %v19765_v34 = vld [vmem:[%s21017_s19 + $0x768] sm:$0xff] }
  0xc2   : > { %11854 = vmatpush.bf16.msrb.mxu2 %v19708_v5  ;;  %v11615_v39 = vpop.f32.mrf.mxu3 }
  0xc3   : > { %11841 = vmatpush.bf16.msrb.mxu1 %v19700_v7  ;;  %v19730_v7 = vld [vmem:[%s21017_s19 + $0x650] sm:$0xff]  ;;  %v19772_v39 = vld [vmem:[%s21017_s19 + $0x7a0] sm:$0xff] }
  0xc4   : > { %11867 = vmatpush.bf16.msrb.mxu3 %v19716_v8  ;;  %v19746_v8 = vld [vmem:[%s21017_s19 + $0x6d0] sm:$0xff] }
  0xc5   : > { %11829 = vmatpush.bf16.msrb.mxu0 %v19691_v10  ;;  %v19721_v10 = vld [vmem:[%s21017_s19 + $0x608] sm:$0xff] }
  0xc6   : > { %11855 = vmatpush.bf16.msrb.mxu2 %v19707_v11  ;;  %v19737_v11 = vld [vmem:[%s21017_s19 + $0x688] sm:$0xff] }
  0xc7   : > { %11842 = vmatpush.bf16.msrb.mxu1 %v19699_v13  ;;  %v19745_v13 = vld [vmem:[%s21017_s19 + $0x6c8] sm:$0xff] }
  0xc8   : > { %11868 = vmatpush.bf16.msrb.mxu3 %v19715_v14 }
  0xc9   : > { %11830 = vmatpush.bf16.msrb.mxu0 %v19690_v16  ;;  %v19736_v16 = vld [vmem:[%s21017_s19 + $0x680] sm:$0xff] }
  0xca   : > { %11856 = vmatpush.bf16.msrb.mxu2 %v19706_v17 }
  0xcb   : > { %11843 = vmatpush.bf16.msrb.mxu1 %v19698_v21  ;;  %v19744_v21 = vld [vmem:[%s21017_s19 + $0x6c0] sm:$0xff] }
  0xcc   : > { %11869 = vmatpush.bf16.msrb.mxu3 %v19714_v22  ;;  %v19767_v22 = vld [vmem:[%s21017_s19 + $0x778] sm:$0xff] }
  0xcd   : > { %11831 = vmatpush.bf16.msrb.mxu0 %v19689_v23  ;;  %v3103_v23 = vld [vmem:[#allocation1] sm:$0xff] }
  0xce   : > { %11857 = vmatpush.bf16.msrb.mxu2 %v19705_v25  ;;  %v19783_v25 = vld [vmem:[%s21017_s19 + $0x7f8] sm:$0xff] }
  0xcf   : > { %11844 = vmatpush.bf16.msrb.mxu1 %v19697_v32  ;;  %v19757_v32 = vld [vmem:[%s21017_s19 + $0x728] sm:$0xff] }
  0xd0   : > { %11870 = vmatpush.bf16.msrb.mxu3 %v19713_v33  ;;  %v19773_v33 = vld [vmem:[%s21017_s19 + $0x7a8] sm:$0xff] }
  0xd1   : > { %11832 = vmatpush.bf16.msrb.mxu0 %v19688_v35  ;;  %v11626_v54 = vpop.f32.mrf.mxu0  ;;  %v19781_v35 = vld [vmem:[%s21017_s19 + $0x7e8] sm:$0xff] }
  0xd2   : > { %11858 = vmatpush.bf16.msrb.mxu2 %v19704_v36  ;;  %v11627_v55 = vadd.f32 %v11626_v54, %v11614_v24  ;;  %v3105_v24 = vld [vmem:[#allocation1 + $0x12] sm:$0xff] }
  0xd3   : > { %11845 = vmatpush.bf16.msrb.mxu1 %v19696_v40  ;;  %v11639_v58 = vpop.f32.mrf.mxu1  ;;  %v19770_v54 = vld [vmem:[%s21017_s19 + $0x790] sm:$0xff] }
  0xd4   : > { %11871 = vmatpush.bf16.msrb.mxu3 %v19712_v41  ;;  %11833 = vmatmul.bf16.vlgmr.msrb.gmra.mxu0 %v3097_v26  ;;  %v11640_v59 = vadd.f32 %v11639_v58, %v11627_v55  ;;  %v3104_v26 = vld [vmem:[#allocation1 + $0x9] sm:$0xff] }
  0xd5   : > { %11877 = vmatpush.bf16.msra.mxu0 %v19727_v37  ;;  %11859 = vmatmul.bf16.vlgmr.msrb.gmra.mxu2 %v3099_v27  ;;  %v3106_v27 = vld [vmem:[#allocation1 + $0x1b] sm:$0xff]  ;;  %v19753_v58 = vld [vmem:[%s21017_s19 + $0x708] sm:$0xff] }
  0xd6   : > { %11903 = vmatpush.bf16.msra.mxu2 %v19743_v38  ;;  %11846 = vmatmul.bf16.vlgmr.msrb.gmra.mxu1 %v3098_v29  ;;  %v19774_v29 = vld [vmem:[%s21017_s19 + $0x7b0] sm:$0xff]  ;;  %v19756_v38 = vld [vmem:[%s21017_s19 + $0x720] sm:$0xff] }
  0xd7   : > { %11890 = vmatpush.bf16.msra.mxu1 %v19735_v42  ;;  %11872 = vmatmul.bf16.vlgmr.msrb.gmra.mxu3 %v3100_v30  ;;  %v19766_v30 = vld [vmem:[%s21017_s19 + $0x770] sm:$0xff]  ;;  %v19764_v42 = vld [vmem:[%s21017_s19 + $0x760] sm:$0xff] }
  0xd8   : > { %11916 = vmatpush.bf16.msra.mxu3 %v19751_v43  ;;  %v11652_v0 = vpop.f32.mrf.mxu2  ;;  %v19780_v43 = vld [vmem:[%s21017_s19 + $0x7e0] sm:$0xff] }
  0xd9   : > { %11878 = vmatpush.bf16.msra.mxu0 %v19726_v44  ;;  %v11653_v1 = vadd.f32 %v11652_v0, %v11640_v59  ;;  %v11628_v5 = vpop.f32.mrf.mxu0  ;;  %v19755_v44 = vld [vmem:[%s21017_s19 + $0x718] sm:$0xff]  ;;  %v19769_v59 = vld [vmem:[%s21017_s19 + $0x788] sm:$0xff] }
  0xda   : > { %11904 = vmatpush.bf16.msra.mxu2 %v19742_v45  ;;  %v11665_v4 = vpop.f32.mrf.mxu3  ;;  %v19771_v45 = vld [vmem:[%s21017_s19 + $0x798] sm:$0xff]  ;;  %v19752_v5 = vld [vmem:[%s21017_s19 + $0x700] sm:$0xff] }
  0xdb   : > { %11891 = vmatpush.bf16.msra.mxu1 %v19734_v46  ;;  %v11666_v6 = vadd.f32 %v11665_v4, %v11653_v1  ;;  %v11641_v9 = vpop.f32.mrf.mxu1  ;;  %v349_v1 = vld [vmem:[%s21012_s15 + $0x20] sm:$0xff] }
  0xdc   : > { %11917 = vmatpush.bf16.msra.mxu3 %v19750_v47  ;;  %v19760_v9 = vld [vmem:[%s21017_s19 + $0x740] sm:$0xff] }
  0xdd   : > { %11879 = vmatpush.bf16.msra.mxu0 %v19725_v48  ;;  %v19763_v48 = vld [vmem:[%s21017_s19 + $0x758] sm:$0xff] }
  0xde   : > { %11905 = vmatpush.bf16.msra.mxu2 %v19741_v49  ;;  %v19779_v49 = vld [vmem:[%s21017_s19 + $0x7d8] sm:$0xff] }
  0xdf   : > { %11892 = vmatpush.bf16.msra.mxu1 %v19733_v50 }
  0xe0   : > { %11918 = vmatpush.bf16.msra.mxu3 %v19749_v51  ;;  %v11654_v14 = vpop.f32.mrf.mxu2 }
  0xe1   : > { %11880 = vmatpush.bf16.msra.mxu0 %v19724_v52  ;;  %v19806_v14 = vld [vmem:[%s21017_s19 + $0x8b0] sm:$0xff] }
  0xe2   : > { %11906 = vmatpush.bf16.msra.mxu2 %v19740_v53  ;;  %v11667_v17 = vpop.f32.mrf.mxu3  ;;  %v19754_v53 = vld [vmem:[%s21017_s19 + $0x710] sm:$0xff] }
  0xe3   : > { %11893 = vmatpush.bf16.msra.mxu1 %v19732_v56  ;;  %v19762_v56 = vld [vmem:[%s21017_s19 + $0x750] sm:$0xff]  ;;  %v19789_v17 = vld [vmem:[%s21017_s19 + $0x828] sm:$0xff] }
  0xe4   : > { %11919 = vmatpush.bf16.msra.mxu3 %v19748_v57  ;;  %v19778_v57 = vld [vmem:[%s21017_s19 + $0x7d0] sm:$0xff] }
  0xe5   : > { %11881 = vmatpush.bf16.msra.mxu0 %v19723_v60  ;;  %v3107_v60 = vld [vmem:[#allocation1 + $0x24] sm:$0xff] }
  0xe6   : > { %11907 = vmatpush.bf16.msra.mxu2 %v19739_v61  ;;  %v3109_v61 = vld [vmem:[#allocation1 + $0x36] sm:$0xff] }
  0xe7   : > { %11894 = vmatpush.bf16.msra.mxu1 %v19731_v62  ;;  %v3108_v62 = vld [vmem:[#allocation1 + $0x2d] sm:$0xff] }
  0xe8   : > { %11920 = vmatpush.bf16.msra.mxu3 %v19747_v63  ;;  %v3110_v63 = vld [vmem:[#allocation1 + $0x3f] sm:$0xff] }
  0xe9   : > { %11882 = vmatpush.bf16.msra.mxu0 %v19722_v2  ;;  %3112 = vst [vmem:[#allocation1] ss:$9 sm:$0xff] %v349_v1  ;;  %v19761_v2 = vld [vmem:[%s21017_s19 + $0x748] sm:$0xff] }
  0xea   : > { %11908 = vmatpush.bf16.msra.mxu2 %v19738_v3  ;;  %v19777_v3 = vld [vmem:[%s21017_s19 + $0x7c8] sm:$0xff] }
  0xeb   : > { %11895 = vmatpush.bf16.msra.mxu1 %v19730_v7  ;;  %v19791_v7 = vld [vmem:[%s21017_s19 + $0x838] sm:$0xff]  ;;  %v19821_v1 = vld [vmem:[%s21017_s19 + $0x928] sm:$0xff] }
  0xec   : > { %11921 = vmatpush.bf16.msra.mxu3 %v19746_v8  ;;  %v19807_v8 = vld [vmem:[%s21017_s19 + $0x8b8] sm:$0xff] }
  0xed   : > { %11883 = vmatpush.bf16.msra.mxu0 %v19721_v10  ;;  %v19776_v10 = vld [vmem:[%s21017_s19 + $0x7c0] sm:$0xff] }
  0xee   : > { %11909 = vmatpush.bf16.msra.mxu2 %v19737_v11  ;;  %v19799_v11 = vld [vmem:[%s21017_s19 + $0x878] sm:$0xff] }
  0xef   : > { %11896 = vmatpush.bf16.msra.mxu1 %v19729_v12  ;;  %v19815_v12 = vld [vmem:[%s21017_s19 + $0x8f8] sm:$0xff] }
  0xf0   : > { %11922 = vmatpush.bf16.msra.mxu3 %v19745_v13  ;;  %v19790_v13 = vld [vmem:[%s21017_s19 + $0x830] sm:$0xff] }
  0xf1   : > { %11884 = vmatpush.bf16.msra.mxu0 %v19720_v15  ;;  %v11678_v36 = vpop.f32.mrf.mxu0  ;;  %v19798_v15 = vld [vmem:[%s21017_s19 + $0x870] sm:$0xff] }
  0xf2   : > { %11910 = vmatpush.bf16.msra.mxu2 %v19736_v16  ;;  %v11679_v37 = vadd.f32 %v11678_v36, %v11666_v6  ;;  %v19768_v6 = vld [vmem:[%s21017_s19 + $0x780] sm:$0xff]  ;;  %v19814_v16 = vld [vmem:[%s21017_s19 + $0x8f0] sm:$0xff] }
  0xf3   : > { %11897 = vmatpush.bf16.msra.mxu1 %v19728_v20  ;;  %v11691_v40 = vpop.f32.mrf.mxu1  ;;  %v19813_v20 = vld [vmem:[%s21017_s19 + $0x8e8] sm:$0xff] }
  0xf4   : > { %11923 = vmatpush.bf16.msra.mxu3 %v19744_v21  ;;  %11885 = vmatmul.bf16.vlgmr.msra.gmra.mxu0 %v3103_v23  ;;  %v11692_v41 = vadd.f32 %v11691_v40, %v11679_v37  ;;  %v19788_v23 = vld [vmem:[%s21017_s19 + $0x820] sm:$0xff] }
  0xf5   : > { %11929 = vmatpush.bf16.msrb.mxu0 %v19759_v18  ;;  %11911 = vmatmul.bf16.vlgmr.msra.gmra.mxu2 %v3105_v24  ;;  %v19805_v18 = vld [vmem:[%s21017_s19 + $0x8a8] sm:$0xff]  ;;  %v19804_v24 = vld [vmem:[%s21017_s19 + $0x8a0] sm:$0xff] }
  0xf6   : > { %11955 = vmatpush.bf16.msrb.mxu2 %v19775_v19  ;;  %11898 = vmatmul.bf16.vlgmr.msra.gmra.mxu1 %v3104_v26  ;;  %v19797_v19 = vld [vmem:[%s21017_s19 + $0x868] sm:$0xff] }
  0xf7   : > { %11942 = vmatpush.bf16.msrb.mxu1 %v19767_v22  ;;  %11924 = vmatmul.bf16.vlgmr.msra.gmra.mxu3 %v3106_v27  ;;  %v19796_v27 = vld [vmem:[%s21017_s19 + $0x860] sm:$0xff] }
  0xf8   : > { %11968 = vmatpush.bf16.msrb.mxu3 %v19783_v25  ;;  %v11704_v46 = vpop.f32.mrf.mxu2 }
  0xf9   : > { %11930 = vmatpush.bf16.msrb.mxu0 %v19758_v28  ;;  %v11705_v47 = vadd.f32 %v11704_v46, %v11692_v41  ;;  %v11680_v51 = vpop.f32.mrf.mxu0  ;;  %v19812_v28 = vld [vmem:[%s21017_s19 + $0x8e0] sm:$0xff]  ;;  %v19794_v41 = vld [vmem:[%s21017_s19 + $0x850] sm:$0xff]  ;;  %v19793_v46 = vld [vmem:[%s21017_s19 + $0x848] sm:$0xff] }
  0xfa   : > { %11956 = vmatpush.bf16.msrb.mxu2 %v19774_v29  ;;  %v11717_v50 = vpop.f32.mrf.mxu3  ;;  %v19787_v29 = vld [vmem:[%s21017_s19 + $0x818] sm:$0xff] }
  0xfb   : > { %11943 = vmatpush.bf16.msrb.mxu1 %v19766_v30  ;;  %v21268_v52 = vadd.f32 %v11717_v50, %v11705_v47  ;;  %v11693_v55 = vpop.f32.mrf.mxu1  ;;  %v19803_v30 = vld [vmem:[%s21017_s19 + $0x898] sm:$0xff]  ;;  %v19809_v47 = vld [vmem:[%s21017_s19 + $0x8c8] sm:$0xff]  ;;  %v19800_v50 = vld [vmem:[%s21017_s19 + $0x880] sm:$0xff] }
  0xfc   : > { %11969 = vmatpush.bf16.msrb.mxu3 %v19782_v31  ;;  %v19823_v51 = vld [vmem:[%s21017_s19 + $0x938] sm:$0xff] }
  0xfd   : > { %11931 = vmatpush.bf16.msrb.mxu0 %v19757_v32  ;;  %v19831_v55 = vld [vmem:[%s21017_s19 + $0x978] sm:$0xff] }
  0xfe   : > { %11957 = vmatpush.bf16.msrb.mxu2 %v19773_v33  ;;  %v19795_v33 = vld [vmem:[%s21017_s19 + $0x858] sm:$0xff] }
  0xff   : > { %11944 = vmatpush.bf16.msrb.mxu1 %v19765_v34  ;;  %v19811_v34 = vld [vmem:[%s21017_s19 + $0x8d8] sm:$0xff] }
 0x100   : > { %11970 = vmatpush.bf16.msrb.mxu3 %v19781_v35  ;;  %v11706_v0 = vpop.f32.mrf.mxu2 }
 0x101   : > { %11932 = vmatpush.bf16.msrb.mxu0 %v19756_v38  ;;  %v19786_v38 = vld [vmem:[%s21017_s19 + $0x810] sm:$0xff] }
 0x102   : > { %11958 = vmatpush.bf16.msrb.mxu2 %v19772_v39  ;;  %v11719_v4 = vpop.f32.mrf.mxu3  ;;  %v19802_v39 = vld [vmem:[%s21017_s19 + $0x890] sm:$0xff] }
 0x103   : > { %11945 = vmatpush.bf16.msrb.mxu1 %v19764_v42  ;;  %v19810_v42 = vld [vmem:[%s21017_s19 + $0x8d0] sm:$0xff]  ;;  %v19845_v4 = vld [vmem:[%s21017_s19 + $0x9e8] sm:$0xff] }
 0x104   : > { %11971 = vmatpush.bf16.msrb.mxu3 %v19780_v43  ;;  %v19785_v43 = vld [vmem:[%s21017_s19 + $0x808] sm:$0xff]  ;;  %v19846_v0 = vld [vmem:[%s21017_s19 + $0x9f0] sm:$0xff] }
 0x105   : > { %11933 = vmatpush.bf16.msrb.mxu0 %v19755_v44  ;;  %v19801_v44 = vld [vmem:[%s21017_s19 + $0x888] sm:$0xff] }
 0x106   : > { %11959 = vmatpush.bf16.msrb.mxu2 %v19771_v45 }
 0x107   : > { %11946 = vmatpush.bf16.msrb.mxu1 %v19763_v48 }
 0x108   : > { %11972 = vmatpush.bf16.msrb.mxu3 %v19779_v49  ;;  %v19784_v49 = vld [vmem:[%s21017_s19 + $0x800] sm:$0xff] }
 0x109   : > { %11934 = vmatpush.bf16.msrb.mxu0 %v19754_v53  ;;  %v19792_v53 = vld [vmem:[%s21017_s19 + $0x840] sm:$0xff] }
 0x10a   : > { %11960 = vmatpush.bf16.msrb.mxu2 %v19770_v54  ;;  %v19808_v54 = vld [vmem:[%s21017_s19 + $0x8c0] sm:$0xff] }
 0x10b   : > { %11947 = vmatpush.bf16.msrb.mxu1 %v19762_v56  ;;  %v3113_v56 = vld [vmem:[#allocation1] sm:$0xff] }
 0x10c   : > { %11973 = vmatpush.bf16.msrb.mxu3 %v19778_v57  ;;  %v3115_v57 = vld [vmem:[#allocation1 + $0x12] sm:$0xff] }
 0x10d   : > { %11935 = vmatpush.bf16.msrb.mxu0 %v19753_v58  ;;  %v19847_v58 = vld [vmem:[%s21017_s19 + $0x9f8] sm:$0xff] }
 0x10e   : > { %11961 = vmatpush.bf16.msrb.mxu2 %v19769_v59  ;;  %v3114_v59 = vld [vmem:[#allocation1 + $0x9] sm:$0xff] }
 0x10f   : > { %11948 = vmatpush.bf16.msrb.mxu1 %v19761_v2  ;;  %v19837_v2 = vld [vmem:[%s21017_s19 + $0x9a8] sm:$0xff] }
 0x110   : > { %11974 = vmatpush.bf16.msrb.mxu3 %v19777_v3  ;;  %v19829_v3 = vld [vmem:[%s21017_s19 + $0x968] sm:$0xff] }
 0x111   : > { %11936 = vmatpush.bf16.msrb.mxu0 %v19752_v5  ;;  %v11730_v21 = vpop.f32.mrf.mxu0 }
 0x112   : > { %11962 = vmatpush.bf16.msrb.mxu2 %v19768_v6  ;;  %v11731_v22 = vadd.f32 %v11730_v21, %v21268_v52  ;;  %v19839_v52 = vld [vmem:[%s21017_s19 + $0x9b8] sm:$0xff] }
 0x113   : > { %11949 = vmatpush.bf16.msrb.mxu1 %v19760_v9  ;;  %v11743_v25 = vpop.f32.mrf.mxu1 }
 0x114   : > { %11975 = vmatpush.bf16.msrb.mxu3 %v19776_v10  ;;  %11937 = vmatmul.bf16.vlgmr.msrb.gmra.mxu0 %v3107_v60  ;;  %v11744_v26 = vadd.f32 %v11743_v25, %v11731_v22  ;;  %v3116_v60 = vld [vmem:[#allocation1 + $0x1b] sm:$0xff]  ;;  %v19818_v22 = vld [vmem:[%s21017_s19 + $0x910] sm:$0xff] }
 0x115   : > { %11981 = vmatpush.bf16.msra.mxu0 %v19791_v7  ;;  %11963 = vmatmul.bf16.vlgmr.msrb.gmra.mxu2 %v3109_v61  ;;  %v19822_v61 = vld [vmem:[%s21017_s19 + $0x930] sm:$0xff]  ;;  %v19820_v7 = vld [vmem:[%s21017_s19 + $0x920] sm:$0xff] }
 0x116   : > { %12007 = vmatpush.bf16.msra.mxu2 %v19807_v8  ;;  %11950 = vmatmul.bf16.vlgmr.msrb.gmra.mxu1 %v3108_v62  ;;  %v19838_v62 = vld [vmem:[%s21017_s19 + $0x9b0] sm:$0xff]  ;;  %v19836_v8 = vld [vmem:[%s21017_s19 + $0x9a0] sm:$0xff] }
 0x117   : > { %11994 = vmatpush.bf16.msra.mxu1 %v19799_v11  ;;  %11976 = vmatmul.bf16.vlgmr.msrb.gmra.mxu3 %v3110_v63  ;;  %v19830_v63 = vld [vmem:[%s21017_s19 + $0x970] sm:$0xff]  ;;  %v19828_v11 = vld [vmem:[%s21017_s19 + $0x960] sm:$0xff] }
 0x118   : > { %12020 = vmatpush.bf16.msra.mxu3 %v19815_v12  ;;  %v11756_v31 = vpop.f32.mrf.mxu2  ;;  %v19844_v12 = vld [vmem:[%s21017_s19 + $0x9e0] sm:$0xff]  ;;  %v19826_v25 = vld [vmem:[%s21017_s19 + $0x950] sm:$0xff] }
 0x119   : > { %11982 = vmatpush.bf16.msra.mxu0 %v19790_v13  ;;  %v11757_v32 = vadd.f32 %v11756_v31, %v11744_v26  ;;  %v11732_v36 = vpop.f32.mrf.mxu0  ;;  %v19819_v13 = vld [vmem:[%s21017_s19 + $0x918] sm:$0xff]  ;;  %v19842_v26 = vld [vmem:[%s21017_s19 + $0x9d0] sm:$0xff] }
 0x11a   : > { %12008 = vmatpush.bf16.msra.mxu2 %v19806_v14  ;;  %v11769_v35 = vpop.f32.mrf.mxu3  ;;  %v19835_v14 = vld [vmem:[%s21017_s19 + $0x998] sm:$0xff]  ;;  %v3118_v31 = vld [vmem:[#allocation1 + $0x2d] sm:$0xff] }
 0x11b   : > { %11995 = vmatpush.bf16.msra.mxu1 %v19798_v15  ;;  %v11770_v37 = vadd.f32 %v11769_v35, %v11757_v32  ;;  %v11745_v40 = vpop.f32.mrf.mxu1  ;;  %v3120_v32 = vld [vmem:[#allocation1 + $0x3f] sm:$0xff]  ;;  %v19825_v35 = vld [vmem:[%s21017_s19 + $0x948] sm:$0xff] }
 0x11c   : > { %12021 = vmatpush.bf16.msra.mxu3 %v19814_v16  ;;  %v19841_v36 = vld [vmem:[%s21017_s19 + $0x9c8] sm:$0xff]  ;;  %v19855_v40 = vld [vmem:[%s21017_s19 + $0xa38] sm:$0xff] }
 0x11d   : > { %11983 = vmatpush.bf16.msra.mxu0 %v19789_v17  ;;  %v19827_v17 = vld [vmem:[%s21017_s19 + $0x958] sm:$0xff] }
 0x11e   : > { %12009 = vmatpush.bf16.msra.mxu2 %v19805_v18  ;;  %v19843_v18 = vld [vmem:[%s21017_s19 + $0x9d8] sm:$0xff] }
 0x11f   : > { %11996 = vmatpush.bf16.msra.mxu1 %v19797_v19 }
 0x120   : > { %12022 = vmatpush.bf16.msra.mxu3 %v19813_v20  ;;  %v11758_v45 = vpop.f32.mrf.mxu2 }
 0x121   : > { %11984 = vmatpush.bf16.msra.mxu0 %v19788_v23  ;;  %v19834_v23 = vld [vmem:[%s21017_s19 + $0x990] sm:$0xff]  ;;  %v19879_v45 = vld [vmem:[%s21017_s19 + $0xaf8] sm:$0xff] }
 0x122   : > { %12010 = vmatpush.bf16.msra.mxu2 %v19804_v24  ;;  %v11771_v48 = vpop.f32.mrf.mxu3 }
 0x123   : > { %11997 = vmatpush.bf16.msra.mxu1 %v19796_v27  ;;  %v19817_v27 = vld [vmem:[%s21017_s19 + $0x908] sm:$0xff]  ;;  %v19862_v48 = vld [vmem:[%s21017_s19 + $0xa70] sm:$0xff] }
 0x124   : > { %12023 = vmatpush.bf16.msra.mxu3 %v19812_v28  ;;  %v19833_v28 = vld [vmem:[%s21017_s19 + $0x988] sm:$0xff] }
 0x125   : > { %11985 = vmatpush.bf16.msra.mxu0 %v19787_v29  ;;  %v3117_v29 = vld [vmem:[#allocation1 + $0x24] sm:$0xff] }
 0x126   : > { %12011 = vmatpush.bf16.msra.mxu2 %v19803_v30  ;;  %v3119_v30 = vld [vmem:[#allocation1 + $0x36] sm:$0xff] }
 0x127   : > { %11998 = vmatpush.bf16.msra.mxu1 %v19795_v33 }
 0x128   : > { %12024 = vmatpush.bf16.msra.mxu3 %v19811_v34  ;;  %v350_v34 = vld [vmem:[%s21012_s15 + $0x28] sm:$0xff] }
 0x129   : > { %11986 = vmatpush.bf16.msra.mxu0 %v19786_v38  ;;  %3122 = vst [vmem:[#allocation1] ss:$9 sm:$0xff] %v350_v34  ;;  %v19816_v38 = vld [vmem:[%s21017_s19 + $0x900] sm:$0xff]  ;;  %v19885_v34 = vld [vmem:[%s21017_s19 + $0xb28] sm:$0xff] }
 0x12a   : > { %12012 = vmatpush.bf16.msra.mxu2 %v19802_v39  ;;  %v19832_v39 = vld [vmem:[%s21017_s19 + $0x980] sm:$0xff] }
 0x12b   : > { %11999 = vmatpush.bf16.msra.mxu1 %v19794_v41  ;;  %v19871_v41 = vld [vmem:[%s21017_s19 + $0xab8] sm:$0xff] }
 0x12c   : > { %12025 = vmatpush.bf16.msra.mxu3 %v19810_v42  ;;  %v19824_v42 = vld [vmem:[%s21017_s19 + $0x940] sm:$0xff] }
 0x12d   : > { %11987 = vmatpush.bf16.msra.mxu0 %v19785_v43  ;;  %v19840_v43 = vld [vmem:[%s21017_s19 + $0x9c0] sm:$0xff] }
 0x12e   : > { %12013 = vmatpush.bf16.msra.mxu2 %v19801_v44  ;;  %v19863_v44 = vld [vmem:[%s21017_s19 + $0xa78] sm:$0xff] }
 0x12f   : > { %12000 = vmatpush.bf16.msra.mxu1 %v19793_v46  ;;  %v19854_v46 = vld [vmem:[%s21017_s19 + $0xa30] sm:$0xff] }
 0x130   : > { %12026 = vmatpush.bf16.msra.mxu3 %v19809_v47  ;;  %v19870_v47 = vld [vmem:[%s21017_s19 + $0xab0] sm:$0xff] }
 0x131   : > { %11988 = vmatpush.bf16.msra.mxu0 %v19784_v49  ;;  %v11782_v5 = vpop.f32.mrf.mxu0  ;;  %v19878_v49 = vld [vmem:[%s21017_s19 + $0xaf0] sm:$0xff] }
 0x132   : > { %12014 = vmatpush.bf16.msra.mxu2 %v19800_v50  ;;  %v11783_v6 = vadd.f32 %v11782_v5, %v11770_v37  ;;  %v19853_v50 = vld [vmem:[%s21017_s19 + $0xa28] sm:$0xff] }
 0x133   : > { %12001 = vmatpush.bf16.msra.mxu1 %v19792_v53  ;;  %v11795_v9 = vpop.f32.mrf.mxu1  ;;  %v19877_v53 = vld [vmem:[%s21017_s19 + $0xae8] sm:$0xff] }
 0x134   : > { %12027 = vmatpush.bf16.msra.mxu3 %v19808_v54  ;;  %11989 = vmatmul.bf16.vlgmr.msra.gmra.mxu0 %v3113_v56  ;;  %v11796_v10 = vadd.f32 %v11795_v9, %v11783_v6  ;;  %v19852_v56 = vld [vmem:[%s21017_s19 + $0xa20] sm:$0xff] }
 0x135   : > { %12033 = vmatpush.bf16.msrb.mxu0 %v19823_v51  ;;  %12015 = vmatmul.bf16.vlgmr.msra.gmra.mxu2 %v3115_v57  ;;  %v19869_v51 = vld [vmem:[%s21017_s19 + $0xaa8] sm:$0xff]  ;;  %v19868_v57 = vld [vmem:[%s21017_s19 + $0xaa0] sm:$0xff] }
 0x136   : > { %12059 = vmatpush.bf16.msrb.mxu2 %v19839_v52  ;;  %12002 = vmatmul.bf16.vlgmr.msra.gmra.mxu1 %v3114_v59  ;;  %v19861_v52 = vld [vmem:[%s21017_s19 + $0xa68] sm:$0xff] }
 0x137   : > { %12046 = vmatpush.bf16.msrb.mxu1 %v19831_v55  ;;  %12028 = vmatmul.bf16.vlgmr.msra.gmra.mxu3 %v3116_v60  ;;  %v19860_v60 = vld [vmem:[%s21017_s19 + $0xa60] sm:$0xff] }
 0x138   : > { %12072 = vmatpush.bf16.msrb.mxu3 %v19847_v58  ;;  %v11808_v15 = vpop.f32.mrf.mxu2 }
 0x139   : > { %12034 = vmatpush.bf16.msrb.mxu0 %v19822_v61  ;;  %v11809_v16 = vadd.f32 %v11808_v15, %v11796_v10  ;;  %v11784_v20 = vpop.f32.mrf.mxu0  ;;  %v19876_v61 = vld [vmem:[%s21017_s19 + $0xae0] sm:$0xff]  ;;  %v19858_v10 = vld [vmem:[%s21017_s19 + $0xa50] sm:$0xff]  ;;  %v19857_v15 = vld [vmem:[%s21017_s19 + $0xa48] sm:$0xff] }
 0x13a   : > { %12060 = vmatpush.bf16.msrb.mxu2 %v19838_v62  ;;  %v11821_v19 = vpop.f32.mrf.mxu3  ;;  %v19851_v62 = vld [vmem:[%s21017_s19 + $0xa18] sm:$0xff] }
 0x13b   : > { %12047 = vmatpush.bf16.msrb.mxu1 %v19830_v63  ;;  %v21336_v21 = vadd.f32 %v11821_v19, %v11809_v16  ;;  %v11797_v24 = vpop.f32.mrf.mxu1  ;;  %v19867_v63 = vld [vmem:[%s21017_s19 + $0xa98] sm:$0xff]  ;;  %v19873_v16 = vld [vmem:[%s21017_s19 + $0xac8] sm:$0xff]  ;;  %v19864_v19 = vld [vmem:[%s21017_s19 + $0xa80] sm:$0xff] }
 0x13c   : > { %12073 = vmatpush.bf16.msrb.mxu3 %v19846_v0  ;;  %v19887_v20 = vld [vmem:[%s21017_s19 + $0xb38] sm:$0xff] }
 0x13d   : > { %12035 = vmatpush.bf16.msrb.mxu0 %v19821_v1  ;;  %v19895_v24 = vld [vmem:[%s21017_s19 + $0xb78] sm:$0xff] }
 0x13e   : > { %12061 = vmatpush.bf16.msrb.mxu2 %v19837_v2  ;;  %v19859_v2 = vld [vmem:[%s21017_s19 + $0xa58] sm:$0xff] }
 0x13f   : > { %12048 = vmatpush.bf16.msrb.mxu1 %v19829_v3  ;;  %v19875_v3 = vld [vmem:[%s21017_s19 + $0xad8] sm:$0xff] }
 0x140   : > { %12074 = vmatpush.bf16.msrb.mxu3 %v19845_v4  ;;  %v11810_v33 = vpop.f32.mrf.mxu2 }
 0x141   : > { %12036 = vmatpush.bf16.msrb.mxu0 %v19820_v7  ;;  %v19850_v7 = vld [vmem:[%s21017_s19 + $0xa10] sm:$0xff] }
 0x142   : > { %12062 = vmatpush.bf16.msrb.mxu2 %v19836_v8  ;;  %v11823_v37 = vpop.f32.mrf.mxu3  ;;  %v19866_v8 = vld [vmem:[%s21017_s19 + $0xa90] sm:$0xff] }
 0x143   : > { %12049 = vmatpush.bf16.msrb.mxu1 %v19828_v11  ;;  %v19874_v11 = vld [vmem:[%s21017_s19 + $0xad0] sm:$0xff]  ;;  %v19909_v37 = vld [vmem:[%s21017_s19 + $0xbe8] sm:$0xff] }
 0x144   : > { %12075 = vmatpush.bf16.msrb.mxu3 %v19844_v12  ;;  %v19849_v12 = vld [vmem:[%s21017_s19 + $0xa08] sm:$0xff]  ;;  %v19910_v33 = vld [vmem:[%s21017_s19 + $0xbf0] sm:$0xff] }
 0x145   : > { %12037 = vmatpush.bf16.msrb.mxu0 %v19819_v13  ;;  %v19865_v13 = vld [vmem:[%s21017_s19 + $0xa88] sm:$0xff] }
 0x146   : > { %12063 = vmatpush.bf16.msrb.mxu2 %v19835_v14 }
 0x147   : > { %12050 = vmatpush.bf16.msrb.mxu1 %v19827_v17 }
 0x148   : > { %12076 = vmatpush.bf16.msrb.mxu3 %v19843_v18  ;;  %v19848_v18 = vld [vmem:[%s21017_s19 + $0xa00] sm:$0xff] }
 0x149   : > { %12038 = vmatpush.bf16.msrb.mxu0 %v19818_v22  ;;  %v19856_v22 = vld [vmem:[%s21017_s19 + $0xa40] sm:$0xff] }
 0x14a   : > { %12064 = vmatpush.bf16.msrb.mxu2 %v19834_v23  ;;  %v19872_v23 = vld [vmem:[%s21017_s19 + $0xac0] sm:$0xff] }
 0x14b   : > { %12051 = vmatpush.bf16.msrb.mxu1 %v19826_v25  ;;  %v3123_v25 = vld [vmem:[#allocation1] sm:$0xff] }
 0x14c   : > { %12077 = vmatpush.bf16.msrb.mxu3 %v19842_v26  ;;  %v3125_v26 = vld [vmem:[#allocation1 + $0x12] sm:$0xff] }
 0x14d   : > { %12039 = vmatpush.bf16.msrb.mxu0 %v19817_v27  ;;  %v19911_v27 = vld [vmem:[%s21017_s19 + $0xbf8] sm:$0xff] }
 0x14e   : > { %12065 = vmatpush.bf16.msrb.mxu2 %v19833_v28  ;;  %v3124_v28 = vld [vmem:[#allocation1 + $0x9] sm:$0xff] }
 0x14f   : > { %12052 = vmatpush.bf16.msrb.mxu1 %v19825_v35  ;;  %v19901_v35 = vld [vmem:[%s21017_s19 + $0xba8] sm:$0xff] }
 0x150   : > { %12078 = vmatpush.bf16.msrb.mxu3 %v19841_v36  ;;  %v19893_v36 = vld [vmem:[%s21017_s19 + $0xb68] sm:$0xff] }
 0x151   : > { %12040 = vmatpush.bf16.msrb.mxu0 %v19816_v38  ;;  %v11834_v54 = vpop.f32.mrf.mxu0 }
 0x152   : > { %12066 = vmatpush.bf16.msrb.mxu2 %v19832_v39  ;;  %v11835_v55 = vadd.f32 %v11834_v54, %v21336_v21  ;;  %v19903_v21 = vld [vmem:[%s21017_s19 + $0xbb8] sm:$0xff] }
 0x153   : > { %12053 = vmatpush.bf16.msrb.mxu1 %v19824_v42  ;;  %v11847_v58 = vpop.f32.mrf.mxu1 }
 0x154   : > { %12079 = vmatpush.bf16.msrb.mxu3 %v19840_v43  ;;  %12041 = vmatmul.bf16.vlgmr.msrb.gmra.mxu0 %v3117_v29  ;;  %v11848_v59 = vadd.f32 %v11847_v58, %v11835_v55  ;;  %v3126_v29 = vld [vmem:[#allocation1 + $0x1b] sm:$0xff]  ;;  %v19882_v55 = vld [vmem:[%s21017_s19 + $0xb10] sm:$0xff] }
 0x155   : > { %12085 = vmatpush.bf16.msra.mxu0 %v19855_v40  ;;  %12067 = vmatmul.bf16.vlgmr.msrb.gmra.mxu2 %v3119_v30  ;;  %v19886_v30 = vld [vmem:[%s21017_s19 + $0xb30] sm:$0xff]  ;;  %v19884_v40 = vld [vmem:[%s21017_s19 + $0xb20] sm:$0xff] }
 0x156   : > { %12111 = vmatpush.bf16.msra.mxu2 %v19871_v41  ;;  %12054 = vmatmul.bf16.vlgmr.msrb.gmra.mxu1 %v3118_v31  ;;  %v19902_v31 = vld [vmem:[%s21017_s19 + $0xbb0] sm:$0xff]  ;;  %v19900_v41 = vld [vmem:[%s21017_s19 + $0xba0] sm:$0xff] }
 0x157   : > { %12098 = vmatpush.bf16.msra.mxu1 %v19863_v44  ;;  %12080 = vmatmul.bf16.vlgmr.msrb.gmra.mxu3 %v3120_v32  ;;  %v19894_v32 = vld [vmem:[%s21017_s19 + $0xb70] sm:$0xff]  ;;  %v19892_v44 = vld [vmem:[%s21017_s19 + $0xb60] sm:$0xff] }
 0x158   : > { %12124 = vmatpush.bf16.msra.mxu3 %v19879_v45  ;;  %v11860_v0 = vpop.f32.mrf.mxu2  ;;  %v19908_v45 = vld [vmem:[%s21017_s19 + $0xbe0] sm:$0xff]  ;;  %v19890_v58 = vld [vmem:[%s21017_s19 + $0xb50] sm:$0xff] }
 0x159   : > { %12086 = vmatpush.bf16.msra.mxu0 %v19854_v46  ;;  %v11861_v1 = vadd.f32 %v11860_v0, %v11848_v59  ;;  %v11836_v5 = vpop.f32.mrf.mxu0  ;;  %v19883_v46 = vld [vmem:[%s21017_s19 + $0xb18] sm:$0xff]  ;;  %v19906_v59 = vld [vmem:[%s21017_s19 + $0xbd0] sm:$0xff] }
 0x15a   : > { %12112 = vmatpush.bf16.msra.mxu2 %v19870_v47  ;;  %v11873_v4 = vpop.f32.mrf.mxu3  ;;  %v19899_v47 = vld [vmem:[%s21017_s19 + $0xb98] sm:$0xff]  ;;  %v3128_v0 = vld [vmem:[#allocation1 + $0x2d] sm:$0xff] }
 0x15b   : > { %12099 = vmatpush.bf16.msra.mxu1 %v19862_v48  ;;  %v11874_v6 = vadd.f32 %v11873_v4, %v11861_v1  ;;  %v11849_v9 = vpop.f32.mrf.mxu1  ;;  %v3130_v1 = vld [vmem:[#allocation1 + $0x3f] sm:$0xff]  ;;  %v19889_v4 = vld [vmem:[%s21017_s19 + $0xb48] sm:$0xff] }
 0x15c   : > { %12125 = vmatpush.bf16.msra.mxu3 %v19878_v49  ;;  %v19905_v5 = vld [vmem:[%s21017_s19 + $0xbc8] sm:$0xff]  ;;  %v19919_v9 = vld [vmem:[%s21017_s19 + $0xc38] sm:$0xff] }
 0x15d   : > { %12087 = vmatpush.bf16.msra.mxu0 %v19853_v50  ;;  %v19891_v50 = vld [vmem:[%s21017_s19 + $0xb58] sm:$0xff] }
 0x15e   : > { %12113 = vmatpush.bf16.msra.mxu2 %v19869_v51  ;;  %v19907_v51 = vld [vmem:[%s21017_s19 + $0xbd8] sm:$0xff] }
 0x15f   : > { %12100 = vmatpush.bf16.msra.mxu1 %v19861_v52 }
 0x160   : > { %12126 = vmatpush.bf16.msra.mxu3 %v19877_v53  ;;  %v11862_v14 = vpop.f32.mrf.mxu2 }
 0x161   : > { %12088 = vmatpush.bf16.msra.mxu0 %v19852_v56  ;;  %v19898_v56 = vld [vmem:[%s21017_s19 + $0xb90] sm:$0xff]  ;;  %v19943_v14 = vld [vmem:[%s21017_s19 + $0xcf8] sm:$0xff] }
 0x162   : > { %12114 = vmatpush.bf16.msra.mxu2 %v19868_v57  ;;  %v11875_v17 = vpop.f32.mrf.mxu3 }
 0x163   : > { %12101 = vmatpush.bf16.msra.mxu1 %v19860_v60  ;;  %v19881_v60 = vld [vmem:[%s21017_s19 + $0xb08] sm:$0xff]  ;;  %v19926_v17 = vld [vmem:[%s21017_s19 + $0xc70] sm:$0xff] }
 0x164   : > { %12127 = vmatpush.bf16.msra.mxu3 %v19876_v61  ;;  %v19897_v61 = vld [vmem:[%s21017_s19 + $0xb88] sm:$0xff] }
 0x165   : > { %12089 = vmatpush.bf16.msra.mxu0 %v19851_v62  ;;  %v3127_v62 = vld [vmem:[#allocation1 + $0x24] sm:$0xff] }
 0x166   : > { %12115 = vmatpush.bf16.msra.mxu2 %v19867_v63  ;;  %v3129_v63 = vld [vmem:[#allocation1 + $0x36] sm:$0xff] }
 0x167   : > { %12102 = vmatpush.bf16.msra.mxu1 %v19859_v2 }
 0x168   : > { %12128 = vmatpush.bf16.msra.mxu3 %v19875_v3  ;;  %v351_v3 = vld [vmem:[%s21012_s15 + $0x30] sm:$0xff] }
 0x169   : > { %12090 = vmatpush.bf16.msra.mxu0 %v19850_v7  ;;  %3132 = vst [vmem:[#allocation1] ss:$9 sm:$0xff] %v351_v3  ;;  %v19880_v7 = vld [vmem:[%s21017_s19 + $0xb00] sm:$0xff]  ;;  %v19949_v3 = vld [vmem:[%s21017_s19 + $0xd28] sm:$0xff] }
 0x16a   : > { %12116 = vmatpush.bf16.msra.mxu2 %v19866_v8  ;;  %v19896_v8 = vld [vmem:[%s21017_s19 + $0xb80] sm:$0xff] }
 0x16b   : > { %12103 = vmatpush.bf16.msra.mxu1 %v19858_v10  ;;  %v19935_v10 = vld [vmem:[%s21017_s19 + $0xcb8] sm:$0xff] }
 0x16c   : > { %12129 = vmatpush.bf16.msra.mxu3 %v19874_v11  ;;  %v19888_v11 = vld [vmem:[%s21017_s19 + $0xb40] sm:$0xff] }
 0x16d   : > { %12091 = vmatpush.bf16.msra.mxu0 %v19849_v12  ;;  %v19904_v12 = vld [vmem:[%s21017_s19 + $0xbc0] sm:$0xff] }
 0x16e   : > { %12117 = vmatpush.bf16.msra.mxu2 %v19865_v13  ;;  %v19927_v13 = vld [vmem:[%s21017_s19 + $0xc78] sm:$0xff] }
 0x16f   : > { %12104 = vmatpush.bf16.msra.mxu1 %v19857_v15  ;;  %v19918_v15 = vld [vmem:[%s21017_s19 + $0xc30] sm:$0xff] }
 0x170   : > { %12130 = vmatpush.bf16.msra.mxu3 %v19873_v16  ;;  %v19934_v16 = vld [vmem:[%s21017_s19 + $0xcb0] sm:$0xff] }
 0x171   : > { %12092 = vmatpush.bf16.msra.mxu0 %v19848_v18  ;;  %v11886_v38 = vpop.f32.mrf.mxu0  ;;  %v19942_v18 = vld [vmem:[%s21017_s19 + $0xcf0] sm:$0xff] }
 0x172   : > { %12118 = vmatpush.bf16.msra.mxu2 %v19864_v19  ;;  %v11887_v39 = vadd.f32 %v11886_v38, %v11874_v6  ;;  %v19917_v19 = vld [vmem:[%s21017_s19 + $0xc28] sm:$0xff] }
 0x173   : > { %12105 = vmatpush.bf16.msra.mxu1 %v19856_v22  ;;  %v11899_v42 = vpop.f32.mrf.mxu1  ;;  %v19941_v22 = vld [vmem:[%s21017_s19 + $0xce8] sm:$0xff] }
 0x174   : > { %12131 = vmatpush.bf16.msra.mxu3 %v19872_v23  ;;  %12093 = vmatmul.bf16.vlgmr.msra.gmra.mxu0 %v3123_v25  ;;  %v11900_v43 = vadd.f32 %v11899_v42, %v11887_v39  ;;  %v19916_v25 = vld [vmem:[%s21017_s19 + $0xc20] sm:$0xff] }
 0x175   : > { %12137 = vmatpush.bf16.msrb.mxu0 %v19887_v20  ;;  %12119 = vmatmul.bf16.vlgmr.msra.gmra.mxu2 %v3125_v26  ;;  %v19933_v20 = vld [vmem:[%s21017_s19 + $0xca8] sm:$0xff]  ;;  %v19932_v26 = vld [vmem:[%s21017_s19 + $0xca0] sm:$0xff] }
 0x176   : > { %12163 = vmatpush.bf16.msrb.mxu2 %v19903_v21  ;;  %12106 = vmatmul.bf16.vlgmr.msra.gmra.mxu1 %v3124_v28  ;;  %v19925_v21 = vld [vmem:[%s21017_s19 + $0xc68] sm:$0xff] }
 0x177   : > { %12150 = vmatpush.bf16.msrb.mxu1 %v19895_v24  ;;  %12132 = vmatmul.bf16.vlgmr.msra.gmra.mxu3 %v3126_v29  ;;  %v19924_v29 = vld [vmem:[%s21017_s19 + $0xc60] sm:$0xff] }
 0x178   : > { %12176 = vmatpush.bf16.msrb.mxu3 %v19911_v27  ;;  %v11912_v48 = vpop.f32.mrf.mxu2 }
 0x179   : > { %12138 = vmatpush.bf16.msrb.mxu0 %v19886_v30  ;;  %v11913_v49 = vadd.f32 %v11912_v48, %v11900_v43  ;;  %v11888_v53 = vpop.f32.mrf.mxu0  ;;  %v19940_v30 = vld [vmem:[%s21017_s19 + $0xce0] sm:$0xff]  ;;  %v19922_v43 = vld [vmem:[%s21017_s19 + $0xc50] sm:$0xff]  ;;  %v19921_v48 = vld [vmem:[%s21017_s19 + $0xc48] sm:$0xff] }
 0x17a   : > { %12164 = vmatpush.bf16.msrb.mxu2 %v19902_v31  ;;  %v11925_v52 = vpop.f32.mrf.mxu3  ;;  %v19915_v31 = vld [vmem:[%s21017_s19 + $0xc18] sm:$0xff] }
 0x17b   : > { %12151 = vmatpush.bf16.msrb.mxu1 %v19894_v32  ;;  %v21404_v54 = vadd.f32 %v11925_v52, %v11913_v49  ;;  %v11901_v57 = vpop.f32.mrf.mxu1  ;;  %v19931_v32 = vld [vmem:[%s21017_s19 + $0xc98] sm:$0xff]  ;;  %v19937_v49 = vld [vmem:[%s21017_s19 + $0xcc8] sm:$0xff]  ;;  %v19928_v52 = vld [vmem:[%s21017_s19 + $0xc80] sm:$0xff] }
 0x17c   : > { %12177 = vmatpush.bf16.msrb.mxu3 %v19910_v33  ;;  %v19951_v53 = vld [vmem:[%s21017_s19 + $0xd38] sm:$0xff] }
 0x17d   : > { %12139 = vmatpush.bf16.msrb.mxu0 %v19885_v34  ;;  %v19959_v57 = vld [vmem:[%s21017_s19 + $0xd78] sm:$0xff] }
 0x17e   : > { %12165 = vmatpush.bf16.msrb.mxu2 %v19901_v35  ;;  %v19923_v35 = vld [vmem:[%s21017_s19 + $0xc58] sm:$0xff] }
 0x17f   : > { %12152 = vmatpush.bf16.msrb.mxu1 %v19893_v36  ;;  %v19939_v36 = vld [vmem:[%s21017_s19 + $0xcd8] sm:$0xff] }
 0x180   : > { %12178 = vmatpush.bf16.msrb.mxu3 %v19909_v37  ;;  %v11914_v2 = vpop.f32.mrf.mxu2 }
 0x181   : > { %12140 = vmatpush.bf16.msrb.mxu0 %v19884_v40  ;;  %v19914_v40 = vld [vmem:[%s21017_s19 + $0xc10] sm:$0xff] }
 0x182   : > { %12166 = vmatpush.bf16.msrb.mxu2 %v19900_v41  ;;  %v11927_v6 = vpop.f32.mrf.mxu3  ;;  %v19930_v41 = vld [vmem:[%s21017_s19 + $0xc90] sm:$0xff] }
 0x183   : > { %12153 = vmatpush.bf16.msrb.mxu1 %v19892_v44  ;;  %v19938_v44 = vld [vmem:[%s21017_s19 + $0xcd0] sm:$0xff]  ;;  %v19973_v6 = vld [vmem:[%s21017_s19 + $0xde8] sm:$0xff] }
 0x184   : > { %12179 = vmatpush.bf16.msrb.mxu3 %v19908_v45  ;;  %v19913_v45 = vld [vmem:[%s21017_s19 + $0xc08] sm:$0xff]  ;;  %v19974_v2 = vld [vmem:[%s21017_s19 + $0xdf0] sm:$0xff] }
 0x185   : > { %12141 = vmatpush.bf16.msrb.mxu0 %v19883_v46  ;;  %v19929_v46 = vld [vmem:[%s21017_s19 + $0xc88] sm:$0xff] }
 0x186   : > { %12167 = vmatpush.bf16.msrb.mxu2 %v19899_v47 }
 0x187   : > { %12154 = vmatpush.bf16.msrb.mxu1 %v19891_v50 }
 0x188   : > { %12180 = vmatpush.bf16.msrb.mxu3 %v19907_v51  ;;  %v19912_v51 = vld [vmem:[%s21017_s19 + $0xc00] sm:$0xff] }
 0x189   : > { %12142 = vmatpush.bf16.msrb.mxu0 %v19882_v55  ;;  %v19920_v55 = vld [vmem:[%s21017_s19 + $0xc40] sm:$0xff] }
 0x18a   : > { %12168 = vmatpush.bf16.msrb.mxu2 %v19898_v56  ;;  %v19936_v56 = vld [vmem:[%s21017_s19 + $0xcc0] sm:$0xff] }
 0x18b   : > { %12155 = vmatpush.bf16.msrb.mxu1 %v19890_v58  ;;  %v3133_v58 = vld [vmem:[#allocation1] sm:$0xff] }
 0x18c   : > { %12181 = vmatpush.bf16.msrb.mxu3 %v19906_v59  ;;  %v3135_v59 = vld [vmem:[#allocation1 + $0x12] sm:$0xff] }
 0x18d   : > { %12143 = vmatpush.bf16.msrb.mxu0 %v19881_v60  ;;  %v19975_v60 = vld [vmem:[%s21017_s19 + $0xdf8] sm:$0xff] }
 0x18e   : > { %12169 = vmatpush.bf16.msrb.mxu2 %v19897_v61  ;;  %v3134_v61 = vld [vmem:[#allocation1 + $0x9] sm:$0xff] }
 0x18f   : > { %12156 = vmatpush.bf16.msrb.mxu1 %v19889_v4  ;;  %v19965_v4 = vld [vmem:[%s21017_s19 + $0xda8] sm:$0xff] }
 0x190   : > { %12182 = vmatpush.bf16.msrb.mxu3 %v19905_v5  ;;  %v19957_v5 = vld [vmem:[%s21017_s19 + $0xd68] sm:$0xff] }
 0x191   : > { %12144 = vmatpush.bf16.msrb.mxu0 %v19880_v7  ;;  %v11938_v23 = vpop.f32.mrf.mxu0 }
 0x192   : > { %12170 = vmatpush.bf16.msrb.mxu2 %v19896_v8  ;;  %v11939_v24 = vadd.f32 %v11938_v23, %v21404_v54  ;;  %v19967_v54 = vld [vmem:[%s21017_s19 + $0xdb8] sm:$0xff] }
 0x193   : > { %12157 = vmatpush.bf16.msrb.mxu1 %v19888_v11  ;;  %v11951_v27 = vpop.f32.mrf.mxu1 }
 0x194   : > { %12183 = vmatpush.bf16.msrb.mxu3 %v19904_v12  ;;  %12145 = vmatmul.bf16.vlgmr.msrb.gmra.mxu0 %v3127_v62  ;;  %v11952_v28 = vadd.f32 %v11951_v27, %v11939_v24  ;;  %v3136_v62 = vld [vmem:[#allocation1 + $0x1b] sm:$0xff]  ;;  %v19946_v24 = vld [vmem:[%s21017_s19 + $0xd10] sm:$0xff] }
 0x195   : > { %12189 = vmatpush.bf16.msra.mxu0 %v19919_v9  ;;  %12171 = vmatmul.bf16.vlgmr.msrb.gmra.mxu2 %v3129_v63  ;;  %v19950_v63 = vld [vmem:[%s21017_s19 + $0xd30] sm:$0xff]  ;;  %v19948_v9 = vld [vmem:[%s21017_s19 + $0xd20] sm:$0xff] }
 0x196   : > { %12215 = vmatpush.bf16.msra.mxu2 %v19935_v10  ;;  %12158 = vmatmul.bf16.vlgmr.msrb.gmra.mxu1 %v3128_v0  ;;  %v19966_v0 = vld [vmem:[%s21017_s19 + $0xdb0] sm:$0xff]  ;;  %v19964_v10 = vld [vmem:[%s21017_s19 + $0xda0] sm:$0xff] }
 0x197   : > { %12202 = vmatpush.bf16.msra.mxu1 %v19927_v13  ;;  %12184 = vmatmul.bf16.vlgmr.msrb.gmra.mxu3 %v3130_v1  ;;  %v19958_v1 = vld [vmem:[%s21017_s19 + $0xd70] sm:$0xff]  ;;  %v19956_v13 = vld [vmem:[%s21017_s19 + $0xd60] sm:$0xff] }
 0x198   : > { %12228 = vmatpush.bf16.msra.mxu3 %v19943_v14  ;;  %v11964_v33 = vpop.f32.mrf.mxu2  ;;  %v19972_v14 = vld [vmem:[%s21017_s19 + $0xde0] sm:$0xff]  ;;  %v19954_v27 = vld [vmem:[%s21017_s19 + $0xd50] sm:$0xff] }
 0x199   : > { %12190 = vmatpush.bf16.msra.mxu0 %v19918_v15  ;;  %v11965_v34 = vadd.f32 %v11964_v33, %v11952_v28  ;;  %v11940_v38 = vpop.f32.mrf.mxu0  ;;  %v19947_v15 = vld [vmem:[%s21017_s19 + $0xd18] sm:$0xff]  ;;  %v19970_v28 = vld [vmem:[%s21017_s19 + $0xdd0] sm:$0xff] }
 0x19a   : > { %12216 = vmatpush.bf16.msra.mxu2 %v19934_v16  ;;  %v11977_v37 = vpop.f32.mrf.mxu3  ;;  %v19963_v16 = vld [vmem:[%s21017_s19 + $0xd98] sm:$0xff]  ;;  %v3138_v33 = vld [vmem:[#allocation1 + $0x2d] sm:$0xff] }
 0x19b   : > { %12203 = vmatpush.bf16.msra.mxu1 %v19926_v17  ;;  %v11978_v39 = vadd.f32 %v11977_v37, %v11965_v34  ;;  %v11953_v42 = vpop.f32.mrf.mxu1  ;;  %v3140_v34 = vld [vmem:[#allocation1 + $0x3f] sm:$0xff]  ;;  %v19953_v37 = vld [vmem:[%s21017_s19 + $0xd48] sm:$0xff] }
 0x19c   : > { %12229 = vmatpush.bf16.msra.mxu3 %v19942_v18  ;;  %v19969_v38 = vld [vmem:[%s21017_s19 + $0xdc8] sm:$0xff]  ;;  %v19983_v42 = vld [vmem:[%s21017_s19 + $0xe38] sm:$0xff] }
 0x19d   : > { %12191 = vmatpush.bf16.msra.mxu0 %v19917_v19  ;;  %v19955_v19 = vld [vmem:[%s21017_s19 + $0xd58] sm:$0xff] }
 0x19e   : > { %12217 = vmatpush.bf16.msra.mxu2 %v19933_v20  ;;  %v19971_v20 = vld [vmem:[%s21017_s19 + $0xdd8] sm:$0xff] }
 0x19f   : > { %12204 = vmatpush.bf16.msra.mxu1 %v19925_v21 }
 0x1a0   : > { %12230 = vmatpush.bf16.msra.mxu3 %v19941_v22  ;;  %v11966_v47 = vpop.f32.mrf.mxu2 }
 0x1a1   : > { %12192 = vmatpush.bf16.msra.mxu0 %v19916_v25  ;;  %v19962_v25 = vld [vmem:[%s21017_s19 + $0xd90] sm:$0xff]  ;;  %v20007_v47 = vld [vmem:[%s21017_s19 + $0xef8] sm:$0xff] }
 0x1a2   : > { %12218 = vmatpush.bf16.msra.mxu2 %v19932_v26  ;;  %v11979_v50 = vpop.f32.mrf.mxu3 }
 0x1a3   : > { %12205 = vmatpush.bf16.msra.mxu1 %v19924_v29  ;;  %v19945_v29 = vld [vmem:[%s21017_s19 + $0xd08] sm:$0xff]  ;;  %v19990_v50 = vld [vmem:[%s21017_s19 + $0xe70] sm:$0xff] }
 0x1a4   : > { %12231 = vmatpush.bf16.msra.mxu3 %v19940_v30  ;;  %v19961_v30 = vld [vmem:[%s21017_s19 + $0xd88] sm:$0xff] }
 0x1a5   : > { %12193 = vmatpush.bf16.msra.mxu0 %v19915_v31  ;;  %v3137_v31 = vld [vmem:[#allocation1 + $0x24] sm:$0xff] }
 0x1a6   : > { %12219 = vmatpush.bf16.msra.mxu2 %v19931_v32  ;;  %v3139_v32 = vld [vmem:[#allocation1 + $0x36] sm:$0xff] }
 0x1a7   : > { %12206 = vmatpush.bf16.msra.mxu1 %v19923_v35 }
 0x1a8   : > { %12232 = vmatpush.bf16.msra.mxu3 %v19939_v36  ;;  %v352_v36 = vld [vmem:[%s21012_s15 + $0x38] sm:$0xff] }
 0x1a9   : > { %12194 = vmatpush.bf16.msra.mxu0 %v19914_v40  ;;  %3142 = vst [vmem:[#allocation1] ss:$9 sm:$0xff] %v352_v36  ;;  %v19944_v40 = vld [vmem:[%s21017_s19 + $0xd00] sm:$0xff]  ;;  %v20013_v36 = vld [vmem:[%s21017_s19 + $0xf28] sm:$0xff] }
 0x1aa   : > { %12220 = vmatpush.bf16.msra.mxu2 %v19930_v41  ;;  %v19960_v41 = vld [vmem:[%s21017_s19 + $0xd80] sm:$0xff] }
 0x1ab   : > { %12207 = vmatpush.bf16.msra.mxu1 %v19922_v43  ;;  %v19999_v43 = vld [vmem:[%s21017_s19 + $0xeb8] sm:$0xff] }
 0x1ac   : > { %12233 = vmatpush.bf16.msra.mxu3 %v19938_v44  ;;  %v19952_v44 = vld [vmem:[%s21017_s19 + $0xd40] sm:$0xff] }
 0x1ad   : > { %12195 = vmatpush.bf16.msra.mxu0 %v19913_v45  ;;  %v19968_v45 = vld [vmem:[%s21017_s19 + $0xdc0] sm:$0xff] }
 0x1ae   : > { %12221 = vmatpush.bf16.msra.mxu2 %v19929_v46  ;;  %v19991_v46 = vld [vmem:[%s21017_s19 + $0xe78] sm:$0xff] }
 0x1af   : > { %12208 = vmatpush.bf16.msra.mxu1 %v19921_v48  ;;  %v19982_v48 = vld [vmem:[%s21017_s19 + $0xe30] sm:$0xff] }
 0x1b0   : > { %12234 = vmatpush.bf16.msra.mxu3 %v19937_v49  ;;  %v19998_v49 = vld [vmem:[%s21017_s19 + $0xeb0] sm:$0xff] }
 0x1b1   : > { %12196 = vmatpush.bf16.msra.mxu0 %v19912_v51  ;;  %v11990_v7 = vpop.f32.mrf.mxu0  ;;  %v20006_v51 = vld [vmem:[%s21017_s19 + $0xef0] sm:$0xff] }
 0x1b2   : > { %12222 = vmatpush.bf16.msra.mxu2 %v19928_v52  ;;  %v11991_v8 = vadd.f32 %v11990_v7, %v11978_v39  ;;  %v19981_v52 = vld [vmem:[%s21017_s19 + $0xe28] sm:$0xff] }
 0x1b3   : > { %12209 = vmatpush.bf16.msra.mxu1 %v19920_v55  ;;  %v12003_v11 = vpop.f32.mrf.mxu1  ;;  %v20005_v55 = vld [vmem:[%s21017_s19 + $0xee8] sm:$0xff] }
 0x1b4   : > { %12235 = vmatpush.bf16.msra.mxu3 %v19936_v56  ;;  %12197 = vmatmul.bf16.vlgmr.msra.gmra.mxu0 %v3133_v58  ;;  %v12004_v12 = vadd.f32 %v12003_v11, %v11991_v8  ;;  %v19980_v58 = vld [vmem:[%s21017_s19 + $0xe20] sm:$0xff] }
 0x1b5   : > { %12241 = vmatpush.bf16.msrb.mxu0 %v19951_v53  ;;  %12223 = vmatmul.bf16.vlgmr.msra.gmra.mxu2 %v3135_v59  ;;  %v19997_v53 = vld [vmem:[%s21017_s19 + $0xea8] sm:$0xff]  ;;  %v19996_v59 = vld [vmem:[%s21017_s19 + $0xea0] sm:$0xff] }
 0x1b6   : > { %12267 = vmatpush.bf16.msrb.mxu2 %v19967_v54  ;;  %12210 = vmatmul.bf16.vlgmr.msra.gmra.mxu1 %v3134_v61  ;;  %v19989_v54 = vld [vmem:[%s21017_s19 + $0xe68] sm:$0xff] }
 0x1b7   : > { %12254 = vmatpush.bf16.msrb.mxu1 %v19959_v57  ;;  %12236 = vmatmul.bf16.vlgmr.msra.gmra.mxu3 %v3136_v62  ;;  %v19988_v62 = vld [vmem:[%s21017_s19 + $0xe60] sm:$0xff] }
 0x1b8   : > { %12280 = vmatpush.bf16.msrb.mxu3 %v19975_v60  ;;  %v12016_v17 = vpop.f32.mrf.mxu2 }
 0x1b9   : > { %12242 = vmatpush.bf16.msrb.mxu0 %v19950_v63  ;;  %v12017_v18 = vadd.f32 %v12016_v17, %v12004_v12  ;;  %v11992_v22 = vpop.f32.mrf.mxu0  ;;  %v20004_v63 = vld [vmem:[%s21017_s19 + $0xee0] sm:$0xff]  ;;  %v19986_v12 = vld [vmem:[%s21017_s19 + $0xe50] sm:$0xff]  ;;  %v19985_v17 = vld [vmem:[%s21017_s19 + $0xe48] sm:$0xff] }
 0x1ba   : > { %12268 = vmatpush.bf16.msrb.mxu2 %v19966_v0  ;;  %v12029_v21 = vpop.f32.mrf.mxu3  ;;  %v19979_v0 = vld [vmem:[%s21017_s19 + $0xe18] sm:$0xff] }
 0x1bb   : > { %12255 = vmatpush.bf16.msrb.mxu1 %v19958_v1  ;;  %v21472_v23 = vadd.f32 %v12029_v21, %v12017_v18  ;;  %v12005_v26 = vpop.f32.mrf.mxu1  ;;  %v19995_v1 = vld [vmem:[%s21017_s19 + $0xe98] sm:$0xff]  ;;  %v20001_v18 = vld [vmem:[%s21017_s19 + $0xec8] sm:$0xff]  ;;  %v19992_v21 = vld [vmem:[%s21017_s19 + $0xe80] sm:$0xff] }
 0x1bc   : > { %12281 = vmatpush.bf16.msrb.mxu3 %v19974_v2  ;;  %v20015_v22 = vld [vmem:[%s21017_s19 + $0xf38] sm:$0xff] }
 0x1bd   : > { %12243 = vmatpush.bf16.msrb.mxu0 %v19949_v3  ;;  %v20023_v26 = vld [vmem:[%s21017_s19 + $0xf78] sm:$0xff] }
 0x1be   : > { %12269 = vmatpush.bf16.msrb.mxu2 %v19965_v4  ;;  %v19987_v4 = vld [vmem:[%s21017_s19 + $0xe58] sm:$0xff] }
 0x1bf   : > { %12256 = vmatpush.bf16.msrb.mxu1 %v19957_v5  ;;  %v20003_v5 = vld [vmem:[%s21017_s19 + $0xed8] sm:$0xff] }
 0x1c0   : > { %12282 = vmatpush.bf16.msrb.mxu3 %v19973_v6  ;;  %v12018_v35 = vpop.f32.mrf.mxu2 }
 0x1c1   : > { %12244 = vmatpush.bf16.msrb.mxu0 %v19948_v9  ;;  %v19978_v9 = vld [vmem:[%s21017_s19 + $0xe10] sm:$0xff] }
 0x1c2   : > { %12270 = vmatpush.bf16.msrb.mxu2 %v19964_v10  ;;  %v12031_v39 = vpop.f32.mrf.mxu3  ;;  %v19994_v10 = vld [vmem:[%s21017_s19 + $0xe90] sm:$0xff] }
 0x1c3   : > { %12257 = vmatpush.bf16.msrb.mxu1 %v19956_v13  ;;  %v20002_v13 = vld [vmem:[%s21017_s19 + $0xed0] sm:$0xff]  ;;  %v20037_v39 = vld [vmem:[%s21017_s19 + $0xfe8] sm:$0xff] }
 0x1c4   : > { %12283 = vmatpush.bf16.msrb.mxu3 %v19972_v14  ;;  %v19977_v14 = vld [vmem:[%s21017_s19 + $0xe08] sm:$0xff]  ;;  %v20038_v35 = vld [vmem:[%s21017_s19 + $0xff0] sm:$0xff] }
 0x1c5   : > { %12245 = vmatpush.bf16.msrb.mxu0 %v19947_v15  ;;  %v19993_v15 = vld [vmem:[%s21017_s19 + $0xe88] sm:$0xff] }
 0x1c6   : > { %12271 = vmatpush.bf16.msrb.mxu2 %v19963_v16 }
 0x1c7   : > { %12258 = vmatpush.bf16.msrb.mxu1 %v19955_v19 }
 0x1c8   : > { %12284 = vmatpush.bf16.msrb.mxu3 %v19971_v20  ;;  %v19976_v20 = vld [vmem:[%s21017_s19 + $0xe00] sm:$0xff] }
 0x1c9   : > { %12246 = vmatpush.bf16.msrb.mxu0 %v19946_v24  ;;  %v19984_v24 = vld [vmem:[%s21017_s19 + $0xe40] sm:$0xff] }
 0x1ca   : > { %12272 = vmatpush.bf16.msrb.mxu2 %v19962_v25  ;;  %v20000_v25 = vld [vmem:[%s21017_s19 + $0xec0] sm:$0xff] }
 0x1cb   : > { %12259 = vmatpush.bf16.msrb.mxu1 %v19954_v27  ;;  %v3143_v27 = vld [vmem:[#allocation1] sm:$0xff] }
 0x1cc   : > { %12285 = vmatpush.bf16.msrb.mxu3 %v19970_v28  ;;  %v3145_v28 = vld [vmem:[#allocation1 + $0x12] sm:$0xff] }
 0x1cd   : > { %12247 = vmatpush.bf16.msrb.mxu0 %v19945_v29  ;;  %v20039_v29 = vld [vmem:[%s21017_s19 + $0xff8] sm:$0xff] }
 0x1ce   : > { %12273 = vmatpush.bf16.msrb.mxu2 %v19961_v30  ;;  %v3144_v30 = vld [vmem:[#allocation1 + $0x9] sm:$0xff] }
 0x1cf   : > { %12260 = vmatpush.bf16.msrb.mxu1 %v19953_v37  ;;  %v20029_v37 = vld [vmem:[%s21017_s19 + $0xfa8] sm:$0xff] }
 0x1d0   : > { %12286 = vmatpush.bf16.msrb.mxu3 %v19969_v38  ;;  %v20021_v38 = vld [vmem:[%s21017_s19 + $0xf68] sm:$0xff] }
 0x1d1   : > { %12248 = vmatpush.bf16.msrb.mxu0 %v19944_v40  ;;  %v12042_v56 = vpop.f32.mrf.mxu0 }
 0x1d2   : > { %12274 = vmatpush.bf16.msrb.mxu2 %v19960_v41  ;;  %v12043_v57 = vadd.f32 %v12042_v56, %v21472_v23  ;;  %v20031_v23 = vld [vmem:[%s21017_s19 + $0xfb8] sm:$0xff] }
 0x1d3   : > { %12261 = vmatpush.bf16.msrb.mxu1 %v19952_v44  ;;  %v12055_v60 = vpop.f32.mrf.mxu1 }
 0x1d4   : > { %12287 = vmatpush.bf16.msrb.mxu3 %v19968_v45  ;;  %12249 = vmatmul.bf16.vlgmr.msrb.gmra.mxu0 %v3137_v31  ;;  %v12056_v61 = vadd.f32 %v12055_v60, %v12043_v57  ;;  %v3146_v31 = vld [vmem:[#allocation1 + $0x1b] sm:$0xff]  ;;  %v20010_v57 = vld [vmem:[%s21017_s19 + $0xf10] sm:$0xff] }
 0x1d5   : > { %12293 = vmatpush.bf16.msra.mxu0 %v19983_v42  ;;  %12275 = vmatmul.bf16.vlgmr.msrb.gmra.mxu2 %v3139_v32  ;;  %v20014_v32 = vld [vmem:[%s21017_s19 + $0xf30] sm:$0xff]  ;;  %v20012_v42 = vld [vmem:[%s21017_s19 + $0xf20] sm:$0xff] }
 0x1d6   : > { %12319 = vmatpush.bf16.msra.mxu2 %v19999_v43  ;;  %12262 = vmatmul.bf16.vlgmr.msrb.gmra.mxu1 %v3138_v33  ;;  %v20030_v33 = vld [vmem:[%s21017_s19 + $0xfb0] sm:$0xff]  ;;  %v20028_v43 = vld [vmem:[%s21017_s19 + $0xfa0] sm:$0xff] }
 0x1d7   : > { %12306 = vmatpush.bf16.msra.mxu1 %v19991_v46  ;;  %12288 = vmatmul.bf16.vlgmr.msrb.gmra.mxu3 %v3140_v34  ;;  %v20022_v34 = vld [vmem:[%s21017_s19 + $0xf70] sm:$0xff]  ;;  %v20020_v46 = vld [vmem:[%s21017_s19 + $0xf60] sm:$0xff] }
 0x1d8   : > { %12332 = vmatpush.bf16.msra.mxu3 %v20007_v47  ;;  %v12068_v2 = vpop.f32.mrf.mxu2  ;;  %v20036_v47 = vld [vmem:[%s21017_s19 + $0xfe0] sm:$0xff]  ;;  %v20018_v60 = vld [vmem:[%s21017_s19 + $0xf50] sm:$0xff] }
 0x1d9   : > { %12294 = vmatpush.bf16.msra.mxu0 %v19982_v48  ;;  %v12069_v3 = vadd.f32 %v12068_v2, %v12056_v61  ;;  %v12044_v7 = vpop.f32.mrf.mxu0  ;;  %v20011_v48 = vld [vmem:[%s21017_s19 + $0xf18] sm:$0xff]  ;;  %v20034_v61 = vld [vmem:[%s21017_s19 + $0xfd0] sm:$0xff] }
 0x1da   : > { %12320 = vmatpush.bf16.msra.mxu2 %v19998_v49  ;;  %v12081_v6 = vpop.f32.mrf.mxu3  ;;  %v20027_v49 = vld [vmem:[%s21017_s19 + $0xf98] sm:$0xff]  ;;  %v3148_v2 = vld [vmem:[#allocation1 + $0x2d] sm:$0xff] }
 0x1db   : > { %12307 = vmatpush.bf16.msra.mxu1 %v19990_v50  ;;  %v12082_v8 = vadd.f32 %v12081_v6, %v12069_v3  ;;  %v12057_v11 = vpop.f32.mrf.mxu1  ;;  %v3150_v3 = vld [vmem:[#allocation1 + $0x3f] sm:$0xff]  ;;  %v20017_v6 = vld [vmem:[%s21017_s19 + $0xf48] sm:$0xff] }
 0x1dc   : > { %12333 = vmatpush.bf16.msra.mxu3 %v20006_v51  ;;  %v20033_v7 = vld [vmem:[%s21017_s19 + $0xfc8] sm:$0xff]  ;;  %v20047_v11 = vld [vmem:[%s21017_s19 + $0x1038] sm:$0xff] }
 0x1dd   : > { %12295 = vmatpush.bf16.msra.mxu0 %v19981_v52  ;;  %v20019_v52 = vld [vmem:[%s21017_s19 + $0xf58] sm:$0xff] }
 0x1de   : > { %12321 = vmatpush.bf16.msra.mxu2 %v19997_v53  ;;  %v20035_v53 = vld [vmem:[%s21017_s19 + $0xfd8] sm:$0xff] }
 0x1df   : > { %12308 = vmatpush.bf16.msra.mxu1 %v19989_v54 }
 0x1e0   : > { %12334 = vmatpush.bf16.msra.mxu3 %v20005_v55  ;;  %v12070_v16 = vpop.f32.mrf.mxu2 }
 0x1e1   : > { %12296 = vmatpush.bf16.msra.mxu0 %v19980_v58  ;;  %v20026_v58 = vld [vmem:[%s21017_s19 + $0xf90] sm:$0xff]  ;;  %v20071_v16 = vld [vmem:[%s21017_s19 + $0x10f8] sm:$0xff] }
 0x1e2   : > { %12322 = vmatpush.bf16.msra.mxu2 %v19996_v59  ;;  %v12083_v19 = vpop.f32.mrf.mxu3 }
 0x1e3   : > { %12309 = vmatpush.bf16.msra.mxu1 %v19988_v62  ;;  %v20009_v62 = vld [vmem:[%s21017_s19 + $0xf08] sm:$0xff]  ;;  %v20054_v19 = vld [vmem:[%s21017_s19 + $0x1070] sm:$0xff] }
 0x1e4   : > { %12335 = vmatpush.bf16.msra.mxu3 %v20004_v63  ;;  %v20025_v63 = vld [vmem:[%s21017_s19 + $0xf88] sm:$0xff] }
 0x1e5   : > { %12297 = vmatpush.bf16.msra.mxu0 %v19979_v0  ;;  %v3147_v0 = vld [vmem:[#allocation1 + $0x24] sm:$0xff] }
 0x1e6   : > { %12323 = vmatpush.bf16.msra.mxu2 %v19995_v1  ;;  %v3149_v1 = vld [vmem:[#allocation1 + $0x36] sm:$0xff] }
 0x1e7   : > { %12310 = vmatpush.bf16.msra.mxu1 %v19987_v4 }
 0x1e8   : > { %12336 = vmatpush.bf16.msra.mxu3 %v20003_v5  ;;  %v353_v5 = vld [vmem:[%s21012_s15 + $0x40] sm:$0xff] }
 0x1e9   : > { %12298 = vmatpush.bf16.msra.mxu0 %v19978_v9  ;;  %3152 = vst [vmem:[#allocation1] ss:$9 sm:$0xff] %v353_v5  ;;  %v20008_v9 = vld [vmem:[%s21017_s19 + $0xf00] sm:$0xff]  ;;  %v20077_v5 = vld [vmem:[%s21017_s19 + $0x1128] sm:$0xff] }
 0x1ea   : > { %12324 = vmatpush.bf16.msra.mxu2 %v19994_v10  ;;  %v20024_v10 = vld [vmem:[%s21017_s19 + $0xf80] sm:$0xff] }
 0x1eb   : > { %12311 = vmatpush.bf16.msra.mxu1 %v19986_v12  ;;  %v20063_v12 = vld [vmem:[%s21017_s19 + $0x10b8] sm:$0xff] }
 0x1ec   : > { %12337 = vmatpush.bf16.msra.mxu3 %v20002_v13  ;;  %v20016_v13 = vld [vmem:[%s21017_s19 + $0xf40] sm:$0xff] }
 0x1ed   : > { %12299 = vmatpush.bf16.msra.mxu0 %v19977_v14  ;;  %v20032_v14 = vld [vmem:[%s21017_s19 + $0xfc0] sm:$0xff] }
 0x1ee   : > { %12325 = vmatpush.bf16.msra.mxu2 %v19993_v15  ;;  %v20055_v15 = vld [vmem:[%s21017_s19 + $0x1078] sm:$0xff] }
 0x1ef   : > { %12312 = vmatpush.bf16.msra.mxu1 %v19985_v17  ;;  %v20046_v17 = vld [vmem:[%s21017_s19 + $0x1030] sm:$0xff] }
 0x1f0   : > { %12338 = vmatpush.bf16.msra.mxu3 %v20001_v18  ;;  %v20062_v18 = vld [vmem:[%s21017_s19 + $0x10b0] sm:$0xff] }
 0x1f1   : > { %12300 = vmatpush.bf16.msra.mxu0 %v19976_v20  ;;  %v12094_v40 = vpop.f32.mrf.mxu0  ;;  %v20070_v20 = vld [vmem:[%s21017_s19 + $0x10f0] sm:$0xff] }
 0x1f2   : > { %12326 = vmatpush.bf16.msra.mxu2 %v19992_v21  ;;  %v12095_v41 = vadd.f32 %v12094_v40, %v12082_v8  ;;  %v20045_v21 = vld [vmem:[%s21017_s19 + $0x1028] sm:$0xff] }
 0x1f3   : > { %12313 = vmatpush.bf16.msra.mxu1 %v19984_v24  ;;  %v12107_v44 = vpop.f32.mrf.mxu1  ;;  %v20069_v24 = vld [vmem:[%s21017_s19 + $0x10e8] sm:$0xff] }
 0x1f4   : > { %12339 = vmatpush.bf16.msra.mxu3 %v20000_v25  ;;  %12301 = vmatmul.bf16.vlgmr.msra.gmra.mxu0 %v3143_v27  ;;  %v12108_v45 = vadd.f32 %v12107_v44, %v12095_v41  ;;  %v20044_v27 = vld [vmem:[%s21017_s19 + $0x1020] sm:$0xff] }
 0x1f5   : > { %12345 = vmatpush.bf16.msrb.mxu0 %v20015_v22  ;;  %12327 = vmatmul.bf16.vlgmr.msra.gmra.mxu2 %v3145_v28  ;;  %v20061_v22 = vld [vmem:[%s21017_s19 + $0x10a8] sm:$0xff]  ;;  %v20060_v28 = vld [vmem:[%s21017_s19 + $0x10a0] sm:$0xff] }
 0x1f6   : > { %12371 = vmatpush.bf16.msrb.mxu2 %v20031_v23  ;;  %12314 = vmatmul.bf16.vlgmr.msra.gmra.mxu1 %v3144_v30  ;;  %v20053_v23 = vld [vmem:[%s21017_s19 + $0x1068] sm:$0xff] }
 0x1f7   : > { %12358 = vmatpush.bf16.msrb.mxu1 %v20023_v26  ;;  %12340 = vmatmul.bf16.vlgmr.msra.gmra.mxu3 %v3146_v31  ;;  %v20052_v31 = vld [vmem:[%s21017_s19 + $0x1060] sm:$0xff] }
 0x1f8   : > { %12384 = vmatpush.bf16.msrb.mxu3 %v20039_v29  ;;  %v12120_v50 = vpop.f32.mrf.mxu2 }
 0x1f9   : > { %12346 = vmatpush.bf16.msrb.mxu0 %v20014_v32  ;;  %v12121_v51 = vadd.f32 %v12120_v50, %v12108_v45  ;;  %v12096_v55 = vpop.f32.mrf.mxu0  ;;  %v20068_v32 = vld [vmem:[%s21017_s19 + $0x10e0] sm:$0xff]  ;;  %v20050_v45 = vld [vmem:[%s21017_s19 + $0x1050] sm:$0xff]  ;;  %v20049_v50 = vld [vmem:[%s21017_s19 + $0x1048] sm:$0xff] }
 0x1fa   : > { %12372 = vmatpush.bf16.msrb.mxu2 %v20030_v33  ;;  %v12133_v54 = vpop.f32.mrf.mxu3  ;;  %v20043_v33 = vld [vmem:[%s21017_s19 + $0x1018] sm:$0xff] }
 0x1fb   : > { %12359 = vmatpush.bf16.msrb.mxu1 %v20022_v34  ;;  %v21540_v56 = vadd.f32 %v12133_v54, %v12121_v51  ;;  %v12109_v59 = vpop.f32.mrf.mxu1  ;;  %v20059_v34 = vld [vmem:[%s21017_s19 + $0x1098] sm:$0xff]  ;;  %v20065_v51 = vld [vmem:[%s21017_s19 + $0x10c8] sm:$0xff]  ;;  %v20056_v54 = vld [vmem:[%s21017_s19 + $0x1080] sm:$0xff] }
 0x1fc   : > { %12385 = vmatpush.bf16.msrb.mxu3 %v20038_v35  ;;  %v20079_v55 = vld [vmem:[%s21017_s19 + $0x1138] sm:$0xff] }
 0x1fd   : > { %12347 = vmatpush.bf16.msrb.mxu0 %v20013_v36  ;;  %v20087_v59 = vld [vmem:[%s21017_s19 + $0x1178] sm:$0xff] }
 0x1fe   : > { %12373 = vmatpush.bf16.msrb.mxu2 %v20029_v37  ;;  %v20051_v37 = vld [vmem:[%s21017_s19 + $0x1058] sm:$0xff] }
 0x1ff   : > { %12360 = vmatpush.bf16.msrb.mxu1 %v20021_v38  ;;  %v20067_v38 = vld [vmem:[%s21017_s19 + $0x10d8] sm:$0xff] }
 0x200   : > { %12386 = vmatpush.bf16.msrb.mxu3 %v20037_v39  ;;  %v12122_v4 = vpop.f32.mrf.mxu2 }
 0x201   : > { %12348 = vmatpush.bf16.msrb.mxu0 %v20012_v42  ;;  %v20042_v42 = vld [vmem:[%s21017_s19 + $0x1010] sm:$0xff] }
 0x202   : > { %12374 = vmatpush.bf16.msrb.mxu2 %v20028_v43  ;;  %v12135_v8 = vpop.f32.mrf.mxu3  ;;  %v20058_v43 = vld [vmem:[%s21017_s19 + $0x1090] sm:$0xff] }
 0x203   : > { %12361 = vmatpush.bf16.msrb.mxu1 %v20020_v46  ;;  %v20066_v46 = vld [vmem:[%s21017_s19 + $0x10d0] sm:$0xff]  ;;  %v20101_v8 = vld [vmem:[%s21017_s19 + $0x11e8] sm:$0xff] }
 0x204   : > { %12387 = vmatpush.bf16.msrb.mxu3 %v20036_v47  ;;  %v20041_v47 = vld [vmem:[%s21017_s19 + $0x1008] sm:$0xff]  ;;  %v20102_v4 = vld [vmem:[%s21017_s19 + $0x11f0] sm:$0xff] }
 0x205   : > { %12349 = vmatpush.bf16.msrb.mxu0 %v20011_v48  ;;  %v20057_v48 = vld [vmem:[%s21017_s19 + $0x1088] sm:$0xff] }
 0x206   : > { %12375 = vmatpush.bf16.msrb.mxu2 %v20027_v49 }
 0x207   : > { %12362 = vmatpush.bf16.msrb.mxu1 %v20019_v52 }
 0x208   : > { %12388 = vmatpush.bf16.msrb.mxu3 %v20035_v53  ;;  %v20040_v53 = vld [vmem:[%s21017_s19 + $0x1000] sm:$0xff] }
 0x209   : > { %12350 = vmatpush.bf16.msrb.mxu0 %v20010_v57  ;;  %v20048_v57 = vld [vmem:[%s21017_s19 + $0x1040] sm:$0xff] }
 0x20a   : > { %12376 = vmatpush.bf16.msrb.mxu2 %v20026_v58  ;;  %v20064_v58 = vld [vmem:[%s21017_s19 + $0x10c0] sm:$0xff] }
 0x20b   : > { %12363 = vmatpush.bf16.msrb.mxu1 %v20018_v60  ;;  %v3153_v60 = vld [vmem:[#allocation1] sm:$0xff] }
 0x20c   : > { %12389 = vmatpush.bf16.msrb.mxu3 %v20034_v61  ;;  %v3155_v61 = vld [vmem:[#allocation1 + $0x12] sm:$0xff] }
 0x20d   : > { %12351 = vmatpush.bf16.msrb.mxu0 %v20009_v62  ;;  %v20103_v62 = vld [vmem:[%s21017_s19 + $0x11f8] sm:$0xff] }
 0x20e   : > { %12377 = vmatpush.bf16.msrb.mxu2 %v20025_v63  ;;  %v3154_v63 = vld [vmem:[#allocation1 + $0x9] sm:$0xff] }
 0x20f   : > { %12364 = vmatpush.bf16.msrb.mxu1 %v20017_v6  ;;  %v20093_v6 = vld [vmem:[%s21017_s19 + $0x11a8] sm:$0xff] }
 0x210   : > { %12390 = vmatpush.bf16.msrb.mxu3 %v20033_v7  ;;  %v20085_v7 = vld [vmem:[%s21017_s19 + $0x1168] sm:$0xff] }
 0x211   : > { %12352 = vmatpush.bf16.msrb.mxu0 %v20008_v9  ;;  %v12146_v25 = vpop.f32.mrf.mxu0 }
 0x212   : > { %12378 = vmatpush.bf16.msrb.mxu2 %v20024_v10  ;;  %v12147_v26 = vadd.f32 %v12146_v25, %v21540_v56  ;;  %v20095_v56 = vld [vmem:[%s21017_s19 + $0x11b8] sm:$0xff] }
 0x213   : > { %12365 = vmatpush.bf16.msrb.mxu1 %v20016_v13  ;;  %v12159_v29 = vpop.f32.mrf.mxu1 }
 0x214   : > { %12391 = vmatpush.bf16.msrb.mxu3 %v20032_v14  ;;  %12353 = vmatmul.bf16.vlgmr.msrb.gmra.mxu0 %v3147_v0  ;;  %v12160_v30 = vadd.f32 %v12159_v29, %v12147_v26  ;;  %v3156_v0 = vld [vmem:[#allocation1 + $0x1b] sm:$0xff]  ;;  %v20074_v26 = vld [vmem:[%s21017_s19 + $0x1110] sm:$0xff] }
 0x215   : > { %12397 = vmatpush.bf16.msra.mxu0 %v20047_v11  ;;  %12379 = vmatmul.bf16.vlgmr.msrb.gmra.mxu2 %v3149_v1  ;;  %v20078_v1 = vld [vmem:[%s21017_s19 + $0x1130] sm:$0xff]  ;;  %v20076_v11 = vld [vmem:[%s21017_s19 + $0x1120] sm:$0xff] }
 0x216   : > { %12423 = vmatpush.bf16.msra.mxu2 %v20063_v12  ;;  %12366 = vmatmul.bf16.vlgmr.msrb.gmra.mxu1 %v3148_v2  ;;  %v20094_v2 = vld [vmem:[%s21017_s19 + $0x11b0] sm:$0xff]  ;;  %v20092_v12 = vld [vmem:[%s21017_s19 + $0x11a0] sm:$0xff] }
 0x217   : > { %12410 = vmatpush.bf16.msra.mxu1 %v20055_v15  ;;  %12392 = vmatmul.bf16.vlgmr.msrb.gmra.mxu3 %v3150_v3  ;;  %v20086_v3 = vld [vmem:[%s21017_s19 + $0x1170] sm:$0xff]  ;;  %v20084_v15 = vld [vmem:[%s21017_s19 + $0x1160] sm:$0xff] }
 0x218   : > { %12436 = vmatpush.bf16.msra.mxu3 %v20071_v16  ;;  %v12172_v35 = vpop.f32.mrf.mxu2  ;;  %v20100_v16 = vld [vmem:[%s21017_s19 + $0x11e0] sm:$0xff]  ;;  %v20082_v29 = vld [vmem:[%s21017_s19 + $0x1150] sm:$0xff] }
 0x219   : > { %12398 = vmatpush.bf16.msra.mxu0 %v20046_v17  ;;  %v12173_v36 = vadd.f32 %v12172_v35, %v12160_v30  ;;  %v12148_v40 = vpop.f32.mrf.mxu0  ;;  %v20075_v17 = vld [vmem:[%s21017_s19 + $0x1118] sm:$0xff]  ;;  %v20098_v30 = vld [vmem:[%s21017_s19 + $0x11d0] sm:$0xff] }
 0x21a   : > { %12424 = vmatpush.bf16.msra.mxu2 %v20062_v18  ;;  %v12185_v39 = vpop.f32.mrf.mxu3  ;;  %v20091_v18 = vld [vmem:[%s21017_s19 + $0x1198] sm:$0xff]  ;;  %v3158_v35 = vld [vmem:[#allocation1 + $0x2d] sm:$0xff] }
 0x21b   : > { %12411 = vmatpush.bf16.msra.mxu1 %v20054_v19  ;;  %v12186_v41 = vadd.f32 %v12185_v39, %v12173_v36  ;;  %v12161_v44 = vpop.f32.mrf.mxu1  ;;  %v3160_v36 = vld [vmem:[#allocation1 + $0x3f] sm:$0xff]  ;;  %v20081_v39 = vld [vmem:[%s21017_s19 + $0x1148] sm:$0xff] }
 0x21c   : > { %12437 = vmatpush.bf16.msra.mxu3 %v20070_v20  ;;  %v20097_v40 = vld [vmem:[%s21017_s19 + $0x11c8] sm:$0xff]  ;;  %v20111_v44 = vld [vmem:[%s21017_s19 + $0x1238] sm:$0xff] }
 0x21d   : > { %12399 = vmatpush.bf16.msra.mxu0 %v20045_v21  ;;  %v20083_v21 = vld [vmem:[%s21017_s19 + $0x1158] sm:$0xff] }
 0x21e   : > { %12425 = vmatpush.bf16.msra.mxu2 %v20061_v22  ;;  %v20099_v22 = vld [vmem:[%s21017_s19 + $0x11d8] sm:$0xff] }
 0x21f   : > { %12412 = vmatpush.bf16.msra.mxu1 %v20053_v23 }
 0x220   : > { %12438 = vmatpush.bf16.msra.mxu3 %v20069_v24  ;;  %v12174_v49 = vpop.f32.mrf.mxu2 }
 0x221   : > { %12400 = vmatpush.bf16.msra.mxu0 %v20044_v27  ;;  %v20090_v27 = vld [vmem:[%s21017_s19 + $0x1190] sm:$0xff]  ;;  %v20135_v49 = vld [vmem:[%s21017_s19 + $0x12f8] sm:$0xff] }
 0x222   : > { %12426 = vmatpush.bf16.msra.mxu2 %v20060_v28  ;;  %v12187_v52 = vpop.f32.mrf.mxu3 }
 0x223   : > { %12413 = vmatpush.bf16.msra.mxu1 %v20052_v31  ;;  %v20073_v31 = vld [vmem:[%s21017_s19 + $0x1108] sm:$0xff]  ;;  %v20118_v52 = vld [vmem:[%s21017_s19 + $0x1270] sm:$0xff] }
 0x224   : > { %12439 = vmatpush.bf16.msra.mxu3 %v20068_v32  ;;  %v20089_v32 = vld [vmem:[%s21017_s19 + $0x1188] sm:$0xff] }
 0x225   : > { %12401 = vmatpush.bf16.msra.mxu0 %v20043_v33  ;;  %v3157_v33 = vld [vmem:[#allocation1 + $0x24] sm:$0xff] }
 0x226   : > { %12427 = vmatpush.bf16.msra.mxu2 %v20059_v34  ;;  %v3159_v34 = vld [vmem:[#allocation1 + $0x36] sm:$0xff] }
 0x227   : > { %12414 = vmatpush.bf16.msra.mxu1 %v20051_v37 }
 0x228   : > { %12440 = vmatpush.bf16.msra.mxu3 %v20067_v38  ;;  %v354_v38 = vld [vmem:[%s21012_s15 + $0x48] sm:$0xff] }
 0x229   : > { %12402 = vmatpush.bf16.msra.mxu0 %v20042_v42  ;;  %3162 = vst [vmem:[#allocation1] ss:$9 sm:$0xff] %v354_v38  ;;  %v20072_v42 = vld [vmem:[%s21017_s19 + $0x1100] sm:$0xff]  ;;  %v20141_v38 = vld [vmem:[%s21017_s19 + $0x1328] sm:$0xff] }
 0x22a   : > { %12428 = vmatpush.bf16.msra.mxu2 %v20058_v43  ;;  %v20088_v43 = vld [vmem:[%s21017_s19 + $0x1180] sm:$0xff] }
 0x22b   : > { %12415 = vmatpush.bf16.msra.mxu1 %v20050_v45  ;;  %v20127_v45 = vld [vmem:[%s21017_s19 + $0x12b8] sm:$0xff] }
 0x22c   : > { %12441 = vmatpush.bf16.msra.mxu3 %v20066_v46  ;;  %v20080_v46 = vld [vmem:[%s21017_s19 + $0x1140] sm:$0xff] }
 0x22d   : > { %12403 = vmatpush.bf16.msra.mxu0 %v20041_v47  ;;  %v20096_v47 = vld [vmem:[%s21017_s19 + $0x11c0] sm:$0xff] }
 0x22e   : > { %12429 = vmatpush.bf16.msra.mxu2 %v20057_v48  ;;  %v20119_v48 = vld [vmem:[%s21017_s19 + $0x1278] sm:$0xff] }
 0x22f   : > { %12416 = vmatpush.bf16.msra.mxu1 %v20049_v50  ;;  %v20110_v50 = vld [vmem:[%s21017_s19 + $0x1230] sm:$0xff] }
 0x230   : > { %12442 = vmatpush.bf16.msra.mxu3 %v20065_v51  ;;  %v20126_v51 = vld [vmem:[%s21017_s19 + $0x12b0] sm:$0xff] }
 0x231   : > { %12404 = vmatpush.bf16.msra.mxu0 %v20040_v53  ;;  %v12198_v9 = vpop.f32.mrf.mxu0  ;;  %v20134_v53 = vld [vmem:[%s21017_s19 + $0x12f0] sm:$0xff] }
 0x232   : > { %12430 = vmatpush.bf16.msra.mxu2 %v20056_v54  ;;  %v12199_v10 = vadd.f32 %v12198_v9, %v12186_v41  ;;  %v20109_v54 = vld [vmem:[%s21017_s19 + $0x1228] sm:$0xff] }
 0x233   : > { %12417 = vmatpush.bf16.msra.mxu1 %v20048_v57  ;;  %v12211_v13 = vpop.f32.mrf.mxu1  ;;  %v20133_v57 = vld [vmem:[%s21017_s19 + $0x12e8] sm:$0xff] }
 0x234   : > { %12443 = vmatpush.bf16.msra.mxu3 %v20064_v58  ;;  %12405 = vmatmul.bf16.vlgmr.msra.gmra.mxu0 %v3153_v60  ;;  %v12212_v14 = vadd.f32 %v12211_v13, %v12199_v10  ;;  %v20108_v60 = vld [vmem:[%s21017_s19 + $0x1220] sm:$0xff] }
 0x235   : > { %12449 = vmatpush.bf16.msrb.mxu0 %v20079_v55  ;;  %12431 = vmatmul.bf16.vlgmr.msra.gmra.mxu2 %v3155_v61  ;;  %v20125_v55 = vld [vmem:[%s21017_s19 + $0x12a8] sm:$0xff]  ;;  %v20124_v61 = vld [vmem:[%s21017_s19 + $0x12a0] sm:$0xff] }
 0x236   : > { %12475 = vmatpush.bf16.msrb.mxu2 %v20095_v56  ;;  %12418 = vmatmul.bf16.vlgmr.msra.gmra.mxu1 %v3154_v63  ;;  %v20117_v56 = vld [vmem:[%s21017_s19 + $0x1268] sm:$0xff] }
 0x237   : > { %12462 = vmatpush.bf16.msrb.mxu1 %v20087_v59  ;;  %12444 = vmatmul.bf16.vlgmr.msra.gmra.mxu3 %v3156_v0  ;;  %v20116_v0 = vld [vmem:[%s21017_s19 + $0x1260] sm:$0xff] }
 0x238   : > { %12488 = vmatpush.bf16.msrb.mxu3 %v20103_v62  ;;  %v12224_v19 = vpop.f32.mrf.mxu2 }
 0x239   : > { %12450 = vmatpush.bf16.msrb.mxu0 %v20078_v1  ;;  %v12225_v20 = vadd.f32 %v12224_v19, %v12212_v14  ;;  %v12200_v24 = vpop.f32.mrf.mxu0  ;;  %v20132_v1 = vld [vmem:[%s21017_s19 + $0x12e0] sm:$0xff]  ;;  %v20114_v14 = vld [vmem:[%s21017_s19 + $0x1250] sm:$0xff]  ;;  %v20113_v19 = vld [vmem:[%s21017_s19 + $0x1248] sm:$0xff] }
 0x23a   : > { %12476 = vmatpush.bf16.msrb.mxu2 %v20094_v2  ;;  %v12237_v23 = vpop.f32.mrf.mxu3  ;;  %v20107_v2 = vld [vmem:[%s21017_s19 + $0x1218] sm:$0xff] }
 0x23b   : > { %12463 = vmatpush.bf16.msrb.mxu1 %v20086_v3  ;;  %v21608_v25 = vadd.f32 %v12237_v23, %v12225_v20  ;;  %v12213_v28 = vpop.f32.mrf.mxu1  ;;  %v20123_v3 = vld [vmem:[%s21017_s19 + $0x1298] sm:$0xff]  ;;  %v20129_v20 = vld [vmem:[%s21017_s19 + $0x12c8] sm:$0xff]  ;;  %v20120_v23 = vld [vmem:[%s21017_s19 + $0x1280] sm:$0xff] }
 0x23c   : > { %12489 = vmatpush.bf16.msrb.mxu3 %v20102_v4  ;;  %v20143_v24 = vld [vmem:[%s21017_s19 + $0x1338] sm:$0xff] }
 0x23d   : > { %12451 = vmatpush.bf16.msrb.mxu0 %v20077_v5  ;;  %v20151_v28 = vld [vmem:[%s21017_s19 + $0x1378] sm:$0xff] }
 0x23e   : > { %12477 = vmatpush.bf16.msrb.mxu2 %v20093_v6  ;;  %v20115_v6 = vld [vmem:[%s21017_s19 + $0x1258] sm:$0xff] }
 0x23f   : > { %12464 = vmatpush.bf16.msrb.mxu1 %v20085_v7  ;;  %v20131_v7 = vld [vmem:[%s21017_s19 + $0x12d8] sm:$0xff] }
 0x240   : > { %12490 = vmatpush.bf16.msrb.mxu3 %v20101_v8  ;;  %v12226_v37 = vpop.f32.mrf.mxu2 }
 0x241   : > { %12452 = vmatpush.bf16.msrb.mxu0 %v20076_v11  ;;  %v20106_v11 = vld [vmem:[%s21017_s19 + $0x1210] sm:$0xff] }
 0x242   : > { %12478 = vmatpush.bf16.msrb.mxu2 %v20092_v12  ;;  %v12239_v41 = vpop.f32.mrf.mxu3  ;;  %v20122_v12 = vld [vmem:[%s21017_s19 + $0x1290] sm:$0xff] }
 0x243   : > { %12465 = vmatpush.bf16.msrb.mxu1 %v20084_v15  ;;  %v20130_v15 = vld [vmem:[%s21017_s19 + $0x12d0] sm:$0xff]  ;;  %v20165_v41 = vld [vmem:[%s21017_s19 + $0x13e8] sm:$0xff] }
 0x244   : > { %12491 = vmatpush.bf16.msrb.mxu3 %v20100_v16  ;;  %v20105_v16 = vld [vmem:[%s21017_s19 + $0x1208] sm:$0xff]  ;;  %v20166_v37 = vld [vmem:[%s21017_s19 + $0x13f0] sm:$0xff] }
 0x245   : > { %12453 = vmatpush.bf16.msrb.mxu0 %v20075_v17  ;;  %v20121_v17 = vld [vmem:[%s21017_s19 + $0x1288] sm:$0xff] }
 0x246   : > { %12479 = vmatpush.bf16.msrb.mxu2 %v20091_v18 }
 0x247   : > { %12466 = vmatpush.bf16.msrb.mxu1 %v20083_v21 }
 0x248   : > { %12492 = vmatpush.bf16.msrb.mxu3 %v20099_v22  ;;  %v20104_v22 = vld [vmem:[%s21017_s19 + $0x1200] sm:$0xff] }
 0x249   : > { %12454 = vmatpush.bf16.msrb.mxu0 %v20074_v26  ;;  %v20112_v26 = vld [vmem:[%s21017_s19 + $0x1240] sm:$0xff] }
 0x24a   : > { %12480 = vmatpush.bf16.msrb.mxu2 %v20090_v27  ;;  %v20128_v27 = vld [vmem:[%s21017_s19 + $0x12c0] sm:$0xff] }
 0x24b   : > { %12467 = vmatpush.bf16.msrb.mxu1 %v20082_v29  ;;  %v3163_v29 = vld [vmem:[#allocation1] sm:$0xff] }
 0x24c   : > { %12493 = vmatpush.bf16.msrb.mxu3 %v20098_v30  ;;  %v3165_v30 = vld [vmem:[#allocation1 + $0x12] sm:$0xff] }
 0x24d   : > { %12455 = vmatpush.bf16.msrb.mxu0 %v20073_v31  ;;  %v20167_v31 = vld [vmem:[%s21017_s19 + $0x13f8] sm:$0xff] }
 0x24e   : > { %12481 = vmatpush.bf16.msrb.mxu2 %v20089_v32  ;;  %v3164_v32 = vld [vmem:[#allocation1 + $0x9] sm:$0xff] }
 0x24f   : > { %12468 = vmatpush.bf16.msrb.mxu1 %v20081_v39  ;;  %v20157_v39 = vld [vmem:[%s21017_s19 + $0x13a8] sm:$0xff] }
 0x250   : > { %12494 = vmatpush.bf16.msrb.mxu3 %v20097_v40  ;;  %v20149_v40 = vld [vmem:[%s21017_s19 + $0x1368] sm:$0xff] }
 0x251   : > { %12456 = vmatpush.bf16.msrb.mxu0 %v20072_v42  ;;  %v12250_v58 = vpop.f32.mrf.mxu0 }
 0x252   : > { %12482 = vmatpush.bf16.msrb.mxu2 %v20088_v43  ;;  %v12251_v59 = vadd.f32 %v12250_v58, %v21608_v25  ;;  %v20159_v25 = vld [vmem:[%s21017_s19 + $0x13b8] sm:$0xff] }
 0x253   : > { %12469 = vmatpush.bf16.msrb.mxu1 %v20080_v46  ;;  %v12263_v62 = vpop.f32.mrf.mxu1 }
 0x254   : > { %12495 = vmatpush.bf16.msrb.mxu3 %v20096_v47  ;;  %12457 = vmatmul.bf16.vlgmr.msrb.gmra.mxu0 %v3157_v33  ;;  %v12264_v63 = vadd.f32 %v12263_v62, %v12251_v59  ;;  %v3166_v33 = vld [vmem:[#allocation1 + $0x1b] sm:$0xff]  ;;  %v20138_v59 = vld [vmem:[%s21017_s19 + $0x1310] sm:$0xff] }
 0x255   : > { %12501 = vmatpush.bf16.msra.mxu0 %v20111_v44  ;;  %12483 = vmatmul.bf16.vlgmr.msrb.gmra.mxu2 %v3159_v34  ;;  %v20142_v34 = vld [vmem:[%s21017_s19 + $0x1330] sm:$0xff]  ;;  %v20140_v44 = vld [vmem:[%s21017_s19 + $0x1320] sm:$0xff] }
 0x256   : > { %12527 = vmatpush.bf16.msra.mxu2 %v20127_v45  ;;  %12470 = vmatmul.bf16.vlgmr.msrb.gmra.mxu1 %v3158_v35  ;;  %v20158_v35 = vld [vmem:[%s21017_s19 + $0x13b0] sm:$0xff]  ;;  %v20156_v45 = vld [vmem:[%s21017_s19 + $0x13a0] sm:$0xff] }
 0x257   : > { %12514 = vmatpush.bf16.msra.mxu1 %v20119_v48  ;;  %12496 = vmatmul.bf16.vlgmr.msrb.gmra.mxu3 %v3160_v36  ;;  %v20150_v36 = vld [vmem:[%s21017_s19 + $0x1370] sm:$0xff]  ;;  %v20148_v48 = vld [vmem:[%s21017_s19 + $0x1360] sm:$0xff] }
 0x258   : > { %12540 = vmatpush.bf16.msra.mxu3 %v20135_v49  ;;  %v12276_v4 = vpop.f32.mrf.mxu2  ;;  %v20164_v49 = vld [vmem:[%s21017_s19 + $0x13e0] sm:$0xff]  ;;  %v20146_v62 = vld [vmem:[%s21017_s19 + $0x1350] sm:$0xff] }
 0x259   : > { %12502 = vmatpush.bf16.msra.mxu0 %v20110_v50  ;;  %v12277_v5 = vadd.f32 %v12276_v4, %v12264_v63  ;;  %v12252_v9 = vpop.f32.mrf.mxu0  ;;  %v20139_v50 = vld [vmem:[%s21017_s19 + $0x1318] sm:$0xff]  ;;  %v20162_v63 = vld [vmem:[%s21017_s19 + $0x13d0] sm:$0xff] }
 0x25a   : > { %12528 = vmatpush.bf16.msra.mxu2 %v20126_v51  ;;  %v12289_v8 = vpop.f32.mrf.mxu3  ;;  %v20155_v51 = vld [vmem:[%s21017_s19 + $0x1398] sm:$0xff]  ;;  %v3168_v4 = vld [vmem:[#allocation1 + $0x2d] sm:$0xff] }
 0x25b   : > { %12515 = vmatpush.bf16.msra.mxu1 %v20118_v52  ;;  %v12290_v10 = vadd.f32 %v12289_v8, %v12277_v5  ;;  %v12265_v13 = vpop.f32.mrf.mxu1  ;;  %v3170_v5 = vld [vmem:[#allocation1 + $0x3f] sm:$0xff]  ;;  %v20145_v8 = vld [vmem:[%s21017_s19 + $0x1348] sm:$0xff] }
 0x25c   : > { %12541 = vmatpush.bf16.msra.mxu3 %v20134_v53  ;;  %v20161_v9 = vld [vmem:[%s21017_s19 + $0x13c8] sm:$0xff]  ;;  %v20175_v13 = vld [vmem:[%s21017_s19 + $0x1438] sm:$0xff] }
 0x25d   : > { %12503 = vmatpush.bf16.msra.mxu0 %v20109_v54  ;;  %v20147_v54 = vld [vmem:[%s21017_s19 + $0x1358] sm:$0xff] }
 0x25e   : > { %12529 = vmatpush.bf16.msra.mxu2 %v20125_v55  ;;  %v20163_v55 = vld [vmem:[%s21017_s19 + $0x13d8] sm:$0xff] }
 0x25f   : > { %12516 = vmatpush.bf16.msra.mxu1 %v20117_v56 }
 0x260   : > { %12542 = vmatpush.bf16.msra.mxu3 %v20133_v57  ;;  %v12278_v18 = vpop.f32.mrf.mxu2 }
 0x261   : > { %12504 = vmatpush.bf16.msra.mxu0 %v20108_v60  ;;  %v20154_v60 = vld [vmem:[%s21017_s19 + $0x1390] sm:$0xff]  ;;  %v20199_v18 = vld [vmem:[%s21017_s19 + $0x14f8] sm:$0xff] }
 0x262   : > { %12530 = vmatpush.bf16.msra.mxu2 %v20124_v61  ;;  %v12291_v21 = vpop.f32.mrf.mxu3 }
 0x263   : > { %12517 = vmatpush.bf16.msra.mxu1 %v20116_v0  ;;  %v20137_v0 = vld [vmem:[%s21017_s19 + $0x1308] sm:$0xff]  ;;  %v20182_v21 = vld [vmem:[%s21017_s19 + $0x1470] sm:$0xff] }
 0x264   : > { %12543 = vmatpush.bf16.msra.mxu3 %v20132_v1  ;;  %v20153_v1 = vld [vmem:[%s21017_s19 + $0x1388] sm:$0xff] }
 0x265   : > { %12505 = vmatpush.bf16.msra.mxu0 %v20107_v2  ;;  %v3167_v2 = vld [vmem:[#allocation1 + $0x24] sm:$0xff] }
 0x266   : > { %12531 = vmatpush.bf16.msra.mxu2 %v20123_v3  ;;  %v3169_v3 = vld [vmem:[#allocation1 + $0x36] sm:$0xff] }
 0x267   : > { %12518 = vmatpush.bf16.msra.mxu1 %v20115_v6 }
 0x268   : > { %12544 = vmatpush.bf16.msra.mxu3 %v20131_v7  ;;  %v355_v7 = vld [vmem:[%s21012_s15 + $0x50] sm:$0xff] }
 0x269   : > { %12506 = vmatpush.bf16.msra.mxu0 %v20106_v11  ;;  %3172 = vst [vmem:[#allocation1] ss:$9 sm:$0xff] %v355_v7  ;;  %v20136_v11 = vld [vmem:[%s21017_s19 + $0x1300] sm:$0xff]  ;;  %v20205_v7 = vld [vmem:[%s21017_s19 + $0x1528] sm:$0xff] }
 0x26a   : > { %12532 = vmatpush.bf16.msra.mxu2 %v20122_v12  ;;  %v20152_v12 = vld [vmem:[%s21017_s19 + $0x1380] sm:$0xff] }
 0x26b   : > { %12519 = vmatpush.bf16.msra.mxu1 %v20114_v14  ;;  %v20191_v14 = vld [vmem:[%s21017_s19 + $0x14b8] sm:$0xff] }
 0x26c   : > { %12545 = vmatpush.bf16.msra.mxu3 %v20130_v15  ;;  %v20144_v15 = vld [vmem:[%s21017_s19 + $0x1340] sm:$0xff] }
 0x26d   : > { %12507 = vmatpush.bf16.msra.mxu0 %v20105_v16  ;;  %v20160_v16 = vld [vmem:[%s21017_s19 + $0x13c0] sm:$0xff] }
 0x26e   : > { %12533 = vmatpush.bf16.msra.mxu2 %v20121_v17  ;;  %v20183_v17 = vld [vmem:[%s21017_s19 + $0x1478] sm:$0xff] }
 0x26f   : > { %12520 = vmatpush.bf16.msra.mxu1 %v20113_v19  ;;  %v20174_v19 = vld [vmem:[%s21017_s19 + $0x1430] sm:$0xff] }
 0x270   : > { %12546 = vmatpush.bf16.msra.mxu3 %v20129_v20  ;;  %v20190_v20 = vld [vmem:[%s21017_s19 + $0x14b0] sm:$0xff] }
 0x271   : > { %12508 = vmatpush.bf16.msra.mxu0 %v20104_v22  ;;  %v12302_v42 = vpop.f32.mrf.mxu0  ;;  %v20198_v22 = vld [vmem:[%s21017_s19 + $0x14f0] sm:$0xff] }
 0x272   : > { %12534 = vmatpush.bf16.msra.mxu2 %v20120_v23  ;;  %v12303_v43 = vadd.f32 %v12302_v42, %v12290_v10  ;;  %v20173_v23 = vld [vmem:[%s21017_s19 + $0x1428] sm:$0xff] }
 0x273   : > { %12521 = vmatpush.bf16.msra.mxu1 %v20112_v26  ;;  %v12315_v46 = vpop.f32.mrf.mxu1  ;;  %v20197_v26 = vld [vmem:[%s21017_s19 + $0x14e8] sm:$0xff] }
 0x274   : > { %12547 = vmatpush.bf16.msra.mxu3 %v20128_v27  ;;  %12509 = vmatmul.bf16.vlgmr.msra.gmra.mxu0 %v3163_v29  ;;  %v12316_v47 = vadd.f32 %v12315_v46, %v12303_v43  ;;  %v20172_v29 = vld [vmem:[%s21017_s19 + $0x1420] sm:$0xff] }
 0x275   : > { %12553 = vmatpush.bf16.msrb.mxu0 %v20143_v24  ;;  %12535 = vmatmul.bf16.vlgmr.msra.gmra.mxu2 %v3165_v30  ;;  %v20189_v24 = vld [vmem:[%s21017_s19 + $0x14a8] sm:$0xff]  ;;  %v20188_v30 = vld [vmem:[%s21017_s19 + $0x14a0] sm:$0xff] }
 0x276   : > { %12579 = vmatpush.bf16.msrb.mxu2 %v20159_v25  ;;  %12522 = vmatmul.bf16.vlgmr.msra.gmra.mxu1 %v3164_v32  ;;  %v20181_v25 = vld [vmem:[%s21017_s19 + $0x1468] sm:$0xff] }
 0x277   : > { %12566 = vmatpush.bf16.msrb.mxu1 %v20151_v28  ;;  %12548 = vmatmul.bf16.vlgmr.msra.gmra.mxu3 %v3166_v33  ;;  %v20180_v33 = vld [vmem:[%s21017_s19 + $0x1460] sm:$0xff] }
 0x278   : > { %12592 = vmatpush.bf16.msrb.mxu3 %v20167_v31  ;;  %v12328_v52 = vpop.f32.mrf.mxu2 }
 0x279   : > { %12554 = vmatpush.bf16.msrb.mxu0 %v20142_v34  ;;  %v12329_v53 = vadd.f32 %v12328_v52, %v12316_v47  ;;  %v12304_v57 = vpop.f32.mrf.mxu0  ;;  %v20196_v34 = vld [vmem:[%s21017_s19 + $0x14e0] sm:$0xff]  ;;  %v20178_v47 = vld [vmem:[%s21017_s19 + $0x1450] sm:$0xff]  ;;  %v20177_v52 = vld [vmem:[%s21017_s19 + $0x1448] sm:$0xff] }
 0x27a   : > { %12580 = vmatpush.bf16.msrb.mxu2 %v20158_v35  ;;  %v12341_v56 = vpop.f32.mrf.mxu3  ;;  %v20171_v35 = vld [vmem:[%s21017_s19 + $0x1418] sm:$0xff] }
 0x27b   : > { %12567 = vmatpush.bf16.msrb.mxu1 %v20150_v36  ;;  %v21676_v58 = vadd.f32 %v12341_v56, %v12329_v53  ;;  %v12317_v61 = vpop.f32.mrf.mxu1  ;;  %v20187_v36 = vld [vmem:[%s21017_s19 + $0x1498] sm:$0xff]  ;;  %v20193_v53 = vld [vmem:[%s21017_s19 + $0x14c8] sm:$0xff]  ;;  %v20184_v56 = vld [vmem:[%s21017_s19 + $0x1480] sm:$0xff] }
 0x27c   : > { %12593 = vmatpush.bf16.msrb.mxu3 %v20166_v37  ;;  %v20207_v57 = vld [vmem:[%s21017_s19 + $0x1538] sm:$0xff] }
 0x27d   : > { %12555 = vmatpush.bf16.msrb.mxu0 %v20141_v38  ;;  %v20215_v61 = vld [vmem:[%s21017_s19 + $0x1578] sm:$0xff] }
 0x27e   : > { %12581 = vmatpush.bf16.msrb.mxu2 %v20157_v39  ;;  %v20179_v39 = vld [vmem:[%s21017_s19 + $0x1458] sm:$0xff] }
 0x27f   : > { %12568 = vmatpush.bf16.msrb.mxu1 %v20149_v40  ;;  %v20195_v40 = vld [vmem:[%s21017_s19 + $0x14d8] sm:$0xff] }
 0x280   : > { %12594 = vmatpush.bf16.msrb.mxu3 %v20165_v41  ;;  %v12330_v6 = vpop.f32.mrf.mxu2 }
 0x281   : > { %12556 = vmatpush.bf16.msrb.mxu0 %v20140_v44  ;;  %v20170_v44 = vld [vmem:[%s21017_s19 + $0x1410] sm:$0xff] }
 0x282   : > { %12582 = vmatpush.bf16.msrb.mxu2 %v20156_v45  ;;  %v12343_v10 = vpop.f32.mrf.mxu3  ;;  %v20186_v45 = vld [vmem:[%s21017_s19 + $0x1490] sm:$0xff] }
 0x283   : > { %12569 = vmatpush.bf16.msrb.mxu1 %v20148_v48  ;;  %v20194_v48 = vld [vmem:[%s21017_s19 + $0x14d0] sm:$0xff]  ;;  %v20229_v10 = vld [vmem:[%s21017_s19 + $0x15e8] sm:$0xff] }
 0x284   : > { %12595 = vmatpush.bf16.msrb.mxu3 %v20164_v49  ;;  %v20169_v49 = vld [vmem:[%s21017_s19 + $0x1408] sm:$0xff]  ;;  %v20230_v6 = vld [vmem:[%s21017_s19 + $0x15f0] sm:$0xff] }
 0x285   : > { %12557 = vmatpush.bf16.msrb.mxu0 %v20139_v50  ;;  %v20185_v50 = vld [vmem:[%s21017_s19 + $0x1488] sm:$0xff] }
 0x286   : > { %12583 = vmatpush.bf16.msrb.mxu2 %v20155_v51 }
 0x287   : > { %12570 = vmatpush.bf16.msrb.mxu1 %v20147_v54 }
 0x288   : > { %12596 = vmatpush.bf16.msrb.mxu3 %v20163_v55  ;;  %v20168_v55 = vld [vmem:[%s21017_s19 + $0x1400] sm:$0xff] }
 0x289   : > { %12558 = vmatpush.bf16.msrb.mxu0 %v20138_v59  ;;  %v20176_v59 = vld [vmem:[%s21017_s19 + $0x1440] sm:$0xff] }
 0x28a   : > { %12584 = vmatpush.bf16.msrb.mxu2 %v20154_v60  ;;  %v20192_v60 = vld [vmem:[%s21017_s19 + $0x14c0] sm:$0xff] }
 0x28b   : > { %12571 = vmatpush.bf16.msrb.mxu1 %v20146_v62  ;;  %v3173_v62 = vld [vmem:[#allocation1] sm:$0xff] }
 0x28c   : > { %12597 = vmatpush.bf16.msrb.mxu3 %v20162_v63  ;;  %v3175_v63 = vld [vmem:[#allocation1 + $0x12] sm:$0xff] }
 0x28d   : > { %12559 = vmatpush.bf16.msrb.mxu0 %v20137_v0  ;;  %v20231_v0 = vld [vmem:[%s21017_s19 + $0x15f8] sm:$0xff] }
 0x28e   : > { %12585 = vmatpush.bf16.msrb.mxu2 %v20153_v1  ;;  %v3174_v1 = vld [vmem:[#allocation1 + $0x9] sm:$0xff] }
 0x28f   : > { %12572 = vmatpush.bf16.msrb.mxu1 %v20145_v8  ;;  %v20221_v8 = vld [vmem:[%s21017_s19 + $0x15a8] sm:$0xff] }
 0x290   : > { %12598 = vmatpush.bf16.msrb.mxu3 %v20161_v9  ;;  %v20213_v9 = vld [vmem:[%s21017_s19 + $0x1568] sm:$0xff] }
 0x291   : > { %12560 = vmatpush.bf16.msrb.mxu0 %v20136_v11  ;;  %v12354_v27 = vpop.f32.mrf.mxu0 }
 0x292   : > { %12586 = vmatpush.bf16.msrb.mxu2 %v20152_v12  ;;  %v12355_v28 = vadd.f32 %v12354_v27, %v21676_v58  ;;  %v20223_v58 = vld [vmem:[%s21017_s19 + $0x15b8] sm:$0xff] }
 0x293   : > { %12573 = vmatpush.bf16.msrb.mxu1 %v20144_v15  ;;  %v12367_v31 = vpop.f32.mrf.mxu1 }
 0x294   : > { %12599 = vmatpush.bf16.msrb.mxu3 %v20160_v16  ;;  %12561 = vmatmul.bf16.vlgmr.msrb.gmra.mxu0 %v3167_v2  ;;  %v12368_v32 = vadd.f32 %v12367_v31, %v12355_v28  ;;  %v3176_v2 = vld [vmem:[#allocation1 + $0x1b] sm:$0xff]  ;;  %v20202_v28 = vld [vmem:[%s21017_s19 + $0x1510] sm:$0xff] }
 0x295   : > { %12605 = vmatpush.bf16.msra.mxu0 %v20175_v13  ;;  %12587 = vmatmul.bf16.vlgmr.msrb.gmra.mxu2 %v3169_v3  ;;  %v20206_v3 = vld [vmem:[%s21017_s19 + $0x1530] sm:$0xff]  ;;  %v20204_v13 = vld [vmem:[%s21017_s19 + $0x1520] sm:$0xff] }
 0x296   : > { %12631 = vmatpush.bf16.msra.mxu2 %v20191_v14  ;;  %12574 = vmatmul.bf16.vlgmr.msrb.gmra.mxu1 %v3168_v4  ;;  %v20222_v4 = vld [vmem:[%s21017_s19 + $0x15b0] sm:$0xff]  ;;  %v20220_v14 = vld [vmem:[%s21017_s19 + $0x15a0] sm:$0xff] }
 0x297   : > { %12618 = vmatpush.bf16.msra.mxu1 %v20183_v17  ;;  %12600 = vmatmul.bf16.vlgmr.msrb.gmra.mxu3 %v3170_v5  ;;  %v20214_v5 = vld [vmem:[%s21017_s19 + $0x1570] sm:$0xff]  ;;  %v20212_v17 = vld [vmem:[%s21017_s19 + $0x1560] sm:$0xff] }
 0x298   : > { %12644 = vmatpush.bf16.msra.mxu3 %v20199_v18  ;;  %v12380_v37 = vpop.f32.mrf.mxu2  ;;  %v20228_v18 = vld [vmem:[%s21017_s19 + $0x15e0] sm:$0xff]  ;;  %v20210_v31 = vld [vmem:[%s21017_s19 + $0x1550] sm:$0xff] }
 0x299   : > { %12606 = vmatpush.bf16.msra.mxu0 %v20174_v19  ;;  %v12381_v38 = vadd.f32 %v12380_v37, %v12368_v32  ;;  %v12356_v42 = vpop.f32.mrf.mxu0  ;;  %v20203_v19 = vld [vmem:[%s21017_s19 + $0x1518] sm:$0xff]  ;;  %v20226_v32 = vld [vmem:[%s21017_s19 + $0x15d0] sm:$0xff] }
 0x29a   : > { %12632 = vmatpush.bf16.msra.mxu2 %v20190_v20  ;;  %v12393_v41 = vpop.f32.mrf.mxu3  ;;  %v20219_v20 = vld [vmem:[%s21017_s19 + $0x1598] sm:$0xff]  ;;  %v3178_v37 = vld [vmem:[#allocation1 + $0x2d] sm:$0xff] }
 0x29b   : > { %12619 = vmatpush.bf16.msra.mxu1 %v20182_v21  ;;  %v12394_v43 = vadd.f32 %v12393_v41, %v12381_v38  ;;  %v12369_v46 = vpop.f32.mrf.mxu1  ;;  %v3180_v38 = vld [vmem:[#allocation1 + $0x3f] sm:$0xff]  ;;  %v20209_v41 = vld [vmem:[%s21017_s19 + $0x1548] sm:$0xff] }
 0x29c   : > { %12645 = vmatpush.bf16.msra.mxu3 %v20198_v22  ;;  %v20225_v42 = vld [vmem:[%s21017_s19 + $0x15c8] sm:$0xff]  ;;  %v20239_v46 = vld [vmem:[%s21017_s19 + $0x1638] sm:$0xff] }
 0x29d   : > { %12607 = vmatpush.bf16.msra.mxu0 %v20173_v23  ;;  %v20211_v23 = vld [vmem:[%s21017_s19 + $0x1558] sm:$0xff] }
 0x29e   : > { %12633 = vmatpush.bf16.msra.mxu2 %v20189_v24  ;;  %v20227_v24 = vld [vmem:[%s21017_s19 + $0x15d8] sm:$0xff] }
 0x29f   : > { %12620 = vmatpush.bf16.msra.mxu1 %v20181_v25 }
 0x2a0   : > { %12646 = vmatpush.bf16.msra.mxu3 %v20197_v26  ;;  %v12382_v51 = vpop.f32.mrf.mxu2 }
 0x2a1   : > { %12608 = vmatpush.bf16.msra.mxu0 %v20172_v29  ;;  %v20218_v29 = vld [vmem:[%s21017_s19 + $0x1590] sm:$0xff]  ;;  %v20263_v51 = vld [vmem:[%s21017_s19 + $0x16f8] sm:$0xff] }
 0x2a2   : > { %12634 = vmatpush.bf16.msra.mxu2 %v20188_v30  ;;  %v12395_v54 = vpop.f32.mrf.mxu3 }
 0x2a3   : > { %12621 = vmatpush.bf16.msra.mxu1 %v20180_v33  ;;  %v20201_v33 = vld [vmem:[%s21017_s19 + $0x1508] sm:$0xff]  ;;  %v20246_v54 = vld [vmem:[%s21017_s19 + $0x1670] sm:$0xff] }
 0x2a4   : > { %12647 = vmatpush.bf16.msra.mxu3 %v20196_v34  ;;  %v20217_v34 = vld [vmem:[%s21017_s19 + $0x1588] sm:$0xff] }
 0x2a5   : > { %12609 = vmatpush.bf16.msra.mxu0 %v20171_v35  ;;  %v3177_v35 = vld [vmem:[#allocation1 + $0x24] sm:$0xff] }
 0x2a6   : > { %12635 = vmatpush.bf16.msra.mxu2 %v20187_v36  ;;  %v3179_v36 = vld [vmem:[#allocation1 + $0x36] sm:$0xff] }
 0x2a7   : > { %12622 = vmatpush.bf16.msra.mxu1 %v20179_v39 }
 0x2a8   : > { %12648 = vmatpush.bf16.msra.mxu3 %v20195_v40  ;;  %v356_v40 = vld [vmem:[%s21012_s15 + $0x58] sm:$0xff] }
 0x2a9   : > { %12610 = vmatpush.bf16.msra.mxu0 %v20170_v44  ;;  %3182 = vst [vmem:[#allocation1] ss:$9 sm:$0xff] %v356_v40  ;;  %v20200_v44 = vld [vmem:[%s21017_s19 + $0x1500] sm:$0xff]  ;;  %v20269_v40 = vld [vmem:[%s21017_s19 + $0x1728] sm:$0xff] }
 0x2aa   : > { %12636 = vmatpush.bf16.msra.mxu2 %v20186_v45  ;;  %v20216_v45 = vld [vmem:[%s21017_s19 + $0x1580] sm:$0xff] }
 0x2ab   : > { %12623 = vmatpush.bf16.msra.mxu1 %v20178_v47  ;;  %v20255_v47 = vld [vmem:[%s21017_s19 + $0x16b8] sm:$0xff] }
 0x2ac   : > { %12649 = vmatpush.bf16.msra.mxu3 %v20194_v48  ;;  %v20208_v48 = vld [vmem:[%s21017_s19 + $0x1540] sm:$0xff] }
 0x2ad   : > { %12611 = vmatpush.bf16.msra.mxu0 %v20169_v49  ;;  %v20224_v49 = vld [vmem:[%s21017_s19 + $0x15c0] sm:$0xff] }
 0x2ae   : > { %12637 = vmatpush.bf16.msra.mxu2 %v20185_v50  ;;  %v20247_v50 = vld [vmem:[%s21017_s19 + $0x1678] sm:$0xff] }
 0x2af   : > { %12624 = vmatpush.bf16.msra.mxu1 %v20177_v52  ;;  %v20238_v52 = vld [vmem:[%s21017_s19 + $0x1630] sm:$0xff] }
 0x2b0   : > { %12650 = vmatpush.bf16.msra.mxu3 %v20193_v53  ;;  %v20254_v53 = vld [vmem:[%s21017_s19 + $0x16b0] sm:$0xff] }
 0x2b1   : > { %12612 = vmatpush.bf16.msra.mxu0 %v20168_v55  ;;  %v12406_v11 = vpop.f32.mrf.mxu0  ;;  %v20262_v55 = vld [vmem:[%s21017_s19 + $0x16f0] sm:$0xff] }
 0x2b2   : > { %12638 = vmatpush.bf16.msra.mxu2 %v20184_v56  ;;  %v12407_v12 = vadd.f32 %v12406_v11, %v12394_v43  ;;  %v20237_v56 = vld [vmem:[%s21017_s19 + $0x1628] sm:$0xff] }
 0x2b3   : > { %12625 = vmatpush.bf16.msra.mxu1 %v20176_v59  ;;  %v12419_v15 = vpop.f32.mrf.mxu1  ;;  %v20261_v59 = vld [vmem:[%s21017_s19 + $0x16e8] sm:$0xff] }
 0x2b4   : > { %12651 = vmatpush.bf16.msra.mxu3 %v20192_v60  ;;  %12613 = vmatmul.bf16.vlgmr.msra.gmra.mxu0 %v3173_v62  ;;  %v12420_v16 = vadd.f32 %v12419_v15, %v12407_v12  ;;  %v20236_v62 = vld [vmem:[%s21017_s19 + $0x1620] sm:$0xff] }
 0x2b5   : > { %12657 = vmatpush.bf16.msrb.mxu0 %v20207_v57  ;;  %12639 = vmatmul.bf16.vlgmr.msra.gmra.mxu2 %v3175_v63  ;;  %v20253_v57 = vld [vmem:[%s21017_s19 + $0x16a8] sm:$0xff]  ;;  %v20252_v63 = vld [vmem:[%s21017_s19 + $0x16a0] sm:$0xff] }
 0x2b6   : > { %12683 = vmatpush.bf16.msrb.mxu2 %v20223_v58  ;;  %12626 = vmatmul.bf16.vlgmr.msra.gmra.mxu1 %v3174_v1  ;;  %v20245_v58 = vld [vmem:[%s21017_s19 + $0x1668] sm:$0xff] }
 0x2b7   : > { %12670 = vmatpush.bf16.msrb.mxu1 %v20215_v61  ;;  %12652 = vmatmul.bf16.vlgmr.msra.gmra.mxu3 %v3176_v2  ;;  %v20244_v2 = vld [vmem:[%s21017_s19 + $0x1660] sm:$0xff] }
 0x2b8   : > { %12696 = vmatpush.bf16.msrb.mxu3 %v20231_v0  ;;  %v12432_v21 = vpop.f32.mrf.mxu2 }
 0x2b9   : > { %12658 = vmatpush.bf16.msrb.mxu0 %v20206_v3  ;;  %v12433_v22 = vadd.f32 %v12432_v21, %v12420_v16  ;;  %v12408_v26 = vpop.f32.mrf.mxu0  ;;  %v20260_v3 = vld [vmem:[%s21017_s19 + $0x16e0] sm:$0xff]  ;;  %v20242_v16 = vld [vmem:[%s21017_s19 + $0x1650] sm:$0xff]  ;;  %v20241_v21 = vld [vmem:[%s21017_s19 + $0x1648] sm:$0xff] }
 0x2ba   : > { %12684 = vmatpush.bf16.msrb.mxu2 %v20222_v4  ;;  %v12445_v25 = vpop.f32.mrf.mxu3  ;;  %v20235_v4 = vld [vmem:[%s21017_s19 + $0x1618] sm:$0xff] }
 0x2bb   : > { %12671 = vmatpush.bf16.msrb.mxu1 %v20214_v5  ;;  %v21744_v27 = vadd.f32 %v12445_v25, %v12433_v22  ;;  %v12421_v30 = vpop.f32.mrf.mxu1  ;;  %v20251_v5 = vld [vmem:[%s21017_s19 + $0x1698] sm:$0xff]  ;;  %v20257_v22 = vld [vmem:[%s21017_s19 + $0x16c8] sm:$0xff]  ;;  %v20248_v25 = vld [vmem:[%s21017_s19 + $0x1680] sm:$0xff] }
 0x2bc   : > { %12697 = vmatpush.bf16.msrb.mxu3 %v20230_v6  ;;  %v20271_v26 = vld [vmem:[%s21017_s19 + $0x1738] sm:$0xff] }
 0x2bd   : > { %12659 = vmatpush.bf16.msrb.mxu0 %v20205_v7  ;;  %v20279_v30 = vld [vmem:[%s21017_s19 + $0x1778] sm:$0xff] }
 0x2be   : > { %12685 = vmatpush.bf16.msrb.mxu2 %v20221_v8  ;;  %v20243_v8 = vld [vmem:[%s21017_s19 + $0x1658] sm:$0xff] }
 0x2bf   : > { %12672 = vmatpush.bf16.msrb.mxu1 %v20213_v9  ;;  %v20259_v9 = vld [vmem:[%s21017_s19 + $0x16d8] sm:$0xff] }
 0x2c0   : > { %12698 = vmatpush.bf16.msrb.mxu3 %v20229_v10  ;;  %v12434_v39 = vpop.f32.mrf.mxu2 }
 0x2c1   : > { %12660 = vmatpush.bf16.msrb.mxu0 %v20204_v13  ;;  %v20234_v13 = vld [vmem:[%s21017_s19 + $0x1610] sm:$0xff] }
 0x2c2   : > { %12686 = vmatpush.bf16.msrb.mxu2 %v20220_v14  ;;  %v12447_v43 = vpop.f32.mrf.mxu3  ;;  %v20250_v14 = vld [vmem:[%s21017_s19 + $0x1690] sm:$0xff] }
 0x2c3   : > { %12673 = vmatpush.bf16.msrb.mxu1 %v20212_v17  ;;  %v20258_v17 = vld [vmem:[%s21017_s19 + $0x16d0] sm:$0xff]  ;;  %v20293_v43 = vld [vmem:[%s21017_s19 + $0x17e8] sm:$0xff] }
 0x2c4   : > { %12699 = vmatpush.bf16.msrb.mxu3 %v20228_v18  ;;  %v20233_v18 = vld [vmem:[%s21017_s19 + $0x1608] sm:$0xff]  ;;  %v20294_v39 = vld [vmem:[%s21017_s19 + $0x17f0] sm:$0xff] }
 0x2c5   : > { %12661 = vmatpush.bf16.msrb.mxu0 %v20203_v19  ;;  %v20249_v19 = vld [vmem:[%s21017_s19 + $0x1688] sm:$0xff] }
 0x2c6   : > { %12687 = vmatpush.bf16.msrb.mxu2 %v20219_v20 }
 0x2c7   : > { %12674 = vmatpush.bf16.msrb.mxu1 %v20211_v23 }
 0x2c8   : > { %12700 = vmatpush.bf16.msrb.mxu3 %v20227_v24  ;;  %v20232_v24 = vld [vmem:[%s21017_s19 + $0x1600] sm:$0xff] }
 0x2c9   : > { %12662 = vmatpush.bf16.msrb.mxu0 %v20202_v28  ;;  %v20240_v28 = vld [vmem:[%s21017_s19 + $0x1640] sm:$0xff] }
 0x2ca   : > { %12688 = vmatpush.bf16.msrb.mxu2 %v20218_v29  ;;  %v20256_v29 = vld [vmem:[%s21017_s19 + $0x16c0] sm:$0xff] }
 0x2cb   : > { %12675 = vmatpush.bf16.msrb.mxu1 %v20210_v31  ;;  %v3183_v31 = vld [vmem:[#allocation1] sm:$0xff] }
 0x2cc   : > { %12701 = vmatpush.bf16.msrb.mxu3 %v20226_v32  ;;  %v3185_v32 = vld [vmem:[#allocation1 + $0x12] sm:$0xff] }
 0x2cd   : > { %12663 = vmatpush.bf16.msrb.mxu0 %v20201_v33  ;;  %v20295_v33 = vld [vmem:[%s21017_s19 + $0x17f8] sm:$0xff] }
 0x2ce   : > { %12689 = vmatpush.bf16.msrb.mxu2 %v20217_v34  ;;  %v3184_v34 = vld [vmem:[#allocation1 + $0x9] sm:$0xff] }
 0x2cf   : > { %12676 = vmatpush.bf16.msrb.mxu1 %v20209_v41  ;;  %v20285_v41 = vld [vmem:[%s21017_s19 + $0x17a8] sm:$0xff] }
 0x2d0   : > { %12702 = vmatpush.bf16.msrb.mxu3 %v20225_v42  ;;  %v20277_v42 = vld [vmem:[%s21017_s19 + $0x1768] sm:$0xff] }
 0x2d1   : > { %12664 = vmatpush.bf16.msrb.mxu0 %v20200_v44  ;;  %v12458_v60 = vpop.f32.mrf.mxu0 }
 0x2d2   : > { %12690 = vmatpush.bf16.msrb.mxu2 %v20216_v45  ;;  %v12459_v61 = vadd.f32 %v12458_v60, %v21744_v27  ;;  %v20287_v27 = vld [vmem:[%s21017_s19 + $0x17b8] sm:$0xff] }
 0x2d3   : > { %12677 = vmatpush.bf16.msrb.mxu1 %v20208_v48  ;;  %v12471_v0 = vpop.f32.mrf.mxu1 }
 0x2d4   : > { %12703 = vmatpush.bf16.msrb.mxu3 %v20224_v49  ;;  %12665 = vmatmul.bf16.vlgmr.msrb.gmra.mxu0 %v3177_v35  ;;  %v12472_v1 = vadd.f32 %v12471_v0, %v12459_v61  ;;  %v3186_v35 = vld [vmem:[#allocation1 + $0x1b] sm:$0xff]  ;;  %v20266_v61 = vld [vmem:[%s21017_s19 + $0x1710] sm:$0xff] }
 0x2d5   : > { %12709 = vmatpush.bf16.msra.mxu0 %v20239_v46  ;;  %12691 = vmatmul.bf16.vlgmr.msrb.gmra.mxu2 %v3179_v36  ;;  %v20270_v36 = vld [vmem:[%s21017_s19 + $0x1730] sm:$0xff]  ;;  %v20268_v46 = vld [vmem:[%s21017_s19 + $0x1720] sm:$0xff] }
 0x2d6   : > { %12735 = vmatpush.bf16.msra.mxu2 %v20255_v47  ;;  %12678 = vmatmul.bf16.vlgmr.msrb.gmra.mxu1 %v3178_v37  ;;  %v20286_v37 = vld [vmem:[%s21017_s19 + $0x17b0] sm:$0xff]  ;;  %v20284_v47 = vld [vmem:[%s21017_s19 + $0x17a0] sm:$0xff] }
 0x2d7   : > { %12722 = vmatpush.bf16.msra.mxu1 %v20247_v50  ;;  %12704 = vmatmul.bf16.vlgmr.msrb.gmra.mxu3 %v3180_v38  ;;  %v20278_v38 = vld [vmem:[%s21017_s19 + $0x1770] sm:$0xff]  ;;  %v20276_v50 = vld [vmem:[%s21017_s19 + $0x1760] sm:$0xff] }
 0x2d8   : > { %12748 = vmatpush.bf16.msra.mxu3 %v20263_v51  ;;  %v12484_v6 = vpop.f32.mrf.mxu2  ;;  %v20292_v51 = vld [vmem:[%s21017_s19 + $0x17e0] sm:$0xff]  ;;  %v20274_v0 = vld [vmem:[%s21017_s19 + $0x1750] sm:$0xff] }
 0x2d9   : > { %12710 = vmatpush.bf16.msra.mxu0 %v20238_v52  ;;  %v12485_v7 = vadd.f32 %v12484_v6, %v12472_v1  ;;  %v12460_v11 = vpop.f32.mrf.mxu0  ;;  %v20267_v52 = vld [vmem:[%s21017_s19 + $0x1718] sm:$0xff]  ;;  %v20290_v1 = vld [vmem:[%s21017_s19 + $0x17d0] sm:$0xff] }
 0x2da   : > { %12736 = vmatpush.bf16.msra.mxu2 %v20254_v53  ;;  %v12497_v10 = vpop.f32.mrf.mxu3  ;;  %v20283_v53 = vld [vmem:[%s21017_s19 + $0x1798] sm:$0xff]  ;;  %v3188_v6 = vld [vmem:[#allocation1 + $0x2d] sm:$0xff] }
 0x2db   : > { %12723 = vmatpush.bf16.msra.mxu1 %v20246_v54  ;;  %v12498_v12 = vadd.f32 %v12497_v10, %v12485_v7  ;;  %v12473_v15 = vpop.f32.mrf.mxu1  ;;  %v3190_v7 = vld [vmem:[#allocation1 + $0x3f] sm:$0xff]  ;;  %v20273_v10 = vld [vmem:[%s21017_s19 + $0x1748] sm:$0xff] }
 0x2dc   : > { %12749 = vmatpush.bf16.msra.mxu3 %v20262_v55  ;;  %v20289_v11 = vld [vmem:[%s21017_s19 + $0x17c8] sm:$0xff]  ;;  %v20303_v15 = vld [vmem:[%s21017_s19 + $0x1838] sm:$0xff] }
 0x2dd   : > { %12711 = vmatpush.bf16.msra.mxu0 %v20237_v56  ;;  %v20275_v56 = vld [vmem:[%s21017_s19 + $0x1758] sm:$0xff] }
 0x2de   : > { %12737 = vmatpush.bf16.msra.mxu2 %v20253_v57  ;;  %v20291_v57 = vld [vmem:[%s21017_s19 + $0x17d8] sm:$0xff] }
 0x2df   : > { %12724 = vmatpush.bf16.msra.mxu1 %v20245_v58 }
 0x2e0   : > { %12750 = vmatpush.bf16.msra.mxu3 %v20261_v59  ;;  %v12486_v20 = vpop.f32.mrf.mxu2 }
 0x2e1   : > { %12712 = vmatpush.bf16.msra.mxu0 %v20236_v62  ;;  %v20282_v62 = vld [vmem:[%s21017_s19 + $0x1790] sm:$0xff]  ;;  %v20327_v20 = vld [vmem:[%s21017_s19 + $0x18f8] sm:$0xff] }
 0x2e2   : > { %12738 = vmatpush.bf16.msra.mxu2 %v20252_v63  ;;  %v12499_v23 = vpop.f32.mrf.mxu3 }
 0x2e3   : > { %12725 = vmatpush.bf16.msra.mxu1 %v20244_v2  ;;  %v20265_v2 = vld [vmem:[%s21017_s19 + $0x1708] sm:$0xff]  ;;  %v20310_v23 = vld [vmem:[%s21017_s19 + $0x1870] sm:$0xff] }
 0x2e4   : > { %12751 = vmatpush.bf16.msra.mxu3 %v20260_v3  ;;  %v20281_v3 = vld [vmem:[%s21017_s19 + $0x1788] sm:$0xff] }
 0x2e5   : > { %12713 = vmatpush.bf16.msra.mxu0 %v20235_v4  ;;  %v3187_v4 = vld [vmem:[#allocation1 + $0x24] sm:$0xff] }
 0x2e6   : > { %12739 = vmatpush.bf16.msra.mxu2 %v20251_v5  ;;  %v3189_v5 = vld [vmem:[#allocation1 + $0x36] sm:$0xff] }
 0x2e7   : > { %12726 = vmatpush.bf16.msra.mxu1 %v20243_v8 }
 0x2e8   : > { %12752 = vmatpush.bf16.msra.mxu3 %v20259_v9  ;;  %v357_v9 = vld [vmem:[%s21012_s15 + $0x60] sm:$0xff] }
 0x2e9   : > { %12714 = vmatpush.bf16.msra.mxu0 %v20234_v13  ;;  %3192 = vst [vmem:[#allocation1] ss:$9 sm:$0xff] %v357_v9  ;;  %v20264_v13 = vld [vmem:[%s21017_s19 + $0x1700] sm:$0xff]  ;;  %v20333_v9 = vld [vmem:[%s21017_s19 + $0x1928] sm:$0xff] }
 0x2ea   : > { %12740 = vmatpush.bf16.msra.mxu2 %v20250_v14  ;;  %v20280_v14 = vld [vmem:[%s21017_s19 + $0x1780] sm:$0xff] }
 0x2eb   : > { %12727 = vmatpush.bf16.msra.mxu1 %v20242_v16  ;;  %v20319_v16 = vld [vmem:[%s21017_s19 + $0x18b8] sm:$0xff] }
 0x2ec   : > { %12753 = vmatpush.bf16.msra.mxu3 %v20258_v17  ;;  %v20272_v17 = vld [vmem:[%s21017_s19 + $0x1740] sm:$0xff] }
 0x2ed   : > { %12715 = vmatpush.bf16.msra.mxu0 %v20233_v18  ;;  %v20288_v18 = vld [vmem:[%s21017_s19 + $0x17c0] sm:$0xff] }
 0x2ee   : > { %12741 = vmatpush.bf16.msra.mxu2 %v20249_v19  ;;  %v20311_v19 = vld [vmem:[%s21017_s19 + $0x1878] sm:$0xff] }
 0x2ef   : > { %12728 = vmatpush.bf16.msra.mxu1 %v20241_v21  ;;  %v20302_v21 = vld [vmem:[%s21017_s19 + $0x1830] sm:$0xff] }
 0x2f0   : > { %12754 = vmatpush.bf16.msra.mxu3 %v20257_v22  ;;  %v20318_v22 = vld [vmem:[%s21017_s19 + $0x18b0] sm:$0xff] }
 0x2f1   : > { %12716 = vmatpush.bf16.msra.mxu0 %v20232_v24  ;;  %v12510_v44 = vpop.f32.mrf.mxu0  ;;  %v20326_v24 = vld [vmem:[%s21017_s19 + $0x18f0] sm:$0xff] }
 0x2f2   : > { %12742 = vmatpush.bf16.msra.mxu2 %v20248_v25  ;;  %v12511_v45 = vadd.f32 %v12510_v44, %v12498_v12  ;;  %v20301_v25 = vld [vmem:[%s21017_s19 + $0x1828] sm:$0xff] }
 0x2f3   : > { %12729 = vmatpush.bf16.msra.mxu1 %v20240_v28  ;;  %v12523_v48 = vpop.f32.mrf.mxu1  ;;  %v20325_v28 = vld [vmem:[%s21017_s19 + $0x18e8] sm:$0xff] }
 0x2f4   : > { %12755 = vmatpush.bf16.msra.mxu3 %v20256_v29  ;;  %12717 = vmatmul.bf16.vlgmr.msra.gmra.mxu0 %v3183_v31  ;;  %v12524_v49 = vadd.f32 %v12523_v48, %v12511_v45  ;;  %v20300_v31 = vld [vmem:[%s21017_s19 + $0x1820] sm:$0xff] }
 0x2f5   : > { %12761 = vmatpush.bf16.msrb.mxu0 %v20271_v26  ;;  %12743 = vmatmul.bf16.vlgmr.msra.gmra.mxu2 %v3185_v32  ;;  %v20317_v26 = vld [vmem:[%s21017_s19 + $0x18a8] sm:$0xff]  ;;  %v20316_v32 = vld [vmem:[%s21017_s19 + $0x18a0] sm:$0xff] }
 0x2f6   : > { %12787 = vmatpush.bf16.msrb.mxu2 %v20287_v27  ;;  %12730 = vmatmul.bf16.vlgmr.msra.gmra.mxu1 %v3184_v34  ;;  %v20309_v27 = vld [vmem:[%s21017_s19 + $0x1868] sm:$0xff] }
 0x2f7   : > { %12774 = vmatpush.bf16.msrb.mxu1 %v20279_v30  ;;  %12756 = vmatmul.bf16.vlgmr.msra.gmra.mxu3 %v3186_v35  ;;  %v20308_v35 = vld [vmem:[%s21017_s19 + $0x1860] sm:$0xff] }
 0x2f8   : > { %12800 = vmatpush.bf16.msrb.mxu3 %v20295_v33  ;;  %v12536_v54 = vpop.f32.mrf.mxu2 }
 0x2f9   : > { %12762 = vmatpush.bf16.msrb.mxu0 %v20270_v36  ;;  %v12537_v55 = vadd.f32 %v12536_v54, %v12524_v49  ;;  %v12512_v59 = vpop.f32.mrf.mxu0  ;;  %v20324_v36 = vld [vmem:[%s21017_s19 + $0x18e0] sm:$0xff]  ;;  %v20306_v49 = vld [vmem:[%s21017_s19 + $0x1850] sm:$0xff]  ;;  %v20305_v54 = vld [vmem:[%s21017_s19 + $0x1848] sm:$0xff] }
 0x2fa   : > { %12788 = vmatpush.bf16.msrb.mxu2 %v20286_v37  ;;  %v12549_v58 = vpop.f32.mrf.mxu3  ;;  %v20299_v37 = vld [vmem:[%s21017_s19 + $0x1818] sm:$0xff] }
 0x2fb   : > { %12775 = vmatpush.bf16.msrb.mxu1 %v20278_v38  ;;  %v21812_v60 = vadd.f32 %v12549_v58, %v12537_v55  ;;  %v12525_v63 = vpop.f32.mrf.mxu1  ;;  %v20315_v38 = vld [vmem:[%s21017_s19 + $0x1898] sm:$0xff]  ;;  %v20321_v55 = vld [vmem:[%s21017_s19 + $0x18c8] sm:$0xff]  ;;  %v20312_v58 = vld [vmem:[%s21017_s19 + $0x1880] sm:$0xff] }
 0x2fc   : > { %12801 = vmatpush.bf16.msrb.mxu3 %v20294_v39  ;;  %v20335_v59 = vld [vmem:[%s21017_s19 + $0x1938] sm:$0xff] }
 0x2fd   : > { %12763 = vmatpush.bf16.msrb.mxu0 %v20269_v40  ;;  %v20343_v63 = vld [vmem:[%s21017_s19 + $0x1978] sm:$0xff] }
 0x2fe   : > { %12789 = vmatpush.bf16.msrb.mxu2 %v20285_v41  ;;  %v20307_v41 = vld [vmem:[%s21017_s19 + $0x1858] sm:$0xff] }
 0x2ff   : > { %12776 = vmatpush.bf16.msrb.mxu1 %v20277_v42  ;;  %v20323_v42 = vld [vmem:[%s21017_s19 + $0x18d8] sm:$0xff] }
 0x300   : > { %12802 = vmatpush.bf16.msrb.mxu3 %v20293_v43  ;;  %v12538_v8 = vpop.f32.mrf.mxu2 }
 0x301   : > { %12764 = vmatpush.bf16.msrb.mxu0 %v20268_v46  ;;  %v20298_v46 = vld [vmem:[%s21017_s19 + $0x1810] sm:$0xff] }
 0x302   : > { %12790 = vmatpush.bf16.msrb.mxu2 %v20284_v47  ;;  %v12551_v12 = vpop.f32.mrf.mxu3  ;;  %v20314_v47 = vld [vmem:[%s21017_s19 + $0x1890] sm:$0xff] }
 0x303   : > { %12777 = vmatpush.bf16.msrb.mxu1 %v20276_v50  ;;  %v20322_v50 = vld [vmem:[%s21017_s19 + $0x18d0] sm:$0xff]  ;;  %v20357_v12 = vld [vmem:[%s21017_s19 + $0x19e8] sm:$0xff] }
 0x304   : > { %12803 = vmatpush.bf16.msrb.mxu3 %v20292_v51  ;;  %v20297_v51 = vld [vmem:[%s21017_s19 + $0x1808] sm:$0xff]  ;;  %v20358_v8 = vld [vmem:[%s21017_s19 + $0x19f0] sm:$0xff] }
 0x305   : > { %12765 = vmatpush.bf16.msrb.mxu0 %v20267_v52  ;;  %v20313_v52 = vld [vmem:[%s21017_s19 + $0x1888] sm:$0xff] }
 0x306   : > { %12791 = vmatpush.bf16.msrb.mxu2 %v20283_v53 }
 0x307   : > { %12778 = vmatpush.bf16.msrb.mxu1 %v20275_v56 }
 0x308   : > { %12804 = vmatpush.bf16.msrb.mxu3 %v20291_v57  ;;  %v20296_v57 = vld [vmem:[%s21017_s19 + $0x1800] sm:$0xff] }
 0x309   : > { %12766 = vmatpush.bf16.msrb.mxu0 %v20266_v61  ;;  %v20304_v61 = vld [vmem:[%s21017_s19 + $0x1840] sm:$0xff] }
 0x30a   : > { %12792 = vmatpush.bf16.msrb.mxu2 %v20282_v62  ;;  %v20320_v62 = vld [vmem:[%s21017_s19 + $0x18c0] sm:$0xff] }
 0x30b   : > { %12779 = vmatpush.bf16.msrb.mxu1 %v20274_v0  ;;  %v3193_v0 = vld [vmem:[#allocation1] sm:$0xff] }
 0x30c   : > { %12805 = vmatpush.bf16.msrb.mxu3 %v20290_v1  ;;  %v3195_v1 = vld [vmem:[#allocation1 + $0x12] sm:$0xff] }
 0x30d   : > { %12767 = vmatpush.bf16.msrb.mxu0 %v20265_v2  ;;  %v20359_v2 = vld [vmem:[%s21017_s19 + $0x19f8] sm:$0xff] }
 0x30e   : > { %12793 = vmatpush.bf16.msrb.mxu2 %v20281_v3  ;;  %v3194_v3 = vld [vmem:[#allocation1 + $0x9] sm:$0xff] }
 0x30f   : > { %12780 = vmatpush.bf16.msrb.mxu1 %v20273_v10  ;;  %v20349_v10 = vld [vmem:[%s21017_s19 + $0x19a8] sm:$0xff] }
 0x310   : > { %12806 = vmatpush.bf16.msrb.mxu3 %v20289_v11  ;;  %v20341_v11 = vld [vmem:[%s21017_s19 + $0x1968] sm:$0xff] }
 0x311   : > { %12768 = vmatpush.bf16.msrb.mxu0 %v20264_v13  ;;  %v12562_v29 = vpop.f32.mrf.mxu0 }
 0x312   : > { %12794 = vmatpush.bf16.msrb.mxu2 %v20280_v14  ;;  %v12563_v30 = vadd.f32 %v12562_v29, %v21812_v60  ;;  %v20351_v60 = vld [vmem:[%s21017_s19 + $0x19b8] sm:$0xff] }
 0x313   : > { %12781 = vmatpush.bf16.msrb.mxu1 %v20272_v17  ;;  %v12575_v33 = vpop.f32.mrf.mxu1 }
 0x314   : > { %12807 = vmatpush.bf16.msrb.mxu3 %v20288_v18  ;;  %12769 = vmatmul.bf16.vlgmr.msrb.gmra.mxu0 %v3187_v4  ;;  %v12576_v34 = vadd.f32 %v12575_v33, %v12563_v30  ;;  %v3196_v4 = vld [vmem:[#allocation1 + $0x1b] sm:$0xff]  ;;  %v20330_v30 = vld [vmem:[%s21017_s19 + $0x1910] sm:$0xff] }
 0x315   : > { %12813 = vmatpush.bf16.msra.mxu0 %v20303_v15  ;;  %12795 = vmatmul.bf16.vlgmr.msrb.gmra.mxu2 %v3189_v5  ;;  %v20334_v5 = vld [vmem:[%s21017_s19 + $0x1930] sm:$0xff]  ;;  %v20332_v15 = vld [vmem:[%s21017_s19 + $0x1920] sm:$0xff] }
 0x316   : > { %12839 = vmatpush.bf16.msra.mxu2 %v20319_v16  ;;  %12782 = vmatmul.bf16.vlgmr.msrb.gmra.mxu1 %v3188_v6  ;;  %v20350_v6 = vld [vmem:[%s21017_s19 + $0x19b0] sm:$0xff]  ;;  %v20348_v16 = vld [vmem:[%s21017_s19 + $0x19a0] sm:$0xff] }
 0x317   : > { %12826 = vmatpush.bf16.msra.mxu1 %v20311_v19  ;;  %12808 = vmatmul.bf16.vlgmr.msrb.gmra.mxu3 %v3190_v7  ;;  %v20342_v7 = vld [vmem:[%s21017_s19 + $0x1970] sm:$0xff]  ;;  %v20340_v19 = vld [vmem:[%s21017_s19 + $0x1960] sm:$0xff] }
 0x318   : > { %12852 = vmatpush.bf16.msra.mxu3 %v20327_v20  ;;  %v12588_v39 = vpop.f32.mrf.mxu2  ;;  %v20356_v20 = vld [vmem:[%s21017_s19 + $0x19e0] sm:$0xff]  ;;  %v20338_v33 = vld [vmem:[%s21017_s19 + $0x1950] sm:$0xff] }
 0x319   : > { %12814 = vmatpush.bf16.msra.mxu0 %v20302_v21  ;;  %v12589_v40 = vadd.f32 %v12588_v39, %v12576_v34  ;;  %v12564_v44 = vpop.f32.mrf.mxu0  ;;  %v20331_v21 = vld [vmem:[%s21017_s19 + $0x1918] sm:$0xff]  ;;  %v20354_v34 = vld [vmem:[%s21017_s19 + $0x19d0] sm:$0xff] }
 0x31a   : > { %12840 = vmatpush.bf16.msra.mxu2 %v20318_v22  ;;  %v12601_v43 = vpop.f32.mrf.mxu3  ;;  %v20347_v22 = vld [vmem:[%s21017_s19 + $0x1998] sm:$0xff]  ;;  %v3198_v39 = vld [vmem:[#allocation1 + $0x2d] sm:$0xff] }
 0x31b   : > { %12827 = vmatpush.bf16.msra.mxu1 %v20310_v23  ;;  %v12602_v45 = vadd.f32 %v12601_v43, %v12589_v40  ;;  %v12577_v48 = vpop.f32.mrf.mxu1  ;;  %v3200_v40 = vld [vmem:[#allocation1 + $0x3f] sm:$0xff]  ;;  %v20337_v43 = vld [vmem:[%s21017_s19 + $0x1948] sm:$0xff] }
 0x31c   : > { %12853 = vmatpush.bf16.msra.mxu3 %v20326_v24  ;;  %v20353_v44 = vld [vmem:[%s21017_s19 + $0x19c8] sm:$0xff]  ;;  %v20367_v48 = vld [vmem:[%s21017_s19 + $0x1a38] sm:$0xff] }
 0x31d   : > { %12815 = vmatpush.bf16.msra.mxu0 %v20301_v25  ;;  %v20339_v25 = vld [vmem:[%s21017_s19 + $0x1958] sm:$0xff] }
 0x31e   : > { %12841 = vmatpush.bf16.msra.mxu2 %v20317_v26  ;;  %v20355_v26 = vld [vmem:[%s21017_s19 + $0x19d8] sm:$0xff] }
 0x31f   : > { %12828 = vmatpush.bf16.msra.mxu1 %v20309_v27 }
 0x320   : > { %12854 = vmatpush.bf16.msra.mxu3 %v20325_v28  ;;  %v12590_v53 = vpop.f32.mrf.mxu2 }
 0x321   : > { %12816 = vmatpush.bf16.msra.mxu0 %v20300_v31  ;;  %v20346_v31 = vld [vmem:[%s21017_s19 + $0x1990] sm:$0xff]  ;;  %v20391_v53 = vld [vmem:[%s21017_s19 + $0x1af8] sm:$0xff] }
 0x322   : > { %12842 = vmatpush.bf16.msra.mxu2 %v20316_v32  ;;  %v12603_v56 = vpop.f32.mrf.mxu3 }
 0x323   : > { %12829 = vmatpush.bf16.msra.mxu1 %v20308_v35  ;;  %v20329_v35 = vld [vmem:[%s21017_s19 + $0x1908] sm:$0xff]  ;;  %v20374_v56 = vld [vmem:[%s21017_s19 + $0x1a70] sm:$0xff] }
 0x324   : > { %12855 = vmatpush.bf16.msra.mxu3 %v20324_v36  ;;  %v20345_v36 = vld [vmem:[%s21017_s19 + $0x1988] sm:$0xff] }
 0x325   : > { %12817 = vmatpush.bf16.msra.mxu0 %v20299_v37  ;;  %v3197_v37 = vld [vmem:[#allocation1 + $0x24] sm:$0xff] }
 0x326   : > { %12843 = vmatpush.bf16.msra.mxu2 %v20315_v38  ;;  %v3199_v38 = vld [vmem:[#allocation1 + $0x36] sm:$0xff] }
 0x327   : > { %12830 = vmatpush.bf16.msra.mxu1 %v20307_v41 }
 0x328   : > { %12856 = vmatpush.bf16.msra.mxu3 %v20323_v42  ;;  %v358_v42 = vld [vmem:[%s21012_s15 + $0x68] sm:$0xff] }
 0x329   : > { %12818 = vmatpush.bf16.msra.mxu0 %v20298_v46  ;;  %3202 = vst [vmem:[#allocation1] ss:$9 sm:$0xff] %v358_v42  ;;  %v20328_v46 = vld [vmem:[%s21017_s19 + $0x1900] sm:$0xff]  ;;  %v20397_v42 = vld [vmem:[%s21017_s19 + $0x1b28] sm:$0xff] }
 0x32a   : > { %12844 = vmatpush.bf16.msra.mxu2 %v20314_v47  ;;  %v20344_v47 = vld [vmem:[%s21017_s19 + $0x1980] sm:$0xff] }
 0x32b   : > { %12831 = vmatpush.bf16.msra.mxu1 %v20306_v49  ;;  %v20383_v49 = vld [vmem:[%s21017_s19 + $0x1ab8] sm:$0xff] }
 0x32c   : > { %12857 = vmatpush.bf16.msra.mxu3 %v20322_v50  ;;  %v20336_v50 = vld [vmem:[%s21017_s19 + $0x1940] sm:$0xff] }
 0x32d   : > { %12819 = vmatpush.bf16.msra.mxu0 %v20297_v51  ;;  %v20352_v51 = vld [vmem:[%s21017_s19 + $0x19c0] sm:$0xff] }
 0x32e   : > { %12845 = vmatpush.bf16.msra.mxu2 %v20313_v52  ;;  %v20375_v52 = vld [vmem:[%s21017_s19 + $0x1a78] sm:$0xff] }
 0x32f   : > { %12832 = vmatpush.bf16.msra.mxu1 %v20305_v54  ;;  %v20366_v54 = vld [vmem:[%s21017_s19 + $0x1a30] sm:$0xff] }
 0x330   : > { %12858 = vmatpush.bf16.msra.mxu3 %v20321_v55  ;;  %v20382_v55 = vld [vmem:[%s21017_s19 + $0x1ab0] sm:$0xff] }
 0x331   : > { %12820 = vmatpush.bf16.msra.mxu0 %v20296_v57  ;;  %v12614_v13 = vpop.f32.mrf.mxu0  ;;  %v20390_v57 = vld [vmem:[%s21017_s19 + $0x1af0] sm:$0xff] }
 0x332   : > { %12846 = vmatpush.bf16.msra.mxu2 %v20312_v58  ;;  %v12615_v14 = vadd.f32 %v12614_v13, %v12602_v45  ;;  %v20365_v58 = vld [vmem:[%s21017_s19 + $0x1a28] sm:$0xff] }
 0x333   : > { %12833 = vmatpush.bf16.msra.mxu1 %v20304_v61  ;;  %v12627_v17 = vpop.f32.mrf.mxu1  ;;  %v20389_v61 = vld [vmem:[%s21017_s19 + $0x1ae8] sm:$0xff] }
 0x334   : > { %12859 = vmatpush.bf16.msra.mxu3 %v20320_v62  ;;  %12821 = vmatmul.bf16.vlgmr.msra.gmra.mxu0 %v3193_v0  ;;  %v12628_v18 = vadd.f32 %v12627_v17, %v12615_v14  ;;  %v20364_v0 = vld [vmem:[%s21017_s19 + $0x1a20] sm:$0xff] }
 0x335   : > { %12865 = vmatpush.bf16.msrb.mxu0 %v20335_v59  ;;  %12847 = vmatmul.bf16.vlgmr.msra.gmra.mxu2 %v3195_v1  ;;  %v20381_v59 = vld [vmem:[%s21017_s19 + $0x1aa8] sm:$0xff]  ;;  %v20380_v1 = vld [vmem:[%s21017_s19 + $0x1aa0] sm:$0xff] }
 0x336   : > { %12891 = vmatpush.bf16.msrb.mxu2 %v20351_v60  ;;  %12834 = vmatmul.bf16.vlgmr.msra.gmra.mxu1 %v3194_v3  ;;  %v20373_v60 = vld [vmem:[%s21017_s19 + $0x1a68] sm:$0xff] }
 0x337   : > { %12878 = vmatpush.bf16.msrb.mxu1 %v20343_v63  ;;  %12860 = vmatmul.bf16.vlgmr.msra.gmra.mxu3 %v3196_v4  ;;  %v20372_v4 = vld [vmem:[%s21017_s19 + $0x1a60] sm:$0xff] }
 0x338   : > { %12904 = vmatpush.bf16.msrb.mxu3 %v20359_v2  ;;  %v12640_v23 = vpop.f32.mrf.mxu2 }
 0x339   : > { %12866 = vmatpush.bf16.msrb.mxu0 %v20334_v5  ;;  %v12641_v24 = vadd.f32 %v12640_v23, %v12628_v18  ;;  %v12616_v28 = vpop.f32.mrf.mxu0  ;;  %v20388_v5 = vld [vmem:[%s21017_s19 + $0x1ae0] sm:$0xff]  ;;  %v20370_v18 = vld [vmem:[%s21017_s19 + $0x1a50] sm:$0xff]  ;;  %v20369_v23 = vld [vmem:[%s21017_s19 + $0x1a48] sm:$0xff] }
 0x33a   : > { %12892 = vmatpush.bf16.msrb.mxu2 %v20350_v6  ;;  %v12653_v27 = vpop.f32.mrf.mxu3  ;;  %v20363_v6 = vld [vmem:[%s21017_s19 + $0x1a18] sm:$0xff] }
 0x33b   : > { %12879 = vmatpush.bf16.msrb.mxu1 %v20342_v7  ;;  %v21880_v29 = vadd.f32 %v12653_v27, %v12641_v24  ;;  %v12629_v32 = vpop.f32.mrf.mxu1  ;;  %v20379_v7 = vld [vmem:[%s21017_s19 + $0x1a98] sm:$0xff]  ;;  %v20385_v24 = vld [vmem:[%s21017_s19 + $0x1ac8] sm:$0xff]  ;;  %v20376_v27 = vld [vmem:[%s21017_s19 + $0x1a80] sm:$0xff] }
 0x33c   : > { %12905 = vmatpush.bf16.msrb.mxu3 %v20358_v8  ;;  %v20399_v28 = vld [vmem:[%s21017_s19 + $0x1b38] sm:$0xff] }
 0x33d   : > { %12867 = vmatpush.bf16.msrb.mxu0 %v20333_v9  ;;  %v20407_v32 = vld [vmem:[%s21017_s19 + $0x1b78] sm:$0xff] }
 0x33e   : > { %12893 = vmatpush.bf16.msrb.mxu2 %v20349_v10  ;;  %v20371_v10 = vld [vmem:[%s21017_s19 + $0x1a58] sm:$0xff] }
 0x33f   : > { %12880 = vmatpush.bf16.msrb.mxu1 %v20341_v11  ;;  %v20387_v11 = vld [vmem:[%s21017_s19 + $0x1ad8] sm:$0xff] }
 0x340   : > { %12906 = vmatpush.bf16.msrb.mxu3 %v20357_v12  ;;  %v12642_v41 = vpop.f32.mrf.mxu2 }
 0x341   : > { %12868 = vmatpush.bf16.msrb.mxu0 %v20332_v15  ;;  %v20362_v15 = vld [vmem:[%s21017_s19 + $0x1a10] sm:$0xff] }
 0x342   : > { %12894 = vmatpush.bf16.msrb.mxu2 %v20348_v16  ;;  %v12655_v45 = vpop.f32.mrf.mxu3  ;;  %v20378_v16 = vld [vmem:[%s21017_s19 + $0x1a90] sm:$0xff] }
 0x343   : > { %12881 = vmatpush.bf16.msrb.mxu1 %v20340_v19  ;;  %v20386_v19 = vld [vmem:[%s21017_s19 + $0x1ad0] sm:$0xff]  ;;  %v20421_v45 = vld [vmem:[%s21017_s19 + $0x1be8] sm:$0xff] }
 0x344   : > { %12907 = vmatpush.bf16.msrb.mxu3 %v20356_v20  ;;  %v20361_v20 = vld [vmem:[%s21017_s19 + $0x1a08] sm:$0xff]  ;;  %v20422_v41 = vld [vmem:[%s21017_s19 + $0x1bf0] sm:$0xff] }
 0x345   : > { %12869 = vmatpush.bf16.msrb.mxu0 %v20331_v21  ;;  %v20377_v21 = vld [vmem:[%s21017_s19 + $0x1a88] sm:$0xff] }
 0x346   : > { %12895 = vmatpush.bf16.msrb.mxu2 %v20347_v22 }
 0x347   : > { %12882 = vmatpush.bf16.msrb.mxu1 %v20339_v25 }
 0x348   : > { %12908 = vmatpush.bf16.msrb.mxu3 %v20355_v26  ;;  %v20360_v26 = vld [vmem:[%s21017_s19 + $0x1a00] sm:$0xff] }
 0x349   : > { %12870 = vmatpush.bf16.msrb.mxu0 %v20330_v30  ;;  %v20368_v30 = vld [vmem:[%s21017_s19 + $0x1a40] sm:$0xff] }
 0x34a   : > { %12896 = vmatpush.bf16.msrb.mxu2 %v20346_v31  ;;  %v20384_v31 = vld [vmem:[%s21017_s19 + $0x1ac0] sm:$0xff] }
 0x34b   : > { %12883 = vmatpush.bf16.msrb.mxu1 %v20338_v33  ;;  %v3203_v33 = vld [vmem:[#allocation1] sm:$0xff] }
 0x34c   : > { %12909 = vmatpush.bf16.msrb.mxu3 %v20354_v34  ;;  %v3205_v34 = vld [vmem:[#allocation1 + $0x12] sm:$0xff] }
 0x34d   : > { %12871 = vmatpush.bf16.msrb.mxu0 %v20329_v35  ;;  %v20423_v35 = vld [vmem:[%s21017_s19 + $0x1bf8] sm:$0xff] }
 0x34e   : > { %12897 = vmatpush.bf16.msrb.mxu2 %v20345_v36  ;;  %v3204_v36 = vld [vmem:[#allocation1 + $0x9] sm:$0xff] }
 0x34f   : > { %12884 = vmatpush.bf16.msrb.mxu1 %v20337_v43  ;;  %v20413_v43 = vld [vmem:[%s21017_s19 + $0x1ba8] sm:$0xff] }
 0x350   : > { %12910 = vmatpush.bf16.msrb.mxu3 %v20353_v44  ;;  %v20405_v44 = vld [vmem:[%s21017_s19 + $0x1b68] sm:$0xff] }
 0x351   : > { %12872 = vmatpush.bf16.msrb.mxu0 %v20328_v46  ;;  %v12666_v62 = vpop.f32.mrf.mxu0 }
 0x352   : > { %12898 = vmatpush.bf16.msrb.mxu2 %v20344_v47  ;;  %v12667_v63 = vadd.f32 %v12666_v62, %v21880_v29  ;;  %v20415_v29 = vld [vmem:[%s21017_s19 + $0x1bb8] sm:$0xff] }
 0x353   : > { %12885 = vmatpush.bf16.msrb.mxu1 %v20336_v50  ;;  %v12679_v2 = vpop.f32.mrf.mxu1 }
 0x354   : > { %12911 = vmatpush.bf16.msrb.mxu3 %v20352_v51  ;;  %12873 = vmatmul.bf16.vlgmr.msrb.gmra.mxu0 %v3197_v37  ;;  %v12680_v3 = vadd.f32 %v12679_v2, %v12667_v63  ;;  %v3206_v37 = vld [vmem:[#allocation1 + $0x1b] sm:$0xff]  ;;  %v20394_v63 = vld [vmem:[%s21017_s19 + $0x1b10] sm:$0xff] }
 0x355   : > { %12917 = vmatpush.bf16.msra.mxu0 %v20367_v48  ;;  %12899 = vmatmul.bf16.vlgmr.msrb.gmra.mxu2 %v3199_v38  ;;  %v20398_v38 = vld [vmem:[%s21017_s19 + $0x1b30] sm:$0xff]  ;;  %v20396_v48 = vld [vmem:[%s21017_s19 + $0x1b20] sm:$0xff] }
 0x356   : > { %12943 = vmatpush.bf16.msra.mxu2 %v20383_v49  ;;  %12886 = vmatmul.bf16.vlgmr.msrb.gmra.mxu1 %v3198_v39  ;;  %v20414_v39 = vld [vmem:[%s21017_s19 + $0x1bb0] sm:$0xff]  ;;  %v20412_v49 = vld [vmem:[%s21017_s19 + $0x1ba0] sm:$0xff] }
 0x357   : > { %12930 = vmatpush.bf16.msra.mxu1 %v20375_v52  ;;  %12912 = vmatmul.bf16.vlgmr.msrb.gmra.mxu3 %v3200_v40  ;;  %v20406_v40 = vld [vmem:[%s21017_s19 + $0x1b70] sm:$0xff]  ;;  %v20404_v52 = vld [vmem:[%s21017_s19 + $0x1b60] sm:$0xff] }
 0x358   : > { %12956 = vmatpush.bf16.msra.mxu3 %v20391_v53  ;;  %v12692_v8 = vpop.f32.mrf.mxu2  ;;  %v20420_v53 = vld [vmem:[%s21017_s19 + $0x1be0] sm:$0xff]  ;;  %v20402_v2 = vld [vmem:[%s21017_s19 + $0x1b50] sm:$0xff] }
 0x359   : > { %12918 = vmatpush.bf16.msra.mxu0 %v20366_v54  ;;  %v12693_v9 = vadd.f32 %v12692_v8, %v12680_v3  ;;  %v12668_v13 = vpop.f32.mrf.mxu0  ;;  %v20395_v54 = vld [vmem:[%s21017_s19 + $0x1b18] sm:$0xff]  ;;  %v20418_v3 = vld [vmem:[%s21017_s19 + $0x1bd0] sm:$0xff] }
 0x35a   : > { %12944 = vmatpush.bf16.msra.mxu2 %v20382_v55  ;;  %v12705_v12 = vpop.f32.mrf.mxu3  ;;  %v20411_v55 = vld [vmem:[%s21017_s19 + $0x1b98] sm:$0xff]  ;;  %v3208_v8 = vld [vmem:[#allocation1 + $0x2d] sm:$0xff] }
 0x35b   : > { %12931 = vmatpush.bf16.msra.mxu1 %v20374_v56  ;;  %v12706_v14 = vadd.f32 %v12705_v12, %v12693_v9  ;;  %v12681_v17 = vpop.f32.mrf.mxu1  ;;  %v3210_v9 = vld [vmem:[#allocation1 + $0x3f] sm:$0xff]  ;;  %v20401_v12 = vld [vmem:[%s21017_s19 + $0x1b48] sm:$0xff] }
 0x35c   : > { %12957 = vmatpush.bf16.msra.mxu3 %v20390_v57  ;;  %v20417_v13 = vld [vmem:[%s21017_s19 + $0x1bc8] sm:$0xff]  ;;  %v20431_v17 = vld [vmem:[%s21017_s19 + $0x1c38] sm:$0xff] }
 0x35d   : > { %12919 = vmatpush.bf16.msra.mxu0 %v20365_v58  ;;  %v20403_v58 = vld [vmem:[%s21017_s19 + $0x1b58] sm:$0xff] }
 0x35e   : > { %12945 = vmatpush.bf16.msra.mxu2 %v20381_v59  ;;  %v20419_v59 = vld [vmem:[%s21017_s19 + $0x1bd8] sm:$0xff] }
 0x35f   : > { %12932 = vmatpush.bf16.msra.mxu1 %v20373_v60 }
 0x360   : > { %12958 = vmatpush.bf16.msra.mxu3 %v20389_v61  ;;  %v12694_v22 = vpop.f32.mrf.mxu2 }
 0x361   : > { %12920 = vmatpush.bf16.msra.mxu0 %v20364_v0  ;;  %v20410_v0 = vld [vmem:[%s21017_s19 + $0x1b90] sm:$0xff]  ;;  %v20455_v22 = vld [vmem:[%s21017_s19 + $0x1cf8] sm:$0xff] }
 0x362   : > { %12946 = vmatpush.bf16.msra.mxu2 %v20380_v1  ;;  %v12707_v25 = vpop.f32.mrf.mxu3 }
 0x363   : > { %12933 = vmatpush.bf16.msra.mxu1 %v20372_v4  ;;  %v20393_v4 = vld [vmem:[%s21017_s19 + $0x1b08] sm:$0xff]  ;;  %v20438_v25 = vld [vmem:[%s21017_s19 + $0x1c70] sm:$0xff] }
 0x364   : > { %12959 = vmatpush.bf16.msra.mxu3 %v20388_v5  ;;  %v20409_v5 = vld [vmem:[%s21017_s19 + $0x1b88] sm:$0xff] }
 0x365   : > { %12921 = vmatpush.bf16.msra.mxu0 %v20363_v6  ;;  %v3207_v6 = vld [vmem:[#allocation1 + $0x24] sm:$0xff] }
 0x366   : > { %12947 = vmatpush.bf16.msra.mxu2 %v20379_v7  ;;  %v3209_v7 = vld [vmem:[#allocation1 + $0x36] sm:$0xff] }
 0x367   : > { %12934 = vmatpush.bf16.msra.mxu1 %v20371_v10 }
 0x368   : > { %12960 = vmatpush.bf16.msra.mxu3 %v20387_v11  ;;  %v359_v11 = vld [vmem:[%s21012_s15 + $0x70] sm:$0xff] }
 0x369   : > { %12922 = vmatpush.bf16.msra.mxu0 %v20362_v15  ;;  %3212 = vst [vmem:[#allocation1] ss:$9 sm:$0xff] %v359_v11  ;;  %v20392_v15 = vld [vmem:[%s21017_s19 + $0x1b00] sm:$0xff]  ;;  %v20461_v11 = vld [vmem:[%s21017_s19 + $0x1d28] sm:$0xff] }
 0x36a   : > { %12948 = vmatpush.bf16.msra.mxu2 %v20378_v16  ;;  %v20408_v16 = vld [vmem:[%s21017_s19 + $0x1b80] sm:$0xff] }
 0x36b   : > { %12935 = vmatpush.bf16.msra.mxu1 %v20370_v18  ;;  %v20447_v18 = vld [vmem:[%s21017_s19 + $0x1cb8] sm:$0xff] }
 0x36c   : > { %12961 = vmatpush.bf16.msra.mxu3 %v20386_v19  ;;  %v20400_v19 = vld [vmem:[%s21017_s19 + $0x1b40] sm:$0xff] }
 0x36d   : > { %12923 = vmatpush.bf16.msra.mxu0 %v20361_v20  ;;  %v20416_v20 = vld [vmem:[%s21017_s19 + $0x1bc0] sm:$0xff] }
 0x36e   : > { %12949 = vmatpush.bf16.msra.mxu2 %v20377_v21  ;;  %v20439_v21 = vld [vmem:[%s21017_s19 + $0x1c78] sm:$0xff] }
 0x36f   : > { %12936 = vmatpush.bf16.msra.mxu1 %v20369_v23  ;;  %v20430_v23 = vld [vmem:[%s21017_s19 + $0x1c30] sm:$0xff] }
 0x370   : > { %12962 = vmatpush.bf16.msra.mxu3 %v20385_v24  ;;  %v20446_v24 = vld [vmem:[%s21017_s19 + $0x1cb0] sm:$0xff] }
 0x371   : > { %12924 = vmatpush.bf16.msra.mxu0 %v20360_v26  ;;  %v12718_v46 = vpop.f32.mrf.mxu0  ;;  %v20454_v26 = vld [vmem:[%s21017_s19 + $0x1cf0] sm:$0xff] }
 0x372   : > { %12950 = vmatpush.bf16.msra.mxu2 %v20376_v27  ;;  %v12719_v47 = vadd.f32 %v12718_v46, %v12706_v14  ;;  %v20429_v27 = vld [vmem:[%s21017_s19 + $0x1c28] sm:$0xff] }
 0x373   : > { %12937 = vmatpush.bf16.msra.mxu1 %v20368_v30  ;;  %v12731_v50 = vpop.f32.mrf.mxu1  ;;  %v20453_v30 = vld [vmem:[%s21017_s19 + $0x1ce8] sm:$0xff] }
 0x374   : > { %12963 = vmatpush.bf16.msra.mxu3 %v20384_v31  ;;  %12925 = vmatmul.bf16.vlgmr.msra.gmra.mxu0 %v3203_v33  ;;  %v12732_v51 = vadd.f32 %v12731_v50, %v12719_v47  ;;  %v20428_v33 = vld [vmem:[%s21017_s19 + $0x1c20] sm:$0xff] }
 0x375   : > { %12969 = vmatpush.bf16.msrb.mxu0 %v20399_v28  ;;  %12951 = vmatmul.bf16.vlgmr.msra.gmra.mxu2 %v3205_v34  ;;  %v20445_v28 = vld [vmem:[%s21017_s19 + $0x1ca8] sm:$0xff]  ;;  %v20444_v34 = vld [vmem:[%s21017_s19 + $0x1ca0] sm:$0xff] }
 0x376   : > { %12995 = vmatpush.bf16.msrb.mxu2 %v20415_v29  ;;  %12938 = vmatmul.bf16.vlgmr.msra.gmra.mxu1 %v3204_v36  ;;  %v20437_v29 = vld [vmem:[%s21017_s19 + $0x1c68] sm:$0xff] }
 0x377   : > { %12982 = vmatpush.bf16.msrb.mxu1 %v20407_v32  ;;  %12964 = vmatmul.bf16.vlgmr.msra.gmra.mxu3 %v3206_v37  ;;  %v20436_v37 = vld [vmem:[%s21017_s19 + $0x1c60] sm:$0xff] }
 0x378   : > { %13008 = vmatpush.bf16.msrb.mxu3 %v20423_v35  ;;  %v12744_v56 = vpop.f32.mrf.mxu2 }
 0x379   : > { %12970 = vmatpush.bf16.msrb.mxu0 %v20398_v38  ;;  %v12745_v57 = vadd.f32 %v12744_v56, %v12732_v51  ;;  %v12720_v61 = vpop.f32.mrf.mxu0  ;;  %v20452_v38 = vld [vmem:[%s21017_s19 + $0x1ce0] sm:$0xff]  ;;  %v20434_v51 = vld [vmem:[%s21017_s19 + $0x1c50] sm:$0xff]  ;;  %v20433_v56 = vld [vmem:[%s21017_s19 + $0x1c48] sm:$0xff] }
 0x37a   : > { %12996 = vmatpush.bf16.msrb.mxu2 %v20414_v39  ;;  %v12757_v60 = vpop.f32.mrf.mxu3  ;;  %v20427_v39 = vld [vmem:[%s21017_s19 + $0x1c18] sm:$0xff] }
 0x37b   : > { %12983 = vmatpush.bf16.msrb.mxu1 %v20406_v40  ;;  %v21948_v62 = vadd.f32 %v12757_v60, %v12745_v57  ;;  %v12733_v1 = vpop.f32.mrf.mxu1  ;;  %v20443_v40 = vld [vmem:[%s21017_s19 + $0x1c98] sm:$0xff]  ;;  %v20449_v57 = vld [vmem:[%s21017_s19 + $0x1cc8] sm:$0xff]  ;;  %v20440_v60 = vld [vmem:[%s21017_s19 + $0x1c80] sm:$0xff] }
 0x37c   : > { %13009 = vmatpush.bf16.msrb.mxu3 %v20422_v41  ;;  %v20463_v61 = vld [vmem:[%s21017_s19 + $0x1d38] sm:$0xff] }
 0x37d   : > { %12971 = vmatpush.bf16.msrb.mxu0 %v20397_v42  ;;  %v20471_v1 = vld [vmem:[%s21017_s19 + $0x1d78] sm:$0xff] }
 0x37e   : > { %12997 = vmatpush.bf16.msrb.mxu2 %v20413_v43  ;;  %v20435_v43 = vld [vmem:[%s21017_s19 + $0x1c58] sm:$0xff] }
 0x37f   : > { %12984 = vmatpush.bf16.msrb.mxu1 %v20405_v44  ;;  %v20451_v44 = vld [vmem:[%s21017_s19 + $0x1cd8] sm:$0xff] }
 0x380   : > { %13010 = vmatpush.bf16.msrb.mxu3 %v20421_v45  ;;  %v12746_v10 = vpop.f32.mrf.mxu2 }
 0x381   : > { %12972 = vmatpush.bf16.msrb.mxu0 %v20396_v48  ;;  %v20426_v48 = vld [vmem:[%s21017_s19 + $0x1c10] sm:$0xff] }
 0x382   : > { %12998 = vmatpush.bf16.msrb.mxu2 %v20412_v49  ;;  %v12759_v14 = vpop.f32.mrf.mxu3  ;;  %v20442_v49 = vld [vmem:[%s21017_s19 + $0x1c90] sm:$0xff] }
 0x383   : > { %12985 = vmatpush.bf16.msrb.mxu1 %v20404_v52  ;;  %v20450_v52 = vld [vmem:[%s21017_s19 + $0x1cd0] sm:$0xff]  ;;  %v20485_v14 = vld [vmem:[%s21017_s19 + $0x1de8] sm:$0xff] }
 0x384   : > { %13011 = vmatpush.bf16.msrb.mxu3 %v20420_v53  ;;  %v20425_v53 = vld [vmem:[%s21017_s19 + $0x1c08] sm:$0xff]  ;;  %v20486_v10 = vld [vmem:[%s21017_s19 + $0x1df0] sm:$0xff] }
 0x385   : > { %12973 = vmatpush.bf16.msrb.mxu0 %v20395_v54  ;;  %v20441_v54 = vld [vmem:[%s21017_s19 + $0x1c88] sm:$0xff] }
 0x386   : > { %12999 = vmatpush.bf16.msrb.mxu2 %v20411_v55 }
 0x387   : > { %12986 = vmatpush.bf16.msrb.mxu1 %v20403_v58 }
 0x388   : > { %13012 = vmatpush.bf16.msrb.mxu3 %v20419_v59  ;;  %v20424_v59 = vld [vmem:[%s21017_s19 + $0x1c00] sm:$0xff] }
 0x389   : > { %12974 = vmatpush.bf16.msrb.mxu0 %v20394_v63  ;;  %v20432_v63 = vld [vmem:[%s21017_s19 + $0x1c40] sm:$0xff] }
 0x38a   : > { %13000 = vmatpush.bf16.msrb.mxu2 %v20410_v0  ;;  %v20448_v0 = vld [vmem:[%s21017_s19 + $0x1cc0] sm:$0xff] }
 0x38b   : > { %12987 = vmatpush.bf16.msrb.mxu1 %v20402_v2  ;;  %v3213_v2 = vld [vmem:[#allocation1] sm:$0xff] }
 0x38c   : > { %13013 = vmatpush.bf16.msrb.mxu3 %v20418_v3  ;;  %v3215_v3 = vld [vmem:[#allocation1 + $0x12] sm:$0xff] }
 0x38d   : > { %12975 = vmatpush.bf16.msrb.mxu0 %v20393_v4  ;;  %v20487_v4 = vld [vmem:[%s21017_s19 + $0x1df8] sm:$0xff] }
 0x38e   : > { %13001 = vmatpush.bf16.msrb.mxu2 %v20409_v5  ;;  %v3214_v5 = vld [vmem:[#allocation1 + $0x9] sm:$0xff] }
 0x38f   : > { %12988 = vmatpush.bf16.msrb.mxu1 %v20401_v12  ;;  %v20477_v12 = vld [vmem:[%s21017_s19 + $0x1da8] sm:$0xff] }
 0x390   : > { %13014 = vmatpush.bf16.msrb.mxu3 %v20417_v13  ;;  %v20469_v13 = vld [vmem:[%s21017_s19 + $0x1d68] sm:$0xff] }
 0x391   : > { %12976 = vmatpush.bf16.msrb.mxu0 %v20392_v15  ;;  %v12770_v31 = vpop.f32.mrf.mxu0 }
 0x392   : > { %13002 = vmatpush.bf16.msrb.mxu2 %v20408_v16  ;;  %v12771_v32 = vadd.f32 %v12770_v31, %v21948_v62  ;;  %v20479_v62 = vld [vmem:[%s21017_s19 + $0x1db8] sm:$0xff] }
 0x393   : > { %12989 = vmatpush.bf16.msrb.mxu1 %v20400_v19  ;;  %v12783_v35 = vpop.f32.mrf.mxu1 }
 0x394   : > { %13015 = vmatpush.bf16.msrb.mxu3 %v20416_v20  ;;  %12977 = vmatmul.bf16.vlgmr.msrb.gmra.mxu0 %v3207_v6  ;;  %v12784_v36 = vadd.f32 %v12783_v35, %v12771_v32  ;;  %v3216_v6 = vld [vmem:[#allocation1 + $0x1b] sm:$0xff]  ;;  %v20458_v32 = vld [vmem:[%s21017_s19 + $0x1d10] sm:$0xff] }
 0x395   : > { %13021 = vmatpush.bf16.msra.mxu0 %v20431_v17  ;;  %13003 = vmatmul.bf16.vlgmr.msrb.gmra.mxu2 %v3209_v7  ;;  %v20462_v7 = vld [vmem:[%s21017_s19 + $0x1d30] sm:$0xff]  ;;  %v20460_v17 = vld [vmem:[%s21017_s19 + $0x1d20] sm:$0xff] }
 0x396   : > { %13047 = vmatpush.bf16.msra.mxu2 %v20447_v18  ;;  %12990 = vmatmul.bf16.vlgmr.msrb.gmra.mxu1 %v3208_v8  ;;  %v20478_v8 = vld [vmem:[%s21017_s19 + $0x1db0] sm:$0xff]  ;;  %v20476_v18 = vld [vmem:[%s21017_s19 + $0x1da0] sm:$0xff] }
 0x397   : > { %13034 = vmatpush.bf16.msra.mxu1 %v20439_v21  ;;  %13016 = vmatmul.bf16.vlgmr.msrb.gmra.mxu3 %v3210_v9  ;;  %v20470_v9 = vld [vmem:[%s21017_s19 + $0x1d70] sm:$0xff]  ;;  %v20468_v21 = vld [vmem:[%s21017_s19 + $0x1d60] sm:$0xff] }
 0x398   : > { %13060 = vmatpush.bf16.msra.mxu3 %v20455_v22  ;;  %v12796_v41 = vpop.f32.mrf.mxu2  ;;  %v20484_v22 = vld [vmem:[%s21017_s19 + $0x1de0] sm:$0xff]  ;;  %v20466_v35 = vld [vmem:[%s21017_s19 + $0x1d50] sm:$0xff] }
 0x399   : > { %13022 = vmatpush.bf16.msra.mxu0 %v20430_v23  ;;  %v12797_v42 = vadd.f32 %v12796_v41, %v12784_v36  ;;  %v12772_v46 = vpop.f32.mrf.mxu0  ;;  %v20459_v23 = vld [vmem:[%s21017_s19 + $0x1d18] sm:$0xff]  ;;  %v20482_v36 = vld [vmem:[%s21017_s19 + $0x1dd0] sm:$0xff] }
 0x39a   : > { %13048 = vmatpush.bf16.msra.mxu2 %v20446_v24  ;;  %v12809_v45 = vpop.f32.mrf.mxu3  ;;  %v20475_v24 = vld [vmem:[%s21017_s19 + $0x1d98] sm:$0xff]  ;;  %v3218_v41 = vld [vmem:[#allocation1 + $0x2d] sm:$0xff] }
 0x39b   : > { %13035 = vmatpush.bf16.msra.mxu1 %v20438_v25  ;;  %v12810_v47 = vadd.f32 %v12809_v45, %v12797_v42  ;;  %v12785_v50 = vpop.f32.mrf.mxu1  ;;  %v3220_v42 = vld [vmem:[#allocation1 + $0x3f] sm:$0xff]  ;;  %v20465_v45 = vld [vmem:[%s21017_s19 + $0x1d48] sm:$0xff] }
 0x39c   : > { %13061 = vmatpush.bf16.msra.mxu3 %v20454_v26  ;;  %v20481_v46 = vld [vmem:[%s21017_s19 + $0x1dc8] sm:$0xff]  ;;  %v20495_v50 = vld [vmem:[%s21017_s19 + $0x1e38] sm:$0xff] }
 0x39d   : > { %13023 = vmatpush.bf16.msra.mxu0 %v20429_v27  ;;  %v20467_v27 = vld [vmem:[%s21017_s19 + $0x1d58] sm:$0xff] }
 0x39e   : > { %13049 = vmatpush.bf16.msra.mxu2 %v20445_v28  ;;  %v20483_v28 = vld [vmem:[%s21017_s19 + $0x1dd8] sm:$0xff] }
 0x39f   : > { %13036 = vmatpush.bf16.msra.mxu1 %v20437_v29 }
 0x3a0   : > { %13062 = vmatpush.bf16.msra.mxu3 %v20453_v30  ;;  %v12798_v55 = vpop.f32.mrf.mxu2 }
 0x3a1   : > { %13024 = vmatpush.bf16.msra.mxu0 %v20428_v33  ;;  %v20474_v33 = vld [vmem:[%s21017_s19 + $0x1d90] sm:$0xff]  ;;  %v20519_v55 = vld [vmem:[%s21017_s19 + $0x1ef8] sm:$0xff] }
 0x3a2   : > { %13050 = vmatpush.bf16.msra.mxu2 %v20444_v34  ;;  %v12811_v58 = vpop.f32.mrf.mxu3 }
 0x3a3   : > { %13037 = vmatpush.bf16.msra.mxu1 %v20436_v37  ;;  %v20457_v37 = vld [vmem:[%s21017_s19 + $0x1d08] sm:$0xff]  ;;  %v20502_v58 = vld [vmem:[%s21017_s19 + $0x1e70] sm:$0xff] }
 0x3a4   : > { %13063 = vmatpush.bf16.msra.mxu3 %v20452_v38  ;;  %v20473_v38 = vld [vmem:[%s21017_s19 + $0x1d88] sm:$0xff] }
 0x3a5   : > { %13025 = vmatpush.bf16.msra.mxu0 %v20427_v39  ;;  %v3217_v39 = vld [vmem:[#allocation1 + $0x24] sm:$0xff] }
 0x3a6   : > { %13051 = vmatpush.bf16.msra.mxu2 %v20443_v40  ;;  %v3219_v40 = vld [vmem:[#allocation1 + $0x36] sm:$0xff] }
 0x3a7   : > { %13038 = vmatpush.bf16.msra.mxu1 %v20435_v43 }
 0x3a8   : > { %13064 = vmatpush.bf16.msra.mxu3 %v20451_v44  ;;  %v360_v44 = vld [vmem:[%s21012_s15 + $0x78] sm:$0xff] }
 0x3a9   : > { %13026 = vmatpush.bf16.msra.mxu0 %v20426_v48  ;;  %3222 = vst [vmem:[#allocation1] ss:$9 sm:$0xff] %v360_v44  ;;  %v20456_v48 = vld [vmem:[%s21017_s19 + $0x1d00] sm:$0xff]  ;;  %v20525_v44 = vld [vmem:[%s21017_s19 + $0x1f28] sm:$0xff] }
 0x3aa   : > { %13052 = vmatpush.bf16.msra.mxu2 %v20442_v49  ;;  %v20472_v49 = vld [vmem:[%s21017_s19 + $0x1d80] sm:$0xff] }
 0x3ab   : > { %13039 = vmatpush.bf16.msra.mxu1 %v20434_v51  ;;  %v20511_v51 = vld [vmem:[%s21017_s19 + $0x1eb8] sm:$0xff] }
 0x3ac   : > { %13065 = vmatpush.bf16.msra.mxu3 %v20450_v52  ;;  %v20464_v52 = vld [vmem:[%s21017_s19 + $0x1d40] sm:$0xff] }
 0x3ad   : > { %13027 = vmatpush.bf16.msra.mxu0 %v20425_v53  ;;  %v20480_v53 = vld [vmem:[%s21017_s19 + $0x1dc0] sm:$0xff] }
 0x3ae   : > { %13053 = vmatpush.bf16.msra.mxu2 %v20441_v54  ;;  %v20503_v54 = vld [vmem:[%s21017_s19 + $0x1e78] sm:$0xff] }
 0x3af   : > { %13040 = vmatpush.bf16.msra.mxu1 %v20433_v56  ;;  %v20494_v56 = vld [vmem:[%s21017_s19 + $0x1e30] sm:$0xff] }
 0x3b0   : > { %13066 = vmatpush.bf16.msra.mxu3 %v20449_v57  ;;  %v20510_v57 = vld [vmem:[%s21017_s19 + $0x1eb0] sm:$0xff] }
 0x3b1   : > { %13028 = vmatpush.bf16.msra.mxu0 %v20424_v59  ;;  %v12822_v15 = vpop.f32.mrf.mxu0  ;;  %v20518_v59 = vld [vmem:[%s21017_s19 + $0x1ef0] sm:$0xff] }
 0x3b2   : > { %13054 = vmatpush.bf16.msra.mxu2 %v20440_v60  ;;  %v12823_v16 = vadd.f32 %v12822_v15, %v12810_v47  ;;  %v20493_v60 = vld [vmem:[%s21017_s19 + $0x1e28] sm:$0xff] }
 0x3b3   : > { %13041 = vmatpush.bf16.msra.mxu1 %v20432_v63  ;;  %v12835_v19 = vpop.f32.mrf.mxu1  ;;  %v20517_v63 = vld [vmem:[%s21017_s19 + $0x1ee8] sm:$0xff] }
 0x3b4   : > { %13067 = vmatpush.bf16.msra.mxu3 %v20448_v0  ;;  %13029 = vmatmul.bf16.vlgmr.msra.gmra.mxu0 %v3213_v2  ;;  %v12836_v20 = vadd.f32 %v12835_v19, %v12823_v16  ;;  %v20492_v2 = vld [vmem:[%s21017_s19 + $0x1e20] sm:$0xff] }
 0x3b5   : > { %13073 = vmatpush.bf16.msrb.mxu0 %v20463_v61  ;;  %13055 = vmatmul.bf16.vlgmr.msra.gmra.mxu2 %v3215_v3  ;;  %v20509_v61 = vld [vmem:[%s21017_s19 + $0x1ea8] sm:$0xff]  ;;  %v20508_v3 = vld [vmem:[%s21017_s19 + $0x1ea0] sm:$0xff] }
 0x3b6   : > { %13099 = vmatpush.bf16.msrb.mxu2 %v20479_v62  ;;  %13042 = vmatmul.bf16.vlgmr.msra.gmra.mxu1 %v3214_v5  ;;  %v20501_v62 = vld [vmem:[%s21017_s19 + $0x1e68] sm:$0xff] }
 0x3b7   : > { %13086 = vmatpush.bf16.msrb.mxu1 %v20471_v1  ;;  %13068 = vmatmul.bf16.vlgmr.msra.gmra.mxu3 %v3216_v6  ;;  %v20500_v6 = vld [vmem:[%s21017_s19 + $0x1e60] sm:$0xff] }
 0x3b8   : > { %13112 = vmatpush.bf16.msrb.mxu3 %v20487_v4  ;;  %v12848_v25 = vpop.f32.mrf.mxu2 }
 0x3b9   : > { %13074 = vmatpush.bf16.msrb.mxu0 %v20462_v7  ;;  %v12849_v26 = vadd.f32 %v12848_v25, %v12836_v20  ;;  %v12824_v30 = vpop.f32.mrf.mxu0  ;;  %v20516_v7 = vld [vmem:[%s21017_s19 + $0x1ee0] sm:$0xff]  ;;  %v20498_v20 = vld [vmem:[%s21017_s19 + $0x1e50] sm:$0xff]  ;;  %v20497_v25 = vld [vmem:[%s21017_s19 + $0x1e48] sm:$0xff] }
 0x3ba   : > { %13100 = vmatpush.bf16.msrb.mxu2 %v20478_v8  ;;  %v12861_v29 = vpop.f32.mrf.mxu3  ;;  %v20491_v8 = vld [vmem:[%s21017_s19 + $0x1e18] sm:$0xff] }
 0x3bb   : > { %13087 = vmatpush.bf16.msrb.mxu1 %v20470_v9  ;;  %v22016_v31 = vadd.f32 %v12861_v29, %v12849_v26  ;;  %v12837_v34 = vpop.f32.mrf.mxu1  ;;  %v20507_v9 = vld [vmem:[%s21017_s19 + $0x1e98] sm:$0xff]  ;;  %v20513_v26 = vld [vmem:[%s21017_s19 + $0x1ec8] sm:$0xff]  ;;  %v20504_v29 = vld [vmem:[%s21017_s19 + $0x1e80] sm:$0xff] }
 0x3bc   : > { %13113 = vmatpush.bf16.msrb.mxu3 %v20486_v10  ;;  %v20527_v30 = vld [vmem:[%s21017_s19 + $0x1f38] sm:$0xff] }
 0x3bd   : > { %13075 = vmatpush.bf16.msrb.mxu0 %v20461_v11  ;;  %v20535_v34 = vld [vmem:[%s21017_s19 + $0x1f78] sm:$0xff] }
 0x3be   : > { %13101 = vmatpush.bf16.msrb.mxu2 %v20477_v12  ;;  %v20499_v12 = vld [vmem:[%s21017_s19 + $0x1e58] sm:$0xff] }
 0x3bf   : > { %13088 = vmatpush.bf16.msrb.mxu1 %v20469_v13  ;;  %v20515_v13 = vld [vmem:[%s21017_s19 + $0x1ed8] sm:$0xff] }
 0x3c0   : > { %13114 = vmatpush.bf16.msrb.mxu3 %v20485_v14  ;;  %v12850_v43 = vpop.f32.mrf.mxu2 }
 0x3c1   : > { %13076 = vmatpush.bf16.msrb.mxu0 %v20460_v17  ;;  %v20490_v17 = vld [vmem:[%s21017_s19 + $0x1e10] sm:$0xff] }
 0x3c2   : > { %13102 = vmatpush.bf16.msrb.mxu2 %v20476_v18  ;;  %v12863_v47 = vpop.f32.mrf.mxu3  ;;  %v20506_v18 = vld [vmem:[%s21017_s19 + $0x1e90] sm:$0xff] }
 0x3c3   : > { %13089 = vmatpush.bf16.msrb.mxu1 %v20468_v21  ;;  %v20514_v21 = vld [vmem:[%s21017_s19 + $0x1ed0] sm:$0xff]  ;;  %v20549_v47 = vld [vmem:[%s21017_s19 + $0x1fe8] sm:$0xff] }
 0x3c4   : > { %13115 = vmatpush.bf16.msrb.mxu3 %v20484_v22  ;;  %v20489_v22 = vld [vmem:[%s21017_s19 + $0x1e08] sm:$0xff]  ;;  %v20550_v43 = vld [vmem:[%s21017_s19 + $0x1ff0] sm:$0xff] }
 0x3c5   : > { %13077 = vmatpush.bf16.msrb.mxu0 %v20459_v23  ;;  %v20505_v23 = vld [vmem:[%s21017_s19 + $0x1e88] sm:$0xff] }
 0x3c6   : > { %13103 = vmatpush.bf16.msrb.mxu2 %v20475_v24 }
 0x3c7   : > { %13090 = vmatpush.bf16.msrb.mxu1 %v20467_v27 }
 0x3c8   : > { %13116 = vmatpush.bf16.msrb.mxu3 %v20483_v28  ;;  %v20488_v28 = vld [vmem:[%s21017_s19 + $0x1e00] sm:$0xff] }
 0x3c9   : > { %13078 = vmatpush.bf16.msrb.mxu0 %v20458_v32  ;;  %v20496_v32 = vld [vmem:[%s21017_s19 + $0x1e40] sm:$0xff] }
 0x3ca   : > { %13104 = vmatpush.bf16.msrb.mxu2 %v20474_v33  ;;  %v20512_v33 = vld [vmem:[%s21017_s19 + $0x1ec0] sm:$0xff] }
 0x3cb   : > { %13091 = vmatpush.bf16.msrb.mxu1 %v20466_v35  ;;  %v3223_v35 = vld [vmem:[#allocation1] sm:$0xff] }
 0x3cc   : > { %13117 = vmatpush.bf16.msrb.mxu3 %v20482_v36  ;;  %v3225_v36 = vld [vmem:[#allocation1 + $0x12] sm:$0xff] }
 0x3cd   : > { %13079 = vmatpush.bf16.msrb.mxu0 %v20457_v37  ;;  %v20551_v37 = vld [vmem:[%s21017_s19 + $0x1ff8] sm:$0xff] }
 0x3ce   : > { %13105 = vmatpush.bf16.msrb.mxu2 %v20473_v38  ;;  %v3224_v38 = vld [vmem:[#allocation1 + $0x9] sm:$0xff] }
 0x3cf   : > { %13092 = vmatpush.bf16.msrb.mxu1 %v20465_v45  ;;  %v20541_v45 = vld [vmem:[%s21017_s19 + $0x1fa8] sm:$0xff] }
 0x3d0   : > { %13118 = vmatpush.bf16.msrb.mxu3 %v20481_v46  ;;  %v20533_v46 = vld [vmem:[%s21017_s19 + $0x1f68] sm:$0xff] }
 0x3d1   : > { %13080 = vmatpush.bf16.msrb.mxu0 %v20456_v48  ;;  %v12874_v0 = vpop.f32.mrf.mxu0 }
 0x3d2   : > { %13106 = vmatpush.bf16.msrb.mxu2 %v20472_v49  ;;  %v12875_v1 = vadd.f32 %v12874_v0, %v22016_v31  ;;  %v20543_v31 = vld [vmem:[%s21017_s19 + $0x1fb8] sm:$0xff] }
 0x3d3   : > { %13093 = vmatpush.bf16.msrb.mxu1 %v20464_v52  ;;  %v12887_v4 = vpop.f32.mrf.mxu1 }
 0x3d4   : > { %13119 = vmatpush.bf16.msrb.mxu3 %v20480_v53  ;;  %13081 = vmatmul.bf16.vlgmr.msrb.gmra.mxu0 %v3217_v39  ;;  %v12888_v5 = vadd.f32 %v12887_v4, %v12875_v1  ;;  %v3226_v39 = vld [vmem:[#allocation1 + $0x1b] sm:$0xff]  ;;  %v20522_v1 = vld [vmem:[%s21017_s19 + $0x1f10] sm:$0xff] }
 0x3d5   : > { %13125 = vmatpush.bf16.msra.mxu0 %v20495_v50  ;;  %13107 = vmatmul.bf16.vlgmr.msrb.gmra.mxu2 %v3219_v40  ;;  %v20526_v40 = vld [vmem:[%s21017_s19 + $0x1f30] sm:$0xff]  ;;  %v20524_v50 = vld [vmem:[%s21017_s19 + $0x1f20] sm:$0xff] }
 0x3d6   : > { %13151 = vmatpush.bf16.msra.mxu2 %v20511_v51  ;;  %13094 = vmatmul.bf16.vlgmr.msrb.gmra.mxu1 %v3218_v41  ;;  %v20542_v41 = vld [vmem:[%s21017_s19 + $0x1fb0] sm:$0xff]  ;;  %v20540_v51 = vld [vmem:[%s21017_s19 + $0x1fa0] sm:$0xff] }
 0x3d7   : > { %13138 = vmatpush.bf16.msra.mxu1 %v20503_v54  ;;  %13120 = vmatmul.bf16.vlgmr.msrb.gmra.mxu3 %v3220_v42  ;;  %v20534_v42 = vld [vmem:[%s21017_s19 + $0x1f70] sm:$0xff]  ;;  %v20532_v54 = vld [vmem:[%s21017_s19 + $0x1f60] sm:$0xff] }
 0x3d8   : > { %13164 = vmatpush.bf16.msra.mxu3 %v20519_v55  ;;  %v12900_v10 = vpop.f32.mrf.mxu2  ;;  %v20548_v55 = vld [vmem:[%s21017_s19 + $0x1fe0] sm:$0xff]  ;;  %v20530_v4 = vld [vmem:[%s21017_s19 + $0x1f50] sm:$0xff] }
 0x3d9   : > { %13126 = vmatpush.bf16.msra.mxu0 %v20494_v56  ;;  %v12901_v11 = vadd.f32 %v12900_v10, %v12888_v5  ;;  %v12876_v15 = vpop.f32.mrf.mxu0  ;;  %v20523_v56 = vld [vmem:[%s21017_s19 + $0x1f18] sm:$0xff]  ;;  %v20546_v5 = vld [vmem:[%s21017_s19 + $0x1fd0] sm:$0xff] }
 0x3da   : > { %13152 = vmatpush.bf16.msra.mxu2 %v20510_v57  ;;  %v12913_v14 = vpop.f32.mrf.mxu3  ;;  %v20539_v57 = vld [vmem:[%s21017_s19 + $0x1f98] sm:$0xff]  ;;  %v3228_v10 = vld [vmem:[#allocation1 + $0x2d] sm:$0xff] }
 0x3db   : > { %13139 = vmatpush.bf16.msra.mxu1 %v20502_v58  ;;  %v12914_v16 = vadd.f32 %v12913_v14, %v12901_v11  ;;  %v12889_v19 = vpop.f32.mrf.mxu1  ;;  %v3230_v11 = vld [vmem:[#allocation1 + $0x3f] sm:$0xff]  ;;  %v20529_v14 = vld [vmem:[%s21017_s19 + $0x1f48] sm:$0xff] }
 0x3dc   : > { %13165 = vmatpush.bf16.msra.mxu3 %v20518_v59  ;;  %v20545_v15 = vld [vmem:[%s21017_s19 + $0x1fc8] sm:$0xff]  ;;  %v20559_v19 = vld [vmem:[%s21017_s19 + $0x2038] sm:$0xff] }
 0x3dd   : > { %13127 = vmatpush.bf16.msra.mxu0 %v20493_v60  ;;  %v20531_v60 = vld [vmem:[%s21017_s19 + $0x1f58] sm:$0xff] }
 0x3de   : > { %13153 = vmatpush.bf16.msra.mxu2 %v20509_v61  ;;  %v20547_v61 = vld [vmem:[%s21017_s19 + $0x1fd8] sm:$0xff] }
 0x3df   : > { %13140 = vmatpush.bf16.msra.mxu1 %v20501_v62 }
 0x3e0   : > { %13166 = vmatpush.bf16.msra.mxu3 %v20517_v63  ;;  %v12902_v24 = vpop.f32.mrf.mxu2 }
 0x3e1   : > { %13128 = vmatpush.bf16.msra.mxu0 %v20492_v2  ;;  %v20538_v2 = vld [vmem:[%s21017_s19 + $0x1f90] sm:$0xff]  ;;  %v20583_v24 = vld [vmem:[%s21017_s19 + $0x20f8] sm:$0xff] }
 0x3e2   : > { %13154 = vmatpush.bf16.msra.mxu2 %v20508_v3  ;;  %v12915_v27 = vpop.f32.mrf.mxu3 }
 0x3e3   : > { %13141 = vmatpush.bf16.msra.mxu1 %v20500_v6  ;;  %v20521_v6 = vld [vmem:[%s21017_s19 + $0x1f08] sm:$0xff]  ;;  %v20566_v27 = vld [vmem:[%s21017_s19 + $0x2070] sm:$0xff] }
 0x3e4   : > { %13167 = vmatpush.bf16.msra.mxu3 %v20516_v7  ;;  %v20537_v7 = vld [vmem:[%s21017_s19 + $0x1f88] sm:$0xff] }
 0x3e5   : > { %13129 = vmatpush.bf16.msra.mxu0 %v20491_v8  ;;  %v3227_v8 = vld [vmem:[#allocation1 + $0x24] sm:$0xff] }
 0x3e6   : > { %13155 = vmatpush.bf16.msra.mxu2 %v20507_v9  ;;  %v3229_v9 = vld [vmem:[#allocation1 + $0x36] sm:$0xff] }
 0x3e7   : > { %13142 = vmatpush.bf16.msra.mxu1 %v20499_v12 }
 0x3e8   : > { %13168 = vmatpush.bf16.msra.mxu3 %v20515_v13  ;;  %v361_v13 = vld [vmem:[%s21012_s15 + $0x80] sm:$0xff] }
 0x3e9   : > { %13130 = vmatpush.bf16.msra.mxu0 %v20490_v17  ;;  %3232 = vst [vmem:[#allocation1] ss:$9 sm:$0xff] %v361_v13  ;;  %v20520_v17 = vld [vmem:[%s21017_s19 + $0x1f00] sm:$0xff]  ;;  %v20589_v13 = vld [vmem:[%s21017_s19 + $0x2128] sm:$0xff] }
 0x3ea   : > { %13156 = vmatpush.bf16.msra.mxu2 %v20506_v18  ;;  %v20536_v18 = vld [vmem:[%s21017_s19 + $0x1f80] sm:$0xff] }
 0x3eb   : > { %13143 = vmatpush.bf16.msra.mxu1 %v20498_v20  ;;  %v20575_v20 = vld [vmem:[%s21017_s19 + $0x20b8] sm:$0xff] }
 0x3ec   : > { %13169 = vmatpush.bf16.msra.mxu3 %v20514_v21  ;;  %v20528_v21 = vld [vmem:[%s21017_s19 + $0x1f40] sm:$0xff] }
 0x3ed   : > { %13131 = vmatpush.bf16.msra.mxu0 %v20489_v22  ;;  %v20544_v22 = vld [vmem:[%s21017_s19 + $0x1fc0] sm:$0xff] }
 0x3ee   : > { %13157 = vmatpush.bf16.msra.mxu2 %v20505_v23  ;;  %v20567_v23 = vld [vmem:[%s21017_s19 + $0x2078] sm:$0xff] }
 0x3ef   : > { %13144 = vmatpush.bf16.msra.mxu1 %v20497_v25  ;;  %v20558_v25 = vld [vmem:[%s21017_s19 + $0x2030] sm:$0xff] }
 0x3f0   : > { %13170 = vmatpush.bf16.msra.mxu3 %v20513_v26  ;;  %v20574_v26 = vld [vmem:[%s21017_s19 + $0x20b0] sm:$0xff] }
 0x3f1   : > { %13132 = vmatpush.bf16.msra.mxu0 %v20488_v28  ;;  %v12926_v48 = vpop.f32.mrf.mxu0  ;;  %v20582_v28 = vld [vmem:[%s21017_s19 + $0x20f0] sm:$0xff] }
 0x3f2   : > { %13158 = vmatpush.bf16.msra.mxu2 %v20504_v29  ;;  %v12927_v49 = vadd.f32 %v12926_v48, %v12914_v16  ;;  %v20557_v29 = vld [vmem:[%s21017_s19 + $0x2028] sm:$0xff] }
 0x3f3   : > { %13145 = vmatpush.bf16.msra.mxu1 %v20496_v32  ;;  %v12939_v52 = vpop.f32.mrf.mxu1  ;;  %v20581_v32 = vld [vmem:[%s21017_s19 + $0x20e8] sm:$0xff] }
 0x3f4   : > { %13171 = vmatpush.bf16.msra.mxu3 %v20512_v33  ;;  %13133 = vmatmul.bf16.vlgmr.msra.gmra.mxu0 %v3223_v35  ;;  %v12940_v53 = vadd.f32 %v12939_v52, %v12927_v49  ;;  %v20556_v35 = vld [vmem:[%s21017_s19 + $0x2020] sm:$0xff] }
 0x3f5   : > { %13177 = vmatpush.bf16.msrb.mxu0 %v20527_v30  ;;  %13159 = vmatmul.bf16.vlgmr.msra.gmra.mxu2 %v3225_v36  ;;  %v20573_v30 = vld [vmem:[%s21017_s19 + $0x20a8] sm:$0xff]  ;;  %v20572_v36 = vld [vmem:[%s21017_s19 + $0x20a0] sm:$0xff] }
 0x3f6   : > { %13203 = vmatpush.bf16.msrb.mxu2 %v20543_v31  ;;  %13146 = vmatmul.bf16.vlgmr.msra.gmra.mxu1 %v3224_v38  ;;  %v20565_v31 = vld [vmem:[%s21017_s19 + $0x2068] sm:$0xff] }
 0x3f7   : > { %13190 = vmatpush.bf16.msrb.mxu1 %v20535_v34  ;;  %13172 = vmatmul.bf16.vlgmr.msra.gmra.mxu3 %v3226_v39  ;;  %v20564_v39 = vld [vmem:[%s21017_s19 + $0x2060] sm:$0xff] }
 0x3f8   : > { %13216 = vmatpush.bf16.msrb.mxu3 %v20551_v37  ;;  %v12952_v58 = vpop.f32.mrf.mxu2 }
 0x3f9   : > { %13178 = vmatpush.bf16.msrb.mxu0 %v20526_v40  ;;  %v12953_v59 = vadd.f32 %v12952_v58, %v12940_v53  ;;  %v12928_v63 = vpop.f32.mrf.mxu0  ;;  %v20580_v40 = vld [vmem:[%s21017_s19 + $0x20e0] sm:$0xff]  ;;  %v20562_v53 = vld [vmem:[%s21017_s19 + $0x2050] sm:$0xff]  ;;  %v20561_v58 = vld [vmem:[%s21017_s19 + $0x2048] sm:$0xff] }
 0x3fa   : > { %13204 = vmatpush.bf16.msrb.mxu2 %v20542_v41  ;;  %v12965_v62 = vpop.f32.mrf.mxu3  ;;  %v20555_v41 = vld [vmem:[%s21017_s19 + $0x2018] sm:$0xff] }
 0x3fb   : > { %13191 = vmatpush.bf16.msrb.mxu1 %v20534_v42  ;;  %v22084_v0 = vadd.f32 %v12965_v62, %v12953_v59  ;;  %v12941_v3 = vpop.f32.mrf.mxu1  ;;  %v20571_v42 = vld [vmem:[%s21017_s19 + $0x2098] sm:$0xff]  ;;  %v20577_v59 = vld [vmem:[%s21017_s19 + $0x20c8] sm:$0xff]  ;;  %v20568_v62 = vld [vmem:[%s21017_s19 + $0x2080] sm:$0xff] }
 0x3fc   : > { %13217 = vmatpush.bf16.msrb.mxu3 %v20550_v43  ;;  %v20591_v63 = vld [vmem:[%s21017_s19 + $0x2138] sm:$0xff] }
 0x3fd   : > { %13179 = vmatpush.bf16.msrb.mxu0 %v20525_v44  ;;  %v20599_v3 = vld [vmem:[%s21017_s19 + $0x2178] sm:$0xff] }
 0x3fe   : > { %13205 = vmatpush.bf16.msrb.mxu2 %v20541_v45  ;;  %v20563_v45 = vld [vmem:[%s21017_s19 + $0x2058] sm:$0xff] }
 0x3ff   : > { %13192 = vmatpush.bf16.msrb.mxu1 %v20533_v46  ;;  %v20579_v46 = vld [vmem:[%s21017_s19 + $0x20d8] sm:$0xff] }
 0x400   : > { %13218 = vmatpush.bf16.msrb.mxu3 %v20549_v47  ;;  %v12954_v12 = vpop.f32.mrf.mxu2 }
 0x401   : > { %13180 = vmatpush.bf16.msrb.mxu0 %v20524_v50  ;;  %v20554_v50 = vld [vmem:[%s21017_s19 + $0x2010] sm:$0xff] }
 0x402   : > { %13206 = vmatpush.bf16.msrb.mxu2 %v20540_v51  ;;  %v12967_v16 = vpop.f32.mrf.mxu3  ;;  %v20570_v51 = vld [vmem:[%s21017_s19 + $0x2090] sm:$0xff] }
 0x403   : > { %13193 = vmatpush.bf16.msrb.mxu1 %v20532_v54  ;;  %v20578_v54 = vld [vmem:[%s21017_s19 + $0x20d0] sm:$0xff]  ;;  %v20613_v16 = vld [vmem:[%s21017_s19 + $0x21e8] sm:$0xff] }
 0x404   : > { %13219 = vmatpush.bf16.msrb.mxu3 %v20548_v55  ;;  %v20553_v55 = vld [vmem:[%s21017_s19 + $0x2008] sm:$0xff]  ;;  %v20614_v12 = vld [vmem:[%s21017_s19 + $0x21f0] sm:$0xff] }
 0x405   : > { %13181 = vmatpush.bf16.msrb.mxu0 %v20523_v56  ;;  %v20569_v56 = vld [vmem:[%s21017_s19 + $0x2088] sm:$0xff] }
 0x406   : > { %13207 = vmatpush.bf16.msrb.mxu2 %v20539_v57 }
 0x407   : > { %13194 = vmatpush.bf16.msrb.mxu1 %v20531_v60 }
 0x408   : > { %13220 = vmatpush.bf16.msrb.mxu3 %v20547_v61  ;;  %v20552_v61 = vld [vmem:[%s21017_s19 + $0x2000] sm:$0xff] }
 0x409   : > { %13182 = vmatpush.bf16.msrb.mxu0 %v20522_v1  ;;  %v20560_v1 = vld [vmem:[%s21017_s19 + $0x2040] sm:$0xff] }
 0x40a   : > { %13208 = vmatpush.bf16.msrb.mxu2 %v20538_v2  ;;  %v20576_v2 = vld [vmem:[%s21017_s19 + $0x20c0] sm:$0xff] }
 0x40b   : > { %13195 = vmatpush.bf16.msrb.mxu1 %v20530_v4  ;;  %v3233_v4 = vld [vmem:[#allocation1] sm:$0xff] }
 0x40c   : > { %13221 = vmatpush.bf16.msrb.mxu3 %v20546_v5  ;;  %v3235_v5 = vld [vmem:[#allocation1 + $0x12] sm:$0xff] }
 0x40d   : > { %13183 = vmatpush.bf16.msrb.mxu0 %v20521_v6  ;;  %v20615_v6 = vld [vmem:[%s21017_s19 + $0x21f8] sm:$0xff] }
 0x40e   : > { %13209 = vmatpush.bf16.msrb.mxu2 %v20537_v7  ;;  %v3234_v7 = vld [vmem:[#allocation1 + $0x9] sm:$0xff] }
 0x40f   : > { %13196 = vmatpush.bf16.msrb.mxu1 %v20529_v14  ;;  %v20605_v14 = vld [vmem:[%s21017_s19 + $0x21a8] sm:$0xff] }
 0x410   : > { %13222 = vmatpush.bf16.msrb.mxu3 %v20545_v15  ;;  %v20597_v15 = vld [vmem:[%s21017_s19 + $0x2168] sm:$0xff] }
 0x411   : > { %13184 = vmatpush.bf16.msrb.mxu0 %v20520_v17  ;;  %v12978_v33 = vpop.f32.mrf.mxu0 }
 0x412   : > { %13210 = vmatpush.bf16.msrb.mxu2 %v20536_v18  ;;  %v12979_v34 = vadd.f32 %v12978_v33, %v22084_v0  ;;  %v20607_v0 = vld [vmem:[%s21017_s19 + $0x21b8] sm:$0xff] }
 0x413   : > { %13197 = vmatpush.bf16.msrb.mxu1 %v20528_v21  ;;  %v12991_v37 = vpop.f32.mrf.mxu1 }
 0x414   : > { %13223 = vmatpush.bf16.msrb.mxu3 %v20544_v22  ;;  %13185 = vmatmul.bf16.vlgmr.msrb.gmra.mxu0 %v3227_v8  ;;  %v12992_v38 = vadd.f32 %v12991_v37, %v12979_v34  ;;  %v3236_v8 = vld [vmem:[#allocation1 + $0x1b] sm:$0xff]  ;;  %v20586_v34 = vld [vmem:[%s21017_s19 + $0x2110] sm:$0xff] }
 0x415   : > { %13229 = vmatpush.bf16.msra.mxu0 %v20559_v19  ;;  %13211 = vmatmul.bf16.vlgmr.msrb.gmra.mxu2 %v3229_v9  ;;  %v20590_v9 = vld [vmem:[%s21017_s19 + $0x2130] sm:$0xff]  ;;  %v20588_v19 = vld [vmem:[%s21017_s19 + $0x2120] sm:$0xff] }
 0x416   : > { %13255 = vmatpush.bf16.msra.mxu2 %v20575_v20  ;;  %13198 = vmatmul.bf16.vlgmr.msrb.gmra.mxu1 %v3228_v10  ;;  %v20606_v10 = vld [vmem:[%s21017_s19 + $0x21b0] sm:$0xff]  ;;  %v20604_v20 = vld [vmem:[%s21017_s19 + $0x21a0] sm:$0xff] }
 0x417   : > { %13242 = vmatpush.bf16.msra.mxu1 %v20567_v23  ;;  %13224 = vmatmul.bf16.vlgmr.msrb.gmra.mxu3 %v3230_v11  ;;  %v20598_v11 = vld [vmem:[%s21017_s19 + $0x2170] sm:$0xff]  ;;  %v20596_v23 = vld [vmem:[%s21017_s19 + $0x2160] sm:$0xff] }
 0x418   : > { %13268 = vmatpush.bf16.msra.mxu3 %v20583_v24  ;;  %v13004_v43 = vpop.f32.mrf.mxu2  ;;  %v20612_v24 = vld [vmem:[%s21017_s19 + $0x21e0] sm:$0xff]  ;;  %v20594_v37 = vld [vmem:[%s21017_s19 + $0x2150] sm:$0xff] }
 0x419   : > { %13230 = vmatpush.bf16.msra.mxu0 %v20558_v25  ;;  %v13005_v44 = vadd.f32 %v13004_v43, %v12992_v38  ;;  %v12980_v48 = vpop.f32.mrf.mxu0  ;;  %v20587_v25 = vld [vmem:[%s21017_s19 + $0x2118] sm:$0xff]  ;;  %v20610_v38 = vld [vmem:[%s21017_s19 + $0x21d0] sm:$0xff] }
 0x41a   : > { %13256 = vmatpush.bf16.msra.mxu2 %v20574_v26  ;;  %v13017_v47 = vpop.f32.mrf.mxu3  ;;  %v20603_v26 = vld [vmem:[%s21017_s19 + $0x2198] sm:$0xff]  ;;  %v3238_v43 = vld [vmem:[#allocation1 + $0x2d] sm:$0xff] }
 0x41b   : > { %13243 = vmatpush.bf16.msra.mxu1 %v20566_v27  ;;  %v13018_v49 = vadd.f32 %v13017_v47, %v13005_v44  ;;  %v12993_v52 = vpop.f32.mrf.mxu1  ;;  %v3240_v44 = vld [vmem:[#allocation1 + $0x3f] sm:$0xff]  ;;  %v20593_v47 = vld [vmem:[%s21017_s19 + $0x2148] sm:$0xff] }
 0x41c   : > { %13269 = vmatpush.bf16.msra.mxu3 %v20582_v28  ;;  %v20609_v48 = vld [vmem:[%s21017_s19 + $0x21c8] sm:$0xff]  ;;  %v20623_v52 = vld [vmem:[%s21017_s19 + $0x2238] sm:$0xff] }
 0x41d   : > { %13231 = vmatpush.bf16.msra.mxu0 %v20557_v29  ;;  %v20595_v29 = vld [vmem:[%s21017_s19 + $0x2158] sm:$0xff] }
 0x41e   : > { %13257 = vmatpush.bf16.msra.mxu2 %v20573_v30  ;;  %v20611_v30 = vld [vmem:[%s21017_s19 + $0x21d8] sm:$0xff] }
 0x41f   : > { %13244 = vmatpush.bf16.msra.mxu1 %v20565_v31 }
 0x420   : > { %13270 = vmatpush.bf16.msra.mxu3 %v20581_v32  ;;  %v13006_v57 = vpop.f32.mrf.mxu2 }
 0x421   : > { %13232 = vmatpush.bf16.msra.mxu0 %v20556_v35  ;;  %v20602_v35 = vld [vmem:[%s21017_s19 + $0x2190] sm:$0xff]  ;;  %v20647_v57 = vld [vmem:[%s21017_s19 + $0x22f8] sm:$0xff] }
 0x422   : > { %13258 = vmatpush.bf16.msra.mxu2 %v20572_v36  ;;  %v13019_v60 = vpop.f32.mrf.mxu3 }
 0x423   : > { %13245 = vmatpush.bf16.msra.mxu1 %v20564_v39  ;;  %v20585_v39 = vld [vmem:[%s21017_s19 + $0x2108] sm:$0xff]  ;;  %v20630_v60 = vld [vmem:[%s21017_s19 + $0x2270] sm:$0xff] }
 0x424   : > { %13271 = vmatpush.bf16.msra.mxu3 %v20580_v40  ;;  %v20601_v40 = vld [vmem:[%s21017_s19 + $0x2188] sm:$0xff] }
 0x425   : > { %13233 = vmatpush.bf16.msra.mxu0 %v20555_v41  ;;  %v3237_v41 = vld [vmem:[#allocation1 + $0x24] sm:$0xff] }
 0x426   : > { %13259 = vmatpush.bf16.msra.mxu2 %v20571_v42  ;;  %v3239_v42 = vld [vmem:[#allocation1 + $0x36] sm:$0xff] }
 0x427   : > { %13246 = vmatpush.bf16.msra.mxu1 %v20563_v45 }
 0x428   : > { %13272 = vmatpush.bf16.msra.mxu3 %v20579_v46  ;;  %v362_v46 = vld [vmem:[%s21012_s15 + $0x88] sm:$0xff] }
 0x429   : > { %13234 = vmatpush.bf16.msra.mxu0 %v20554_v50  ;;  %3242 = vst [vmem:[#allocation1] ss:$9 sm:$0xff] %v362_v46  ;;  %v20584_v50 = vld [vmem:[%s21017_s19 + $0x2100] sm:$0xff]  ;;  %v20653_v46 = vld [vmem:[%s21017_s19 + $0x2328] sm:$0xff] }
 0x42a   : > { %13260 = vmatpush.bf16.msra.mxu2 %v20570_v51  ;;  %v20600_v51 = vld [vmem:[%s21017_s19 + $0x2180] sm:$0xff] }
 0x42b   : > { %13247 = vmatpush.bf16.msra.mxu1 %v20562_v53  ;;  %v20639_v53 = vld [vmem:[%s21017_s19 + $0x22b8] sm:$0xff] }
 0x42c   : > { %13273 = vmatpush.bf16.msra.mxu3 %v20578_v54  ;;  %v20592_v54 = vld [vmem:[%s21017_s19 + $0x2140] sm:$0xff] }
 0x42d   : > { %13235 = vmatpush.bf16.msra.mxu0 %v20553_v55  ;;  %v20608_v55 = vld [vmem:[%s21017_s19 + $0x21c0] sm:$0xff] }
 0x42e   : > { %13261 = vmatpush.bf16.msra.mxu2 %v20569_v56  ;;  %v20631_v56 = vld [vmem:[%s21017_s19 + $0x2278] sm:$0xff] }
 0x42f   : > { %13248 = vmatpush.bf16.msra.mxu1 %v20561_v58  ;;  %v20622_v58 = vld [vmem:[%s21017_s19 + $0x2230] sm:$0xff] }
 0x430   : > { %13274 = vmatpush.bf16.msra.mxu3 %v20577_v59  ;;  %v20638_v59 = vld [vmem:[%s21017_s19 + $0x22b0] sm:$0xff] }
 0x431   : > { %13236 = vmatpush.bf16.msra.mxu0 %v20552_v61  ;;  %v13030_v17 = vpop.f32.mrf.mxu0  ;;  %v20646_v61 = vld [vmem:[%s21017_s19 + $0x22f0] sm:$0xff] }
 0x432   : > { %13262 = vmatpush.bf16.msra.mxu2 %v20568_v62  ;;  %v13031_v18 = vadd.f32 %v13030_v17, %v13018_v49  ;;  %v20621_v62 = vld [vmem:[%s21017_s19 + $0x2228] sm:$0xff] }
 0x433   : > { %13249 = vmatpush.bf16.msra.mxu1 %v20560_v1  ;;  %v13043_v21 = vpop.f32.mrf.mxu1  ;;  %v20645_v1 = vld [vmem:[%s21017_s19 + $0x22e8] sm:$0xff] }
 0x434   : > { %13275 = vmatpush.bf16.msra.mxu3 %v20576_v2  ;;  %13237 = vmatmul.bf16.vlgmr.msra.gmra.mxu0 %v3233_v4  ;;  %v13044_v22 = vadd.f32 %v13043_v21, %v13031_v18  ;;  %v20620_v4 = vld [vmem:[%s21017_s19 + $0x2220] sm:$0xff] }
 0x435   : > { %13281 = vmatpush.bf16.msrb.mxu0 %v20591_v63  ;;  %13263 = vmatmul.bf16.vlgmr.msra.gmra.mxu2 %v3235_v5  ;;  %v20637_v63 = vld [vmem:[%s21017_s19 + $0x22a8] sm:$0xff]  ;;  %v20636_v5 = vld [vmem:[%s21017_s19 + $0x22a0] sm:$0xff] }
 0x436   : > { %13307 = vmatpush.bf16.msrb.mxu2 %v20607_v0  ;;  %13250 = vmatmul.bf16.vlgmr.msra.gmra.mxu1 %v3234_v7  ;;  %v20629_v0 = vld [vmem:[%s21017_s19 + $0x2268] sm:$0xff] }
 0x437   : > { %13294 = vmatpush.bf16.msrb.mxu1 %v20599_v3  ;;  %13276 = vmatmul.bf16.vlgmr.msra.gmra.mxu3 %v3236_v8  ;;  %v20628_v8 = vld [vmem:[%s21017_s19 + $0x2260] sm:$0xff] }
 0x438   : > { %13320 = vmatpush.bf16.msrb.mxu3 %v20615_v6  ;;  %v13056_v27 = vpop.f32.mrf.mxu2 }
 0x439   : > { %13282 = vmatpush.bf16.msrb.mxu0 %v20590_v9  ;;  %v13057_v28 = vadd.f32 %v13056_v27, %v13044_v22  ;;  %v13032_v32 = vpop.f32.mrf.mxu0  ;;  %v20644_v9 = vld [vmem:[%s21017_s19 + $0x22e0] sm:$0xff]  ;;  %v20626_v22 = vld [vmem:[%s21017_s19 + $0x2250] sm:$0xff]  ;;  %v20625_v27 = vld [vmem:[%s21017_s19 + $0x2248] sm:$0xff] }
 0x43a   : > { %13308 = vmatpush.bf16.msrb.mxu2 %v20606_v10  ;;  %v13069_v31 = vpop.f32.mrf.mxu3  ;;  %v20619_v10 = vld [vmem:[%s21017_s19 + $0x2218] sm:$0xff] }
 0x43b   : > { %13295 = vmatpush.bf16.msrb.mxu1 %v20598_v11  ;;  %v22152_v33 = vadd.f32 %v13069_v31, %v13057_v28  ;;  %v13045_v36 = vpop.f32.mrf.mxu1  ;;  %v20635_v11 = vld [vmem:[%s21017_s19 + $0x2298] sm:$0xff]  ;;  %v20641_v28 = vld [vmem:[%s21017_s19 + $0x22c8] sm:$0xff]  ;;  %v20632_v31 = vld [vmem:[%s21017_s19 + $0x2280] sm:$0xff] }
 0x43c   : > { %13321 = vmatpush.bf16.msrb.mxu3 %v20614_v12  ;;  %v20655_v32 = vld [vmem:[%s21017_s19 + $0x2338] sm:$0xff] }
 0x43d   : > { %13283 = vmatpush.bf16.msrb.mxu0 %v20589_v13  ;;  %v20663_v36 = vld [vmem:[%s21017_s19 + $0x2378] sm:$0xff] }
 0x43e   : > { %13309 = vmatpush.bf16.msrb.mxu2 %v20605_v14  ;;  %v20627_v14 = vld [vmem:[%s21017_s19 + $0x2258] sm:$0xff] }
 0x43f   : > { %13296 = vmatpush.bf16.msrb.mxu1 %v20597_v15  ;;  %v20643_v15 = vld [vmem:[%s21017_s19 + $0x22d8] sm:$0xff] }
 0x440   : > { %13322 = vmatpush.bf16.msrb.mxu3 %v20613_v16  ;;  %v13058_v45 = vpop.f32.mrf.mxu2 }
 0x441   : > { %13284 = vmatpush.bf16.msrb.mxu0 %v20588_v19  ;;  %v20618_v19 = vld [vmem:[%s21017_s19 + $0x2210] sm:$0xff] }
 0x442   : > { %13310 = vmatpush.bf16.msrb.mxu2 %v20604_v20  ;;  %v13071_v49 = vpop.f32.mrf.mxu3  ;;  %v20634_v20 = vld [vmem:[%s21017_s19 + $0x2290] sm:$0xff] }
 0x443   : > { %13297 = vmatpush.bf16.msrb.mxu1 %v20596_v23  ;;  %v20642_v23 = vld [vmem:[%s21017_s19 + $0x22d0] sm:$0xff]  ;;  %v20677_v49 = vld [vmem:[%s21017_s19 + $0x23e8] sm:$0xff] }
 0x444   : > { %13323 = vmatpush.bf16.msrb.mxu3 %v20612_v24  ;;  %v20617_v24 = vld [vmem:[%s21017_s19 + $0x2208] sm:$0xff]  ;;  %v20678_v45 = vld [vmem:[%s21017_s19 + $0x23f0] sm:$0xff] }
 0x445   : > { %13285 = vmatpush.bf16.msrb.mxu0 %v20587_v25  ;;  %v20633_v25 = vld [vmem:[%s21017_s19 + $0x2288] sm:$0xff] }
 0x446   : > { %13311 = vmatpush.bf16.msrb.mxu2 %v20603_v26 }
 0x447   : > { %13298 = vmatpush.bf16.msrb.mxu1 %v20595_v29 }
 0x448   : > { %13324 = vmatpush.bf16.msrb.mxu3 %v20611_v30  ;;  %v20616_v30 = vld [vmem:[%s21017_s19 + $0x2200] sm:$0xff] }
 0x449   : > { %13286 = vmatpush.bf16.msrb.mxu0 %v20586_v34  ;;  %v20624_v34 = vld [vmem:[%s21017_s19 + $0x2240] sm:$0xff] }
 0x44a   : > { %13312 = vmatpush.bf16.msrb.mxu2 %v20602_v35  ;;  %v20640_v35 = vld [vmem:[%s21017_s19 + $0x22c0] sm:$0xff] }
 0x44b   : > { %13299 = vmatpush.bf16.msrb.mxu1 %v20594_v37  ;;  %v3243_v37 = vld [vmem:[#allocation1] sm:$0xff] }
 0x44c   : > { %13325 = vmatpush.bf16.msrb.mxu3 %v20610_v38  ;;  %v3245_v38 = vld [vmem:[#allocation1 + $0x12] sm:$0xff] }
 0x44d   : > { %13287 = vmatpush.bf16.msrb.mxu0 %v20585_v39  ;;  %v20679_v39 = vld [vmem:[%s21017_s19 + $0x23f8] sm:$0xff] }
 0x44e   : > { %13313 = vmatpush.bf16.msrb.mxu2 %v20601_v40  ;;  %v3244_v40 = vld [vmem:[#allocation1 + $0x9] sm:$0xff] }
 0x44f   : > { %13300 = vmatpush.bf16.msrb.mxu1 %v20593_v47  ;;  %v20669_v47 = vld [vmem:[%s21017_s19 + $0x23a8] sm:$0xff] }
 0x450   : > { %13326 = vmatpush.bf16.msrb.mxu3 %v20609_v48  ;;  %v20661_v48 = vld [vmem:[%s21017_s19 + $0x2368] sm:$0xff] }
 0x451   : > { %13288 = vmatpush.bf16.msrb.mxu0 %v20584_v50  ;;  %v13082_v2 = vpop.f32.mrf.mxu0 }
 0x452   : > { %13314 = vmatpush.bf16.msrb.mxu2 %v20600_v51  ;;  %v13083_v3 = vadd.f32 %v13082_v2, %v22152_v33  ;;  %v20671_v33 = vld [vmem:[%s21017_s19 + $0x23b8] sm:$0xff] }
 0x453   : > { %13301 = vmatpush.bf16.msrb.mxu1 %v20592_v54  ;;  %v13095_v6 = vpop.f32.mrf.mxu1 }
 0x454   : > { %13327 = vmatpush.bf16.msrb.mxu3 %v20608_v55  ;;  %13289 = vmatmul.bf16.vlgmr.msrb.gmra.mxu0 %v3237_v41  ;;  %v13096_v7 = vadd.f32 %v13095_v6, %v13083_v3  ;;  %v3246_v41 = vld [vmem:[#allocation1 + $0x1b] sm:$0xff]  ;;  %v20650_v3 = vld [vmem:[%s21017_s19 + $0x2310] sm:$0xff] }
 0x455   : > { %13333 = vmatpush.bf16.msra.mxu0 %v20623_v52  ;;  %13315 = vmatmul.bf16.vlgmr.msrb.gmra.mxu2 %v3239_v42  ;;  %v20654_v42 = vld [vmem:[%s21017_s19 + $0x2330] sm:$0xff]  ;;  %v20652_v52 = vld [vmem:[%s21017_s19 + $0x2320] sm:$0xff] }
 0x456   : > { %13359 = vmatpush.bf16.msra.mxu2 %v20639_v53  ;;  %13302 = vmatmul.bf16.vlgmr.msrb.gmra.mxu1 %v3238_v43  ;;  %v20670_v43 = vld [vmem:[%s21017_s19 + $0x23b0] sm:$0xff]  ;;  %v20668_v53 = vld [vmem:[%s21017_s19 + $0x23a0] sm:$0xff] }
 0x457   : > { %13346 = vmatpush.bf16.msra.mxu1 %v20631_v56  ;;  %13328 = vmatmul.bf16.vlgmr.msrb.gmra.mxu3 %v3240_v44  ;;  %v20662_v44 = vld [vmem:[%s21017_s19 + $0x2370] sm:$0xff]  ;;  %v20660_v56 = vld [vmem:[%s21017_s19 + $0x2360] sm:$0xff] }
 0x458   : > { %13372 = vmatpush.bf16.msra.mxu3 %v20647_v57  ;;  %v13108_v12 = vpop.f32.mrf.mxu2  ;;  %v20676_v57 = vld [vmem:[%s21017_s19 + $0x23e0] sm:$0xff]  ;;  %v20658_v6 = vld [vmem:[%s21017_s19 + $0x2350] sm:$0xff] }
 0x459   : > { %13334 = vmatpush.bf16.msra.mxu0 %v20622_v58  ;;  %v13109_v13 = vadd.f32 %v13108_v12, %v13096_v7  ;;  %v13084_v17 = vpop.f32.mrf.mxu0  ;;  %v20651_v58 = vld [vmem:[%s21017_s19 + $0x2318] sm:$0xff]  ;;  %v20674_v7 = vld [vmem:[%s21017_s19 + $0x23d0] sm:$0xff] }
 0x45a   : > { %13360 = vmatpush.bf16.msra.mxu2 %v20638_v59  ;;  %v13121_v16 = vpop.f32.mrf.mxu3  ;;  %v20667_v59 = vld [vmem:[%s21017_s19 + $0x2398] sm:$0xff]  ;;  %v3248_v12 = vld [vmem:[#allocation1 + $0x2d] sm:$0xff] }
 0x45b   : > { %13347 = vmatpush.bf16.msra.mxu1 %v20630_v60  ;;  %v13122_v18 = vadd.f32 %v13121_v16, %v13109_v13  ;;  %v13097_v21 = vpop.f32.mrf.mxu1  ;;  %v3250_v13 = vld [vmem:[#allocation1 + $0x3f] sm:$0xff]  ;;  %v20657_v16 = vld [vmem:[%s21017_s19 + $0x2348] sm:$0xff] }
 0x45c   : > { %13373 = vmatpush.bf16.msra.mxu3 %v20646_v61  ;;  %v20673_v17 = vld [vmem:[%s21017_s19 + $0x23c8] sm:$0xff]  ;;  %v20687_v21 = vld [vmem:[%s21017_s19 + $0x2438] sm:$0xff] }
 0x45d   : > { %13335 = vmatpush.bf16.msra.mxu0 %v20621_v62  ;;  %v20659_v62 = vld [vmem:[%s21017_s19 + $0x2358] sm:$0xff] }
 0x45e   : > { %13361 = vmatpush.bf16.msra.mxu2 %v20637_v63  ;;  %v20675_v63 = vld [vmem:[%s21017_s19 + $0x23d8] sm:$0xff] }
 0x45f   : > { %13348 = vmatpush.bf16.msra.mxu1 %v20629_v0 }
 0x460   : > { %13374 = vmatpush.bf16.msra.mxu3 %v20645_v1  ;;  %v13110_v26 = vpop.f32.mrf.mxu2 }
 0x461   : > { %13336 = vmatpush.bf16.msra.mxu0 %v20620_v4  ;;  %v20666_v4 = vld [vmem:[%s21017_s19 + $0x2390] sm:$0xff]  ;;  %v20711_v26 = vld [vmem:[%s21017_s19 + $0x24f8] sm:$0xff] }
 0x462   : > { %13362 = vmatpush.bf16.msra.mxu2 %v20636_v5  ;;  %v13123_v29 = vpop.f32.mrf.mxu3 }
 0x463   : > { %13349 = vmatpush.bf16.msra.mxu1 %v20628_v8  ;;  %v20649_v8 = vld [vmem:[%s21017_s19 + $0x2308] sm:$0xff]  ;;  %v20694_v29 = vld [vmem:[%s21017_s19 + $0x2470] sm:$0xff] }
 0x464   : > { %13375 = vmatpush.bf16.msra.mxu3 %v20644_v9  ;;  %v20665_v9 = vld [vmem:[%s21017_s19 + $0x2388] sm:$0xff] }
 0x465   : > { %13337 = vmatpush.bf16.msra.mxu0 %v20619_v10  ;;  %v3247_v10 = vld [vmem:[#allocation1 + $0x24] sm:$0xff] }
 0x466   : > { %13363 = vmatpush.bf16.msra.mxu2 %v20635_v11  ;;  %v3249_v11 = vld [vmem:[#allocation1 + $0x36] sm:$0xff] }
 0x467   : > { %13350 = vmatpush.bf16.msra.mxu1 %v20627_v14 }
 0x468   : > { %13376 = vmatpush.bf16.msra.mxu3 %v20643_v15  ;;  %v363_v15 = vld [vmem:[%s21012_s15 + $0x90] sm:$0xff] }
 0x469   : > { %13338 = vmatpush.bf16.msra.mxu0 %v20618_v19  ;;  %3252 = vst [vmem:[#allocation1] ss:$9 sm:$0xff] %v363_v15  ;;  %v20648_v19 = vld [vmem:[%s21017_s19 + $0x2300] sm:$0xff]  ;;  %v20717_v15 = vld [vmem:[%s21017_s19 + $0x2528] sm:$0xff] }
 0x46a   : > { %13364 = vmatpush.bf16.msra.mxu2 %v20634_v20  ;;  %v20664_v20 = vld [vmem:[%s21017_s19 + $0x2380] sm:$0xff] }
 0x46b   : > { %13351 = vmatpush.bf16.msra.mxu1 %v20626_v22  ;;  %v20703_v22 = vld [vmem:[%s21017_s19 + $0x24b8] sm:$0xff] }
 0x46c   : > { %13377 = vmatpush.bf16.msra.mxu3 %v20642_v23  ;;  %v20656_v23 = vld [vmem:[%s21017_s19 + $0x2340] sm:$0xff] }
 0x46d   : > { %13339 = vmatpush.bf16.msra.mxu0 %v20617_v24  ;;  %v20672_v24 = vld [vmem:[%s21017_s19 + $0x23c0] sm:$0xff] }
 0x46e   : > { %13365 = vmatpush.bf16.msra.mxu2 %v20633_v25  ;;  %v20695_v25 = vld [vmem:[%s21017_s19 + $0x2478] sm:$0xff] }
 0x46f   : > { %13352 = vmatpush.bf16.msra.mxu1 %v20625_v27  ;;  %v20686_v27 = vld [vmem:[%s21017_s19 + $0x2430] sm:$0xff] }
 0x470   : > { %13378 = vmatpush.bf16.msra.mxu3 %v20641_v28  ;;  %v20702_v28 = vld [vmem:[%s21017_s19 + $0x24b0] sm:$0xff] }
 0x471   : > { %13340 = vmatpush.bf16.msra.mxu0 %v20616_v30  ;;  %v13134_v50 = vpop.f32.mrf.mxu0  ;;  %v20710_v30 = vld [vmem:[%s21017_s19 + $0x24f0] sm:$0xff] }
 0x472   : > { %13366 = vmatpush.bf16.msra.mxu2 %v20632_v31  ;;  %v13135_v51 = vadd.f32 %v13134_v50, %v13122_v18  ;;  %v20685_v31 = vld [vmem:[%s21017_s19 + $0x2428] sm:$0xff] }
 0x473   : > { %13353 = vmatpush.bf16.msra.mxu1 %v20624_v34  ;;  %v13147_v54 = vpop.f32.mrf.mxu1  ;;  %v20709_v34 = vld [vmem:[%s21017_s19 + $0x24e8] sm:$0xff] }
 0x474   : > { %13379 = vmatpush.bf16.msra.mxu3 %v20640_v35  ;;  %13341 = vmatmul.bf16.vlgmr.msra.gmra.mxu0 %v3243_v37  ;;  %v13148_v55 = vadd.f32 %v13147_v54, %v13135_v51  ;;  %v20684_v37 = vld [vmem:[%s21017_s19 + $0x2420] sm:$0xff] }
 0x475   : > { %13385 = vmatpush.bf16.msrb.mxu0 %v20655_v32  ;;  %13367 = vmatmul.bf16.vlgmr.msra.gmra.mxu2 %v3245_v38  ;;  %v20701_v32 = vld [vmem:[%s21017_s19 + $0x24a8] sm:$0xff]  ;;  %v20700_v38 = vld [vmem:[%s21017_s19 + $0x24a0] sm:$0xff] }
 0x476   : > { %13411 = vmatpush.bf16.msrb.mxu2 %v20671_v33  ;;  %13354 = vmatmul.bf16.vlgmr.msra.gmra.mxu1 %v3244_v40  ;;  %v20693_v33 = vld [vmem:[%s21017_s19 + $0x2468] sm:$0xff] }
 0x477   : > { %13398 = vmatpush.bf16.msrb.mxu1 %v20663_v36  ;;  %13380 = vmatmul.bf16.vlgmr.msra.gmra.mxu3 %v3246_v41  ;;  %v20692_v41 = vld [vmem:[%s21017_s19 + $0x2460] sm:$0xff] }
 0x478   : > { %13424 = vmatpush.bf16.msrb.mxu3 %v20679_v39  ;;  %v13160_v60 = vpop.f32.mrf.mxu2 }
 0x479   : > { %13386 = vmatpush.bf16.msrb.mxu0 %v20654_v42  ;;  %v13161_v61 = vadd.f32 %v13160_v60, %v13148_v55  ;;  %v13136_v1 = vpop.f32.mrf.mxu0  ;;  %v20708_v42 = vld [vmem:[%s21017_s19 + $0x24e0] sm:$0xff]  ;;  %v20690_v55 = vld [vmem:[%s21017_s19 + $0x2450] sm:$0xff]  ;;  %v20689_v60 = vld [vmem:[%s21017_s19 + $0x2448] sm:$0xff] }
 0x47a   : > { %13412 = vmatpush.bf16.msrb.mxu2 %v20670_v43  ;;  %v13173_v0 = vpop.f32.mrf.mxu3  ;;  %v20683_v43 = vld [vmem:[%s21017_s19 + $0x2418] sm:$0xff] }
 0x47b   : > { %13399 = vmatpush.bf16.msrb.mxu1 %v20662_v44  ;;  %v22220_v2 = vadd.f32 %v13173_v0, %v13161_v61  ;;  %v13149_v5 = vpop.f32.mrf.mxu1  ;;  %v20699_v44 = vld [vmem:[%s21017_s19 + $0x2498] sm:$0xff]  ;;  %v20705_v61 = vld [vmem:[%s21017_s19 + $0x24c8] sm:$0xff]  ;;  %v20696_v0 = vld [vmem:[%s21017_s19 + $0x2480] sm:$0xff] }
 0x47c   : > { %13425 = vmatpush.bf16.msrb.mxu3 %v20678_v45  ;;  %v20719_v1 = vld [vmem:[%s21017_s19 + $0x2538] sm:$0xff] }
 0x47d   : > { %13387 = vmatpush.bf16.msrb.mxu0 %v20653_v46  ;;  %v20727_v5 = vld [vmem:[%s21017_s19 + $0x2578] sm:$0xff] }
 0x47e   : > { %13413 = vmatpush.bf16.msrb.mxu2 %v20669_v47  ;;  %v20691_v47 = vld [vmem:[%s21017_s19 + $0x2458] sm:$0xff] }
 0x47f   : > { %13400 = vmatpush.bf16.msrb.mxu1 %v20661_v48  ;;  %v20707_v48 = vld [vmem:[%s21017_s19 + $0x24d8] sm:$0xff] }
 0x480   : > { %13426 = vmatpush.bf16.msrb.mxu3 %v20677_v49  ;;  %v13162_v14 = vpop.f32.mrf.mxu2 }
 0x481   : > { %13388 = vmatpush.bf16.msrb.mxu0 %v20652_v52  ;;  %v20682_v52 = vld [vmem:[%s21017_s19 + $0x2410] sm:$0xff] }
 0x482   : > { %13414 = vmatpush.bf16.msrb.mxu2 %v20668_v53  ;;  %v13175_v18 = vpop.f32.mrf.mxu3  ;;  %v20698_v53 = vld [vmem:[%s21017_s19 + $0x2490] sm:$0xff] }
 0x483   : > { %13401 = vmatpush.bf16.msrb.mxu1 %v20660_v56  ;;  %v20706_v56 = vld [vmem:[%s21017_s19 + $0x24d0] sm:$0xff]  ;;  %v20741_v18 = vld [vmem:[%s21017_s19 + $0x25e8] sm:$0xff] }
 0x484   : > { %13427 = vmatpush.bf16.msrb.mxu3 %v20676_v57  ;;  %v20681_v57 = vld [vmem:[%s21017_s19 + $0x2408] sm:$0xff]  ;;  %v20742_v14 = vld [vmem:[%s21017_s19 + $0x25f0] sm:$0xff] }
 0x485   : > { %13389 = vmatpush.bf16.msrb.mxu0 %v20651_v58  ;;  %v20697_v58 = vld [vmem:[%s21017_s19 + $0x2488] sm:$0xff] }
 0x486   : > { %13415 = vmatpush.bf16.msrb.mxu2 %v20667_v59 }
 0x487   : > { %13402 = vmatpush.bf16.msrb.mxu1 %v20659_v62 }
 0x488   : > { %13428 = vmatpush.bf16.msrb.mxu3 %v20675_v63  ;;  %v20680_v63 = vld [vmem:[%s21017_s19 + $0x2400] sm:$0xff] }
 0x489   : > { %13390 = vmatpush.bf16.msrb.mxu0 %v20650_v3  ;;  %v20688_v3 = vld [vmem:[%s21017_s19 + $0x2440] sm:$0xff] }
 0x48a   : > { %13416 = vmatpush.bf16.msrb.mxu2 %v20666_v4  ;;  %v20704_v4 = vld [vmem:[%s21017_s19 + $0x24c0] sm:$0xff] }
 0x48b   : > { %13403 = vmatpush.bf16.msrb.mxu1 %v20658_v6  ;;  %v3253_v6 = vld [vmem:[#allocation1] sm:$0xff] }
 0x48c   : > { %13429 = vmatpush.bf16.msrb.mxu3 %v20674_v7  ;;  %v3255_v7 = vld [vmem:[#allocation1 + $0x12] sm:$0xff] }
 0x48d   : > { %13391 = vmatpush.bf16.msrb.mxu0 %v20649_v8  ;;  %v20743_v8 = vld [vmem:[%s21017_s19 + $0x25f8] sm:$0xff] }
 0x48e   : > { %13417 = vmatpush.bf16.msrb.mxu2 %v20665_v9  ;;  %v3254_v9 = vld [vmem:[#allocation1 + $0x9] sm:$0xff] }
 0x48f   : > { %13404 = vmatpush.bf16.msrb.mxu1 %v20657_v16  ;;  %v20733_v16 = vld [vmem:[%s21017_s19 + $0x25a8] sm:$0xff] }
 0x490   : > { %13430 = vmatpush.bf16.msrb.mxu3 %v20673_v17  ;;  %v20725_v17 = vld [vmem:[%s21017_s19 + $0x2568] sm:$0xff] }
 0x491   : > { %13392 = vmatpush.bf16.msrb.mxu0 %v20648_v19  ;;  %v13186_v35 = vpop.f32.mrf.mxu0 }
 0x492   : > { %13418 = vmatpush.bf16.msrb.mxu2 %v20664_v20  ;;  %v13187_v36 = vadd.f32 %v13186_v35, %v22220_v2  ;;  %v20735_v2 = vld [vmem:[%s21017_s19 + $0x25b8] sm:$0xff] }
 0x493   : > { %13405 = vmatpush.bf16.msrb.mxu1 %v20656_v23  ;;  %v13199_v39 = vpop.f32.mrf.mxu1 }
 0x494   : > { %13431 = vmatpush.bf16.msrb.mxu3 %v20672_v24  ;;  %13393 = vmatmul.bf16.vlgmr.msrb.gmra.mxu0 %v3247_v10  ;;  %v13200_v40 = vadd.f32 %v13199_v39, %v13187_v36  ;;  %v3256_v10 = vld [vmem:[#allocation1 + $0x1b] sm:$0xff]  ;;  %v20714_v36 = vld [vmem:[%s21017_s19 + $0x2510] sm:$0xff] }
 0x495   : > { %13437 = vmatpush.bf16.msra.mxu0 %v20687_v21  ;;  %13419 = vmatmul.bf16.vlgmr.msrb.gmra.mxu2 %v3249_v11  ;;  %v20718_v11 = vld [vmem:[%s21017_s19 + $0x2530] sm:$0xff]  ;;  %v20716_v21 = vld [vmem:[%s21017_s19 + $0x2520] sm:$0xff] }
 0x496   : > { %13463 = vmatpush.bf16.msra.mxu2 %v20703_v22  ;;  %13406 = vmatmul.bf16.vlgmr.msrb.gmra.mxu1 %v3248_v12  ;;  %v20734_v12 = vld [vmem:[%s21017_s19 + $0x25b0] sm:$0xff]  ;;  %v20732_v22 = vld [vmem:[%s21017_s19 + $0x25a0] sm:$0xff] }
 0x497   : > { %13450 = vmatpush.bf16.msra.mxu1 %v20695_v25  ;;  %13432 = vmatmul.bf16.vlgmr.msrb.gmra.mxu3 %v3250_v13  ;;  %v20726_v13 = vld [vmem:[%s21017_s19 + $0x2570] sm:$0xff]  ;;  %v20724_v25 = vld [vmem:[%s21017_s19 + $0x2560] sm:$0xff] }
 0x498   : > { %13476 = vmatpush.bf16.msra.mxu3 %v20711_v26  ;;  %v13212_v45 = vpop.f32.mrf.mxu2  ;;  %v20740_v26 = vld [vmem:[%s21017_s19 + $0x25e0] sm:$0xff]  ;;  %v20722_v39 = vld [vmem:[%s21017_s19 + $0x2550] sm:$0xff] }
 0x499   : > { %13438 = vmatpush.bf16.msra.mxu0 %v20686_v27  ;;  %v13213_v46 = vadd.f32 %v13212_v45, %v13200_v40  ;;  %v13188_v50 = vpop.f32.mrf.mxu0  ;;  %v20715_v27 = vld [vmem:[%s21017_s19 + $0x2518] sm:$0xff]  ;;  %v20738_v40 = vld [vmem:[%s21017_s19 + $0x25d0] sm:$0xff] }
 0x49a   : > { %13464 = vmatpush.bf16.msra.mxu2 %v20702_v28  ;;  %v13225_v49 = vpop.f32.mrf.mxu3  ;;  %v20731_v28 = vld [vmem:[%s21017_s19 + $0x2598] sm:$0xff]  ;;  %v3258_v45 = vld [vmem:[#allocation1 + $0x2d] sm:$0xff] }
 0x49b   : > { %13451 = vmatpush.bf16.msra.mxu1 %v20694_v29  ;;  %v13226_v51 = vadd.f32 %v13225_v49, %v13213_v46  ;;  %v13201_v54 = vpop.f32.mrf.mxu1  ;;  %v3260_v46 = vld [vmem:[#allocation1 + $0x3f] sm:$0xff]  ;;  %v20721_v49 = vld [vmem:[%s21017_s19 + $0x2548] sm:$0xff] }
 0x49c   : > { %13477 = vmatpush.bf16.msra.mxu3 %v20710_v30  ;;  %v20737_v50 = vld [vmem:[%s21017_s19 + $0x25c8] sm:$0xff]  ;;  %v20751_v54 = vld [vmem:[%s21017_s19 + $0x2638] sm:$0xff] }
 0x49d   : > { %13439 = vmatpush.bf16.msra.mxu0 %v20685_v31  ;;  %v20723_v31 = vld [vmem:[%s21017_s19 + $0x2558] sm:$0xff] }
 0x49e   : > { %13465 = vmatpush.bf16.msra.mxu2 %v20701_v32  ;;  %v20739_v32 = vld [vmem:[%s21017_s19 + $0x25d8] sm:$0xff] }
 0x49f   : > { %13452 = vmatpush.bf16.msra.mxu1 %v20693_v33 }
 0x4a0   : > { %13478 = vmatpush.bf16.msra.mxu3 %v20709_v34  ;;  %v13214_v59 = vpop.f32.mrf.mxu2 }
 0x4a1   : > { %13440 = vmatpush.bf16.msra.mxu0 %v20684_v37  ;;  %v20730_v37 = vld [vmem:[%s21017_s19 + $0x2590] sm:$0xff]  ;;  %v20775_v59 = vld [vmem:[%s21017_s19 + $0x26f8] sm:$0xff] }
 0x4a2   : > { %13466 = vmatpush.bf16.msra.mxu2 %v20700_v38  ;;  %v13227_v62 = vpop.f32.mrf.mxu3 }
 0x4a3   : > { %13453 = vmatpush.bf16.msra.mxu1 %v20692_v41  ;;  %v20713_v41 = vld [vmem:[%s21017_s19 + $0x2508] sm:$0xff]  ;;  %v20758_v62 = vld [vmem:[%s21017_s19 + $0x2670] sm:$0xff] }
 0x4a4   : > { %13479 = vmatpush.bf16.msra.mxu3 %v20708_v42  ;;  %v20729_v42 = vld [vmem:[%s21017_s19 + $0x2588] sm:$0xff] }
 0x4a5   : > { %13441 = vmatpush.bf16.msra.mxu0 %v20683_v43  ;;  %v3257_v43 = vld [vmem:[#allocation1 + $0x24] sm:$0xff] }
 0x4a6   : > { %13467 = vmatpush.bf16.msra.mxu2 %v20699_v44  ;;  %v3259_v44 = vld [vmem:[#allocation1 + $0x36] sm:$0xff] }
 0x4a7   : > { %13454 = vmatpush.bf16.msra.mxu1 %v20691_v47 }
 0x4a8   : > { %13480 = vmatpush.bf16.msra.mxu3 %v20707_v48  ;;  %v364_v48 = vld [vmem:[%s21012_s15 + $0x98] sm:$0xff] }
 0x4a9   : > { %13442 = vmatpush.bf16.msra.mxu0 %v20682_v52  ;;  %3262 = vst [vmem:[#allocation1] ss:$9 sm:$0xff] %v364_v48  ;;  %v20712_v52 = vld [vmem:[%s21017_s19 + $0x2500] sm:$0xff]  ;;  %v20781_v48 = vld [vmem:[%s21017_s19 + $0x2728] sm:$0xff] }
 0x4aa   : > { %13468 = vmatpush.bf16.msra.mxu2 %v20698_v53  ;;  %v20728_v53 = vld [vmem:[%s21017_s19 + $0x2580] sm:$0xff] }
 0x4ab   : > { %13455 = vmatpush.bf16.msra.mxu1 %v20690_v55  ;;  %v20767_v55 = vld [vmem:[%s21017_s19 + $0x26b8] sm:$0xff] }
 0x4ac   : > { %13481 = vmatpush.bf16.msra.mxu3 %v20706_v56  ;;  %v20720_v56 = vld [vmem:[%s21017_s19 + $0x2540] sm:$0xff] }
 0x4ad   : > { %13443 = vmatpush.bf16.msra.mxu0 %v20681_v57  ;;  %v20736_v57 = vld [vmem:[%s21017_s19 + $0x25c0] sm:$0xff] }
 0x4ae   : > { %13469 = vmatpush.bf16.msra.mxu2 %v20697_v58  ;;  %v20759_v58 = vld [vmem:[%s21017_s19 + $0x2678] sm:$0xff] }
 0x4af   : > { %13456 = vmatpush.bf16.msra.mxu1 %v20689_v60  ;;  %v20750_v60 = vld [vmem:[%s21017_s19 + $0x2630] sm:$0xff] }
 0x4b0   : > { %13482 = vmatpush.bf16.msra.mxu3 %v20705_v61  ;;  %v20766_v61 = vld [vmem:[%s21017_s19 + $0x26b0] sm:$0xff] }
 0x4b1   : > { %13444 = vmatpush.bf16.msra.mxu0 %v20680_v63  ;;  %v13238_v19 = vpop.f32.mrf.mxu0  ;;  %v20774_v63 = vld [vmem:[%s21017_s19 + $0x26f0] sm:$0xff] }
 0x4b2   : > { %13470 = vmatpush.bf16.msra.mxu2 %v20696_v0  ;;  %v13239_v20 = vadd.f32 %v13238_v19, %v13226_v51  ;;  %v20749_v0 = vld [vmem:[%s21017_s19 + $0x2628] sm:$0xff] }
 0x4b3   : > { %13457 = vmatpush.bf16.msra.mxu1 %v20688_v3  ;;  %v13251_v23 = vpop.f32.mrf.mxu1  ;;  %v20773_v3 = vld [vmem:[%s21017_s19 + $0x26e8] sm:$0xff] }
 0x4b4   : > { %13483 = vmatpush.bf16.msra.mxu3 %v20704_v4  ;;  %13445 = vmatmul.bf16.vlgmr.msra.gmra.mxu0 %v3253_v6  ;;  %v13252_v24 = vadd.f32 %v13251_v23, %v13239_v20  ;;  %v20748_v6 = vld [vmem:[%s21017_s19 + $0x2620] sm:$0xff] }
 0x4b5   : > { %13489 = vmatpush.bf16.msrb.mxu0 %v20719_v1  ;;  %13471 = vmatmul.bf16.vlgmr.msra.gmra.mxu2 %v3255_v7  ;;  %v20765_v1 = vld [vmem:[%s21017_s19 + $0x26a8] sm:$0xff]  ;;  %v20764_v7 = vld [vmem:[%s21017_s19 + $0x26a0] sm:$0xff] }
 0x4b6   : > { %13515 = vmatpush.bf16.msrb.mxu2 %v20735_v2  ;;  %13458 = vmatmul.bf16.vlgmr.msra.gmra.mxu1 %v3254_v9  ;;  %v20757_v2 = vld [vmem:[%s21017_s19 + $0x2668] sm:$0xff] }
 0x4b7   : > { %13502 = vmatpush.bf16.msrb.mxu1 %v20727_v5  ;;  %13484 = vmatmul.bf16.vlgmr.msra.gmra.mxu3 %v3256_v10  ;;  %v20756_v10 = vld [vmem:[%s21017_s19 + $0x2660] sm:$0xff] }
 0x4b8   : > { %13528 = vmatpush.bf16.msrb.mxu3 %v20743_v8  ;;  %v13264_v29 = vpop.f32.mrf.mxu2 }
 0x4b9   : > { %13490 = vmatpush.bf16.msrb.mxu0 %v20718_v11  ;;  %v13265_v30 = vadd.f32 %v13264_v29, %v13252_v24  ;;  %v13240_v34 = vpop.f32.mrf.mxu0  ;;  %v20772_v11 = vld [vmem:[%s21017_s19 + $0x26e0] sm:$0xff]  ;;  %v20754_v24 = vld [vmem:[%s21017_s19 + $0x2650] sm:$0xff]  ;;  %v20753_v29 = vld [vmem:[%s21017_s19 + $0x2648] sm:$0xff] }
 0x4ba   : > { %13516 = vmatpush.bf16.msrb.mxu2 %v20734_v12  ;;  %v13277_v33 = vpop.f32.mrf.mxu3  ;;  %v20747_v12 = vld [vmem:[%s21017_s19 + $0x2618] sm:$0xff] }
 0x4bb   : > { %13503 = vmatpush.bf16.msrb.mxu1 %v20726_v13  ;;  %v22288_v35 = vadd.f32 %v13277_v33, %v13265_v30  ;;  %v13253_v38 = vpop.f32.mrf.mxu1  ;;  %v20763_v13 = vld [vmem:[%s21017_s19 + $0x2698] sm:$0xff]  ;;  %v20769_v30 = vld [vmem:[%s21017_s19 + $0x26c8] sm:$0xff]  ;;  %v20760_v33 = vld [vmem:[%s21017_s19 + $0x2680] sm:$0xff] }
 0x4bc   : > { %13529 = vmatpush.bf16.msrb.mxu3 %v20742_v14  ;;  %v20783_v34 = vld [vmem:[%s21017_s19 + $0x2738] sm:$0xff] }
 0x4bd   : > { %13491 = vmatpush.bf16.msrb.mxu0 %v20717_v15  ;;  %v20791_v38 = vld [vmem:[%s21017_s19 + $0x2778] sm:$0xff] }
 0x4be   : > { %13517 = vmatpush.bf16.msrb.mxu2 %v20733_v16  ;;  %v20755_v16 = vld [vmem:[%s21017_s19 + $0x2658] sm:$0xff] }
 0x4bf   : > { %13504 = vmatpush.bf16.msrb.mxu1 %v20725_v17  ;;  %v20771_v17 = vld [vmem:[%s21017_s19 + $0x26d8] sm:$0xff] }
 0x4c0   : > { %13530 = vmatpush.bf16.msrb.mxu3 %v20741_v18  ;;  %v13266_v47 = vpop.f32.mrf.mxu2 }
 0x4c1   : > { %13492 = vmatpush.bf16.msrb.mxu0 %v20716_v21  ;;  %v20746_v21 = vld [vmem:[%s21017_s19 + $0x2610] sm:$0xff] }
 0x4c2   : > { %13518 = vmatpush.bf16.msrb.mxu2 %v20732_v22  ;;  %v13279_v51 = vpop.f32.mrf.mxu3  ;;  %v20762_v22 = vld [vmem:[%s21017_s19 + $0x2690] sm:$0xff] }
 0x4c3   : > { %13505 = vmatpush.bf16.msrb.mxu1 %v20724_v25  ;;  %v20770_v25 = vld [vmem:[%s21017_s19 + $0x26d0] sm:$0xff]  ;;  %v20805_v51 = vld [vmem:[%s21017_s19 + $0x27e8] sm:$0xff] }
 0x4c4   : > { %13531 = vmatpush.bf16.msrb.mxu3 %v20740_v26  ;;  %v20745_v26 = vld [vmem:[%s21017_s19 + $0x2608] sm:$0xff]  ;;  %v20806_v47 = vld [vmem:[%s21017_s19 + $0x27f0] sm:$0xff] }
 0x4c5   : > { %13493 = vmatpush.bf16.msrb.mxu0 %v20715_v27  ;;  %v20761_v27 = vld [vmem:[%s21017_s19 + $0x2688] sm:$0xff] }
 0x4c6   : > { %13519 = vmatpush.bf16.msrb.mxu2 %v20731_v28 }
 0x4c7   : > { %13506 = vmatpush.bf16.msrb.mxu1 %v20723_v31 }
 0x4c8   : > { %13532 = vmatpush.bf16.msrb.mxu3 %v20739_v32  ;;  %v20744_v32 = vld [vmem:[%s21017_s19 + $0x2600] sm:$0xff] }
 0x4c9   : > { %13494 = vmatpush.bf16.msrb.mxu0 %v20714_v36  ;;  %v20752_v36 = vld [vmem:[%s21017_s19 + $0x2640] sm:$0xff] }
 0x4ca   : > { %13520 = vmatpush.bf16.msrb.mxu2 %v20730_v37  ;;  %v20768_v37 = vld [vmem:[%s21017_s19 + $0x26c0] sm:$0xff] }
 0x4cb   : > { %13507 = vmatpush.bf16.msrb.mxu1 %v20722_v39  ;;  %v3263_v39 = vld [vmem:[#allocation1] sm:$0xff] }
 0x4cc   : > { %13533 = vmatpush.bf16.msrb.mxu3 %v20738_v40  ;;  %v3265_v40 = vld [vmem:[#allocation1 + $0x12] sm:$0xff] }
 0x4cd   : > { %13495 = vmatpush.bf16.msrb.mxu0 %v20713_v41  ;;  %v20807_v41 = vld [vmem:[%s21017_s19 + $0x27f8] sm:$0xff] }
 0x4ce   : > { %13521 = vmatpush.bf16.msrb.mxu2 %v20729_v42  ;;  %v3264_v42 = vld [vmem:[#allocation1 + $0x9] sm:$0xff] }
 0x4cf   : > { %13508 = vmatpush.bf16.msrb.mxu1 %v20721_v49  ;;  %v20797_v49 = vld [vmem:[%s21017_s19 + $0x27a8] sm:$0xff] }
 0x4d0   : > { %13534 = vmatpush.bf16.msrb.mxu3 %v20737_v50  ;;  %v20789_v50 = vld [vmem:[%s21017_s19 + $0x2768] sm:$0xff] }
 0x4d1   : > { %13496 = vmatpush.bf16.msrb.mxu0 %v20712_v52  ;;  %v13290_v4 = vpop.f32.mrf.mxu0 }
 0x4d2   : > { %13522 = vmatpush.bf16.msrb.mxu2 %v20728_v53  ;;  %v13291_v5 = vadd.f32 %v13290_v4, %v22288_v35  ;;  %v20799_v35 = vld [vmem:[%s21017_s19 + $0x27b8] sm:$0xff] }
 0x4d3   : > { %13509 = vmatpush.bf16.msrb.mxu1 %v20720_v56  ;;  %v13303_v8 = vpop.f32.mrf.mxu1 }
 0x4d4   : > { %13535 = vmatpush.bf16.msrb.mxu3 %v20736_v57  ;;  %13497 = vmatmul.bf16.vlgmr.msrb.gmra.mxu0 %v3257_v43  ;;  %v13304_v9 = vadd.f32 %v13303_v8, %v13291_v5  ;;  %v3266_v43 = vld [vmem:[#allocation1 + $0x1b] sm:$0xff]  ;;  %v20778_v5 = vld [vmem:[%s21017_s19 + $0x2710] sm:$0xff] }
 0x4d5   : > { %13541 = vmatpush.bf16.msra.mxu0 %v20751_v54  ;;  %13523 = vmatmul.bf16.vlgmr.msrb.gmra.mxu2 %v3259_v44  ;;  %v20782_v44 = vld [vmem:[%s21017_s19 + $0x2730] sm:$0xff]  ;;  %v20780_v54 = vld [vmem:[%s21017_s19 + $0x2720] sm:$0xff] }
 0x4d6   : > { %13567 = vmatpush.bf16.msra.mxu2 %v20767_v55  ;;  %13510 = vmatmul.bf16.vlgmr.msrb.gmra.mxu1 %v3258_v45  ;;  %v20798_v45 = vld [vmem:[%s21017_s19 + $0x27b0] sm:$0xff]  ;;  %v20796_v55 = vld [vmem:[%s21017_s19 + $0x27a0] sm:$0xff] }
 0x4d7   : > { %13554 = vmatpush.bf16.msra.mxu1 %v20759_v58  ;;  %13536 = vmatmul.bf16.vlgmr.msrb.gmra.mxu3 %v3260_v46  ;;  %v20790_v46 = vld [vmem:[%s21017_s19 + $0x2770] sm:$0xff]  ;;  %v20788_v58 = vld [vmem:[%s21017_s19 + $0x2760] sm:$0xff] }
 0x4d8   : > { %13580 = vmatpush.bf16.msra.mxu3 %v20775_v59  ;;  %v13316_v14 = vpop.f32.mrf.mxu2  ;;  %v20804_v59 = vld [vmem:[%s21017_s19 + $0x27e0] sm:$0xff]  ;;  %v20786_v8 = vld [vmem:[%s21017_s19 + $0x2750] sm:$0xff] }
 0x4d9   : > { %13542 = vmatpush.bf16.msra.mxu0 %v20750_v60  ;;  %v13317_v15 = vadd.f32 %v13316_v14, %v13304_v9  ;;  %v13292_v19 = vpop.f32.mrf.mxu0  ;;  %v20779_v60 = vld [vmem:[%s21017_s19 + $0x2718] sm:$0xff]  ;;  %v20802_v9 = vld [vmem:[%s21017_s19 + $0x27d0] sm:$0xff] }
 0x4da   : > { %13568 = vmatpush.bf16.msra.mxu2 %v20766_v61  ;;  %v13329_v18 = vpop.f32.mrf.mxu3  ;;  %v20795_v61 = vld [vmem:[%s21017_s19 + $0x2798] sm:$0xff]  ;;  %v3268_v14 = vld [vmem:[#allocation1 + $0x2d] sm:$0xff] }
 0x4db   : > { %13555 = vmatpush.bf16.msra.mxu1 %v20758_v62  ;;  %v13330_v20 = vadd.f32 %v13329_v18, %v13317_v15  ;;  %v13305_v23 = vpop.f32.mrf.mxu1  ;;  %v3270_v15 = vld [vmem:[#allocation1 + $0x3f] sm:$0xff]  ;;  %v20785_v18 = vld [vmem:[%s21017_s19 + $0x2748] sm:$0xff] }
 0x4dc   : > { %13581 = vmatpush.bf16.msra.mxu3 %v20774_v63  ;;  %v20801_v19 = vld [vmem:[%s21017_s19 + $0x27c8] sm:$0xff]  ;;  %v20815_v23 = vld [vmem:[%s21017_s19 + $0x2838] sm:$0xff] }
 0x4dd   : > { %13543 = vmatpush.bf16.msra.mxu0 %v20749_v0  ;;  %v20787_v0 = vld [vmem:[%s21017_s19 + $0x2758] sm:$0xff] }
 0x4de   : > { %13569 = vmatpush.bf16.msra.mxu2 %v20765_v1  ;;  %v20803_v1 = vld [vmem:[%s21017_s19 + $0x27d8] sm:$0xff] }
 0x4df   : > { %13556 = vmatpush.bf16.msra.mxu1 %v20757_v2 }
 0x4e0   : > { %13582 = vmatpush.bf16.msra.mxu3 %v20773_v3  ;;  %v13318_v28 = vpop.f32.mrf.mxu2 }
 0x4e1   : > { %13544 = vmatpush.bf16.msra.mxu0 %v20748_v6  ;;  %v20794_v6 = vld [vmem:[%s21017_s19 + $0x2790] sm:$0xff]  ;;  %v20839_v28 = vld [vmem:[%s21017_s19 + $0x28f8] sm:$0xff] }
 0x4e2   : > { %13570 = vmatpush.bf16.msra.mxu2 %v20764_v7  ;;  %v13331_v31 = vpop.f32.mrf.mxu3 }
 0x4e3   : > { %13557 = vmatpush.bf16.msra.mxu1 %v20756_v10  ;;  %v20777_v10 = vld [vmem:[%s21017_s19 + $0x2708] sm:$0xff]  ;;  %v20822_v31 = vld [vmem:[%s21017_s19 + $0x2870] sm:$0xff] }
 0x4e4   : > { %13583 = vmatpush.bf16.msra.mxu3 %v20772_v11  ;;  %v20793_v11 = vld [vmem:[%s21017_s19 + $0x2788] sm:$0xff] }
 0x4e5   : > { %13545 = vmatpush.bf16.msra.mxu0 %v20747_v12  ;;  %v3267_v12 = vld [vmem:[#allocation1 + $0x24] sm:$0xff] }
 0x4e6   : > { %13571 = vmatpush.bf16.msra.mxu2 %v20763_v13  ;;  %v3269_v13 = vld [vmem:[#allocation1 + $0x36] sm:$0xff] }
 0x4e7   : > { %13558 = vmatpush.bf16.msra.mxu1 %v20755_v16 }
 0x4e8   : > { %13584 = vmatpush.bf16.msra.mxu3 %v20771_v17  ;;  %v365_v17 = vld [vmem:[%s21012_s15 + $0xa0] sm:$0xff] }
 0x4e9   : > { %13546 = vmatpush.bf16.msra.mxu0 %v20746_v21  ;;  %3272 = vst [vmem:[#allocation1] ss:$9 sm:$0xff] %v365_v17  ;;  %v20776_v21 = vld [vmem:[%s21017_s19 + $0x2700] sm:$0xff]  ;;  %v20845_v17 = vld [vmem:[%s21017_s19 + $0x2928] sm:$0xff] }
 0x4ea   : > { %13572 = vmatpush.bf16.msra.mxu2 %v20762_v22  ;;  %v20792_v22 = vld [vmem:[%s21017_s19 + $0x2780] sm:$0xff] }
 0x4eb   : > { %13559 = vmatpush.bf16.msra.mxu1 %v20754_v24  ;;  %v20831_v24 = vld [vmem:[%s21017_s19 + $0x28b8] sm:$0xff] }
 0x4ec   : > { %13585 = vmatpush.bf16.msra.mxu3 %v20770_v25  ;;  %v20784_v25 = vld [vmem:[%s21017_s19 + $0x2740] sm:$0xff] }
 0x4ed   : > { %13547 = vmatpush.bf16.msra.mxu0 %v20745_v26  ;;  %v20800_v26 = vld [vmem:[%s21017_s19 + $0x27c0] sm:$0xff] }
 0x4ee   : > { %13573 = vmatpush.bf16.msra.mxu2 %v20761_v27  ;;  %v20823_v27 = vld [vmem:[%s21017_s19 + $0x2878] sm:$0xff] }
 0x4ef   : > { %13560 = vmatpush.bf16.msra.mxu1 %v20753_v29  ;;  %v20814_v29 = vld [vmem:[%s21017_s19 + $0x2830] sm:$0xff] }
 0x4f0   : > { %13586 = vmatpush.bf16.msra.mxu3 %v20769_v30  ;;  %v20830_v30 = vld [vmem:[%s21017_s19 + $0x28b0] sm:$0xff] }
 0x4f1   : > { %13548 = vmatpush.bf16.msra.mxu0 %v20744_v32  ;;  %v13342_v52 = vpop.f32.mrf.mxu0  ;;  %v20838_v32 = vld [vmem:[%s21017_s19 + $0x28f0] sm:$0xff] }
 0x4f2   : > { %13574 = vmatpush.bf16.msra.mxu2 %v20760_v33  ;;  %v13343_v53 = vadd.f32 %v13342_v52, %v13330_v20  ;;  %v20813_v33 = vld [vmem:[%s21017_s19 + $0x2828] sm:$0xff] }
 0x4f3   : > { %13561 = vmatpush.bf16.msra.mxu1 %v20752_v36  ;;  %v13355_v56 = vpop.f32.mrf.mxu1  ;;  %v20837_v36 = vld [vmem:[%s21017_s19 + $0x28e8] sm:$0xff] }
 0x4f4   : > { %13587 = vmatpush.bf16.msra.mxu3 %v20768_v37  ;;  %13549 = vmatmul.bf16.vlgmr.msra.gmra.mxu0 %v3263_v39  ;;  %v13356_v57 = vadd.f32 %v13355_v56, %v13343_v53  ;;  %v20812_v39 = vld [vmem:[%s21017_s19 + $0x2820] sm:$0xff] }
 0x4f5   : > { %13593 = vmatpush.bf16.msrb.mxu0 %v20783_v34  ;;  %13575 = vmatmul.bf16.vlgmr.msra.gmra.mxu2 %v3265_v40  ;;  %v20829_v34 = vld [vmem:[%s21017_s19 + $0x28a8] sm:$0xff]  ;;  %v20828_v40 = vld [vmem:[%s21017_s19 + $0x28a0] sm:$0xff] }
 0x4f6   : > { %13619 = vmatpush.bf16.msrb.mxu2 %v20799_v35  ;;  %13562 = vmatmul.bf16.vlgmr.msra.gmra.mxu1 %v3264_v42  ;;  %v20821_v35 = vld [vmem:[%s21017_s19 + $0x2868] sm:$0xff] }
 0x4f7   : > { %13606 = vmatpush.bf16.msrb.mxu1 %v20791_v38  ;;  %13588 = vmatmul.bf16.vlgmr.msra.gmra.mxu3 %v3266_v43  ;;  %v20820_v43 = vld [vmem:[%s21017_s19 + $0x2860] sm:$0xff] }
 0x4f8   : > { %13632 = vmatpush.bf16.msrb.mxu3 %v20807_v41  ;;  %v13368_v62 = vpop.f32.mrf.mxu2 }
 0x4f9   : > { %13594 = vmatpush.bf16.msrb.mxu0 %v20782_v44  ;;  %v13369_v63 = vadd.f32 %v13368_v62, %v13356_v57  ;;  %v13344_v3 = vpop.f32.mrf.mxu0  ;;  %v20836_v44 = vld [vmem:[%s21017_s19 + $0x28e0] sm:$0xff]  ;;  %v20818_v57 = vld [vmem:[%s21017_s19 + $0x2850] sm:$0xff]  ;;  %v20817_v62 = vld [vmem:[%s21017_s19 + $0x2848] sm:$0xff] }
 0x4fa   : > { %13620 = vmatpush.bf16.msrb.mxu2 %v20798_v45  ;;  %v13381_v2 = vpop.f32.mrf.mxu3  ;;  %v20811_v45 = vld [vmem:[%s21017_s19 + $0x2818] sm:$0xff] }
 0x4fb   : > { %13607 = vmatpush.bf16.msrb.mxu1 %v20790_v46  ;;  %v22356_v4 = vadd.f32 %v13381_v2, %v13369_v63  ;;  %v13357_v7 = vpop.f32.mrf.mxu1  ;;  %v20827_v46 = vld [vmem:[%s21017_s19 + $0x2898] sm:$0xff]  ;;  %v20833_v63 = vld [vmem:[%s21017_s19 + $0x28c8] sm:$0xff]  ;;  %v20824_v2 = vld [vmem:[%s21017_s19 + $0x2880] sm:$0xff] }
 0x4fc   : > { %13633 = vmatpush.bf16.msrb.mxu3 %v20806_v47  ;;  %v20847_v3 = vld [vmem:[%s21017_s19 + $0x2938] sm:$0xff] }
 0x4fd   : > { %13595 = vmatpush.bf16.msrb.mxu0 %v20781_v48  ;;  %v20855_v7 = vld [vmem:[%s21017_s19 + $0x2978] sm:$0xff] }
 0x4fe   : > { %13621 = vmatpush.bf16.msrb.mxu2 %v20797_v49  ;;  %v20819_v49 = vld [vmem:[%s21017_s19 + $0x2858] sm:$0xff] }
 0x4ff   : > { %13608 = vmatpush.bf16.msrb.mxu1 %v20789_v50  ;;  %v20835_v50 = vld [vmem:[%s21017_s19 + $0x28d8] sm:$0xff] }
 0x500   : > { %13634 = vmatpush.bf16.msrb.mxu3 %v20805_v51  ;;  %v13370_v16 = vpop.f32.mrf.mxu2 }
 0x501   : > { %13596 = vmatpush.bf16.msrb.mxu0 %v20780_v54  ;;  %v20810_v54 = vld [vmem:[%s21017_s19 + $0x2810] sm:$0xff] }
 0x502   : > { %13622 = vmatpush.bf16.msrb.mxu2 %v20796_v55  ;;  %v13383_v20 = vpop.f32.mrf.mxu3  ;;  %v20826_v55 = vld [vmem:[%s21017_s19 + $0x2890] sm:$0xff] }
 0x503   : > { %13609 = vmatpush.bf16.msrb.mxu1 %v20788_v58  ;;  %v20834_v58 = vld [vmem:[%s21017_s19 + $0x28d0] sm:$0xff]  ;;  %v20869_v20 = vld [vmem:[%s21017_s19 + $0x29e8] sm:$0xff] }
 0x504   : > { %13635 = vmatpush.bf16.msrb.mxu3 %v20804_v59  ;;  %v20809_v59 = vld [vmem:[%s21017_s19 + $0x2808] sm:$0xff]  ;;  %v20870_v16 = vld [vmem:[%s21017_s19 + $0x29f0] sm:$0xff] }
 0x505   : > { %13597 = vmatpush.bf16.msrb.mxu0 %v20779_v60  ;;  %v20825_v60 = vld [vmem:[%s21017_s19 + $0x2888] sm:$0xff] }
 0x506   : > { %13623 = vmatpush.bf16.msrb.mxu2 %v20795_v61 }
 0x507   : > { %13610 = vmatpush.bf16.msrb.mxu1 %v20787_v0 }
 0x508   : > { %13636 = vmatpush.bf16.msrb.mxu3 %v20803_v1  ;;  %v20808_v1 = vld [vmem:[%s21017_s19 + $0x2800] sm:$0xff] }
 0x509   : > { %13598 = vmatpush.bf16.msrb.mxu0 %v20778_v5  ;;  %v20816_v5 = vld [vmem:[%s21017_s19 + $0x2840] sm:$0xff] }
 0x50a   : > { %13624 = vmatpush.bf16.msrb.mxu2 %v20794_v6  ;;  %v20832_v6 = vld [vmem:[%s21017_s19 + $0x28c0] sm:$0xff] }
 0x50b   : > { %13611 = vmatpush.bf16.msrb.mxu1 %v20786_v8  ;;  %v3273_v8 = vld [vmem:[#allocation1] sm:$0xff] }
 0x50c   : > { %13637 = vmatpush.bf16.msrb.mxu3 %v20802_v9  ;;  %v3275_v9 = vld [vmem:[#allocation1 + $0x12] sm:$0xff] }
 0x50d   : > { %13599 = vmatpush.bf16.msrb.mxu0 %v20777_v10  ;;  %v20871_v10 = vld [vmem:[%s21017_s19 + $0x29f8] sm:$0xff] }
 0x50e   : > { %13625 = vmatpush.bf16.msrb.mxu2 %v20793_v11  ;;  %v3274_v11 = vld [vmem:[#allocation1 + $0x9] sm:$0xff] }
 0x50f   : > { %13612 = vmatpush.bf16.msrb.mxu1 %v20785_v18  ;;  %v20861_v18 = vld [vmem:[%s21017_s19 + $0x29a8] sm:$0xff] }
 0x510   : > { %13638 = vmatpush.bf16.msrb.mxu3 %v20801_v19  ;;  %v20853_v19 = vld [vmem:[%s21017_s19 + $0x2968] sm:$0xff] }
 0x511   : > { %13600 = vmatpush.bf16.msrb.mxu0 %v20776_v21  ;;  %v13394_v37 = vpop.f32.mrf.mxu0 }
 0x512   : > { %13626 = vmatpush.bf16.msrb.mxu2 %v20792_v22  ;;  %v13395_v38 = vadd.f32 %v13394_v37, %v22356_v4  ;;  %v20863_v4 = vld [vmem:[%s21017_s19 + $0x29b8] sm:$0xff] }
 0x513   : > { %13613 = vmatpush.bf16.msrb.mxu1 %v20784_v25  ;;  %v13407_v41 = vpop.f32.mrf.mxu1 }
 0x514   : > { %13639 = vmatpush.bf16.msrb.mxu3 %v20800_v26  ;;  %13601 = vmatmul.bf16.vlgmr.msrb.gmra.mxu0 %v3267_v12  ;;  %v13408_v42 = vadd.f32 %v13407_v41, %v13395_v38  ;;  %v3276_v12 = vld [vmem:[#allocation1 + $0x1b] sm:$0xff]  ;;  %v20842_v38 = vld [vmem:[%s21017_s19 + $0x2910] sm:$0xff] }
 0x515   : > { %13645 = vmatpush.bf16.msra.mxu0 %v20815_v23  ;;  %13627 = vmatmul.bf16.vlgmr.msrb.gmra.mxu2 %v3269_v13  ;;  %v20846_v13 = vld [vmem:[%s21017_s19 + $0x2930] sm:$0xff]  ;;  %v20844_v23 = vld [vmem:[%s21017_s19 + $0x2920] sm:$0xff] }
 0x516   : > { %13671 = vmatpush.bf16.msra.mxu2 %v20831_v24  ;;  %13614 = vmatmul.bf16.vlgmr.msrb.gmra.mxu1 %v3268_v14  ;;  %v20862_v14 = vld [vmem:[%s21017_s19 + $0x29b0] sm:$0xff]  ;;  %v20860_v24 = vld [vmem:[%s21017_s19 + $0x29a0] sm:$0xff] }
 0x517   : > { %13658 = vmatpush.bf16.msra.mxu1 %v20823_v27  ;;  %13640 = vmatmul.bf16.vlgmr.msrb.gmra.mxu3 %v3270_v15  ;;  %v20854_v15 = vld [vmem:[%s21017_s19 + $0x2970] sm:$0xff]  ;;  %v20852_v27 = vld [vmem:[%s21017_s19 + $0x2960] sm:$0xff] }
 0x518   : > { %13684 = vmatpush.bf16.msra.mxu3 %v20839_v28  ;;  %v13420_v47 = vpop.f32.mrf.mxu2  ;;  %v20868_v28 = vld [vmem:[%s21017_s19 + $0x29e0] sm:$0xff]  ;;  %v20850_v41 = vld [vmem:[%s21017_s19 + $0x2950] sm:$0xff] }
 0x519   : > { %13646 = vmatpush.bf16.msra.mxu0 %v20814_v29  ;;  %v13421_v48 = vadd.f32 %v13420_v47, %v13408_v42  ;;  %v13396_v52 = vpop.f32.mrf.mxu0  ;;  %v20843_v29 = vld [vmem:[%s21017_s19 + $0x2918] sm:$0xff]  ;;  %v20866_v42 = vld [vmem:[%s21017_s19 + $0x29d0] sm:$0xff] }
 0x51a   : > { %13672 = vmatpush.bf16.msra.mxu2 %v20830_v30  ;;  %v13433_v51 = vpop.f32.mrf.mxu3  ;;  %v20859_v30 = vld [vmem:[%s21017_s19 + $0x2998] sm:$0xff]  ;;  %v3278_v47 = vld [vmem:[#allocation1 + $0x2d] sm:$0xff] }
 0x51b   : > { %13659 = vmatpush.bf16.msra.mxu1 %v20822_v31  ;;  %v13434_v53 = vadd.f32 %v13433_v51, %v13421_v48  ;;  %v13409_v56 = vpop.f32.mrf.mxu1  ;;  %v3280_v48 = vld [vmem:[#allocation1 + $0x3f] sm:$0xff]  ;;  %v20849_v51 = vld [vmem:[%s21017_s19 + $0x2948] sm:$0xff] }
 0x51c   : > { %13685 = vmatpush.bf16.msra.mxu3 %v20838_v32  ;;  %v20865_v52 = vld [vmem:[%s21017_s19 + $0x29c8] sm:$0xff]  ;;  %v20879_v56 = vld [vmem:[%s21017_s19 + $0x2a38] sm:$0xff] }
 0x51d   : > { %13647 = vmatpush.bf16.msra.mxu0 %v20813_v33  ;;  %v20851_v33 = vld [vmem:[%s21017_s19 + $0x2958] sm:$0xff] }
 0x51e   : > { %13673 = vmatpush.bf16.msra.mxu2 %v20829_v34  ;;  %v20867_v34 = vld [vmem:[%s21017_s19 + $0x29d8] sm:$0xff] }
 0x51f   : > { %13660 = vmatpush.bf16.msra.mxu1 %v20821_v35 }
 0x520   : > { %13686 = vmatpush.bf16.msra.mxu3 %v20837_v36  ;;  %v13422_v61 = vpop.f32.mrf.mxu2 }
 0x521   : > { %13648 = vmatpush.bf16.msra.mxu0 %v20812_v39  ;;  %v20858_v39 = vld [vmem:[%s21017_s19 + $0x2990] sm:$0xff] }
 0x522   : > { %13674 = vmatpush.bf16.msra.mxu2 %v20828_v40  ;;  %v13435_v0 = vpop.f32.mrf.mxu3 }
 0x523   : > { %13661 = vmatpush.bf16.msra.mxu1 %v20820_v43  ;;  %v20841_v43 = vld [vmem:[%s21017_s19 + $0x2908] sm:$0xff] }
 0x524   : > { %13687 = vmatpush.bf16.msra.mxu3 %v20836_v44  ;;  %v20857_v44 = vld [vmem:[%s21017_s19 + $0x2988] sm:$0xff] }
 0x525   : > { %13649 = vmatpush.bf16.msra.mxu0 %v20811_v45  ;;  %v3277_v45 = vld [vmem:[#allocation1 + $0x24] sm:$0xff] }
 0x526   : > { %13675 = vmatpush.bf16.msra.mxu2 %v20827_v46  ;;  %v3279_v46 = vld [vmem:[#allocation1 + $0x36] sm:$0xff] }
 0x527   : > { %13662 = vmatpush.bf16.msra.mxu1 %v20819_v49 }
 0x528   : > { %13688 = vmatpush.bf16.msra.mxu3 %v20835_v50  ;;  %v366_v50 = vld [vmem:[%s21012_s15 + $0xa8] sm:$0x1] }
 0x529   : > { %13650 = vmatpush.bf16.msra.mxu0 %v20810_v54  ;;  %3282 = vst [vmem:[#allocation1] ss:$9 sm:$0xff] %v366_v50  ;;  %v20840_v54 = vld [vmem:[%s21017_s19 + $0x2900] sm:$0xff] }
 0x52a   : > { %13676 = vmatpush.bf16.msra.mxu2 %v20826_v55  ;;  %v20856_v55 = vld [vmem:[%s21017_s19 + $0x2980] sm:$0xff] }
 0x52b   : > { %13663 = vmatpush.bf16.msra.mxu1 %v20818_v57  ;;  %v20848_v57 = vld [vmem:[%s21017_s19 + $0x2940] sm:$0xff] }
 0x52c   : > { %13689 = vmatpush.bf16.msra.mxu3 %v20834_v58  ;;  %v20864_v58 = vld [vmem:[%s21017_s19 + $0x29c0] sm:$0xff] }
 0x52d   : > { %13651 = vmatpush.bf16.msra.mxu0 %v20809_v59  ;;  %v20878_v59 = vld [vmem:[%s21017_s19 + $0x2a30] sm:$0xff] }
 0x52e   : > { %13677 = vmatpush.bf16.msra.mxu2 %v20825_v60  ;;  %v20877_v60 = vld [vmem:[%s21017_s19 + $0x2a28] sm:$0xff] }
 0x52f   : > { %13664 = vmatpush.bf16.msra.mxu1 %v20817_v62 }
 0x530   : > { %13690 = vmatpush.bf16.msra.mxu3 %v20833_v63  ;;  %v20876_v63 = vld [vmem:[%s21017_s19 + $0x2a20] sm:$0xff] }
 0x531   : > { %13652 = vmatpush.bf16.msra.mxu0 %v20808_v1  ;;  %v13446_v21 = vpop.f32.mrf.mxu0 }
 0x532   : > { %13678 = vmatpush.bf16.msra.mxu2 %v20824_v2  ;;  %v13447_v22 = vadd.f32 %v13446_v21, %v13434_v53  ;;  %v20875_v2 = vld [vmem:[%s21017_s19 + $0x2a18] sm:$0xff] }
 0x533   : > { %13665 = vmatpush.bf16.msra.mxu1 %v20816_v5  ;;  %v13459_v25 = vpop.f32.mrf.mxu1 }
 0x534   : > { %13691 = vmatpush.bf16.msra.mxu3 %v20832_v6  ;;  %13653 = vmatmul.bf16.vlgmr.msra.gmra.mxu0 %v3273_v8  ;;  %v13460_v26 = vadd.f32 %v13459_v25, %v13447_v22  ;;  %v20874_v8 = vld [vmem:[%s21017_s19 + $0x2a10] sm:$0xff] }
 0x535   : > { %13697 = vmatpush.bf16.msrb.mxu0 %v20847_v3  ;;  %13679 = vmatmul.bf16.vlgmr.msra.gmra.mxu2 %v3275_v9 }
 0x536   : > { %13723 = vmatpush.bf16.msrb.mxu2 %v20863_v4  ;;  %13666 = vmatmul.bf16.vlgmr.msra.gmra.mxu1 %v3274_v11 }
 0x537   : > { %13710 = vmatpush.bf16.msrb.mxu1 %v20855_v7  ;;  %13692 = vmatmul.bf16.vlgmr.msra.gmra.mxu3 %v3276_v12 }
 0x538   : > { %13736 = vmatpush.bf16.msrb.mxu3 %v20871_v10  ;;  %v13472_v31 = vpop.f32.mrf.mxu2  ;;  %v20873_v10 = vld [vmem:[%s21017_s19 + $0x2a08] sm:$0xff] }
 0x539   : > { %13698 = vmatpush.bf16.msrb.mxu0 %v20846_v13  ;;  %v13473_v32 = vadd.f32 %v13472_v31, %v13460_v26  ;;  %v13448_v36 = vpop.f32.mrf.mxu0  ;;  %v20872_v13 = vld [vmem:[%s21017_s19 + $0x2a00] sm:$0xff] }
 0x53a   : > { %13724 = vmatpush.bf16.msrb.mxu2 %v20862_v14  ;;  %v13485_v35 = vpop.f32.mrf.mxu3  ;;  %v3283_v14 = vld [vmem:[#allocation1] sm:$0xff] }
 0x53b   : > { %13711 = vmatpush.bf16.msrb.mxu1 %v20854_v15  ;;  %v13486_v37 = vadd.f32 %v13485_v35, %v13473_v32  ;;  %v13461_v40 = vpop.f32.mrf.mxu1 }
 0x53c   : > { %13737 = vmatpush.bf16.msrb.mxu3 %v20870_v16 }
 0x53d   : > { %13699 = vmatpush.bf16.msrb.mxu0 %v20845_v17 }
 0x53e   : > { %13725 = vmatpush.bf16.msrb.mxu2 %v20861_v18 }
 0x53f   : > { %13712 = vmatpush.bf16.msrb.mxu1 %v20853_v19 }
 0x540   : > { %13738 = vmatpush.bf16.msrb.mxu3 %v20869_v20  ;;  %v13474_v49 = vpop.f32.mrf.mxu2 }
 0x541   : > { %13700 = vmatpush.bf16.msrb.mxu0 %v20844_v23 }
 0x542   : > { %13726 = vmatpush.bf16.msrb.mxu2 %v20860_v24  ;;  %v13487_v53 = vpop.f32.mrf.mxu3 }
 0x543   : > { %13713 = vmatpush.bf16.msrb.mxu1 %v20852_v27 }
 0x544   : > { %13739 = vmatpush.bf16.msrb.mxu3 %v20868_v28 }
 0x545   : > { %13701 = vmatpush.bf16.msrb.mxu0 %v20843_v29 }
 0x546   : > { %13727 = vmatpush.bf16.msrb.mxu2 %v20859_v30 }
 0x547   : > { %13714 = vmatpush.bf16.msrb.mxu1 %v20851_v33 }
 0x548   : > { %13740 = vmatpush.bf16.msrb.mxu3 %v20867_v34 }
 0x549   : > { %13702 = vmatpush.bf16.msrb.mxu0 %v20842_v38 }
 0x54a   : > { %13728 = vmatpush.bf16.msrb.mxu2 %v20858_v39 }
 0x54b   : > { %13715 = vmatpush.bf16.msrb.mxu1 %v20850_v41 }
 0x54c   : > { %13741 = vmatpush.bf16.msrb.mxu3 %v20866_v42 }
 0x54d   : > { %13703 = vmatpush.bf16.msrb.mxu0 %v20841_v43 }
 0x54e   : > { %13729 = vmatpush.bf16.msrb.mxu2 %v20857_v44 }
 0x54f   : > { %13716 = vmatpush.bf16.msrb.mxu1 %v20849_v51 }
 0x550   : > { %13742 = vmatpush.bf16.msrb.mxu3 %v20865_v52 }
 0x551   : > { %13704 = vmatpush.bf16.msrb.mxu0 %v20840_v54  ;;  %v13498_v61 = vpop.f32.mrf.mxu0 }
 0x552   : > { %13730 = vmatpush.bf16.msrb.mxu2 %v20856_v55  ;;  %v13499_v62 = vadd.f32 %v13498_v61, %v13486_v37 }
 0x553   : > { %13717 = vmatpush.bf16.msrb.mxu1 %v20848_v57  ;;  %v13511_v0 = vpop.f32.mrf.mxu1 }
 0x554   : > { %13743 = vmatpush.bf16.msrb.mxu3 %v20864_v58  ;;  %13705 = vmatmul.bf16.vlgmr.msrb.gmra.mxu0 %v3277_v45  ;;  %v13512_v1 = vadd.f32 %v13511_v0, %v13499_v62 }
 0x555   : > { %13749 = vmatpush.bf16.msra.mxu0 %v20879_v56  ;;  %13731 = vmatmul.bf16.vlgmr.msrb.gmra.mxu2 %v3279_v46 }
 0x556   : > { %13718 = vmatmul.bf16.vlgmr.msrb.gmra.mxu1 %v3278_v47 }
 0x557   : > { %13744 = vmatmul.bf16.vlgmr.msrb.gmra.mxu3 %v3280_v48 }
 0x558   : > { %v13524_v3 = vpop.f32.mrf.mxu2 }
 0x559   : > { %13750 = vmatpush.bf16.msra.mxu0 %v20878_v59  ;;  %v13525_v4 = vadd.f32 %v13524_v3, %v13512_v1  ;;  %v13500_v6 = vpop.f32.mrf.mxu0 }
 0x55a   : > { %v13537_v5 = vpop.f32.mrf.mxu3 }
 0x55b   : > { %v13538_v7 = vadd.f32 %v13537_v5, %v13525_v4  ;;  %v13513_v9 = vpop.f32.mrf.mxu1 }
 0x55d   : > { %13751 = vmatpush.bf16.msra.mxu0 %v20877_v60 }
 0x560   : > { %v13526_v11 = vpop.f32.mrf.mxu2 }
 0x561   : > { %13752 = vmatpush.bf16.msra.mxu0 %v20876_v63  ;;  %v344_v63 = vld [vmem:[#allocation2] sm:$0x3] }
 0x562   : > { %v13539_v12 = vpop.f32.mrf.mxu3 }
 0x565   : > { %13753 = vmatpush.bf16.msra.mxu0 %v20875_v2 }
 0x569   : > { %13754 = vmatpush.bf16.msra.mxu0 %v20874_v8 }
 0x56d   : > { %13755 = vmatpush.bf16.msra.mxu0 %v20873_v10 }
 0x571   : > { %13756 = vmatpush.bf16.msra.mxu0 %v20872_v13  ;;  %v13550_v15 = vpop.f32.mrf.mxu0 }
 0x572   : > { %v13551_v16 = vadd.f32 %v13550_v15, %v13538_v7 }
 0x573   : > { %v13563_v17 = vpop.f32.mrf.mxu1 }
 0x574   : > { %13757 = vmatmul.bf16.vlgmr.msra.gmra.mxu0 %v3283_v14  ;;  %v13564_v18 = vadd.f32 %v13563_v17, %v13551_v16 }
 0x578   : > { %v13576_v19 = vpop.f32.mrf.mxu2 }
 0x579   : > { %v13577_v20 = vadd.f32 %v13576_v19, %v13564_v18  ;;  %v13552_v22 = vpop.f32.mrf.mxu0 }
 0x57a   : > { %v13589_v21 = vpop.f32.mrf.mxu3 }
 0x57b   : > { %v13590_v23 = vadd.f32 %v13589_v21, %v13577_v20  ;;  %v13565_v24 = vpop.f32.mrf.mxu1 }
 0x580   : > { %v13578_v25 = vpop.f32.mrf.mxu2 }
 0x582   : > { %v13591_v26 = vpop.f32.mrf.mxu3 }
 0x591   : > { %v13602_v27 = vpop.f32.mrf.mxu0 }
 0x592   : > { %v13603_v28 = vadd.f32 %v13602_v27, %v13590_v23 }
 0x593   : > { %v13615_v29 = vpop.f32.mrf.mxu1 }
 0x594   : > { %v13616_v30 = vadd.f32 %v13615_v29, %v13603_v28 }
 0x598   : > { %v13628_v31 = vpop.f32.mrf.mxu2 }
 0x599   : > { %v13629_v32 = vadd.f32 %v13628_v31, %v13616_v30  ;;  %v13604_v34 = vpop.f32.mrf.mxu0 }
 0x59a   : > { %v13641_v33 = vpop.f32.mrf.mxu3 }
 0x59b   : > { %v13642_v35 = vadd.f32 %v13641_v33, %v13629_v32  ;;  %v13617_v36 = vpop.f32.mrf.mxu1 }
 0x5a0   : > { %v13630_v37 = vpop.f32.mrf.mxu2 }
 0x5a2   : > { %v13643_v38 = vpop.f32.mrf.mxu3 }
 0x5b1   : > { %v13654_v39 = vpop.f32.mrf.mxu0 }
 0x5b2   : > { %v13655_v50 = vadd.f32 %v13654_v39, %v13642_v35 }
 0x5b3   : > { %v13667_v40 = vpop.f32.mrf.mxu1 }
 0x5b4   : > { %v13668_v54 = vadd.f32 %v13667_v40, %v13655_v50 }
 0x5b8   : > { %v13680_v41 = vpop.f32.mrf.mxu2 }
 0x5b9   : > { %v13656_v43 = vpop.f32.mrf.mxu0  ;;  %v13681_v55 = vadd.f32 %v13680_v41, %v13668_v54 }
 0x5ba   : > { %v13693_v42 = vpop.f32.mrf.mxu3 }
 0x5bb   : > { %v13669_v44 = vpop.f32.mrf.mxu1  ;;  %v13694_v58 = vadd.f32 %v13693_v42, %v13681_v55 }
 0x5c0   : > { %v13682_v45 = vpop.f32.mrf.mxu2 }
 0x5c2   : > { %v13695_v46 = vpop.f32.mrf.mxu3 }
 0x5d1   : > { %v13706_v47 = vpop.f32.mrf.mxu0 }
 0x5d2   : > { %v13707_v59 = vadd.f32 %v13706_v47, %v13694_v58 }
 0x5d3   : > { %v13719_v48 = vpop.f32.mrf.mxu1 }
 0x5d4   : > { %v13720_v60 = vadd.f32 %v13719_v48, %v13707_v59 }
 0x5d8   : > { %v13732_v49 = vpop.f32.mrf.mxu2 }
 0x5d9   : > { %v13708_v52 = vpop.f32.mrf.mxu0  ;;  %v13733_v61 = vadd.f32 %v13732_v49, %v13720_v60 }
 0x5da   : > { %v13745_v51 = vpop.f32.mrf.mxu3 }
 0x5db   : > { %v13721_v53 = vpop.f32.mrf.mxu1  ;;  %v13746_v62 = vadd.f32 %v13745_v51, %v13733_v61 }
 0x5e0   : > { %v13734_v56 = vpop.f32.mrf.mxu2 }
 0x5e2   : > { %v13747_v57 = vpop.f32.mrf.mxu3 }
 0x5f1   : > { %v13758_v0 = vpop.f32.mrf.mxu0 }
 0x5f2   : > { %v13759_v1 = vadd.f32 %v13758_v0, %v13746_v62 }
 0x5f4   : > { %v13762_v2 = vadd.f32 %v13759_v1, %v344_v63 }
 0x5f5   : > { %13768 = sbr.rel (%p19500_p6) target bundleno = 1972 (0x7b4), region = 60 }
 0x5f6   : > { %13764 = vst.msk [vmem:[#allocation2] sm:$0x3] %vm13763_vm1, %v13762_v2 }
 0x5f9   : > { %v13760_v3 = vpop.f32.mrf.mxu0 }
 0x5fa   : > { %v13803_v4 = vld [vmem:[%s22633_s3 + $0x38] sm:$0xff]  ;;  %v13802_v5 = vld [vmem:[%s22633_s3 + $0x30] sm:$0xff]  ;;  %v20944_v8 = vmov 3.0   ;;  %v13801_v9 = vld [vmem:[%s22633_s3 + $0x28] sm:$0xff]  ;;  %vm13778_vm2 = vcmask 1040384   ;;  %vm13780_vm3 = vcmask 518144  }
 0x5fb   : > { %v13835_v6 = vld [vmem:[%s22634_s4 + $0x38] sm:$0xff]  ;;  %13816 = vmatpush.msra.mxu0 %v13803_v4  ;;  %v13834_v7 = vld [vmem:[%s22634_s4 + $0x30] sm:$0xff]  ;;  %20901 = vrcp.f32 %v20944_v8  ;;  %v13833_v10 = vld [vmem:[%s22634_s4 + $0x28] sm:$0xff]  ;;  %vm13804_vm4 = vcmask 523264   ;;  %vm14021_vm6 = vcmask 92160  }
 0x5fc   : > { %13847 = vmatpush.msra.mxu1 %v13835_v6  ;;  %v13800_v11 = vld [vmem:[%s22633_s3 + $0x20] sm:$0xff]  ;;  %v13799_v15 = vld [vmem:[%s22633_s3 + $0x18] sm:$0xff]  ;;  %v19518_v20 = vld [vmem:[%s22634_s4 + $0x70] sm:$0xff] }
 0x5fd   : > { %13817 = vmatpush.msra.mxu0 %v13802_v5  ;;  %v13832_v12 = vld [vmem:[%s22634_s4 + $0x20] sm:$0xff]  ;;  %v13769_v13 = vld [vmem:[#allocation2] sm:$0x3]  ;;  %v13831_v16 = vld [vmem:[%s22634_s4 + $0x18] sm:$0xff] }
 0x5fe   : > { %13848 = vmatpush.msra.mxu1 %v13834_v7  ;;  %v20898_v14 = vld [vmem:[%s22632_s2] ss:$0 sm:$0xff]  ;;  %v19519_v17 = vld [vmem:[%s22634_s4 + $0x78] sm:$0xff]  ;;  %v13798_v21 = vld [vmem:[%s22633_s3 + $0x10] sm:$0xff] }
 0x5ff   : > { %13818 = vmatpush.msra.mxu0 %v13801_v9  ;;  %v22482_v19 = vadd.f32 %v20898_v14, %v13769_v13  ;;  %v13830_v22 = vld [vmem:[%s22634_s4 + $0x10] sm:$0xff]  ;;  %13926 = vmatpush.msra.mxu3 %v19519_v17  ;;  %v19517_v25 = vld [vmem:[%s22634_s4 + $0x68] sm:$0xff]  ;;  %v19516_v30 = vld [vmem:[%s22634_s4 + $0x60] sm:$0xff] }
 0x600   : > { %13849 = vmatpush.msra.mxu1 %v13833_v10  ;;  %v13797_v26 = vld [vmem:[%s22633_s3 + $0x8] sm:$0xff]  ;;  %v13796_v31 = vld [vmem:[%s22633_s3] sm:$0xff]  ;;  %v19515_v44 = vld [vmem:[%s22634_s4 + $0x58] sm:$0xff] }
 0x601   : > { %v20902_v18 = vpop.eup %20901  ;;  %13819 = vmatpush.msra.mxu0 %v13800_v11  ;;  %v13776_v24 = vrot.slane %v22482_v19, 7  ;;  %v13829_v27 = vld [vmem:[%s22634_s4 + $0x8] sm:$0xff]  ;;  %13927 = vmatpush.msra.mxu3 %v19518_v20  ;;  %v13828_v33 = vld [vmem:[%s22634_s4] sm:$0xff]  ;;  %v19514_v45 = vld [vmem:[%s22634_s4 + $0x50] sm:$0xff] }
 0x602   : > { %13850 = vmatpush.msra.mxu1 %v13832_v12  ;;  %v13789_v23 = vmul.f32 3.0, %v20902_v18  ;;  %vm13793_vm5 = vweird.f32 %v20902_v18  ;;  %v19513_v46 = vld [vmem:[%s22634_s4 + $0x48] sm:$0xff]  ;;  %v19512_v47 = vld [vmem:[%s22634_s4 + $0x40] sm:$0xff]  ;;  %v19510_v48 = vld [vmem:[%s22633_s3 + $0x78] sm:$0xff] }
 0x603   : > { %13820 = vmatpush.msra.mxu0 %v13799_v15  ;;  %v13779_v29 = vsel %vm13778_vm2, 0.0, %v13776_v24  ;;  %13928 = vmatpush.msra.mxu3 %v19517_v25  ;;  %v19509_v49 = vld [vmem:[%s22633_s3 + $0x70] sm:$0xff]  ;;  %v19508_v50 = vld [vmem:[%s22633_s3 + $0x68] sm:$0xff]  ;;  %v19507_v51 = vld [vmem:[%s22633_s3 + $0x60] sm:$0xff] }
 0x604   : > { %13851 = vmatpush.msra.mxu1 %v13831_v16  ;;  %v13790_v28 = vsub.f32 1.0, %v13789_v23  ;;  %v13781_v32 = vsel %vm13780_vm3, %v13779_v29, 0.0  ;;  %13894 = vmatpush.msra.mxu2 %v19510_v48  ;;  %v19506_v52 = vld [vmem:[%s22633_s3 + $0x58] sm:$0xff]  ;;  %v19505_v53 = vld [vmem:[%s22633_s3 + $0x50] sm:$0xff]  ;;  %v19504_v54 = vld [vmem:[%s22633_s3 + $0x48] sm:$0xff] }
 0x605   : > { %13821 = vmatpush.msra.mxu0 %v13798_v21  ;;  %v13782_v34 = vrot.slane %v13781_v32, 4  ;;  %13929 = vmatpush.msra.mxu3 %v19516_v30  ;;  %v19503_v55 = vld [vmem:[%s22633_s3 + $0x40] sm:$0xff]  ;;  %v13961_v6 = vld [vmem:[%s22637_s7 + $0x70] sm:$0xff]  ;;  %v13962_v7 = vld [vmem:[%s22637_s7 + $0x78] sm:$0xff]  ;;  %v14012_v30 = vlaneseq }
 0x606   : > { %13852 = vmatpush.msra.mxu1 %v13830_v22  ;;  %v13791_v35 = vmul.f32 %v20902_v18, %v13790_v28  ;;  %13895 = vmatpush.msra.mxu2 %v19509_v49  ;;  %v20899_v59 = vld [vmem:[%s22635_s5] ss:$0 sm:$0xff]  ;;  %v13960_v9 = vld [vmem:[%s22637_s7 + $0x68] sm:$0xff]  ;;  %v13957_v10 = vld [vmem:[%s22637_s7 + $0x50] sm:$0xff] }
 0x607   : > { %13822 = vmatpush.msra.mxu0 %v13797_v26  ;;  %v13783_v36 = vadd.f32 %v13782_v34, %v13781_v32  ;;  %13930 = vmatpush.msra.mxu3 %v19515_v44  ;;  %v13959_v8 = vld [vmem:[%s22637_s7 + $0x60] sm:$0xff]  ;;  %v13958_v11 = vld [vmem:[%s22637_s7 + $0x58] sm:$0xff]  ;;  %v13956_v13 = vld [vmem:[%s22637_s7 + $0x48] sm:$0xff]  ;;  %vm14014_vm7 = vcmp.lt.s32.totalorder %v14012_v30, 204 }
 0x608   : > { %13853 = vmatpush.msra.mxu1 %v13829_v27  ;;  %v13792_v38 = vadd.f32 %v20902_v18, %v13791_v35  ;;  %13896 = vmatpush.msra.mxu2 %v19508_v50  ;;  %v13955_v12 = vld [vmem:[%s22637_s7 + $0x40] sm:$0xff]  ;;  %v13953_v14 = vld [vmem:[%s22637_s7 + $0x30] sm:$0xff]  ;;  %v13954_v15 = vld [vmem:[%s22637_s7 + $0x38] sm:$0xff] }
 0x609   : > { %13823 = vmatpush.msra.mxu0 %v13796_v31  ;;  %v13784_v37 = vrot.slane %v13783_v36, 2  ;;  %13931 = vmatpush.msra.mxu3 %v19514_v45  ;;  %v13951_v16 = vld [vmem:[%s22637_s7 + $0x20] sm:$0xff]  ;;  %v13952_v17 = vld [vmem:[%s22637_s7 + $0x28] sm:$0xff]  ;;  %v13950_v19 = vld [vmem:[%s22637_s7 + $0x18] sm:$0xff] }
 0x60a   : > { %13854 = vmatpush.msra.mxu1 %v13828_v33  ;;  %v13794_v41 = vsel %vm13793_vm5, %v20902_v18, %v13792_v38  ;;  %13897 = vmatpush.msra.mxu2 %v19507_v51  ;;  %v13949_v18 = vld [vmem:[%s22637_s7 + $0x10] sm:$0xff]  ;;  %v13947_v20 = vld [vmem:[%s22637_s7] sm:$0xff]  ;;  %v13948_v21 = vld [vmem:[%s22637_s7 + $0x8] sm:$0xff] }
 0x60b   : > { %19502 = vmatmul.msk.f32.vlgmr.msra.gmra.mxu1 %vm13804_vm4, %v13779_v29  ;;  %v13785_v39 = vadd.f32 %v13784_v37, %v13783_v36  ;;  %13932 = vmatpush.msra.mxu3 %v19513_v46  ;;  %v13946_v32 = vld [vmem:[%s22636_s6] sm:$0x3] }
 0x60c   : > { %13898 = vmatpush.msra.mxu2 %v19506_v52  ;;  %14017 = vrot.lane.b32.xlu0 %v13776_v24, %s20945_s12  ;;  %v20900_v24 = vld [vmem:[%s22635_s5 + $0x1] ss:$0 sm:$0xff] }
 0x60d   : > { %v13786_v40 = vrot.slane %v13785_v39, 1  ;;  %13933 = vmatpush.msra.mxu3 %v19512_v47  ;;  %13974 = vmatpush.msrb.mxu0 %v13961_v6 }
 0x60e   : > { %13899 = vmatpush.msra.mxu2 %v19505_v53  ;;  %13994 = vmatpush.msrb.mxu1 %v13962_v7 }
 0x60f   : > { %v13787_v42 = vadd.f32 %v13786_v40, %v13785_v39  ;;  %13975 = vmatpush.msrb.mxu0 %v13959_v8 }
 0x610   : > { %13900 = vmatpush.msra.mxu2 %v19504_v54  ;;  %13995 = vmatpush.msrb.mxu1 %v13960_v9 }
 0x611   : > { %v13795_v43 = vmul.f32 %v13794_v41, %v13787_v42  ;;  %13976 = vmatpush.msrb.mxu0 %v13957_v10 }
 0x612   : > { %13901 = vmatpush.msra.mxu2 %v19503_v55  ;;  %13996 = vmatpush.msrb.mxu1 %v13958_v11 }
 0x613   : > { %19501 = vmatmul.msk.f32.vlgmr.msra.gmra.mxu0 %vm13804_vm4, %v13795_v43 }
 0x614   : > { %13977 = vmatpush.msrb.mxu0 %v13955_v12  ;;  %13997 = vmatpush.msrb.mxu1 %v13956_v13 }
 0x616   : > { %13978 = vmatpush.msrb.mxu0 %v13953_v14  ;;  %13998 = vmatpush.msrb.mxu1 %v13954_v15 }
 0x618   : > { %13979 = vmatpush.msrb.mxu0 %v13951_v16  ;;  %13999 = vmatpush.msrb.mxu1 %v13952_v17 }
 0x61a   : > { %13980 = vmatpush.msrb.mxu0 %v13949_v18  ;;  %14000 = vmatpush.msrb.mxu1 %v13950_v19 }
 0x61c   : > { %13981 = vmatpush.msrb.mxu0 %v13947_v20  ;;  %14001 = vmatpush.msrb.mxu1 %v13948_v21 }
 0x67e   : > { %v14018_v28 = vpop.permute.xlu0 %14017 }
 0x67f   : > { %v14020_v29 = vsel %vm13778_vm2, 0.0, %v14018_v28 }
 0x680   : > { %14022 = vst.msk [vmem:[#allocation3] sm:$0x7] %vm14021_vm6, %v14020_v29 }
 0x688   : > { %v13856_v57 = vpop.f32.mrf.mxu1 }
 0x690   : > { %v13825_v56 = vpop.f32.mrf.mxu0 }
 0x691   : > { %v13859_v58 = vperm.slane %v13825_v56, 0 }
 0x693   : > { %v13860_v60 = vadd.f32 %v13859_v58, %v13856_v57 }
 0x695   : > { %v13865_v61 = vadd.f32 %v20899_v59, %v13860_v60 }
 0x697   : > { %v13866_v62 = vsel %vm13780_vm3, %v13865_v61, 0.0  ;;  %19520 = vmatmul.msk.f32.vlgmr.msra.gmra.mxu3 %vm13804_vm4, %v13865_v61 }
 0x698   : > { %v13867_v63 = vrot.slane %v13866_v62, 4 }
 0x69a   : > { %v13868_v0 = vadd.f32 %v13867_v63, %v13866_v62 }
 0x69c   : > { %v13869_v1 = vrot.slane %v13868_v0, 2 }
 0x69e   : > { %v13870_v2 = vadd.f32 %v13869_v1, %v13868_v0 }
 0x6a0   : > { %v13871_v3 = vrot.slane %v13870_v2, 1 }
 0x6a2   : > { %v13872_v4 = vadd.f32 %v13871_v3, %v13870_v2 }
 0x6a4   : > { %v13873_v5 = vmul.f32 %v13872_v4, %v13794_v41 }
 0x6a6   : > { %19511 = vmatmul.msk.f32.vlgmr.msra.gmra.mxu2 %vm13804_vm4, %v13873_v5 }
 0x71a   : > { %v13935_v25 = vpop.f32.mrf.mxu3 }
 0x729   : > { %v13903_v22 = vpop.f32.mrf.mxu2 }
 0x72a   : > { %v13938_v23 = vperm.slane %v13903_v22, 0 }
 0x72c   : > { %v13939_v26 = vadd.f32 %v13938_v23, %v13935_v25 }
 0x72e   : > { %v13945_v27 = vadd.f32 %v20900_v24, %v13939_v26 }
 0x730   : > { %19522 = vmatmul.msk.f32.vlgmr.msrb.gmra.mxu0 %vm13804_vm4, %v13945_v27  ;;  %19523 = vmatmul.msk.f32.vlgmr.msrb.gmra.mxu1 %vm13804_vm4, %v13945_v27 }
 0x7ad   : > { %v14003_v31 = vpop.f32.mrf.mxu1  ;;  %v13983_v34 = vpop.f32.mrf.mxu0 }
 0x7ae   : > { %v14008_v33 = vrot.slane %v14003_v31, 7 }
 0x7b0   : > { %v14009_v35 = vsel %vm13778_vm2, %v13983_v34, %v14008_v33 }
 0x7b1   : > { %v14011_v36 = vadd.f32 %v14009_v35, %v13946_v32 }
 0x7b3   : > { %14016 = vst.msk [vmem:[%s22638_s8] sm:$0x3] %vm14014_vm7, %v14011_v36 }
 0x7b4 PF: > { %p20884_p7 = scmp.eq.s32.totalorder %s21003_s10, 1  ;;  %s20946_s13 = smov [#allocation3]  }
 0x7b5   : > { %s14032_s14 = sshll.u32 %s20946_s13, 4  ;;  %s14034_s17 = sshll.u32 %s22639_s9, 4  ;;  %s14033_s14 = int_to_ptr.vmem [resolvable:$true] %s14032_s14  ;;  %s14035_s17 = int_to_ptr.hbm [resolvable:$true] %s14034_s17 }
 0x7b6   : > { %20881 = dma.vmem_to_hbm [thread:$0]  (%p20884_p7), %s14033_s14, 64, %s14035_s17, [#allocation4]  }
 0x7b7   : > { %20936 = dma.done.wait (%p20884_p7), [#allocation4], 64  }
 0x7b8   : > { %20938 = vsyncadd (%p20884_p7), [#allocation4], 4294967232 }
 0x7b9 PF: > { %s21_s30 = sadd.s32 1, %s20941_s30  }
 0x7ba   : > { %p18_p8 = scmp.ge.s32.totalorder %s21_s30, 4  }
 0x7bc   :  { %20 = sbr.rel (!%p18_p8) target bundleno = 1 (0x1), region = 101 }
 0x7c1   :  { %14051 = vsyncpa [#allocation4], 1 }
 0x7c2   :  { %14053 = vsyncpa [#allocation4 + $0x1], 1 }

</bundles_post_ra>
